<compile_context>
chip_gen: v7x
topology: tpu7x:2x2x1
jax: 0.10.0
libtpu: 0.0.40
codegen_flags: <defaults>
</compile_context>

<pallas_src>
import functools

import jax
import jax.numpy as jnp
from jax.experimental import pallas as pl
from jax.experimental.pallas import tpu as pltpu


def _fablock_kernel(x_ref,
                    w1_ref, b1_ref, w2_ref, b2_ref,
                    wc1_ref, bc1_ref, wc2_ref, bc2_ref,
                    wp1_ref, bp1_ref, wp2_ref, bp2_ref,
                    out_ref,
                    pad_ref, col_ref,
                    *, k, p, w_off):
    H, W, C = x_ref.shape
    HW = H * W
    Hp, Wpad, _ = pad_ref.shape

    # --- zero only the halo border of the shared (bf16) pad scratch.  The
    #     interior is fully overwritten before each conv and columns
    #     < w_off - p are never read.  Done every grid step, so it is
    #     megacore ("parallel") safe (each core zeroes its own scratch).
    if p > 0:
        zrow = jnp.zeros((p, Wpad, C), jnp.bfloat16)
        pad_ref[0:p, :, :] = zrow
        pad_ref[p + H:Hp, :, :] = zrow
        zcol = jnp.zeros((Hp, p, C), jnp.bfloat16)
        pad_ref[:, w_off - p:w_off, :] = zcol
        pad_ref[:, w_off + W:w_off + W + p, :] = zcol

    def build_col():
        # im2col: col[:, tap*C:(tap+1)*C] = window shifted by (kh, kw).
        # The pad scratch is already bf16, so this is a pure copy (no casts);
        # the conv matmul then runs bf16 x bf16 -> f32 on the MXU.
        for kh in range(k):
            for kw in range(k):
                tap = kh * k + kw
                start = w_off - p + kw
                patch = pad_ref[kh:kh + H, start:start + W, :]
                col_ref[:, tap * C:(tap + 1) * C] = patch.reshape(HW, C)

    x = x_ref[...]                                   # (H, W, C) f32
    x_flat = x.reshape(HW, C)                        # hoisted, done once

    # ---- conv1 (kxk, SAME) as one im2col matmul, then ReLU + residual -----
    pad_ref[p:p + H, w_off:w_off + W, :] = x.astype(jnp.bfloat16)
    build_col()
    conv1 = jnp.dot(col_ref[...], w1_ref[...],
                    preferred_element_type=jnp.float32) + b1_ref[...]
    y = x_flat + jnp.maximum(conv1, 0.0)             # (HW, C) f32

    # ---- conv2 (kxk, SAME), reusing the same pad / col scratch ------------
    pad_ref[p:p + H, w_off:w_off + W, :] = (
        y.reshape(H, W, C).astype(jnp.bfloat16))
    build_col()
    y2 = jnp.dot(col_ref[...], w2_ref[...],
                 preferred_element_type=jnp.float32) + b2_ref[...]

    # ---- ChannelAttention: GAP -> 1x1 -> relu -> 1x1 -> sigmoid ------------
    pooled = jnp.mean(y2, axis=0, keepdims=True)                      # (1, C)
    h_ca = jnp.maximum(
        jnp.dot(pooled, wc1_ref[...], preferred_element_type=jnp.float32)
        + bc1_ref[...], 0.0)
    ca = jax.nn.sigmoid(
        jnp.dot(h_ca, wc2_ref[...], preferred_element_type=jnp.float32)
        + bc2_ref[...])                                               # (1, C)
    y_ca = y2 * ca

    # ---- PixelAttention: 1x1 -> relu -> 1x1 -> sigmoid ---------------------
    h_pa = jnp.maximum(
        jnp.dot(y_ca, wp1_ref[...], preferred_element_type=jnp.float32)
        + bp1_ref[...], 0.0)                                          # (HW, C/8)
    pa = jax.nn.sigmoid(
        jnp.dot(h_pa, wp2_ref[...], preferred_element_type=jnp.float32)
        + bp2_ref[...])                                               # (HW, C)

    # ---- final residual (re-read x from VMEM instead of keeping it live) --
    out_ref[...] = x_ref[...].reshape(HW, C) + y_ca * pa


def fablock_pallas(x_nhwc, params):
    N, H, W, C = x_nhwc.shape
    k = params["w1"].shape[0]
    p = k // 2
    # Interior of the halo scratch starts at a 16-aligned column (bf16 packs
    # 16 sublanes per vreg) so the per-image copy of x / y into it is an
    # unmasked store.
    w_off = max(16, ((p + 15) // 16) * 16)
    Hp = H + 2 * p
    Wpad = w_off + W + p
    HW = H * W
    KKC = k * k * C
    C8 = C // 8

    # Pack conv weights for the im2col matmul; matmul operands in bf16,
    # accumulation stays f32 inside the kernel.  Attention math stays f32.
    w1_cat = params["w1"].reshape(KKC, C).astype(jnp.bfloat16)
    w2_cat = params["w2"].reshape(KKC, C).astype(jnp.bfloat16)

    img_spec = pl.BlockSpec((pl.Squeezed(), H, W, C), lambda n: (n, 0, 0, 0))
    rep = lambda shape: pl.BlockSpec(shape, lambda n: (0, 0))  # replicated param

    in_specs = [
        img_spec,               # x  (no separate padded HBM copy)
        rep((KKC, C)),          # w1 (im2col-packed, bf16)
        rep((1, C)),            # b1
        rep((KKC, C)),          # w2 (im2col-packed, bf16)
        rep((1, C)),            # b2
        rep((C, C8)),           # wc1
        rep((1, C8)),           # bc1
        rep((C8, C)),           # wc2
        rep((1, C)),            # bc2
        rep((C, C8)),           # wp1
        rep((1, C8)),           # bp1
        rep((C8, C)),           # wp2
        rep((1, C)),            # bp2
    ]

    grid_spec = pltpu.PrefetchScalarGridSpec(
        num_scalar_prefetch=0,
        grid=(N,),
        in_specs=in_specs,
        out_specs=pl.BlockSpec((pl.Squeezed(), HW, C), lambda n: (n, 0, 0)),
        scratch_shapes=[
            pltpu.VMEM((Hp, Wpad, C), jnp.bfloat16),  # shared halo scratch
            pltpu.VMEM((HW, KKC), jnp.bfloat16),      # shared im2col scratch
        ],
    )

    kernel = functools.partial(_fablock_kernel, k=k, p=p, w_off=w_off)

    out = pl.pallas_call(
        kernel,
        out_shape=jax.ShapeDtypeStruct((N, HW, C), jnp.float32),
        grid_spec=grid_spec,
        compiler_params=pltpu.CompilerParams(
            dimension_semantics=("parallel",),
            vmem_limit_bytes=32 * 1024 * 1024,   # far above footprint, <= v7x physical
        ),
    )(x_nhwc, w1_cat, params["b1"], w2_cat, params["b2"],
      params["wc1"], params["bc1"], params["wc2"], params["bc2"],
      params["wp1"], params["bp1"], params["wp2"], params["bp2"])
    return out.reshape(N, H, W, C)


def fablock_reference(x_nhwc, params):
    """Pure-JAX f32 reference (mirrors the PyTorch forward)."""
    def conv(x, w, b):
        out = jax.lax.conv_general_dilated(
            x, w, (1, 1), "SAME",
            dimension_numbers=("NHWC", "HWIO", "NHWC"))
        return out + b.reshape(1, 1, 1, -1)

    x = conv(x_nhwc, params["w1"], params["b1"][0])
    x = jnp.maximum(x, 0.0)
    y = x_nhwc + x
    y = conv(y, params["w2"], params["b2"][0])

    # channel attention
    pooled = jnp.mean(y, axis=(1, 2), keepdims=True)                 # (N,1,1,C)
    h = jnp.maximum(pooled @ params["wc1"] + params["bc1"], 0.0)
    ca = jax.nn.sigmoid(h @ params["wc2"] + params["bc2"])
    y = y * ca

    # pixel attention
    h = jnp.maximum(y @ params["wp1"] + params["bp1"], 0.0)
    pa = jax.nn.sigmoid(h @ params["wp2"] + params["bp2"])
    y = y * pa
    return x_nhwc + y


def make_params(key, dim, kernel_size):
    C, C8, k = dim, dim // 8, kernel_size
    ks = jax.random.split(key, 12)
    def rnd(kk, shape, fan_in):
        return (jax.random.normal(kk, shape, jnp.float32)
                / jnp.sqrt(fan_in)).astype(jnp.float32)
    return {
        "w1": rnd(ks[0], (k, k, C, C), C * k * k),
        "b1": rnd(ks[1], (1, C), C),
        "w2": rnd(ks[2], (k, k, C, C), C * k * k),
        "b2": rnd(ks[3], (1, C), C),
        "wc1": rnd(ks[4], (C, C8), C),
        "bc1": rnd(ks[5], (1, C8), C),
        "wc2": rnd(ks[6], (C8, C), C8),
        "bc2": rnd(ks[7], (1, C), C8),
        "wp1": rnd(ks[8], (C, C8), C),
        "bp1": rnd(ks[9], (1, C8), C),
        "wp2": rnd(ks[10], (C8, C), C8),
        "bp2": rnd(ks[11], (1, C), C8),
    }


if __name__ == "__main__":
    N, H, W = 2, 16, 16
    dim, kernel_size = 16, 3     # dim must be divisible by 8 (bottleneck = dim // 8)

    key = jax.random.PRNGKey(0)
    kx, kp = jax.random.split(key)
    # NCHW input (PyTorch convention) -> transpose to NHWC for the kernel
    x_nchw = jax.random.normal(kx, (N, dim, H, W), jnp.float32)
    x_nhwc = jnp.transpose(x_nchw, (0, 2, 3, 1))

    params = make_params(kp, dim, kernel_size)

    out = fablock_pallas(x_nhwc, params)
    out = jax.block_until_ready(out)

    ref = fablock_reference(x_nhwc, params)
    assert out.shape == (N, H, W, dim)
    # bf16 MXU operands for the two kxk convs (f32 accumulation) -> tolerance
    # widened accordingly vs. a pure-f32 reference.
    err = float(jnp.max(jnp.abs(out - ref)))
    assert jnp.allclose(out, ref, atol=3e-2, rtol=3e-2), err

    print("KERNEL_OK")
</pallas_src>

<mosaic_0001>
module attributes {stable_mosaic.version = 11 : i64} {
  func.func @_fablock_kernel(%arg0: i32, %arg1: memref<1x16x16x16xf32, #tpu.memory_space<vmem>>, %arg2: memref<144x16xbf16, #tpu.memory_space<vmem>>, %arg3: memref<1x16xf32, #tpu.memory_space<vmem>>, %arg4: memref<144x16xbf16, #tpu.memory_space<vmem>>, %arg5: memref<1x16xf32, #tpu.memory_space<vmem>>, %arg6: memref<16x2xf32, #tpu.memory_space<vmem>>, %arg7: memref<1x2xf32, #tpu.memory_space<vmem>>, %arg8: memref<2x16xf32, #tpu.memory_space<vmem>>, %arg9: memref<1x16xf32, #tpu.memory_space<vmem>>, %arg10: memref<16x2xf32, #tpu.memory_space<vmem>>, %arg11: memref<1x2xf32, #tpu.memory_space<vmem>>, %arg12: memref<2x16xf32, #tpu.memory_space<vmem>>, %arg13: memref<1x16xf32, #tpu.memory_space<vmem>>, %arg14: memref<1x256x16xf32, #tpu.memory_space<vmem>>, %arg15: memref<18x33x16xbf16, #tpu.memory_space<vmem>>, %arg16: memref<256x144xbf16, #tpu.memory_space<vmem>>) attributes {dimension_semantics = [#tpu.dimension_semantics<parallel>], iteration_bounds = array<i64: 2>, scalar_prefetch = 0 : i64, scratch_operands = 2 : i64, tpu.core_type = #tpu.core_type<tc>, window_params = [{transform_indices = @transform_0, window_bounds = array<i64: 1, 16, 16, 16>}, {pipeline_mode = #tpu.pipeline_mode<synchronous>, transform_indices = @transform_1, window_bounds = array<i64: 144, 16>}, {pipeline_mode = #tpu.pipeline_mode<synchronous>, transform_indices = @transform_2, window_bounds = array<i64: 1, 16>}, {pipeline_mode = #tpu.pipeline_mode<synchronous>, transform_indices = @transform_3, window_bounds = array<i64: 144, 16>}, {pipeline_mode = #tpu.pipeline_mode<synchronous>, transform_indices = @transform_4, window_bounds = array<i64: 1, 16>}, {pipeline_mode = #tpu.pipeline_mode<synchronous>, transform_indices = @transform_5, window_bounds = array<i64: 16, 2>}, {pipeline_mode = #tpu.pipeline_mode<synchronous>, transform_indices = @transform_6, window_bounds = array<i64: 1, 2>}, {pipeline_mode = #tpu.pipeline_mode<synchronous>, transform_indices = @transform_7, window_bounds = array<i64: 2, 16>}, {pipeline_mode = #tpu.pipeline_mode<synchronous>, transform_indices = @transform_8, window_bounds = array<i64: 1, 16>}, {pipeline_mode = #tpu.pipeline_mode<synchronous>, transform_indices = @transform_9, window_bounds = array<i64: 16, 2>}, {pipeline_mode = #tpu.pipeline_mode<synchronous>, transform_indices = @transform_10, window_bounds = array<i64: 1, 2>}, {pipeline_mode = #tpu.pipeline_mode<synchronous>, transform_indices = @transform_11, window_bounds = array<i64: 2, 16>}, {pipeline_mode = #tpu.pipeline_mode<synchronous>, transform_indices = @transform_12, window_bounds = array<i64: 1, 16>}, {transform_indices = @transform_13, window_bounds = array<i64: 1, 256, 16>}]} {
    %cst = arith.constant 0.000000e+00 : bf16
    %0 = vector.broadcast %cst : bf16 to vector<1x33x16xbf16>
    %c0 = arith.constant 0 : index
    %c0_0 = arith.constant 0 : index
    %c0_1 = arith.constant 0 : index
    %1 = vector.load %arg15[%c0, %c0_0, %c0_1] : memref<18x33x16xbf16, #tpu.memory_space<vmem>>, vector<1x33x16xbf16>
    tpu.vector_store %arg15[%c0, %c0_0, %c0_1], %0 {strides = array<i32>} : memref<18x33x16xbf16, #tpu.memory_space<vmem>>, vector<1x33x16xbf16>,
    %c17 = arith.constant 17 : index
    %c0_2 = arith.constant 0 : index
    %c0_3 = arith.constant 0 : index
    %2 = vector.load %arg15[%c17, %c0_2, %c0_3] : memref<18x33x16xbf16, #tpu.memory_space<vmem>>, vector<1x33x16xbf16>
    tpu.vector_store %arg15[%c17, %c0_2, %c0_3], %0 {strides = array<i32>} : memref<18x33x16xbf16, #tpu.memory_space<vmem>>, vector<1x33x16xbf16>,
    %cst_4 = arith.constant 0.000000e+00 : bf16
    %3 = vector.broadcast %cst_4 : bf16 to vector<18x1x16xbf16>
    %c0_5 = arith.constant 0 : index
    %c15 = arith.constant 15 : index
    %c0_6 = arith.constant 0 : index
    %4 = vector.load %arg15[%c0_5, %c15, %c0_6] : memref<18x33x16xbf16, #tpu.memory_space<vmem>>, vector<18x1x16xbf16>
    tpu.vector_store %arg15[%c0_5, %c15, %c0_6], %3 {strides = array<i32>} : memref<18x33x16xbf16, #tpu.memory_space<vmem>>, vector<18x1x16xbf16>,
    %c0_7 = arith.constant 0 : index
    %c32 = arith.constant 32 : index
    %c0_8 = arith.constant 0 : index
    %5 = vector.load %arg15[%c0_7, %c32, %c0_8] : memref<18x33x16xbf16, #tpu.memory_space<vmem>>, vector<18x1x16xbf16>
    tpu.vector_store %arg15[%c0_7, %c32, %c0_8], %3 {strides = array<i32>} : memref<18x33x16xbf16, #tpu.memory_space<vmem>>, vector<18x1x16xbf16>,
    %c0_9 = arith.constant 0 : index
    %c0_10 = arith.constant 0 : index
    %c0_11 = arith.constant 0 : index
    %c0_12 = arith.constant 0 : index
    %6 = vector.load %arg1[%c0_9, %c0_10, %c0_11, %c0_12] : memref<1x16x16x16xf32, #tpu.memory_space<vmem>>, vector<1x16x16x16xf32>
    %7 = vector.shape_cast %6 : vector<1x16x16x16xf32> to vector<16x16x16xf32>
    %8 = vector.shape_cast %7 : vector<16x16x16xf32> to vector<256x16xf32>
    %9 = arith.truncf %7 : vector<16x16x16xf32> to vector<16x16x16xbf16>
    %c1 = arith.constant 1 : index
    %c16 = arith.constant 16 : index
    %c0_13 = arith.constant 0 : index
    %10 = vector.load %arg15[%c1, %c16, %c0_13] : memref<18x33x16xbf16, #tpu.memory_space<vmem>>, vector<16x16x16xbf16>
    tpu.vector_store %arg15[%c1, %c16, %c0_13], %9 {strides = array<i32>} : memref<18x33x16xbf16, #tpu.memory_space<vmem>>, vector<16x16x16xbf16>,
    %c0_14 = arith.constant 0 : index
    %c15_15 = arith.constant 15 : index
    %c0_16 = arith.constant 0 : index
    %11 = vector.load %arg15[%c0_14, %c15_15, %c0_16] : memref<18x33x16xbf16, #tpu.memory_space<vmem>>, vector<16x16x16xbf16>
    %12 = vector.shape_cast %11 : vector<16x16x16xbf16> to vector<256x16xbf16>
    %c0_17 = arith.constant 0 : index
    %c0_18 = arith.constant 0 : index
    %13 = vector.load %arg16[%c0_17, %c0_18] : memref<256x144xbf16, #tpu.memory_space<vmem>>, vector<256x16xbf16>
    tpu.vector_store %arg16[%c0_17, %c0_18], %12 {strides = array<i32>} : memref<256x144xbf16, #tpu.memory_space<vmem>>, vector<256x16xbf16>,
    %c0_19 = arith.constant 0 : index
    %c16_20 = arith.constant 16 : index
    %c0_21 = arith.constant 0 : index
    %14 = vector.load %arg15[%c0_19, %c16_20, %c0_21] : memref<18x33x16xbf16, #tpu.memory_space<vmem>>, vector<16x16x16xbf16>
    %15 = vector.shape_cast %14 : vector<16x16x16xbf16> to vector<256x16xbf16>
    %c0_22 = arith.constant 0 : index
    %c16_23 = arith.constant 16 : index
    %16 = vector.load %arg16[%c0_22, %c16_23] : memref<256x144xbf16, #tpu.memory_space<vmem>>, vector<256x16xbf16>
    tpu.vector_store %arg16[%c0_22, %c16_23], %15 {strides = array<i32>} : memref<256x144xbf16, #tpu.memory_space<vmem>>, vector<256x16xbf16>,
    %c0_24 = arith.constant 0 : index
    %c17_25 = arith.constant 17 : index
    %c0_26 = arith.constant 0 : index
    %17 = vector.load %arg15[%c0_24, %c17_25, %c0_26] : memref<18x33x16xbf16, #tpu.memory_space<vmem>>, vector<16x16x16xbf16>
    %18 = vector.shape_cast %17 : vector<16x16x16xbf16> to vector<256x16xbf16>
    %c0_27 = arith.constant 0 : index
    %c32_28 = arith.constant 32 : index
    %19 = vector.load %arg16[%c0_27, %c32_28] : memref<256x144xbf16, #tpu.memory_space<vmem>>, vector<256x16xbf16>
    tpu.vector_store %arg16[%c0_27, %c32_28], %18 {strides = array<i32>} : memref<256x144xbf16, #tpu.memory_space<vmem>>, vector<256x16xbf16>,
    %c1_29 = arith.constant 1 : index
    %c15_30 = arith.constant 15 : index
    %c0_31 = arith.constant 0 : index
    %20 = vector.load %arg15[%c1_29, %c15_30, %c0_31] : memref<18x33x16xbf16, #tpu.memory_space<vmem>>, vector<16x16x16xbf16>
    %21 = vector.shape_cast %20 : vector<16x16x16xbf16> to vector<256x16xbf16>
    %c0_32 = arith.constant 0 : index
    %c48 = arith.constant 48 : index
    %22 = vector.load %arg16[%c0_32, %c48] : memref<256x144xbf16, #tpu.memory_space<vmem>>, vector<256x16xbf16>
    tpu.vector_store %arg16[%c0_32, %c48], %21 {strides = array<i32>} : memref<256x144xbf16, #tpu.memory_space<vmem>>, vector<256x16xbf16>,
    %c1_33 = arith.constant 1 : index
    %c16_34 = arith.constant 16 : index
    %c0_35 = arith.constant 0 : index
    %23 = vector.load %arg15[%c1_33, %c16_34, %c0_35] : memref<18x33x16xbf16, #tpu.memory_space<vmem>>, vector<16x16x16xbf16>
    %24 = vector.shape_cast %23 : vector<16x16x16xbf16> to vector<256x16xbf16>
    %c0_36 = arith.constant 0 : index
    %c64 = arith.constant 64 : index
    %25 = vector.load %arg16[%c0_36, %c64] : memref<256x144xbf16, #tpu.memory_space<vmem>>, vector<256x16xbf16>
    tpu.vector_store %arg16[%c0_36, %c64], %24 {strides = array<i32>} : memref<256x144xbf16, #tpu.memory_space<vmem>>, vector<256x16xbf16>,
    %c1_37 = arith.constant 1 : index
    %c17_38 = arith.constant 17 : index
    %c0_39 = arith.constant 0 : index
    %26 = vector.load %arg15[%c1_37, %c17_38, %c0_39] : memref<18x33x16xbf16, #tpu.memory_space<vmem>>, vector<16x16x16xbf16>
    %27 = vector.shape_cast %26 : vector<16x16x16xbf16> to vector<256x16xbf16>
    %c0_40 = arith.constant 0 : index
    %c80 = arith.constant 80 : index
    %28 = vector.load %arg16[%c0_40, %c80] : memref<256x144xbf16, #tpu.memory_space<vmem>>, vector<256x16xbf16>
    tpu.vector_store %arg16[%c0_40, %c80], %27 {strides = array<i32>} : memref<256x144xbf16, #tpu.memory_space<vmem>>, vector<256x16xbf16>,
    %c2 = arith.constant 2 : index
    %c15_41 = arith.constant 15 : index
    %c0_42 = arith.constant 0 : index
    %29 = vector.load %arg15[%c2, %c15_41, %c0_42] : memref<18x33x16xbf16, #tpu.memory_space<vmem>>, vector<16x16x16xbf16>
    %30 = vector.shape_cast %29 : vector<16x16x16xbf16> to vector<256x16xbf16>
    %c0_43 = arith.constant 0 : index
    %c96 = arith.constant 96 : index
    %31 = vector.load %arg16[%c0_43, %c96] : memref<256x144xbf16, #tpu.memory_space<vmem>>, vector<256x16xbf16>
    tpu.vector_store %arg16[%c0_43, %c96], %30 {strides = array<i32>} : memref<256x144xbf16, #tpu.memory_space<vmem>>, vector<256x16xbf16>,
    %c2_44 = arith.constant 2 : index
    %c16_45 = arith.constant 16 : index
    %c0_46 = arith.constant 0 : index
    %32 = vector.load %arg15[%c2_44, %c16_45, %c0_46] : memref<18x33x16xbf16, #tpu.memory_space<vmem>>, vector<16x16x16xbf16>
    %33 = vector.shape_cast %32 : vector<16x16x16xbf16> to vector<256x16xbf16>
    %c0_47 = arith.constant 0 : index
    %c112 = arith.constant 112 : index
    %34 = vector.load %arg16[%c0_47, %c112] : memref<256x144xbf16, #tpu.memory_space<vmem>>, vector<256x16xbf16>
    tpu.vector_store %arg16[%c0_47, %c112], %33 {strides = array<i32>} : memref<256x144xbf16, #tpu.memory_space<vmem>>, vector<256x16xbf16>,
    %c2_48 = arith.constant 2 : index
    %c17_49 = arith.constant 17 : index
    %c0_50 = arith.constant 0 : index
    %35 = vector.load %arg15[%c2_48, %c17_49, %c0_50] : memref<18x33x16xbf16, #tpu.memory_space<vmem>>, vector<16x16x16xbf16>
    %36 = vector.shape_cast %35 : vector<16x16x16xbf16> to vector<256x16xbf16>
    %c0_51 = arith.constant 0 : index
    %c128 = arith.constant 128 : index
    %37 = vector.load %arg16[%c0_51, %c128] : memref<256x144xbf16, #tpu.memory_space<vmem>>, vector<256x16xbf16>
    tpu.vector_store %arg16[%c0_51, %c128], %36 {strides = array<i32>} : memref<256x144xbf16, #tpu.memory_space<vmem>>, vector<256x16xbf16>,
    %c0_52 = arith.constant 0 : index
    %c0_53 = arith.constant 0 : index
    %38 = vector.load %arg16[%c0_52, %c0_53] : memref<256x144xbf16, #tpu.memory_space<vmem>>, vector<256x144xbf16>
    %c0_54 = arith.constant 0 : index
    %c0_55 = arith.constant 0 : index
    %39 = vector.load %arg2[%c0_54, %c0_55] : memref<144x16xbf16, #tpu.memory_space<vmem>>, vector<144x16xbf16>
    %cst_56 = arith.constant dense<0.000000e+00> : vector<256x16xf32>
    %40 = tpu.matmul %38, %39, %cst_56 {dimension_numbers = #tpu.dot_dimension_numbers<[1], [0], [0], [1], [0, 0, 1, 1], [], []>} : vector<256x144xbf16>, vector<144x16xbf16>, vector<256x16xf32> -> vector<256x16xf32>
    %c0_57 = arith.constant 0 : index
    %c0_58 = arith.constant 0 : index
    %41 = vector.load %arg3[%c0_57, %c0_58] : memref<1x16xf32, #tpu.memory_space<vmem>>, vector<1x16xf32>
    %42 = vector.broadcast %41 : vector<1x16xf32> to vector<256x16xf32>
    %43 = arith.addf %40, %42 : vector<256x16xf32>
    %cst_59 = arith.constant 0.000000e+00 : f32
    %44 = vector.broadcast %cst_59 : f32 to vector<256x16xf32>
    %45 = arith.maximumf %43, %44 : vector<256x16xf32>
    %46 = arith.addf %8, %45 : vector<256x16xf32>
    %47 = vector.shape_cast %46 : vector<256x16xf32> to vector<16x16x16xf32>
    %48 = arith.truncf %47 : vector<16x16x16xf32> to vector<16x16x16xbf16>
    %c1_60 = arith.constant 1 : index
    %c16_61 = arith.constant 16 : index
    %c0_62 = arith.constant 0 : index
    %49 = vector.load %arg15[%c1_60, %c16_61, %c0_62] : memref<18x33x16xbf16, #tpu.memory_space<vmem>>, vector<16x16x16xbf16>
    tpu.vector_store %arg15[%c1_60, %c16_61, %c0_62], %48 {strides = array<i32>} : memref<18x33x16xbf16, #tpu.memory_space<vmem>>, vector<16x16x16xbf16>,
    %c0_63 = arith.constant 0 : index
    %c15_64 = arith.constant 15 : index
    %c0_65 = arith.constant 0 : index
    %50 = vector.load %arg15[%c0_63, %c15_64, %c0_65] : memref<18x33x16xbf16, #tpu.memory_space<vmem>>, vector<16x16x16xbf16>
    %51 = vector.shape_cast %50 : vector<16x16x16xbf16> to vector<256x16xbf16>
    %c0_66 = arith.constant 0 : index
    %c0_67 = arith.constant 0 : index
    %52 = vector.load %arg16[%c0_66, %c0_67] : memref<256x144xbf16, #tpu.memory_space<vmem>>, vector<256x16xbf16>
    tpu.vector_store %arg16[%c0_66, %c0_67], %51 {strides = array<i32>} : memref<256x144xbf16, #tpu.memory_space<vmem>>, vector<256x16xbf16>,
    %c0_68 = arith.constant 0 : index
    %c16_69 = arith.constant 16 : index
    %c0_70 = arith.constant 0 : index
    %53 = vector.load %arg15[%c0_68, %c16_69, %c0_70] : memref<18x33x16xbf16, #tpu.memory_space<vmem>>, vector<16x16x16xbf16>
    %54 = vector.shape_cast %53 : vector<16x16x16xbf16> to vector<256x16xbf16>
    %c0_71 = arith.constant 0 : index
    %c16_72 = arith.constant 16 : index
    %55 = vector.load %arg16[%c0_71, %c16_72] : memref<256x144xbf16, #tpu.memory_space<vmem>>, vector<256x16xbf16>
    tpu.vector_store %arg16[%c0_71, %c16_72], %54 {strides = array<i32>} : memref<256x144xbf16, #tpu.memory_space<vmem>>, vector<256x16xbf16>,
    %c0_73 = arith.constant 0 : index
    %c17_74 = arith.constant 17 : index
    %c0_75 = arith.constant 0 : index
    %56 = vector.load %arg15[%c0_73, %c17_74, %c0_75] : memref<18x33x16xbf16, #tpu.memory_space<vmem>>, vector<16x16x16xbf16>
    %57 = vector.shape_cast %56 : vector<16x16x16xbf16> to vector<256x16xbf16>
    %c0_76 = arith.constant 0 : index
    %c32_77 = arith.constant 32 : index
    %58 = vector.load %arg16[%c0_76, %c32_77] : memref<256x144xbf16, #tpu.memory_space<vmem>>, vector<256x16xbf16>
    tpu.vector_store %arg16[%c0_76, %c32_77], %57 {strides = array<i32>} : memref<256x144xbf16, #tpu.memory_space<vmem>>, vector<256x16xbf16>,
    %c1_78 = arith.constant 1 : index
    %c15_79 = arith.constant 15 : index
    %c0_80 = arith.constant 0 : index
    %59 = vector.load %arg15[%c1_78, %c15_79, %c0_80] : memref<18x33x16xbf16, #tpu.memory_space<vmem>>, vector<16x16x16xbf16>
    %60 = vector.shape_cast %59 : vector<16x16x16xbf16> to vector<256x16xbf16>
    %c0_81 = arith.constant 0 : index
    %c48_82 = arith.constant 48 : index
    %61 = vector.load %arg16[%c0_81, %c48_82] : memref<256x144xbf16, #tpu.memory_space<vmem>>, vector<256x16xbf16>
    tpu.vector_store %arg16[%c0_81, %c48_82], %60 {strides = array<i32>} : memref<256x144xbf16, #tpu.memory_space<vmem>>, vector<256x16xbf16>,
    %c1_83 = arith.constant 1 : index
    %c16_84 = arith.constant 16 : index
    %c0_85 = arith.constant 0 : index
    %62 = vector.load %arg15[%c1_83, %c16_84, %c0_85] : memref<18x33x16xbf16, #tpu.memory_space<vmem>>, vector<16x16x16xbf16>
    %63 = vector.shape_cast %62 : vector<16x16x16xbf16> to vector<256x16xbf16>
    %c0_86 = arith.constant 0 : index
    %c64_87 = arith.constant 64 : index
    %64 = vector.load %arg16[%c0_86, %c64_87] : memref<256x144xbf16, #tpu.memory_space<vmem>>, vector<256x16xbf16>
    tpu.vector_store %arg16[%c0_86, %c64_87], %63 {strides = array<i32>} : memref<256x144xbf16, #tpu.memory_space<vmem>>, vector<256x16xbf16>,
    %c1_88 = arith.constant 1 : index
    %c17_89 = arith.constant 17 : index
    %c0_90 = arith.constant 0 : index
    %65 = vector.load %arg15[%c1_88, %c17_89, %c0_90] : memref<18x33x16xbf16, #tpu.memory_space<vmem>>, vector<16x16x16xbf16>
    %66 = vector.shape_cast %65 : vector<16x16x16xbf16> to vector<256x16xbf16>
    %c0_91 = arith.constant 0 : index
    %c80_92 = arith.constant 80 : index
    %67 = vector.load %arg16[%c0_91, %c80_92] : memref<256x144xbf16, #tpu.memory_space<vmem>>, vector<256x16xbf16>
    tpu.vector_store %arg16[%c0_91, %c80_92], %66 {strides = array<i32>} : memref<256x144xbf16, #tpu.memory_space<vmem>>, vector<256x16xbf16>,
    %c2_93 = arith.constant 2 : index
    %c15_94 = arith.constant 15 : index
    %c0_95 = arith.constant 0 : index
    %68 = vector.load %arg15[%c2_93, %c15_94, %c0_95] : memref<18x33x16xbf16, #tpu.memory_space<vmem>>, vector<16x16x16xbf16>
    %69 = vector.shape_cast %68 : vector<16x16x16xbf16> to vector<256x16xbf16>
    %c0_96 = arith.constant 0 : index
    %c96_97 = arith.constant 96 : index
    %70 = vector.load %arg16[%c0_96, %c96_97] : memref<256x144xbf16, #tpu.memory_space<vmem>>, vector<256x16xbf16>
    tpu.vector_store %arg16[%c0_96, %c96_97], %69 {strides = array<i32>} : memref<256x144xbf16, #tpu.memory_space<vmem>>, vector<256x16xbf16>,
    %c2_98 = arith.constant 2 : index
    %c16_99 = arith.constant 16 : index
    %c0_100 = arith.constant 0 : index
    %71 = vector.load %arg15[%c2_98, %c16_99, %c0_100] : memref<18x33x16xbf16, #tpu.memory_space<vmem>>, vector<16x16x16xbf16>
    %72 = vector.shape_cast %71 : vector<16x16x16xbf16> to vector<256x16xbf16>
    %c0_101 = arith.constant 0 : index
    %c112_102 = arith.constant 112 : index
    %73 = vector.load %arg16[%c0_101, %c112_102] : memref<256x144xbf16, #tpu.memory_space<vmem>>, vector<256x16xbf16>
    tpu.vector_store %arg16[%c0_101, %c112_102], %72 {strides = array<i32>} : memref<256x144xbf16, #tpu.memory_space<vmem>>, vector<256x16xbf16>,
    %c2_103 = arith.constant 2 : index
    %c17_104 = arith.constant 17 : index
    %c0_105 = arith.constant 0 : index
    %74 = vector.load %arg15[%c2_103, %c17_104, %c0_105] : memref<18x33x16xbf16, #tpu.memory_space<vmem>>, vector<16x16x16xbf16>
    %75 = vector.shape_cast %74 : vector<16x16x16xbf16> to vector<256x16xbf16>
    %c0_106 = arith.constant 0 : index
    %c128_107 = arith.constant 128 : index
    %76 = vector.load %arg16[%c0_106, %c128_107] : memref<256x144xbf16, #tpu.memory_space<vmem>>, vector<256x16xbf16>
    tpu.vector_store %arg16[%c0_106, %c128_107], %75 {strides = array<i32>} : memref<256x144xbf16, #tpu.memory_space<vmem>>, vector<256x16xbf16>,
    %c0_108 = arith.constant 0 : index
    %c0_109 = arith.constant 0 : index
    %77 = vector.load %arg16[%c0_108, %c0_109] : memref<256x144xbf16, #tpu.memory_space<vmem>>, vector<256x144xbf16>
    %c0_110 = arith.constant 0 : index
    %c0_111 = arith.constant 0 : index
    %78 = vector.load %arg4[%c0_110, %c0_111] : memref<144x16xbf16, #tpu.memory_space<vmem>>, vector<144x16xbf16>
    %cst_112 = arith.constant dense<0.000000e+00> : vector<256x16xf32>
    %79 = tpu.matmul %77, %78, %cst_112 {dimension_numbers = #tpu.dot_dimension_numbers<[1], [0], [0], [1], [0, 0, 1, 1], [], []>} : vector<256x144xbf16>, vector<144x16xbf16>, vector<256x16xf32> -> vector<256x16xf32>
    %c0_113 = arith.constant 0 : index
    %c0_114 = arith.constant 0 : index
    %80 = vector.load %arg5[%c0_113, %c0_114] : memref<1x16xf32, #tpu.memory_space<vmem>>, vector<1x16xf32>
    %81 = vector.broadcast %80 : vector<1x16xf32> to vector<256x16xf32>
    %82 = arith.addf %79, %81 : vector<256x16xf32>
    %cst_115 = arith.constant dense<0.000000e+00> : vector<16xf32>
    %83 = vector.multi_reduction <add>, %82, %cst_115 [0] : vector<256x16xf32> to vector<16xf32>
    %84 = vector.shape_cast %83 : vector<16xf32> to vector<1x16xf32>
    %cst_116 = arith.constant 2.560000e+02 : f32
    %85 = vector.broadcast %cst_116 : f32 to vector<1x16xf32>
    %86 = arith.divf %84, %85 : vector<1x16xf32>
    %c0_117 = arith.constant 0 : index
    %c0_118 = arith.constant 0 : index
    %87 = vector.load %arg6[%c0_117, %c0_118] : memref<16x2xf32, #tpu.memory_space<vmem>>, vector<16x2xf32>
    %cst_119 = arith.constant dense<0.000000e+00> : vector<1x2xf32>
    %88 = tpu.matmul %86, %87, %cst_119 {dimension_numbers = #tpu.dot_dimension_numbers<[1], [0], [0], [1], [0, 0, 1, 1], [], []>} : vector<1x16xf32>, vector<16x2xf32>, vector<1x2xf32> -> vector<1x2xf32>
    %c0_120 = arith.constant 0 : index
    %c0_121 = arith.constant 0 : index
    %89 = vector.load %arg7[%c0_120, %c0_121] : memref<1x2xf32, #tpu.memory_space<vmem>>, vector<1x2xf32>
    %90 = arith.addf %88, %89 : vector<1x2xf32>
    %cst_122 = arith.constant 0.000000e+00 : f32
    %91 = vector.broadcast %cst_122 : f32 to vector<1x2xf32>
    %92 = arith.maximumf %90, %91 : vector<1x2xf32>
    %c0_123 = arith.constant 0 : index
    %c0_124 = arith.constant 0 : index
    %93 = vector.load %arg8[%c0_123, %c0_124] : memref<2x16xf32, #tpu.memory_space<vmem>>, vector<2x16xf32>
    %cst_125 = arith.constant dense<0.000000e+00> : vector<1x16xf32>
    %94 = tpu.matmul %92, %93, %cst_125 {dimension_numbers = #tpu.dot_dimension_numbers<[1], [0], [0], [1], [0, 0, 1, 1], [], []>} : vector<1x2xf32>, vector<2x16xf32>, vector<1x16xf32> -> vector<1x16xf32>
    %c0_126 = arith.constant 0 : index
    %c0_127 = arith.constant 0 : index
    %95 = vector.load %arg9[%c0_126, %c0_127] : memref<1x16xf32, #tpu.memory_space<vmem>>, vector<1x16xf32>
    %96 = arith.addf %94, %95 : vector<1x16xf32>
    %97 = arith.negf %96 : vector<1x16xf32>
    %98 = math.exp %97 : vector<1x16xf32>
    %cst_128 = arith.constant 1.000000e+00 : f32
    %99 = vector.broadcast %cst_128 : f32 to vector<1x16xf32>
    %100 = arith.addf %99, %98 : vector<1x16xf32>
    %101 = arith.divf %99, %100 : vector<1x16xf32>
    %102 = vector.broadcast %101 : vector<1x16xf32> to vector<256x16xf32>
    %103 = arith.mulf %82, %102 : vector<256x16xf32>
    %c0_129 = arith.constant 0 : index
    %c0_130 = arith.constant 0 : index
    %104 = vector.load %arg10[%c0_129, %c0_130] : memref<16x2xf32, #tpu.memory_space<vmem>>, vector<16x2xf32>
    %cst_131 = arith.constant dense<0.000000e+00> : vector<256x2xf32>
    %105 = tpu.matmul %103, %104, %cst_131 {dimension_numbers = #tpu.dot_dimension_numbers<[1], [0], [0], [1], [0, 0, 1, 1], [], []>} : vector<256x16xf32>, vector<16x2xf32>, vector<256x2xf32> -> vector<256x2xf32>
    %c0_132 = arith.constant 0 : index
    %c0_133 = arith.constant 0 : index
    %106 = vector.load %arg11[%c0_132, %c0_133] : memref<1x2xf32, #tpu.memory_space<vmem>>, vector<1x2xf32>
    %107 = vector.broadcast %106 : vector<1x2xf32> to vector<256x2xf32>
    %108 = arith.addf %105, %107 : vector<256x2xf32>
    %cst_134 = arith.constant 0.000000e+00 : f32
    %109 = vector.broadcast %cst_134 : f32 to vector<256x2xf32>
    %110 = arith.maximumf %108, %109 : vector<256x2xf32>
    %c0_135 = arith.constant 0 : index
    %c0_136 = arith.constant 0 : index
    %111 = vector.load %arg12[%c0_135, %c0_136] : memref<2x16xf32, #tpu.memory_space<vmem>>, vector<2x16xf32>
    %cst_137 = arith.constant dense<0.000000e+00> : vector<256x16xf32>
    %112 = tpu.matmul %110, %111, %cst_137 {dimension_numbers = #tpu.dot_dimension_numbers<[1], [0], [0], [1], [0, 0, 1, 1], [], []>} : vector<256x2xf32>, vector<2x16xf32>, vector<256x16xf32> -> vector<256x16xf32>
    %c0_138 = arith.constant 0 : index
    %c0_139 = arith.constant 0 : index
    %113 = vector.load %arg13[%c0_138, %c0_139] : memref<1x16xf32, #tpu.memory_space<vmem>>, vector<1x16xf32>
    %114 = vector.broadcast %113 : vector<1x16xf32> to vector<256x16xf32>
    %115 = arith.addf %112, %114 : vector<256x16xf32>
    %116 = arith.negf %115 : vector<256x16xf32>
    %117 = math.exp %116 : vector<256x16xf32>
    %cst_140 = arith.constant 1.000000e+00 : f32
    %118 = vector.broadcast %cst_140 : f32 to vector<256x16xf32>
    %119 = arith.addf %118, %117 : vector<256x16xf32>
    %120 = arith.divf %118, %119 : vector<256x16xf32>
    %c0_141 = arith.constant 0 : index
    %c0_142 = arith.constant 0 : index
    %c0_143 = arith.constant 0 : index
    %c0_144 = arith.constant 0 : index
    %121 = vector.load %arg1[%c0_141, %c0_142, %c0_143, %c0_144] : memref<1x16x16x16xf32, #tpu.memory_space<vmem>>, vector<1x16x16x16xf32>
    %122 = vector.shape_cast %121 : vector<1x16x16x16xf32> to vector<16x16x16xf32>
    %123 = vector.shape_cast %122 : vector<16x16x16xf32> to vector<256x16xf32>
    %124 = arith.mulf %103, %120 : vector<256x16xf32>
    %125 = arith.addf %123, %124 : vector<256x16xf32>
    %c0_145 = arith.constant 0 : index
    %c0_146 = arith.constant 0 : index
    %c0_147 = arith.constant 0 : index
    %126 = vector.load %arg14[%c0_145, %c0_146, %c0_147] : memref<1x256x16xf32, #tpu.memory_space<vmem>>, vector<1x256x16xf32>
    %127 = vector.shape_cast %126 : vector<1x256x16xf32> to vector<256x16xf32>
    %128 = vector.shape_cast %125 : vector<256x16xf32> to vector<1x256x16xf32>
    tpu.vector_store %arg14[%c0_145, %c0_146, %c0_147], %128 {strides = array<i32>} : memref<1x256x16xf32, #tpu.memory_space<vmem>>, vector<1x256x16xf32>,
    return
  }
  func.func @transform_0(%arg0: i32) -> (i32, i32, i32, i32) {
    %c0_i32 = arith.constant 0 : i32
    %c0_i32_0 = arith.constant 0 : i32
    %c0_i32_1 = arith.constant 0 : i32
    %c0_i32_2 = arith.constant 0 : i32
    return %arg0, %c0_i32, %c0_i32_0, %c0_i32_1 : i32, i32, i32, i32
  }
  func.func @transform_1(%arg0: i32) -> (i32, i32) {
    %c0_i32 = arith.constant 0 : i32
    %c0_i32_0 = arith.constant 0 : i32
    %c0_i32_1 = arith.constant 0 : i32
    return %c0_i32, %c0_i32_0 : i32, i32
  }
  func.func @transform_2(%arg0: i32) -> (i32, i32) {
    %c0_i32 = arith.constant 0 : i32
    %c0_i32_0 = arith.constant 0 : i32
    %c0_i32_1 = arith.constant 0 : i32
    return %c0_i32, %c0_i32_0 : i32, i32
  }
  func.func @transform_3(%arg0: i32) -> (i32, i32) {
    %c0_i32 = arith.constant 0 : i32
    %c0_i32_0 = arith.constant 0 : i32
    %c0_i32_1 = arith.constant 0 : i32
    return %c0_i32, %c0_i32_0 : i32, i32
  }
  func.func @transform_4(%arg0: i32) -> (i32, i32) {
    %c0_i32 = arith.constant 0 : i32
    %c0_i32_0 = arith.constant 0 : i32
    %c0_i32_1 = arith.constant 0 : i32
    return %c0_i32, %c0_i32_0 : i32, i32
  }
  func.func @transform_5(%arg0: i32) -> (i32, i32) {
    %c0_i32 = arith.constant 0 : i32
    %c0_i32_0 = arith.constant 0 : i32
    %c0_i32_1 = arith.constant 0 : i32
    return %c0_i32, %c0_i32_0 : i32, i32
  }
  func.func @transform_6(%arg0: i32) -> (i32, i32) {
    %c0_i32 = arith.constant 0 : i32
    %c0_i32_0 = arith.constant 0 : i32
    %c0_i32_1 = arith.constant 0 : i32
    return %c0_i32, %c0_i32_0 : i32, i32
  }
  func.func @transform_7(%arg0: i32) -> (i32, i32) {
    %c0_i32 = arith.constant 0 : i32
    %c0_i32_0 = arith.constant 0 : i32
    %c0_i32_1 = arith.constant 0 : i32
    return %c0_i32, %c0_i32_0 : i32, i32
  }
  func.func @transform_8(%arg0: i32) -> (i32, i32) {
    %c0_i32 = arith.constant 0 : i32
    %c0_i32_0 = arith.constant 0 : i32
    %c0_i32_1 = arith.constant 0 : i32
    return %c0_i32, %c0_i32_0 : i32, i32
  }
  func.func @transform_9(%arg0: i32) -> (i32, i32) {
    %c0_i32 = arith.constant 0 : i32
    %c0_i32_0 = arith.constant 0 : i32
    %c0_i32_1 = arith.constant 0 : i32
    return %c0_i32, %c0_i32_0 : i32, i32
  }
  func.func @transform_10(%arg0: i32) -> (i32, i32) {
    %c0_i32 = arith.constant 0 : i32
    %c0_i32_0 = arith.constant 0 : i32
    %c0_i32_1 = arith.constant 0 : i32
    return %c0_i32, %c0_i32_0 : i32, i32
  }
  func.func @transform_11(%arg0: i32) -> (i32, i32) {
    %c0_i32 = arith.constant 0 : i32
    %c0_i32_0 = arith.constant 0 : i32
    %c0_i32_1 = arith.constant 0 : i32
    return %c0_i32, %c0_i32_0 : i32, i32
  }
  func.func @transform_12(%arg0: i32) -> (i32, i32) {
    %c0_i32 = arith.constant 0 : i32
    %c0_i32_0 = arith.constant 0 : i32
    %c0_i32_1 = arith.constant 0 : i32
    return %c0_i32, %c0_i32_0 : i32, i32
  }
  func.func @transform_13(%arg0: i32) -> (i32, i32, i32) {
    %c0_i32 = arith.constant 0 : i32
    %c0_i32_0 = arith.constant 0 : i32
    %c0_i32_1 = arith.constant 0 : i32
    return %arg0, %c0_i32, %c0_i32_0 : i32, i32, i32
  }
}

</mosaic_0001>

<bundles_post_ra>
// kernel: tpu_custom_call.1
= control target key start
LH: loop header
LB: loop body
LE: loop exit
PB: predicated region body
PF: predicated region fallthrough
CT: control target
= control target key end

     0   :  { %18 = vsyncpa [#allocation5], 0  ;;  %s14976_s0 = inlined_call_operand.hbm [shape: f32[2,16,16,16], index: 0, kind: input, shape index: {}]   ;;  %s14977_s1 = inlined_call_operand.vmem [shape: bf16[144,16], index: 1, kind: input, shape index: {}]   ;;  %s14978_s2 = inlined_call_operand.vmem [shape: f32[1,16], index: 2, kind: input, shape index: {}]   ;;  %s14979_s3 = inlined_call_operand.vmem [shape: bf16[144,16], index: 3, kind: input, shape index: {}]   ;;  %s14980_s4 = inlined_call_operand.vmem [shape: f32[1,16], index: 4, kind: input, shape index: {}]   ;;  %s14981_s5 = inlined_call_operand.vmem [shape: f32[16,2], index: 5, kind: input, shape index: {}]   ;;  %s14982_s6 = inlined_call_operand.vmem [shape: f32[1,2], index: 6, kind: input, shape index: {}]   ;;  %s14983_s7 = inlined_call_operand.vmem [shape: f32[2,16], index: 7, kind: input, shape index: {}]   ;;  %s14984_s8 = inlined_call_operand.vmem [shape: f32[1,16], index: 8, kind: input, shape index: {}]   ;;  %s14985_s9 = inlined_call_operand.vmem [shape: f32[16,2], index: 9, kind: input, shape index: {}]   ;;  %s14986_s10 = inlined_call_operand.vmem [shape: f32[1,2], index: 10, kind: input, shape index: {}]   ;;  %s14987_s11 = inlined_call_operand.vmem [shape: f32[2,16], index: 11, kind: input, shape index: {}]   ;;  %s14988_s12 = inlined_call_operand.vmem [shape: f32[1,16], index: 12, kind: input, shape index: {}]   ;;  %s14989_s13 = inlined_call_operand.vmem [shape: f32[2,256,16], index: 13, kind: output, shape index: {}]  }
   0x1   :  { %20 = vsyncpa [#allocation5 + $0x1], 0  ;;  %s11635_s25 = smov 0   ;;  %s11637_s26 = smov 0  }
   0x2   :  { %s11639_s27 = smov 0   ;;  %s11641_s28 = smov 0  }
   0x3 LB: > { %s11654_s29 = sadd.s32 4294967295, %s11549_s28   ;;  %s11657_s30 = sadd.s32 1, %s11549_s28   ;;  %s11549_s28 = sphi %s11641_s28, %s15007_s28   ;;  %s11545_s27 = sphi %s11639_s27, %s15006_s27   ;;  %s11541_s26 = sphi %s11637_s26, %s15005_s26   ;;  %s11537_s25 = sphi %s11635_s25, %s15004_s25  }
   0x4   : > { %s30_s14 = ssub.s32 %s11549_s28, %s11657_s30  ;;  %s33_s15 = sadd.s32 1, %s11545_s27 }
   0x5   : > { %p31_p0 = scmp.eq.s32.totalorder %s30_s14, 0  ;;  %p40_p1 = scmp.ne.s32.totalorder %s11545_s27, %s11541_s26 }
   0x6   : > { %p41_p2 = scmp.eq.s32.totalorder %s11549_s28, 0  ;;  %p46_p3 = scmp.ne.s32.totalorder %s11541_s26, %s11537_s25 }
   0x7   : > { %s11667_s16 = scalar_select %p31_p0, %s11545_s27, %s33_s15  }
   0x8   : > { %p42_p4 = por %p41_p2, %p40_p1  ;;  %p47_p5 = scmp.eq.s32.totalorder %s11654_s29, 0 }
   0x9   : > { %14990 = sst [smem:[#allocation7_spill]] %s11667_s16  ;;  %p11158_p6 = scmp.lt.s32.totalorder %s11549_s28, 2 }
   0xa   : > { %p11671_p7 = por %p47_p5, %p46_p3  ;;  %s384_s18 = sand.u32 1, %s11545_s27  }
   0xb   : > { %s10281_s19 = sshll.u32 %s384_s18, 8  ;;  %s10893_s20 = sshll.u32 %s11549_s28, 12 }
   0xc   : > { %s11680_s23 = scalar_lea.hbm %s14976_s0, %s10893_s20  ;;  %s388_s24 = scalar_lea.vmem [#allocation4], %s10281_s19 }
   0xd   : > { %s395_s25 = sshll.u32 %s388_s24, 4  ;;  %p11684_p8 = pnand %p11158_p6, %p42_p4  ;;  %s11682_s25 = int_to_ptr.vmem [resolvable:$true] %s395_s25 }
   0xe   : > { %s11689_s15 = scalar_lea.sflag [#allocation5], %s384_s18  ;;  %s11485_s21 = scalar_lea.hbm %s11680_s23, 4096 }
   0xf   : > { %p11486_p10 = scmp.ne.s32.totalorder %s11680_s23, %s11485_s21  ;;  %p11487_p11 = pneg %p11684_p8 }
  0x10   : > { %s11490_s22 = scalar_lea.hbm %s14976_s0, 8192  ;;  %p11491_p0 = scmp.lt.u32.totalorder %s11680_s23, %s14976_s0 }
  0x11   : > { %p11488_p12 = pnand %p11487_p11, %p11486_p10  ;;  %p11492_p1 = scmp.lt.u32.totalorder %s11490_s22, %s11485_s21 }
  0x12   : > { %p11494_p3 = scmp.lt.u32.totalorder %s11485_s21, %s11680_s23 }
  0x13   : > { %p11489_p13 = pneg %p11488_p12  ;;  %p11493_p2 = por %p11492_p1, %p11491_p0 }
  0x15   : > { %p11495_p4 = por %p11494_p3, %p11493_p2 }
  0x17   : > { %p11496_p5 = pnand %p11495_p4, %p11489_p13 }
  0x19   : > { %11499 = shalt.err (!%p11496_p5)
}
  0x1a   : > { %s11500_s18 = scalar_lea.vmem %s11682_s25, 4096  ;;  %s11551_s19 = smov [#allocation4]  }
  0x1b   : > { %p11501_p6 = scmp.ne.s32.totalorder %s11682_s25, %s11500_s18  ;;  %s11505_s20 = sshll.u32 %s11551_s19, 4  ;;  %s11506_s20 = int_to_ptr.vmem [resolvable:$false] %s11505_s20 }
  0x1c   : > { %s11507_s16 = scalar_lea.vmem %s11506_s20, 8192  ;;  %p11508_p9 = scmp.lt.s32.totalorder %s11682_s25, %s11506_s20 }
  0x1d   : > { %p11503_p10 = pnand %p11501_p6, %p11487_p11  ;;  %p11509_p0 = scmp.lt.s32.totalorder %s11507_s16, %s11500_s18 }
  0x1f   : > { %p11504_p12 = pneg %p11503_p10  ;;  %p11510_p1 = por %p11509_p0, %p11508_p9 }
  0x21   : > { %p11511_p2 = pnand %p11510_p1, %p11504_p12 }
  0x23   : > { %11514 = shalt.err (!%p11511_p2)
}
  0x24   : > { %s11552_s21 = smov 128   ;;  %s11553_s22 = smov 8  }
  0x25   : > { %11157 = dma.hbm_to_vmem [thread:$0]  (!%p11684_p8), %s11680_s23, 4096, %s11682_s25, %s11689_s15, %s11552_s21, %s11552_s21, %s11553_s22  }
  0x26   : > { %p403_p11 = scmp.lt.s32.totalorder %s11549_s28, 3  ;;  %p14993_p13 = scmp.ge.s32.totalorder %s11549_s28, 1 }
  0x28   : > { %p404_p3 = pnand %p14993_p13, %p403_p11 }
  0x29   : > { %s409_s24 = sand.u32 (!%p404_p3), 1, %s11541_s26  }
  0x2a   : > { %407 = sbr.rel (%p404_p3) target bundleno = 2189 (0x88d), region = 72  ;;  %s10285_s18 = sshll.u32 (!%p404_p3), %s409_s24, 8 }
  0x2b   : > { %s410_s19 = scalar_lea.sflag (!%p404_p3), [#allocation5], %s409_s24  ;;  %s11721_s20 = scalar_lea.vmem (!%p404_p3), [#allocation4], %s10285_s18 }
  0x31   : > { %11532 = dma.done.wait (%p11671_p7), %s410_s19, 4096  }
  0x32   : > { %11534 = vsyncadd (%p11671_p7), %s410_s19, 4294963200  ;;  %vm462_vm0 = vcmask 125952   ;;  %v11554_v0 = vmov 0   ;;  %vm481_vm1 = vcmask 125955   ;;  %vm482_vm2 = vsmask.f32 7950 }
  0x33   : > { %465 = vst.msk [vmem:[#allocation2 + $0x8] sm:$0xf] %vm462_vm0, %v11554_v0  ;;  %466 = vst.msk [vmem:[#allocation2 + $0xc] sm:$0xf] %vm462_vm0, %v11554_v0  ;;  %4590 = vmatprep.subr.bf16.mxu0 %v11554_v0  ;;  %8766 = vmatprep.subr.bf16.mxu1 %v11554_v0  ;;  %vm468_vm3 = vsmask.f32 256 }
  0x34   : > { %464 = vst.msk [vmem:[#allocation2 + $0x4] sm:$0xf] %vm462_vm0, %v11554_v0  ;;  %475 = vst.msk [vmem:[#allocation2 + $0x158] sm:$0xf] %vm462_vm0, %v11554_v0  ;;  %vm467_vm4 = vcmask 122880   ;;  %v592_v3 = vld [vmem:[%s11721_s20] sm:$0xff] }
  0x35   : > { %476 = vst.msk [vmem:[#allocation2 + $0x15c] sm:$0xf] %vm462_vm0, %v11554_v0  ;;  %477 = vst.msk [vmem:[#allocation2 + $0x160] sm:$0xf] %vm462_vm0, %v11554_v0  ;;  %v593_v4 = vld [vmem:[%s11721_s20 + $0x8] sm:$0xff]  ;;  %v594_v5 = vld [vmem:[%s11721_s20 + $0x10] sm:$0xff]  ;;  %v10895_v7 = vpack.c.bf16 %v592_v3, %v592_v3 }
  0x36   : > { %vm11741_vm5 = vmand %vm481_vm1, %vm482_vm2  ;;  %v10896_v8 = vpack.c.bf16 %v593_v4, %v593_v4  ;;  %v10897_v9 = vpack.c.bf16 %v594_v5, %v594_v5  ;;  %v595_v10 = vld [vmem:[%s11721_s20 + $0x18] sm:$0xff]  ;;  %v596_v11 = vld [vmem:[%s11721_s20 + $0x20] sm:$0xff]  ;;  %s11555_s28 = smov 16   ;;  %vm1493_vm7 = vsmask.f32 3328  ;;  %s11556_s17 = smov 64  }
  0x37   : > { %vm11746_vm6 = vmand %vm467_vm4, %vm468_vm3  ;;  %v597_v12 = vld [vmem:[%s11721_s20 + $0x28] sm:$0xff]  ;;  %753 = vst.msk [vmem:[#allocation2 + $0x1c] sm:$0xf] %vm462_vm0, %v10895_v7  ;;  %v10898_v13 = vpack.c.bf16 %v595_v10, %v595_v10  ;;  %v10899_v14 = vpack.c.bf16 %v596_v11, %v596_v11  ;;  %v487_v16 = vld [vmem:[#allocation2 + $0x18] sm:$0x8]  ;;  %s11557_s23 = smov 112  }
  0x38   : > { %754 = vst.msk [vmem:[#allocation2 + $0x20] sm:$0xf] %vm462_vm0, %v10896_v8  ;;  %755 = vst.msk [vmem:[#allocation2 + $0x30] sm:$0xf] %vm462_vm0, %v10897_v9  ;;  %v10900_v15 = vpack.c.bf16 %v597_v12, %v597_v12  ;;  %v493_v17 = vld [vmem:[#allocation2 + $0x40] sm:$0x8] }
  0x39   : > { %v490_v18 = vld [vmem:[#allocation2 + $0x2c] sm:$0x8]  ;;  %v488_v19 = vsel %vm11741_vm5, 0, %v487_v16  ;;  %v494_v20 = vsel %vm11741_vm5, 0, %v493_v17  ;;  %v541_v22 = vld [vmem:[#allocation2 + $0x24] sm:$0x1] }
  0x3a   : > { %v11204_v6 = vld [vmem:[#allocation2 + $0x8] sm:$0xff]   ;;  %v491_v21 = vsel %vm11741_vm5, 0, %v490_v18  ;;  %v598_v23 = vld [vmem:[%s11721_s20 + $0x30] sm:$0xff]  ;;  %756 = vst.msk [vmem:[#allocation2 + $0x34] sm:$0xf] %vm462_vm0, %v10898_v13  ;;  %v542_v24 = vsel %vm11746_vm6, 0, %v541_v22 }
  0x3b   : > { %1380 = vrot.lane.b32.xlu0 %v11204_v6, %s11555_s28  ;;  %757 = vst.msk [vmem:[#allocation2 + $0x44] sm:$0xf] %vm462_vm0, %v10899_v14  ;;  %758 = vst.msk [vmem:[#allocation2 + $0x48] sm:$0xf] %vm462_vm0, %v10900_v15  ;;  %v544_v25 = vld [vmem:[#allocation2 + $0x38] sm:$0x1]  ;;  %v10901_v28 = vpack.c.bf16 %v598_v23, %v598_v23 }
  0x3c   : > { %489 = vst [vmem:[#allocation2 + $0x18] sm:$0x8] %v488_v19  ;;  %495 = vst [vmem:[#allocation2 + $0x40] sm:$0x8] %v494_v20  ;;  %v470_v26 = vld [vmem:[#allocation2 + $0x10] sm:$0x1] }
  0x3d   : > { %492 = vst [vmem:[#allocation2 + $0x2c] sm:$0x8] %v491_v21  ;;  %v599_v27 = vld [vmem:[%s11721_s20 + $0x38] sm:$0xff]  ;;  %543 = vst [vmem:[#allocation2 + $0x24] sm:$0x1] %v542_v24  ;;  %v545_v29 = vsel %vm11746_vm6, 0, %v544_v25 }
  0x3e   : > { %v471_v30 = vsel %vm11746_vm6, 0, %v470_v26  ;;  %v1445_v31 = vld [vmem:[#allocation2 + $0x8] sm:$0xf]  ;;  %v1446_v32 = vld [vmem:[#allocation2 + $0xc] sm:$0xf]  ;;  %v10902_v33 = vpack.c.bf16 %v599_v27, %v599_v27  ;;  %s11558_s25 = smov 48  }
  0x3f   : > { %546 = vst [vmem:[#allocation2 + $0x38] sm:$0x1] %v545_v29  ;;  %472 = vst [vmem:[#allocation2 + $0x10] sm:$0x1] %v471_v30  ;;  %v1497_v34 = vshrl.u32 %v1445_v31, 16  ;;  %v1500_v35 = vshll.u32 %v1445_v31, 16 }
  0x40   : > { %v1506_v36 = vshll.u32 %v1446_v32, 16  ;;  %v1510_v37 = vshrl.u32 %v1446_v32, 16  ;;  %v547_v38 = vld [vmem:[#allocation2 + $0x4c] sm:$0x1]  ;;  %759 = vst.msk [vmem:[#allocation2 + $0x58] sm:$0xf] %vm462_vm0, %v10901_v28 }
  0x41   : > { %v548_v39 = vsel %vm11746_vm6, 0, %v547_v38  ;;  %v496_v40 = vld [vmem:[#allocation2 + $0x54] sm:$0x8]  ;;  %760 = vst.msk [vmem:[#allocation2 + $0x5c] sm:$0xf] %vm462_vm0, %v10902_v33  ;;  %v600_v42 = vld [vmem:[%s11721_s20 + $0x40] sm:$0xff] }
  0x42   : > { %v550_v41 = vld [vmem:[#allocation2 + $0x60] sm:$0x1]  ;;  %vm833_vm8 = vsmask.f32 4368  ;;  %v1499_v43 = vrot.slane %v1497_v34, 4  ;;  %v1502_v44 = vrot.slane %v1500_v35, 5  ;;  %v10903_v50 = vpack.c.bf16 %v600_v42, %v600_v42 }
  0x43   : > { %v11782_v45 = vrot.slane %v1506_v36, 5  ;;  %v1512_v46 = vrot.slane %v1510_v37, 4  ;;  %549 = vst [vmem:[#allocation2 + $0x4c] sm:$0x1] %v548_v39  ;;  %v499_v47 = vld [vmem:[#allocation2 + $0x68] sm:$0x8]  ;;  %vm11813_vm11 = vmor %vm468_vm3, %vm833_vm8 }
  0x44   : > { %v11205_v48 = vld [vmem:[#allocation2 + $0x1c] sm:$0xff]   ;;  %v497_v49 = vsel %vm11741_vm5, 0, %v496_v40  ;;  %v1503_v51 = vor.u32 %v1502_v44, %v1499_v43  ;;  %v11206_v53 = vld [vmem:[#allocation2 + $0x30] sm:$0xff]   ;;  %v551_v55 = vsel %vm11746_vm6, 0, %v550_v41  ;;  %v500_v56 = vsel %vm11741_vm5, 0, %v499_v47  ;;  %v11209_v59 = vld [vmem:[#allocation2 + $0x44] sm:$0xff]  }
  0x45   : > { %v1513_v52 = vor.u32 %v1512_v46, %v11782_v45  ;;  %498 = vst [vmem:[#allocation2 + $0x54] sm:$0x8] %v497_v49  ;;  %2618 = vrot.lane.b32.xlu1 %v11205_v48, %s11556_s17  ;;  %v11207_v54 = vld [vmem:[#allocation2 + $0x1c] sm:$0xff]   ;;  %761 = vst.msk [vmem:[#allocation2 + $0x6c] sm:$0xf] %vm462_vm0, %v10903_v50  ;;  %3854 = vrot.lane.b32.xlu0 %v11206_v53, %s11557_s23  ;;  %v11208_v57 = vld [vmem:[#allocation2 + $0x30] sm:$0xff]  }
  0x46   : > { %vm1494_vm9 = vsmask.f32 7440  ;;  %552 = vst [vmem:[#allocation2 + $0x60] sm:$0x1] %v551_v55  ;;  %501 = vst [vmem:[#allocation2 + $0x68] sm:$0x8] %v500_v56 }
  0x47   : > { %v11794_v58 = vrot.slane %v1503_v51, 4  ;;  %v11796_v60 = vrot.slane %v1513_v52, 4  ;;  %v11210_v61 = vld [vmem:[#allocation2 + $0x30] sm:$0xff]   ;;  %v1993_v62 = vld [vmem:[#allocation2 + $0x18] sm:$0x8]  ;;  %vm11801_vm10 = vmor %vm1493_vm7, %vm1494_vm9  ;;  %s11559_s14 = smov 96  }
  0x48   : > { %v1994_v63 = vld [vmem:[#allocation2 + $0x1c] sm:$0xf]  ;;  %v1995_v3 = vld [vmem:[#allocation2 + $0x20] sm:$0xf]  ;;  %v2042_v4 = vshrl.u32 %v1993_v62, 16  ;;  %s11560_s15 = smov 80  }
  0x49   : > { %1382 = vrot.lane.b32.xlu1 %v11207_v54, %s11555_s28  ;;  %v2047_v5 = vshrl.u32 %v1994_v63, 16  ;;  %v2050_v6 = vshll.u32 %v1994_v63, 16  ;;  %v2056_v7 = vshrl.u32 %v1995_v3, 16  ;;  %v3232_v8 = vld [vmem:[#allocation2 + $0x40] sm:$0x8]  ;;  %2620 = vrot.lane.b32.xlu0 %v11208_v57, %s11556_s17  ;;  %v2059_v10 = vshll.u32 %v1995_v3, 16 }
  0x4a   : > { %v3233_v11 = vld [vmem:[#allocation2 + $0x44] sm:$0xf]  ;;  %v3234_v12 = vld [vmem:[#allocation2 + $0x48] sm:$0xf]  ;;  %v3300_v13 = vshrl.u32 %v3232_v8, 16  ;;  %v1509_v14 = vsel %vm11801_vm10, %v11794_v58, %v11782_v45  ;;  %v10384_v15 = vrot.slane %v2042_v4, 11 }
  0x4b   : > { %v2049_v16 = vrot.slane %v2047_v5, 7  ;;  %v2058_v17 = vrot.slane %v2056_v7, 7  ;;  %v3305_v18 = vshrl.u32 %v3233_v11, 16  ;;  %v3229_v19 = vld [vmem:[#allocation2 + $0x2c] sm:$0x8]  ;;  %v3308_v22 = vshll.u32 %v3233_v11, 16 }
  0x4c   : > { %v10449_v21 = vrot.slane %v3300_v13, 11  ;;  %v3314_v23 = vshrl.u32 %v3234_v12, 16  ;;  %v3317_v24 = vshll.u32 %v3234_v12, 16  ;;  %v3230_v25 = vld [vmem:[#allocation2 + $0x30] sm:$0xf]  ;;  %v3278_v32 = vshrl.u32 %v3229_v19, 16 }
  0x4d   : > { %3856 = vrot.lane.b32.xlu1 %v11209_v59, %s11557_s23  ;;  %v2052_v26 = vor.u32 %v2050_v6, %v2049_v16  ;;  %v2054_v27 = vrot.slane %v2049_v16, 4  ;;  %v2061_v28 = vor.u32 %v2059_v10, %v2058_v17  ;;  %v3307_v29 = vrot.slane %v3305_v18, 7  ;;  %v3231_v30 = vld [vmem:[#allocation2 + $0x34] sm:$0xf]  ;;  %1384 = vrot.lane.b32.xlu0 %v11210_v61, %s11555_s28  ;;  %v1999_v35 = vld [vmem:[#allocation2 + $0x40] sm:$0x8] }
  0x4e   : > { %v3316_v31 = vrot.slane %v3314_v23, 7  ;;  %v3283_v33 = vshrl.u32 %v3230_v25, 16  ;;  %v3286_v34 = vshll.u32 %v3230_v25, 16  ;;  %v2000_v40 = vld [vmem:[#allocation2 + $0x44] sm:$0xf]  ;;  %v10448_v43 = vrot.slane %v3278_v32, 11 }
  0x4f   : > { %v2053_v36 = vsel %vm11813_vm11, %v10384_v15, %v2052_v26  ;;  %v2062_v37 = vsel %vm11813_vm11, %v2054_v27, %v2061_v28  ;;  %v3310_v38 = vor.u32 %v3308_v22, %v3307_v29  ;;  %v3312_v39 = vrot.slane %v3307_v29, 4  ;;  %v2001_v49 = vld [vmem:[#allocation2 + $0x48] sm:$0xf]  ;;  %v1996_v55 = vld [vmem:[#allocation2 + $0x2c] sm:$0x8]  ;;  %s11561_s22 = smov 32  }
  0x50   : > { %v10400_v41 = vcombine.low %v2053_v36, %v2062_v37  ;;  %v3319_v42 = vor.u32 %v3317_v24, %v3316_v31  ;;  %v3285_v44 = vrot.slane %v3283_v33, 7  ;;  %v3292_v47 = vshrl.u32 %v3231_v30, 16  ;;  %v1997_v56 = vld [vmem:[#allocation2 + $0x30] sm:$0xf]  ;;  %v1998_v63 = vld [vmem:[#allocation2 + $0x34] sm:$0xf] }
  0x51   : > { %v3311_v46 = vsel %vm11813_vm11, %v10449_v21, %v3310_v38  ;;  %v3295_v48 = vshll.u32 %v3231_v30, 16  ;;  %v2086_v50 = vshrl.u32 %v1999_v35, 16  ;;  %v2091_v54 = vshrl.u32 %v2000_v40, 16  ;;  %v2683_v17 = vld [vmem:[#allocation2 + $0x1c] sm:$0xf]  ;;  %p456_p7 = scmp.lt.s32.totalorder %s11654_s29, 1 }
  0x52   : > { %2441 = vrot.lane.b32.xlu1 %v10400_v41, %s11558_s25  ;;  %v3320_v51 = vsel %vm11813_vm11, %v3312_v39, %v3319_v42  ;;  %v3288_v52 = vor.u32 %v3286_v34, %v3285_v44  ;;  %v3290_v53 = vrot.slane %v3285_v44, 4  ;;  %v3294_v59 = vrot.slane %v3292_v47, 7  ;;  %v2684_v23 = vld [vmem:[#allocation2 + $0x20] sm:$0xf]  ;;  %v2685_v30 = vld [vmem:[#allocation2 + $0x24] sm:$0x1] }
  0x53   : > { %v10465_v57 = vcombine.low %v3311_v46, %v3320_v51  ;;  %v10386_v61 = vrot.slane %v2086_v50, 11  ;;  %v2094_v62 = vshll.u32 %v2000_v40, 16  ;;  %v2093_v4 = vrot.slane %v2091_v54, 7  ;;  %v2686_v37 = vld [vmem:[#allocation2 + $0x30] sm:$0xf]  ;;  %s15009_s29 = smov (!%p456_p7, %s11654_s29), 1 }
  0x54   : > { %v3289_v3 = vsel %vm11813_vm11, %v10448_v43, %v3288_v52  ;;  %v2100_v5 = vshrl.u32 %v2001_v49, 16  ;;  %v2103_v6 = vshll.u32 %v2001_v49, 16  ;;  %v3297_v7 = vor.u32 %v3295_v48, %v3294_v59  ;;  %v2687_v38 = vld [vmem:[#allocation2 + $0x34] sm:$0xf]  ;;  %v2688_v48 = vld [vmem:[#allocation2 + $0x38] sm:$0x1] }
  0x55   : > { %3679 = vrot.lane.b32.xlu0 %v10465_v57, %s11559_s14  ;;  %v2064_v8 = vshrl.u32 %v1996_v55, 16  ;;  %v2069_v10 = vshrl.u32 %v1997_v56, 16  ;;  %v2072_v11 = vshll.u32 %v1997_v56, 16  ;;  %v2096_v12 = vor.u32 %v2094_v62, %v2093_v4  ;;  %v1449_v59 = vld [vmem:[#allocation2 + $0x20] sm:$0xf]  ;;  %s10894_s24 = sshll.u32 %s15009_s29, 8 }
  0x56   : > { %v2098_v13 = vrot.slane %v2093_v4, 4  ;;  %v2102_v15 = vrot.slane %v2100_v5, 7  ;;  %v2078_v16 = vshrl.u32 %v1998_v63, 16  ;;  %v3298_v18 = vsel %vm11813_vm11, %v3290_v53, %v3297_v7  ;;  %v1448_v53 = vld [vmem:[#allocation2 + $0x1c] sm:$0xf] }
  0x57   : > { %v10385_v19 = vrot.slane %v2064_v8, 11  ;;  %v2071_v21 = vrot.slane %v2069_v10, 7  ;;  %v2081_v22 = vshll.u32 %v1998_v63, 16  ;;  %v10464_v24 = vcombine.low %v3289_v3, %v3298_v18  ;;  %v1450_v4 = vld [vmem:[#allocation2 + $0x24] sm:$0x1] }
  0x58   : > { %v2097_v25 = vsel %vm11813_vm11, %v10386_v61, %v2096_v12  ;;  %v2105_v26 = vor.u32 %v2103_v6, %v2102_v15  ;;  %v2080_v27 = vrot.slane %v2078_v16, 7  ;;  %v2732_v31 = vshrl.u32 %v2683_v17, 16  ;;  %v1451_v10 = vld [vmem:[#allocation2 + $0x30] sm:$0xf] }
  0x59   : > { %v2074_v28 = vor.u32 %v2072_v11, %v2071_v21  ;;  %v2076_v29 = vrot.slane %v2071_v21, 4  ;;  %v2735_v32 = vshll.u32 %v2683_v17, 16  ;;  %3677 = vrot.lane.b32.xlu1 %v10464_v24, %s11559_s14  ;;  %v2741_v35 = vshll.u32 %v2684_v23, 16 }
  0x5a   : > { %v2106_v33 = vsel %vm11813_vm11, %v2098_v13, %v2105_v26  ;;  %v2083_v34 = vor.u32 %v2081_v22, %v2080_v27  ;;  %v2745_v36 = vshrl.u32 %v2684_v23, 16  ;;  %v2734_v41 = vrot.slane %v2732_v31, 4 }
  0x5b   : > { %v10402_v39 = vcombine.low %v2097_v25, %v2106_v33  ;;  %v2075_v40 = vsel %vm11813_vm11, %v10385_v19, %v2074_v28  ;;  %v2737_v42 = vrot.slane %v2735_v32, 5  ;;  %v2743_v44 = vrot.slane %v2741_v35, 5  ;;  %v1452_v25 = vld [vmem:[#allocation2 + $0x34] sm:$0xf]  ;;  %v1453_v33 = vld [vmem:[#allocation2 + $0x38] sm:$0x1] }
  0x5c   : > { %v2084_v43 = vsel %vm11813_vm11, %v2076_v29, %v2083_v34  ;;  %v2747_v46 = vrot.slane %v2745_v36, 4  ;;  %v2751_v47 = vshll.u32 %v2685_v30, 16  ;;  %v2756_v51 = vshrl.u32 %v2686_v37, 16  ;;  %v538_v35 = vld [vmem:[#allocation2 + $0x10] sm:$0x1] }
  0x5d   : > { %2445 = vrot.lane.b32.xlu0 %v10402_v39, %s11558_s25  ;;  %v10401_v49 = vcombine.low %v2075_v40, %v2084_v43  ;;  %v2738_v50 = vor.u32 %v2737_v42, %v2734_v41  ;;  %v2759_v52 = vshll.u32 %v2686_v37, 16  ;;  %v2765_v56 = vshll.u32 %v2687_v38, 16  ;;  %v2689_v40 = vld [vmem:[#allocation2 + $0x44] sm:$0xf] }
  0x5e   : > { %v2748_v54 = vor.u32 %v2747_v46, %v2743_v44  ;;  %v2753_v55 = vrot.slane %v2751_v47, 5  ;;  %v2769_v57 = vshrl.u32 %v2687_v38, 16  ;;  %v2758_v62 = vrot.slane %v2756_v51, 4  ;;  %v2690_v46 = vld [vmem:[#allocation2 + $0x48] sm:$0xf] }
  0x5f   : > { %2443 = vrot.lane.b32.xlu1 %v10401_v49, %s11558_s25  ;;  %v2739_v61 = vrot.slane %v2738_v50, 4  ;;  %v2761_v63 = vrot.slane %v2759_v52, 5  ;;  %v2775_v3 = vshll.u32 %v2688_v48, 16  ;;  %v2767_v6 = vrot.slane %v2765_v56, 5 }
  0x60   : > { %v2749_v5 = vrot.slane %v2748_v54, 4  ;;  %v2771_v7 = vrot.slane %v2769_v57, 4  ;;  %v1521_v8 = vshrl.u32 %v1448_v53, 16  ;;  %v1524_v15 = vshll.u32 %v1448_v53, 16  ;;  %v2691_v54 = vld [vmem:[#allocation2 + $0x4c] sm:$0x1] }
  0x61   : > { %v2744_v11 = vsel %vm11801_vm10, %v2739_v61, %v2743_v44  ;;  %v2762_v12 = vor.u32 %v2761_v63, %v2758_v62  ;;  %v2777_v13 = vrot.slane %v2775_v3, 5  ;;  %v1530_v19 = vshll.u32 %v1449_v59, 16  ;;  %v3235_v62 = vld [vmem:[#allocation2 + $0x54] sm:$0x8] }
  0x62   : > { %v2754_v16 = vsel %vm11801_vm10, %v2749_v5, %v2753_v55  ;;  %v2772_v17 = vor.u32 %v2771_v7, %v2767_v6  ;;  %v1523_v18 = vrot.slane %v1521_v8, 4  ;;  %v1526_v23 = vrot.slane %v1524_v15, 5 }
  0x63   : > { %v10432_v21 = vcombine.low %v2744_v11, %v2754_v16  ;;  %v2763_v22 = vrot.slane %v2762_v12, 4  ;;  %v1534_v24 = vshrl.u32 %v1449_v59, 16  ;;  %v1532_v27 = vrot.slane %v1530_v19, 5  ;;  %v3237_v12 = vld [vmem:[#allocation2 + $0x5c] sm:$0xf] }
  0x64   : > { %v2773_v26 = vrot.slane %v2772_v17, 4  ;;  %v1540_v28 = vshll.u32 %v1450_v4, 16  ;;  %v1545_v29 = vshrl.u32 %v1451_v10, 16  ;;  %v1527_v31 = vor.u32 %v1526_v23, %v1523_v18  ;;  %v11228_v18 = vld [vmem:[%s14977_s1] sm:$0xff]  }
  0x65   : > { %3163 = vrot.lane.b32.xlu0 %v10432_v21, %s11560_s15  ;;  %v2768_v30 = vsel %vm11801_vm10, %v2763_v22, %v2767_v6  ;;  %v1536_v32 = vrot.slane %v1534_v24, 4  ;;  %v1548_v34 = vshll.u32 %v1451_v10, 16  ;;  %v1554_v39 = vshll.u32 %v1452_v25, 16  ;;  %v3236_v6 = vld [vmem:[#allocation2 + $0x58] sm:$0xf]  ;;  %4591 = vmatpush1.bf16.msra.mxu0 %v11228_v18 }
  0x66   : > { %v2778_v36 = vsel %vm11801_vm10, %v2773_v26, %v2777_v13  ;;  %v1542_v37 = vrot.slane %v1540_v28, 5  ;;  %v1547_v38 = vrot.slane %v1545_v29, 4  ;;  %v1528_v42 = vrot.slane %v1527_v31, 4  ;;  %v1454_v28 = vld [vmem:[#allocation2 + $0x44] sm:$0xf]  ;;  %v11230_v29 = vld [vmem:[%s14977_s1 + $0x8] sm:$0xff]   ;;  %4592 = vmatprep.subr.bf16.mxu0 %v11554_v0 }
  0x67   : > { %v10433_v41 = vcombine.low %v2768_v30, %v2778_v36  ;;  %v1537_v43 = vor.u32 %v1536_v32, %v1532_v27  ;;  %v1550_v44 = vrot.slane %v1548_v34, 5  ;;  %v1556_v47 = vrot.slane %v1554_v39, 5  ;;  %v1455_v39 = vld [vmem:[#allocation2 + $0x48] sm:$0xf] }
  0x68   : > { %v1558_v48 = vshrl.u32 %v1452_v25, 16  ;;  %v1564_v49 = vshll.u32 %v1453_v33, 16  ;;  %v539_v50 = vsel %vm11746_vm6, 0, %v538_v35  ;;  %v1533_v51 = vsel %vm11801_vm10, %v1528_v42, %v1532_v27 }
  0x69   : > { %3165 = vrot.lane.b32.xlu1 %v10433_v41, %s11560_s15  ;;  %v1538_v52 = vrot.slane %v1537_v43, 4  ;;  %v1551_v53 = vor.u32 %v1550_v44, %v1547_v38  ;;  %540 = vst [vmem:[#allocation2 + $0x10] sm:$0x1] %v539_v50  ;;  %v2780_v55 = vshrl.u32 %v2689_v40, 16  ;;  %v2783_v59 = vshll.u32 %v2689_v40, 16  ;;  %4593 = vmatpush1.bf16.msra.mxu0 %v11230_v29 }
  0x6a   : > { %v1560_v56 = vrot.slane %v1558_v48, 4  ;;  %v1566_v57 = vrot.slane %v1564_v49, 5  ;;  %v2789_v61 = vshll.u32 %v2690_v46, 16  ;;  %v2793_v5 = vshrl.u32 %v2690_v46, 16  ;;  %v1456_v43 = vld [vmem:[#allocation2 + $0x4c] sm:$0x1]  ;;  %4594 = vmatprep.subr.bf16.mxu0 %v11554_v0 }
  0x6b   : > { %v1543_v63 = vsel %vm11801_vm10, %v1538_v52, %v1542_v37  ;;  %v1552_v3 = vrot.slane %v1551_v53, 4  ;;  %v2782_v4 = vrot.slane %v2780_v55, 4  ;;  %v2785_v10 = vrot.slane %v2783_v59, 5 }
  0x6c   : > { %v10369_v7 = vcombine.low %v1533_v51, %v1543_v63  ;;  %v1561_v8 = vor.u32 %v1560_v56, %v1556_v47  ;;  %v2791_v11 = vrot.slane %v2789_v61, 5  ;;  %v2795_v15 = vrot.slane %v2793_v5, 4  ;;  %v11232_v51 = vld [vmem:[%s14977_s1 + $0x10] sm:$0xff]  }
  0x6d   : > { %v1557_v13 = vsel %vm11801_vm10, %v1552_v3, %v1556_v47  ;;  %v2799_v16 = vshll.u32 %v2691_v54, 16  ;;  %v3322_v17 = vshrl.u32 %v3235_v62, 16  ;;  %v2786_v21 = vor.u32 %v2785_v10, %v2782_v4  ;;  %v11211_v47 = vld [vmem:[#allocation2 + $0x44] sm:$0xff]   ;;  %v2002_v56 = vld [vmem:[#allocation2 + $0x54] sm:$0x8]  ;;  %4595 = vmatpush1.bf16.msra.mxu0 %v11232_v51 }
  0x6e   : > { %1930 = vrot.lane.b32.xlu0 %v10369_v7, %s11561_s22  ;;  %v1562_v19 = vrot.slane %v1561_v8, 4  ;;  %v3327_v22 = vshrl.u32 %v3236_v6, 16  ;;  %v3330_v23 = vshll.u32 %v3236_v6, 16  ;;  %v2796_v24 = vor.u32 %v2795_v15, %v2791_v11  ;;  %v2004_v3 = vld [vmem:[#allocation2 + $0x5c] sm:$0xf]  ;;  %4596 = vmatprep.subr.bf16.mxu0 %v11554_v0 }
  0x6f   : > { %v2801_v25 = vrot.slane %v2799_v16, 5  ;;  %v10450_v26 = vrot.slane %v3322_v17, 11  ;;  %v3336_v27 = vshrl.u32 %v3237_v12, 16  ;;  %v2787_v32 = vrot.slane %v2786_v21, 4  ;;  %v2692_v8 = vld [vmem:[#allocation2 + $0x58] sm:$0xf] }
  0x70   : > { %v1567_v30 = vsel %vm11801_vm10, %v1562_v19, %v1566_v57  ;;  %v1447_v31 = vld [vmem:[#allocation2 + $0x10] sm:$0x1]  ;;  %v3329_v33 = vrot.slane %v3327_v22, 7  ;;  %v3339_v34 = vshll.u32 %v3237_v12, 16  ;;  %v2797_v37 = vrot.slane %v2796_v24, 4  ;;  %v11233_v15 = vld [vmem:[%s14977_s1 + $0x18] sm:$0xff]  }
  0x71   : > { %v10370_v35 = vcombine.low %v1557_v13, %v1567_v30  ;;  %v1516_v36 = vshll.u32 %v1447_v31, 16  ;;  %v3338_v38 = vrot.slane %v3336_v27, 7  ;;  %v2792_v40 = vsel %vm11801_vm10, %v2787_v32, %v2791_v11  ;;  %v2003_v57 = vld [vmem:[#allocation2 + $0x58] sm:$0xf]  ;;  %v2693_v13 = vld [vmem:[#allocation2 + $0x5c] sm:$0xf]  ;;  %4597 = vmatpush1.bf16.msra.mxu0 %v11233_v15 }
  0x72   : > { %v3332_v41 = vor.u32 %v3330_v23, %v3329_v33  ;;  %v3334_v42 = vrot.slane %v3329_v33, 4  ;;  %v1569_v44 = vshrl.u32 %v1454_v28, 16  ;;  %v2802_v48 = vsel %vm11801_vm10, %v2797_v37, %v2801_v25  ;;  %v2694_v23 = vld [vmem:[#allocation2 + $0x60] sm:$0x1]  ;;  %v11213_v27 = vld [vmem:[#allocation2 + $0x44] sm:$0xff]   ;;  %v601_v32 = vld [vmem:[%s11721_s20 + $0x48] sm:$0xff]  ;;  %4598 = vmatprep.subr.bf16.mxu0 %v11554_v0 }
  0x73   : > { %1932 = vrot.lane.b32.xlu1 %v10370_v35, %s11561_s22  ;;  %v1518_v46 = vrot.slane %v1516_v36, 5  ;;  %v3341_v49 = vor.u32 %v3339_v34, %v3338_v38  ;;  %v1572_v50 = vshll.u32 %v1454_v28, 16  ;;  %v10434_v52 = vcombine.low %v2792_v40, %v2802_v48  ;;  %v11236_v33 = vld [vmem:[%s14977_s1 + $0x20] sm:$0xff]   ;;  %v11212_v34 = vld [vmem:[#allocation2 + $0x58] sm:$0xff]  }
  0x74   : > { %v3333_v53 = vsel %vm11813_vm11, %v10450_v26, %v3332_v41  ;;  %v1571_v54 = vrot.slane %v1569_v44, 4  ;;  %v1578_v55 = vshll.u32 %v1455_v39, 16  ;;  %v1582_v63 = vshrl.u32 %v1455_v39, 16  ;;  %v3238_v39 = vld [vmem:[#allocation2 + $0x68] sm:$0x8]  ;;  %v602_v15 = vld [vmem:[%s11721_s20 + $0x50] sm:$0xff] }
  0x75   : > { %v1519_v59 = vsel %vm11801_vm10, %v11796_v60, %v1518_v46  ;;  %v3342_v61 = vsel %vm11813_vm11, %v3334_v42, %v3341_v49  ;;  %v1574_v62 = vrot.slane %v1572_v50, 5  ;;  %v1588_v7 = vshll.u32 %v1456_v43, 16  ;;  %v3239_v44 = vld [vmem:[#allocation2 + $0x6c] sm:$0xf]  ;;  %v1457_v46 = vld [vmem:[#allocation2 + $0x58] sm:$0xf]  ;;  %4599 = vmatpush1.bf16.msra.mxu0 %v11236_v33 }
  0x76   : > { %v10368_v4 = vcombine.low %v1509_v14, %v1519_v59  ;;  %v10466_v5 = vcombine.low %v3333_v53, %v3342_v61  ;;  %v1580_v6 = vrot.slane %v1578_v55, 5  ;;  %v1584_v60 = vrot.slane %v1582_v63, 4  ;;  %v1458_v51 = vld [vmem:[#allocation2 + $0x5c] sm:$0xf]  ;;  %4600 = vmatprep.subr.bf16.mxu0 %v11554_v0  ;;  %v553_v33 = vld [vmem:[#allocation2 + $0x74] sm:$0x1] }
  0x77   : > { %2622 = vrot.lane.b32.xlu1 %v11211_v47, %s11556_s17  ;;  %v1575_v10 = vor.u32 %v1574_v62, %v1571_v54  ;;  %v2108_v11 = vshrl.u32 %v2002_v56, 16  ;;  %v2113_v12 = vshrl.u32 %v2003_v57, 16  ;;  %v1590_v45 = vrot.slane %v1588_v7, 5  ;;  %v11237_v56 = vld [vmem:[%s14977_s1 + $0x28] sm:$0xff]   ;;  %v1459_v62 = vld [vmem:[#allocation2 + $0x60] sm:$0x1] }
  0x78   : > { %1928 = vrot.lane.b32.xlu0 %v10368_v4, %s11561_s22  ;;  %v2116_v58 = vshll.u32 %v2003_v57, 16  ;;  %v2122_v14 = vshrl.u32 %v2004_v3, 16  ;;  %v2125_v16 = vshll.u32 %v2004_v3, 16  ;;  %v1585_v18 = vor.u32 %v1584_v60, %v1580_v6  ;;  %v2005_v7 = vld [vmem:[#allocation2 + $0x68] sm:$0x8] }
  0x79   : > { %v1576_v17 = vrot.slane %v1575_v10, 4  ;;  %v10387_v19 = vrot.slane %v2108_v11, 11  ;;  %v2115_v21 = vrot.slane %v2113_v12, 7  ;;  %v2804_v24 = vshrl.u32 %v2692_v8, 16  ;;  %4601 = vmatpush1.bf16.msra.mxu0 %v11237_v56 }
  0x7a   : > { %v2124_v22 = vrot.slane %v2122_v14, 7  ;;  %v2807_v25 = vshll.u32 %v2692_v8, 16  ;;  %v2813_v26 = vshll.u32 %v2693_v13, 16  ;;  %v1586_v29 = vrot.slane %v1585_v18, 4  ;;  %v11214_v8 = vld [vmem:[#allocation2 + $0x58] sm:$0xff]   ;;  %4602 = vmatprep.subr.bf16.mxu0 %v11554_v0 }
  0x7b   : > { %3681 = vrot.lane.b32.xlu1 %v10466_v5, %s11559_s14  ;;  %v1581_v28 = vsel %vm11801_vm10, %v1576_v17, %v1580_v6  ;;  %v2118_v30 = vor.u32 %v2116_v58, %v2115_v21  ;;  %v2120_v31 = vrot.slane %v2115_v21, 4  ;;  %v2806_v36 = vrot.slane %v2804_v24, 4  ;;  %v11239_v58 = vld [vmem:[%s14977_s1 + $0x30] sm:$0xff]   ;;  %v604_v24 = vld [vmem:[%s11721_s20 + $0x60] sm:$0xff] }
  0x7c   : > { %3167 = vrot.lane.b32.xlu0 %v10434_v52, %s11560_s15  ;;  %v2127_v35 = vor.u32 %v2125_v16, %v2124_v22  ;;  %v2809_v37 = vrot.slane %v2807_v25, 5  ;;  %v2815_v38 = vrot.slane %v2813_v26, 5  ;;  %v1591_v40 = vsel %vm11801_vm10, %v1586_v29, %v1590_v45  ;;  %v603_v45 = vld [vmem:[%s11721_s20 + $0x58] sm:$0xff] }
  0x7d   : > { %v2119_v41 = vsel %vm11813_vm11, %v10387_v19, %v2118_v30  ;;  %v2817_v42 = vshrl.u32 %v2693_v13, 16  ;;  %v2823_v43 = vshll.u32 %v2694_v23, 16  ;;  %v10371_v47 = vcombine.low %v1581_v28, %v1591_v40  ;;  %v2006_v13 = vld [vmem:[#allocation2 + $0x6c] sm:$0xf]  ;;  %4603 = vmatpush1.bf16.msra.mxu0 %v11239_v58 }
  0x7e   : > { %v2128_v48 = vsel %vm11813_vm11, %v2120_v31, %v2127_v35  ;;  %v2810_v49 = vor.u32 %v2809_v37, %v2806_v36  ;;  %v10904_v50 = vpack.c.bf16 %v601_v32, %v601_v32  ;;  %v3344_v55 = vshrl.u32 %v3238_v39, 16  ;;  %v11241_v35 = vld [vmem:[%s14977_s1 + $0x38] sm:$0xff]   ;;  %4604 = vmatprep.subr.bf16.mxu0 %v11554_v0 }
  0x7f   : > { %1386 = vrot.lane.b32.xlu1 %v11213_v27, %s11555_s28  ;;  %v10403_v52 = vcombine.low %v2119_v41, %v2128_v48  ;;  %v2819_v53 = vrot.slane %v2817_v42, 4  ;;  %v2825_v54 = vrot.slane %v2823_v43, 5  ;;  %v3349_v59 = vshrl.u32 %v3239_v44, 16  ;;  %v502_v48 = vld [vmem:[#allocation2 + $0x7c] sm:$0x8] }
  0x80   : > { %3858 = vrot.lane.b32.xlu0 %v11212_v34, %s11557_s23  ;;  %v2811_v57 = vrot.slane %v2810_v49, 4  ;;  %762 = vst.msk [vmem:[#allocation2 + $0x70] sm:$0xf] %vm462_vm0, %v10904_v50  ;;  %v3352_v61 = vshll.u32 %v3239_v44, 16  ;;  %v1593_v63 = vshrl.u32 %v1457_v46, 16  ;;  %v11920_v4 = vrot.slane %v3344_v55, 11 }
  0x81   : > { %v2820_v3 = vor.u32 %v2819_v53, %v2815_v38  ;;  %v1596_v5 = vshll.u32 %v1457_v46, 16  ;;  %v1602_v6 = vshll.u32 %v1458_v51, 16  ;;  %v11924_v60 = vrot.slane %v3349_v59, 7  ;;  %v2695_v34 = vld [vmem:[#allocation2 + $0x6c] sm:$0xf]  ;;  %4605 = vmatpush1.bf16.msra.mxu0 %v11241_v35 }
  0x82   : > { %v2816_v10 = vsel %vm11801_vm10, %v2811_v57, %v2815_v38  ;;  %v1595_v11 = vrot.slane %v1593_v63, 4  ;;  %v1606_v12 = vshrl.u32 %v1458_v51, 16  ;;  %v1612_v18 = vshll.u32 %v1459_v62, 16  ;;  %v1460_v59 = vld [vmem:[#allocation2 + $0x6c] sm:$0xf]  ;;  %4606 = vmatprep.subr.bf16.mxu0 %v11554_v0 }
  0x83   : > { %2447 = vrot.lane.b32.xlu1 %v10403_v52, %s11558_s25  ;;  %v2821_v14 = vrot.slane %v2820_v3, 4  ;;  %v1598_v16 = vrot.slane %v1596_v5, 5  ;;  %v1604_v17 = vrot.slane %v1602_v6, 5  ;;  %v11934_v19 = vor.u32 %v3352_v61, %v11924_v60 }
  0x84   : > { %1934 = vrot.lane.b32.xlu0 %v10371_v47, %s11561_s22  ;;  %v3356_v21 = vrot.slane %v11924_v60, 4  ;;  %v1608_v22 = vrot.slane %v1606_v12, 4  ;;  %v2130_v23 = vshrl.u32 %v2005_v7, 16  ;;  %v1614_v27 = vrot.slane %v1612_v18, 5 }
  0x85   : > { %v2826_v25 = vsel %vm11801_vm10, %v2821_v14, %v2825_v54  ;;  %v1599_v26 = vor.u32 %v1598_v16, %v1595_v11  ;;  %v2135_v28 = vshrl.u32 %v2006_v13, 16  ;;  %v3355_v30 = vsel %vm11813_vm11, %v11920_v4, %v11934_v19  ;;  %v11243_v4 = vld [vmem:[%s14977_s1 + $0x40] sm:$0xff]  }
  0x86   : > { %v10435_v29 = vcombine.low %v2816_v10, %v2826_v25  ;;  %v1609_v31 = vor.u32 %v1608_v22, %v1604_v17  ;;  %v11945_v32 = vrot.slane %v2130_v23, 11  ;;  %v10905_v39 = vpack.c.bf16 %v602_v15, %v602_v15  ;;  %v605_v10 = vld [vmem:[%s11721_s20 + $0x68] sm:$0xff]  ;;  %v11216_v22 = vld [vmem:[#allocation2 + $0x58] sm:$0xff]   ;;  %4607 = vmatpush1.bf16.msra.mxu0 %v11243_v4 }
  0x87   : > { %v3240_v36 = vld [vmem:[#allocation2 + $0x70] sm:$0xf]  ;;  %v1600_v38 = vrot.slane %v1599_v26, 4  ;;  %v10906_v40 = vpack.c.bf16 %v603_v45, %v603_v45  ;;  %v10907_v41 = vpack.c.bf16 %v604_v24, %v604_v24  ;;  %v2137_v47 = vrot.slane %v2135_v28, 7  ;;  %v606_v45 = vld [vmem:[%s11721_s20 + $0x70] sm:$0xff] }
  0x88   : > { %v11215_v37 = vld [vmem:[#allocation2 + $0x6c] sm:$0xff]   ;;  %2624 = vrot.lane.b32.xlu0 %v11214_v8, %s11556_s17  ;;  %3169 = vrot.lane.b32.xlu1 %v10435_v29, %s11560_s15  ;;  %v3358_v42 = vshrl.u32 %v3240_v36, 16  ;;  %v3361_v43 = vshll.u32 %v3240_v36, 16  ;;  %v1610_v44 = vrot.slane %v1609_v31, 4  ;;  %v2138_v50 = vshll.u32 %v2006_v13, 16 }
  0x89   : > { %v2007_v46 = vld [vmem:[#allocation2 + $0x70] sm:$0xf]  ;;  %v1605_v49 = vsel %vm11801_vm10, %v1600_v38, %v1604_v17  ;;  %763 = vst.msk [vmem:[#allocation2 + $0x80] sm:$0xf] %vm462_vm0, %v10905_v39  ;;  %764 = vst.msk [vmem:[#allocation2 + $0x84] sm:$0xf] %vm462_vm0, %v10906_v40  ;;  %v10908_v31 = vpack.c.bf16 %v605_v10, %v605_v10  ;;  %v10909_v39 = vpack.c.bf16 %v606_v45, %v606_v45 }
  0x8a   : > { %v2144_v51 = vshrl.u32 %v2007_v46, 16  ;;  %v2147_v52 = vshll.u32 %v2007_v46, 16  ;;  %765 = vst.msk [vmem:[#allocation2 + $0x94] sm:$0xf] %vm462_vm0, %v10907_v41  ;;  %v3360_v53 = vrot.slane %v3358_v42, 7  ;;  %v1615_v54 = vsel %vm11801_vm10, %v1610_v44, %v1614_v27  ;;  %v11217_v14 = vld [vmem:[#allocation2 + $0x6c] sm:$0xff]  }
  0x8b   : > { %v2142_v55 = vrot.slane %v2137_v47, 4  ;;  %v554_v56 = vsel %vm11746_vm6, 0, %v553_v33  ;;  %v2696_v57 = vld [vmem:[#allocation2 + $0x70] sm:$0xf]  ;;  %v10372_v61 = vcombine.low %v1605_v49, %v1615_v54  ;;  %v2140_v62 = vor.u32 %v2138_v50, %v2137_v47  ;;  %766 = vst.msk [vmem:[#allocation2 + $0x98] sm:$0xf] %vm462_vm0, %v10908_v31 }
  0x8c   : > { %v2146_v63 = vrot.slane %v2144_v51, 7  ;;  %555 = vst [vmem:[#allocation2 + $0x74] sm:$0x1] %v554_v56  ;;  %v2828_v3 = vshrl.u32 %v2695_v34, 16  ;;  %v3363_v5 = vor.u32 %v3361_v43, %v3360_v53  ;;  %3860 = vrot.lane.b32.xlu1 %v11215_v37, %s11557_s23  ;;  %v2831_v6 = vshll.u32 %v2695_v34, 16 }
  0x8d   : > { %v2837_v7 = vshll.u32 %v2696_v57, 16  ;;  %v2841_v8 = vshrl.u32 %v2696_v57, 16  ;;  %v2141_v11 = vsel %vm11813_vm11, %v11945_v32, %v2140_v62  ;;  %v503_v15 = vsel %vm11741_vm5, 0, %v502_v48  ;;  %v1461_v24 = vld [vmem:[#allocation2 + $0x70] sm:$0xf] }
  0x8e   : > { %v2149_v12 = vor.u32 %v2147_v52, %v2146_v63  ;;  %v2830_v13 = vrot.slane %v2828_v3, 4  ;;  %v3364_v58 = vsel %vm11813_vm11, %v3356_v21, %v3363_v5  ;;  %v2833_v16 = vrot.slane %v2831_v6, 5  ;;  %504 = vst [vmem:[#allocation2 + $0x7c] sm:$0x8] %v503_v15  ;;  %767 = vst.msk [vmem:[#allocation2 + $0xa8] sm:$0xf] %vm462_vm0, %v10909_v39 }
  0x8f   : > { %v2839_v17 = vrot.slane %v2837_v7, 5  ;;  %v2843_v18 = vrot.slane %v2841_v8, 4  ;;  %v10467_v19 = vcombine.low %v3355_v30, %v3364_v58  ;;  %v1617_v25 = vshrl.u32 %v1460_v59, 16 }
  0x90   : > { %v2150_v23 = vsel %vm11813_vm11, %v2142_v55, %v2149_v12  ;;  %v1620_v26 = vshll.u32 %v1460_v59, 16  ;;  %1936 = vrot.lane.b32.xlu1 %v10372_v61, %s11561_s22  ;;  %v2834_v27 = vor.u32 %v2833_v16, %v2830_v13  ;;  %v3242_v21 = vld [vmem:[#allocation2 + $0x80] sm:$0xf]  ;;  %v3243_v29 = vld [vmem:[#allocation2 + $0x84] sm:$0xf]  ;;  %v1626_v47 = vshll.u32 %v1461_v24, 16 }
  0x91   : > { %v10404_v60 = vcombine.low %v2141_v11, %v2150_v23  ;;  %v2844_v28 = vor.u32 %v2843_v18, %v2839_v17  ;;  %3683 = vrot.lane.b32.xlu0 %v10467_v19, %s11559_s14  ;;  %v3371_v32 = vshrl.u32 %v3242_v21, 16  ;;  %v3374_v30 = vshll.u32 %v3242_v21, 16  ;;  %v2009_v50 = vld [vmem:[#allocation2 + $0x80] sm:$0xf]  ;;  %v2010_v63 = vld [vmem:[#allocation2 + $0x84] sm:$0xf] }
  0x92   : > { %v3380_v33 = vshrl.u32 %v3243_v29, 16  ;;  %v3383_v34 = vshll.u32 %v3243_v29, 16  ;;  %v2835_v36 = vrot.slane %v2834_v27, 4  ;;  %v1619_v38 = vrot.slane %v1617_v25, 4  ;;  %v556_v12 = vld [vmem:[#allocation2 + $0x88] sm:$0x1] }
  0x93   : > { %v2697_v35 = vld [vmem:[#allocation2 + $0x74] sm:$0x1]  ;;  %v2845_v37 = vrot.slane %v2844_v28, 4  ;;  %v3373_v41 = vrot.slane %v3371_v32, 7  ;;  %v1622_v44 = vrot.slane %v1620_v26, 5  ;;  %v1630_v48 = vshrl.u32 %v1461_v24, 16 }
  0x94   : > { %v2847_v40 = vshll.u32 %v2697_v35, 16  ;;  %v3382_v42 = vrot.slane %v3380_v33, 7  ;;  %v1462_v43 = vld [vmem:[#allocation2 + $0x74] sm:$0x1]  ;;  %2626 = vrot.lane.b32.xlu1 %v11217_v14, %s11556_s17  ;;  %v2840_v46 = vsel %vm11801_vm10, %v2835_v36, %v2839_v17  ;;  %v1628_v61 = vrot.slane %v1626_v47, 5  ;;  %v11219_v28 = vld [vmem:[#allocation2 + $0x6c] sm:$0xff]  }
  0x95   : > { %v1636_v49 = vshll.u32 %v1462_v43, 16  ;;  %1388 = vrot.lane.b32.xlu0 %v11216_v22, %s11555_s28  ;;  %v3241_v52 = vld [vmem:[#allocation2 + $0x7c] sm:$0x8]  ;;  %v3376_v53 = vor.u32 %v3374_v30, %v3373_v41  ;;  %v3378_v54 = vrot.slane %v3373_v41, 4  ;;  %v1623_v59 = vor.u32 %v1622_v44, %v1619_v38  ;;  %v2698_v13 = vld [vmem:[#allocation2 + $0x80] sm:$0xf] }
  0x96   : > { %v2849_v51 = vrot.slane %v2847_v40, 5  ;;  %v3385_v55 = vor.u32 %v3383_v34, %v3382_v42  ;;  %v2008_v56 = vld [vmem:[#allocation2 + $0x7c] sm:$0x8]  ;;  %v3366_v57 = vshrl.u32 %v3241_v52, 16  ;;  %v1632_v62 = vrot.slane %v1630_v48, 4  ;;  %v11218_v30 = vld [vmem:[#allocation2 + $0x80] sm:$0xff]  }
  0x97   : > { %v1638_v5 = vrot.slane %v1636_v49, 5  ;;  %v2152_v6 = vshrl.u32 %v2008_v56, 16  ;;  %v1624_v10 = vrot.slane %v1623_v59, 4  ;;  %v2157_v45 = vshrl.u32 %v2009_v50, 16  ;;  %v2699_v16 = vld [vmem:[#allocation2 + $0x84] sm:$0xf] }
  0x98   : > { %v2850_v3 = vsel %vm11801_vm10, %v2845_v37, %v2849_v51  ;;  %v3386_v4 = vsel %vm11813_vm11, %v3378_v54, %v3385_v55  ;;  %v10452_v8 = vrot.slane %v3366_v57, 11  ;;  %v1633_v11 = vor.u32 %v1632_v62, %v1628_v61  ;;  %v505_v23 = vld [vmem:[#allocation2 + $0x90] sm:$0x8]  ;;  %v3245_v24 = vld [vmem:[#allocation2 + $0x94] sm:$0xf]  ;;  %v607_v49 = vld [vmem:[%s11721_s20 + $0x78] sm:$0xff] }
  0x99   : > { %v10436_v7 = vcombine.low %v2840_v46, %v2850_v3  ;;  %2449 = vrot.lane.b32.xlu0 %v10404_v60, %s11558_s25  ;;  %v10389_v15 = vrot.slane %v2152_v6, 11  ;;  %v2160_v58 = vshll.u32 %v2009_v50, 16  ;;  %v2166_v14 = vshrl.u32 %v2010_v63, 16  ;;  %v3246_v37 = vld [vmem:[#allocation2 + $0x98] sm:$0xf] }
  0x9a   : > { %v3377_v17 = vsel %vm11813_vm11, %v10452_v8, %v3376_v53  ;;  %v1629_v18 = vsel %vm11801_vm10, %v1624_v10, %v1628_v61  ;;  %v1634_v19 = vrot.slane %v1633_v11, 4  ;;  %v2169_v22 = vshll.u32 %v2010_v63, 16  ;;  %v1463_v42 = vld [vmem:[#allocation2 + $0x80] sm:$0xf]  ;;  %v1464_v48 = vld [vmem:[#allocation2 + $0x84] sm:$0xf] }
  0x9b   : > { %v10468_v25 = vcombine.low %v3377_v17, %v3386_v4  ;;  %v2159_v26 = vrot.slane %v2157_v45, 7  ;;  %v2168_v27 = vrot.slane %v2166_v14, 7  ;;  %v557_v60 = vsel %vm11746_vm6, 0, %v556_v12  ;;  %v2012_v3 = vld [vmem:[#allocation2 + $0x94] sm:$0xf] }
  0x9c   : > { %v1639_v21 = vsel %vm11801_vm10, %v1634_v19, %v1638_v5  ;;  %558 = vst [vmem:[#allocation2 + $0x88] sm:$0x1] %v557_v60  ;;  %v2852_v29 = vshrl.u32 %v2698_v13, 16  ;;  %v2855_v31 = vshll.u32 %v2698_v13, 16  ;;  %v2861_v32 = vshll.u32 %v2699_v16, 16 }
  0x9d   : > { %3171 = vrot.lane.b32.xlu0 %v10436_v7, %s11560_s15  ;;  %3685 = vrot.lane.b32.xlu1 %v10468_v25, %s11559_s14  ;;  %v10373_v33 = vcombine.low %v1629_v18, %v1639_v21  ;;  %v2162_v34 = vor.u32 %v2160_v58, %v2159_v26  ;;  %v2164_v35 = vrot.slane %v2159_v26, 4  ;;  %v2171_v36 = vor.u32 %v2169_v22, %v2168_v27  ;;  %v2013_v45 = vld [vmem:[#allocation2 + $0x98] sm:$0xf]  ;;  %v11220_v58 = vld [vmem:[#allocation2 + $0x80] sm:$0xff]  }
  0x9e   : > { %v2854_v38 = vrot.slane %v2852_v29, 4  ;;  %v2857_v39 = vrot.slane %v2855_v31, 5  ;;  %v2863_v40 = vrot.slane %v2861_v32, 5  ;;  %v2865_v41 = vshrl.u32 %v2699_v16, 16 }
  0x9f   : > { %v2163_v43 = vsel %vm11813_vm11, %v10389_v15, %v2162_v34  ;;  %v2172_v44 = vsel %vm11813_vm11, %v2164_v35, %v2171_v36  ;;  %v506_v46 = vsel %vm11741_vm5, 0, %v505_v23  ;;  %v3393_v47 = vshrl.u32 %v3245_v24, 16 }
  0xa0   : > { %v10405_v50 = vcombine.low %v2163_v43, %v2172_v44  ;;  %v2858_v51 = vor.u32 %v2857_v39, %v2854_v38  ;;  %v2867_v52 = vrot.slane %v2865_v41, 4  ;;  %507 = vst [vmem:[#allocation2 + $0x90] sm:$0x8] %v506_v46  ;;  %v3396_v53 = vshll.u32 %v3245_v24, 16  ;;  %v2701_v38 = vld [vmem:[#allocation2 + $0x94] sm:$0xf] }
  0xa1   : > { %3862 = vrot.lane.b32.xlu0 %v11218_v30, %s11557_s23  ;;  %1390 = vrot.lane.b32.xlu1 %v11219_v28, %s11555_s28  ;;  %v3395_v54 = vrot.slane %v3393_v47, 7  ;;  %v3402_v55 = vshrl.u32 %v3246_v37, 16  ;;  %v3405_v56 = vshll.u32 %v3246_v37, 16  ;;  %v1641_v57 = vshrl.u32 %v1463_v42, 16  ;;  %v559_v37 = vld [vmem:[#allocation2 + $0x9c] sm:$0x1] }
  0xa2   : > { %v2859_v59 = vrot.slane %v2858_v51, 4  ;;  %v2868_v61 = vor.u32 %v2867_v52, %v2863_v40  ;;  %v1644_v62 = vshll.u32 %v1463_v42, 16  ;;  %v1650_v63 = vshll.u32 %v1464_v48, 16  ;;  %v508_v44 = vld [vmem:[#allocation2 + $0xa4] sm:$0x8] }
  0xa3   : > { %v2700_v4 = vld [vmem:[#allocation2 + $0x88] sm:$0x1]  ;;  %v3398_v5 = vor.u32 %v3396_v53, %v3395_v54  ;;  %v3400_v6 = vrot.slane %v3395_v54, 4  ;;  %v3404_v7 = vrot.slane %v3402_v55, 7  ;;  %v10910_v10 = vpack.c.bf16 %v607_v49, %v607_v49 }
  0xa4   : > { %v1465_v8 = vld [vmem:[#allocation2 + $0x88] sm:$0x1]  ;;  %v2864_v11 = vsel %vm11801_vm10, %v2859_v59, %v2863_v40  ;;  %v2869_v12 = vrot.slane %v2868_v61, 4  ;;  %v2871_v13 = vshll.u32 %v2700_v4, 16  ;;  %v1643_v15 = vrot.slane %v1641_v57, 4  ;;  %v11221_v40 = vld [vmem:[#allocation2 + $0x94] sm:$0xff]  }
  0xa5   : > { %1938 = vrot.lane.b32.xlu0 %v10373_v33, %s11561_s22  ;;  %2451 = vrot.lane.b32.xlu1 %v10405_v50, %s11558_s25  ;;  %v3407_v14 = vor.u32 %v3405_v56, %v3404_v7  ;;  %v1646_v16 = vrot.slane %v1644_v62, 5  ;;  %v1652_v17 = vrot.slane %v1650_v63, 5  ;;  %v1654_v18 = vshrl.u32 %v1464_v48, 16  ;;  %768 = vst.msk [vmem:[#allocation2 + $0xac] sm:$0xf] %vm462_vm0, %v10910_v10  ;;  %v11222_v7 = vld [vmem:[#allocation2 + $0x80] sm:$0xff]  }
  0xa6   : > { %v2873_v19 = vrot.slane %v2871_v13, 5  ;;  %v1660_v22 = vshll.u32 %v1465_v8, 16  ;;  %v2179_v23 = vshrl.u32 %v2012_v3, 16  ;;  %v2182_v24 = vshll.u32 %v2012_v3, 16  ;;  %v2702_v50 = vld [vmem:[#allocation2 + $0x98] sm:$0xf] }
  0xa7   : > { %v3244_v25 = vld [vmem:[#allocation2 + $0x90] sm:$0x8]  ;;  %v3408_v26 = vsel %vm11813_vm11, %v3400_v6, %v3407_v14  ;;  %v1647_v27 = vor.u32 %v1646_v16, %v1643_v15  ;;  %v1656_v60 = vrot.slane %v1654_v18, 4  ;;  %v2188_v21 = vshrl.u32 %v2013_v45, 16  ;;  %v3248_v55 = vld [vmem:[#allocation2 + $0xa8] sm:$0xf] }
  0xa8   : > { %v2011_v28 = vld [vmem:[#allocation2 + $0x90] sm:$0x8]  ;;  %v2874_v29 = vsel %vm11801_vm10, %v2869_v12, %v2873_v19  ;;  %v3388_v31 = vshrl.u32 %v3244_v25, 16  ;;  %v1662_v32 = vrot.slane %v1660_v22, 5  ;;  %v2181_v36 = vrot.slane %v2179_v23, 7 }
  0xa9   : > { %v2174_v30 = vshrl.u32 %v2011_v28, 16  ;;  %2628 = vrot.lane.b32.xlu0 %v11220_v58, %s11556_s17  ;;  %v10437_v33 = vcombine.low %v2864_v11, %v2874_v29  ;;  %v1648_v34 = vrot.slane %v1647_v27, 4  ;;  %v1657_v35 = vor.u32 %v1656_v60, %v1652_v17  ;;  %v484_v6 = vld [vmem:[#allocation2 + $0x4] sm:$0x8]  ;;  %v786_v19 = vld [vmem:[#allocation2 + $0x8] sm:$0xf] }
  0xaa   : > { %v10453_v39 = vrot.slane %v3388_v31, 11  ;;  %v2190_v42 = vrot.slane %v2188_v21, 7  ;;  %v2191_v43 = vshll.u32 %v2013_v45, 16  ;;  %v2184_v48 = vor.u32 %v2182_v24, %v2181_v36  ;;  %v1466_v29 = vld [vmem:[#allocation2 + $0x94] sm:$0xf] }
  0xab   : > { %v10390_v41 = vrot.slane %v2174_v30, 11  ;;  %3173 = vrot.lane.b32.xlu1 %v10437_v33, %s11560_s15  ;;  %v1653_v46 = vsel %vm11801_vm10, %v1648_v34, %v1652_v17  ;;  %v1658_v47 = vrot.slane %v1657_v35, 4  ;;  %v2186_v49 = vrot.slane %v2181_v36, 4  ;;  %v1467_v35 = vld [vmem:[#allocation2 + $0x98] sm:$0xf] }
  0xac   : > { %v3399_v51 = vsel %vm11813_vm11, %v10453_v39, %v3398_v5  ;;  %v2193_v52 = vor.u32 %v2191_v43, %v2190_v42  ;;  %v560_v53 = vsel %vm11746_vm6, 0, %v559_v37  ;;  %v2876_v54 = vshrl.u32 %v2701_v38, 16  ;;  %v3249_v61 = vld [vmem:[#allocation2 + $0xac] sm:$0xf] }
  0xad   : > { %v10469_v56 = vcombine.low %v3399_v51, %v3408_v26  ;;  %v1663_v57 = vsel %vm11801_vm10, %v1658_v47, %v1662_v32  ;;  %561 = vst [vmem:[#allocation2 + $0x9c] sm:$0x1] %v560_v53  ;;  %v2879_v59 = vshll.u32 %v2701_v38, 16  ;;  %v2185_v63 = vsel %vm11813_vm11, %v10390_v41, %v2184_v48  ;;  %v787_v5 = vld [vmem:[#allocation2 + $0xc] sm:$0xf]  ;;  %v11223_v26 = vld [vmem:[#allocation2 + $0x94] sm:$0xff]   ;;  %v12047_v41 = vpop.permute.xlu0 %1380 }
  0xae   : > { %v10374_v62 = vcombine.low %v1653_v46, %v1663_v57  ;;  %v2878_v3 = vrot.slane %v2876_v54, 4  ;;  %v2885_v4 = vshll.u32 %v2702_v50, 16  ;;  %v2194_v8 = vsel %vm11813_vm11, %v2186_v49, %v2193_v52  ;;  %v2015_v47 = vld [vmem:[#allocation2 + $0xa8] sm:$0xf] }
  0xaf   : > { %3687 = vrot.lane.b32.xlu0 %v10469_v56, %s11559_s14  ;;  %3864 = vrot.lane.b32.xlu1 %v11221_v40, %s11557_s23  ;;  %v2881_v10 = vrot.slane %v2879_v59, 5  ;;  %v2889_v11 = vshrl.u32 %v2702_v50, 16  ;;  %v509_v12 = vsel %vm11741_vm5, 0, %v508_v44  ;;  %v3415_v15 = vshrl.u32 %v3248_v55, 16 }
  0xb0   : > { %v2887_v13 = vrot.slane %v2885_v4, 5  ;;  %510 = vst [vmem:[#allocation2 + $0xa4] sm:$0x8] %v509_v12  ;;  %v3418_v45 = vshll.u32 %v3248_v55, 16  ;;  %v3424_v58 = vshrl.u32 %v3249_v61, 16  ;;  %v3427_v17 = vshll.u32 %v3249_v61, 16 }
  0xb1   : > { %v2882_v14 = vor.u32 %v2881_v10, %v2878_v3  ;;  %v2891_v16 = vrot.slane %v2889_v11, 4  ;;  %v850_v18 = vshrl.u32 %v787_v5, 16  ;;  %v10406_v22 = vcombine.low %v2185_v63, %v2194_v8  ;;  %v2016_v3 = vld [vmem:[#allocation2 + $0xac] sm:$0xf]  ;;  %v562_v8 = vld [vmem:[#allocation2 + $0xb0] sm:$0x1] }
  0xb2   : > { %v3417_v23 = vrot.slane %v3415_v15, 7  ;;  %v3426_v24 = vrot.slane %v3424_v58, 7  ;;  %v853_v25 = vshll.u32 %v787_v5, 16  ;;  %v485_v21 = vsel %vm11741_vm5, 0, %v484_v6 }
  0xb3   : > { %1392 = vrot.lane.b32.xlu0 %v11222_v7, %s11555_s28  ;;  %1940 = vrot.lane.b32.xlu1 %v10374_v62, %s11561_s22  ;;  %v2883_v27 = vrot.slane %v2882_v14, 4  ;;  %v2892_v60 = vor.u32 %v2891_v16, %v2887_v13  ;;  %v852_v28 = vrot.slane %v850_v18, 7  ;;  %486 = vst [vmem:[#allocation2 + $0x4] sm:$0x8] %v485_v21  ;;  %v841_v34 = vshrl.u32 %v786_v19, 16  ;;  %v11224_v14 = vld [vmem:[#allocation2 + $0xa8] sm:$0xff]  }
  0xb4   : > { %v2703_v31 = vld [vmem:[#allocation2 + $0x9c] sm:$0x1]  ;;  %v3420_v32 = vor.u32 %v3418_v45, %v3417_v23  ;;  %v3422_v30 = vrot.slane %v3417_v23, 4  ;;  %v3429_v33 = vor.u32 %v3427_v17, %v3426_v24  ;;  %v844_v43 = vshll.u32 %v786_v19, 16 }
  0xb5   : > { %v2888_v36 = vsel %vm11801_vm10, %v2883_v27, %v2887_v13  ;;  %v2893_v37 = vrot.slane %v2892_v60, 4  ;;  %v2895_v38 = vshll.u32 %v2703_v31, 16  ;;  %v855_v39 = vor.u32 %v853_v25, %v852_v28  ;;  %v1468_v44 = vld [vmem:[#allocation2 + $0x9c] sm:$0x1]  ;;  %v11225_v31 = vld [vmem:[#allocation2 + $0x94] sm:$0xff]  }
  0xb6   : > { %v3430_v40 = vsel %vm11813_vm11, %v3422_v30, %v3429_v33  ;;  %v843_v42 = vrot.slane %v841_v34, 7  ;;  %v1665_v46 = vshrl.u32 %v1466_v29, 16  ;;  %v1668_v50 = vshll.u32 %v1466_v29, 16  ;;  %v790_v29 = vld [vmem:[#allocation2 + $0x20] sm:$0xf] }
  0xb7   : > { %2453 = vrot.lane.b32.xlu0 %v10406_v22, %s11558_s25  ;;  %2630 = vrot.lane.b32.xlu1 %v11223_v26, %s11556_s17  ;;  %v2897_v48 = vrot.slane %v2895_v38, 5  ;;  %v3247_v49 = vld [vmem:[#allocation2 + $0xa4] sm:$0x8]  ;;  %v1674_v51 = vshll.u32 %v1467_v35, 16  ;;  %v1678_v52 = vshrl.u32 %v1467_v35, 16  ;;  %vm1251_vm12 = vcmask 130048   ;;  %v12055_v45 = vpop.permute.xlu1 %2618  ;;  %v12060_v19 = vpop.permute.xlu0 %3854 }
  0xb8   : > { %v3410_v53 = vshrl.u32 %v3247_v49, 16  ;;  %v846_v54 = vor.u32 %v844_v43, %v843_v42  ;;  %v848_v55 = vrot.slane %v843_v42, 4  ;;  %v1667_v56 = vrot.slane %v1665_v46, 4  ;;  %v2014_v57 = vld [vmem:[#allocation2 + $0xa4] sm:$0x8] }
  0xb9   : > { %v2898_v59 = vsel %vm11801_vm10, %v2893_v37, %v2897_v48  ;;  %vm1428_vm13 = vcmask 261248   ;;  %v1670_v61 = vrot.slane %v1668_v50, 5  ;;  %v1676_v62 = vrot.slane %v1674_v51, 5  ;;  %v2704_v22 = vld [vmem:[#allocation2 + $0xa8] sm:$0xf] }
  0xba   : > { %v1680_v63 = vrot.slane %v1678_v52, 4  ;;  %v10438_v4 = vcombine.low %v2888_v36, %v2898_v59  ;;  %v10454_v5 = vrot.slane %v3410_v53, 11  ;;  %v856_v6 = vsel %vm11813_vm11, %v848_v55, %v855_v39  ;;  %v785_v10 = vld [vmem:[#allocation2 + $0x4] sm:$0x8]  ;;  %v2705_v34 = vld [vmem:[#allocation2 + $0xac] sm:$0xf] }
  0xbb   : > { %v1684_v7 = vshll.u32 %v1468_v44, 16  ;;  %v1671_v11 = vor.u32 %v1670_v61, %v1667_v56  ;;  %v2196_v13 = vshrl.u32 %v2014_v57, 16  ;;  %v2201_v15 = vshrl.u32 %v2015_v47, 16  ;;  %v789_v48 = vld [vmem:[#allocation2 + $0x1c] sm:$0xf]  ;;  %v12076_v53 = vpop.permute.xlu0 %2620  ;;  %v608_v61 = vld [vmem:[%s11721_s20 + $0x80] sm:$0xff] }
  0xbc   : > { %v1681_v12 = vor.u32 %v1680_v63, %v1676_v62  ;;  %3175 = vrot.lane.b32.xlu0 %v10438_v4, %s11560_s15  ;;  %v3421_v58 = vsel %vm11813_vm11, %v10454_v5, %v3420_v32  ;;  %v836_v16 = vshrl.u32 %v785_v10, 16  ;;  %v2204_v18 = vshll.u32 %v2015_v47, 16  ;;  %v12072_v47 = vpop.permute.xlu1 %1382  ;;  %v511_v59 = vld [vmem:[#allocation2 + $0xb8] sm:$0x8] }
  0xbd   : > { %v1686_v17 = vrot.slane %v1684_v7, 5  ;;  %v10470_v23 = vcombine.low %v3421_v58, %v3430_v40  ;;  %v1672_v24 = vrot.slane %v1671_v11, 4  ;;  %v10391_v26 = vrot.slane %v2196_v13, 11  ;;  %v788_v40 = vld [vmem:[#allocation2 + $0x18] sm:$0x8] }
  0xbe   : > { %v1682_v25 = vrot.slane %v1681_v12, 4  ;;  %v10320_v27 = vrot.slane %v836_v16, 11  ;;  %v2203_v60 = vrot.slane %v2201_v15, 7  ;;  %v2210_v28 = vshrl.u32 %v2016_v3, 16 }
  0xbf   : > { %v2213_v21 = vshll.u32 %v2016_v3, 16  ;;  %3689 = vrot.lane.b32.xlu1 %v10470_v23, %s11559_s14  ;;  %v1677_v32 = vsel %vm11801_vm10, %v1672_v24, %v1676_v62  ;;  %v563_v33 = vsel %vm11746_vm6, 0, %v562_v8  ;;  %v2900_v35 = vshrl.u32 %v2704_v22, 16  ;;  %v11226_v62 = vld [vmem:[#allocation2 + $0xa8] sm:$0xff]  }
  0xc0   : > { %v1687_v30 = vsel %vm11801_vm10, %v1682_v25, %v1686_v17  ;;  %3866 = vrot.lane.b32.xlu0 %v11224_v14, %s11557_s23  ;;  %v847_v36 = vsel %vm11813_vm11, %v10320_v27, %v846_v54  ;;  %v2206_v38 = vor.u32 %v2204_v18, %v2203_v60  ;;  %v2208_v39 = vrot.slane %v2203_v60, 4  ;;  %564 = vst [vmem:[#allocation2 + $0xb0] sm:$0x1] %v563_v33  ;;  %v791_v14 = vld [vmem:[#allocation2 + $0x2c] sm:$0x8]  ;;  %v12089_v24 = vpop.permute.xlu1 %3856 }
  0xc1   : > { %v10375_v37 = vcombine.low %v1677_v32, %v1687_v30  ;;  %v10336_v42 = vcombine.low %v847_v36, %v856_v6  ;;  %v2212_v43 = vrot.slane %v2210_v28, 7  ;;  %v2902_v44 = vrot.slane %v2900_v35, 4  ;;  %v609_v6 = vld [vmem:[%s11721_s20 + $0x88] sm:$0xff]  ;;  %v1469_v33 = vld [vmem:[#allocation2 + $0xa8] sm:$0xf] }
  0xc2   : > { %v2903_v46 = vshll.u32 %v2704_v22, 16  ;;  %v2207_v49 = vsel %vm11813_vm11, %v10391_v26, %v2206_v38  ;;  %v2909_v50 = vshll.u32 %v2705_v34, 16  ;;  %v2913_v51 = vshrl.u32 %v2705_v34, 16  ;;  %v793_v25 = vld [vmem:[#allocation2 + $0x34] sm:$0xf] }
  0xc3   : > { %v872_v52 = vshrl.u32 %v790_v29, 16  ;;  %1394 = vrot.lane.b32.xlu1 %v11225_v31, %s11555_s28  ;;  %1252 = vst.msk [vmem:[#allocation3] sm:$0xff] %vm1251_vm12, %v10336_v42  ;;  %v2215_v54 = vor.u32 %v2213_v21, %v2212_v43  ;;  %v875_v56 = vshll.u32 %v790_v29, 16  ;;  %v858_v57 = vshrl.u32 %v788_v40, 16  ;;  %v12093_v21 = vpop.permute.xlu0 %1384  ;;  %v1470_v38 = vld [vmem:[#allocation2 + $0xac] sm:$0xf] }
  0xc4   : > { %v2905_v55 = vrot.slane %v2903_v46, 5  ;;  %1429 = vst.msk [vmem:[#allocation3] sm:$0xff] %vm1428_vm13, %v12047_v41  ;;  %1942 = vrot.lane.b32.xlu0 %v10375_v37, %s11561_s22  ;;  %v2911_v63 = vrot.slane %v2909_v50, 5  ;;  %v2915_v3 = vrot.slane %v2913_v51, 4  ;;  %v863_v5 = vshrl.u32 %v789_v48, 16  ;;  %v610_v51 = vld [vmem:[%s11721_s20 + $0x90] sm:$0xff] }
  0xc5   : > { %v874_v4 = vrot.slane %v872_v52, 7  ;;  %v2216_v7 = vsel %vm11813_vm11, %v2208_v39, %v2215_v54  ;;  %v10321_v10 = vrot.slane %v858_v57, 11  ;;  %v866_v11 = vshll.u32 %v789_v48, 16  ;;  %v792_v41 = vld [vmem:[#allocation2 + $0x30] sm:$0xf]  ;;  %v12107_v57 = vpop.permute.xlu1 %2441 }
  0xc6   : > { %v2906_v8 = vor.u32 %v2905_v55, %v2902_v44  ;;  %v10407_v12 = vcombine.low %v2207_v49, %v2216_v7  ;;  %v2916_v13 = vor.u32 %v2915_v3, %v2911_v63  ;;  %v865_v58 = vrot.slane %v863_v5, 7 }
  0xc7   : > { %v877_v15 = vor.u32 %v875_v56, %v874_v4  ;;  %v2706_v16 = vld [vmem:[#allocation2 + $0xb0] sm:$0x1]  ;;  %v512_v18 = vsel %vm11741_vm5, 0, %v511_v59  ;;  %v10911_v22 = vpack.c.bf16 %v608_v61, %v608_v61  ;;  %v10912_v23 = vpack.c.bf16 %v609_v6, %v609_v6  ;;  %v611_v59 = vld [vmem:[%s11721_s20 + $0x98] sm:$0xff]  ;;  %v12112_v4 = vpop.permute.xlu0 %3679 }
  0xc8   : > { %v2907_v17 = vrot.slane %v2906_v8, 4  ;;  %2455 = vrot.lane.b32.xlu1 %v10407_v12, %s11558_s25  ;;  %2632 = vrot.lane.b32.xlu0 %v11226_v62, %s11556_s17  ;;  %v2917_v26 = vrot.slane %v2916_v13, 4  ;;  %v2919_v27 = vshll.u32 %v2706_v16, 16  ;;  %v868_v60 = vor.u32 %v866_v11, %v865_v58  ;;  %513 = vst [vmem:[#allocation2 + $0xb8] sm:$0x8] %v512_v18 }
  0xc9   : > { %v870_v28 = vrot.slane %v865_v58, 4  ;;  %769 = vst.msk [vmem:[#allocation2 + $0xbc] sm:$0xf] %vm462_vm0, %v10911_v22  ;;  %770 = vst.msk [vmem:[#allocation2 + $0xc0] sm:$0xf] %vm462_vm0, %v10912_v23  ;;  %v880_v31 = vshrl.u32 %v791_v14, 16  ;;  %v10913_v11 = vpack.c.bf16 %v610_v51, %v610_v51 }
  0xca   : > { %v2912_v29 = vsel %vm11801_vm10, %v2907_v17, %v2911_v63  ;;  %v885_v32 = vshrl.u32 %v792_v41, 16  ;;  %v888_v30 = vshll.u32 %v792_v41, 16  ;;  %v2921_v34 = vrot.slane %v2919_v27, 5  ;;  %v1471_v48 = vld [vmem:[#allocation2 + $0xb0] sm:$0x1] }
  0xcb   : > { %v869_v35 = vsel %vm11813_vm11, %v10321_v10, %v868_v60  ;;  %v878_v36 = vsel %vm11813_vm11, %v870_v28, %v877_v15  ;;  %v894_v37 = vshrl.u32 %v793_v25, 16  ;;  %v10322_v40 = vrot.slane %v880_v31, 11  ;;  %771 = vst.msk [vmem:[#allocation2 + $0xd0] sm:$0xf] %vm462_vm0, %v10913_v11  ;;  %v565_v60 = vld [vmem:[#allocation2 + $0xc4] sm:$0x1] }
  0xcc   : > { %v10337_v39 = vcombine.low %v869_v35, %v878_v36  ;;  %v887_v42 = vrot.slane %v885_v32, 7  ;;  %v897_v43 = vshll.u32 %v793_v25, 16  ;;  %v2922_v44 = vsel %vm11801_vm10, %v2917_v26, %v2921_v34 }
  0xcd   : > { %v896_v46 = vrot.slane %v894_v37, 7  ;;  %v1689_v49 = vshrl.u32 %v1469_v33, 16  ;;  %v1692_v50 = vshll.u32 %v1469_v33, 16  ;;  %v10439_v52 = vcombine.low %v2912_v29, %v2922_v44  ;;  %v12122_v33 = vpop.permute.xlu1 %3677 }
  0xce   : > { %1253 = vst.msk [vmem:[#allocation3 + $0x10] sm:$0xff] %vm1251_vm12, %v10337_v39  ;;  %v890_v54 = vor.u32 %v888_v30, %v887_v42  ;;  %v892_v55 = vrot.slane %v887_v42, 4  ;;  %v1698_v56 = vshll.u32 %v1470_v38, 16  ;;  %v1702_v3 = vshrl.u32 %v1470_v38, 16 }
  0xcf   : > { %1430 = vst.msk [vmem:[#allocation3 + $0x10] sm:$0xff] %vm1428_vm13, %v12072_v47  ;;  %v899_v61 = vor.u32 %v897_v43, %v896_v46  ;;  %v1691_v62 = vrot.slane %v1689_v49, 4  ;;  %v1694_v63 = vrot.slane %v1692_v50, 5  ;;  %3177 = vrot.lane.b32.xlu1 %v10439_v52, %s11560_s15  ;;  %v3250_v5 = vld [vmem:[#allocation2 + $0xb8] sm:$0x8]  ;;  %v1708_v8 = vshll.u32 %v1471_v48, 16  ;;  %v12127_v39 = vpop.permute.xlu0 %2445 }
  0xd0   : > { %v891_v6 = vsel %vm11813_vm11, %v10322_v40, %v890_v54  ;;  %v1700_v7 = vrot.slane %v1698_v56, 5  ;;  %v2017_v10 = vld [vmem:[#allocation2 + $0xb8] sm:$0x8]  ;;  %v3251_v12 = vld [vmem:[#allocation2 + $0xbc] sm:$0xf]  ;;  %v3432_v15 = vshrl.u32 %v3250_v5, 16  ;;  %v10914_v41 = vpack.c.bf16 %v611_v59, %v611_v59 }
  0xd1   : > { %v3252_v13 = vld [vmem:[#allocation2 + $0xc0] sm:$0xf]  ;;  %v900_v58 = vsel %vm11813_vm11, %v892_v55, %v899_v61  ;;  %v1695_v14 = vor.u32 %v1694_v63, %v1691_v62  ;;  %v3437_v16 = vshrl.u32 %v3251_v12, 16  ;;  %v3440_v17 = vshll.u32 %v3251_v12, 16  ;;  %v2018_v32 = vld [vmem:[#allocation2 + $0xbc] sm:$0xf]  ;;  %v2444_v12 = vpop.permute.xlu1 %2443 }
  0xd2   : > { %v11227_v47 = vld [vmem:[#allocation2 + $0xbc] sm:$0xff]   ;;  %v3446_v18 = vshrl.u32 %v3252_v13, 16  ;;  %v3449_v22 = vshll.u32 %v3252_v13, 16  ;;  %v10455_v23 = vrot.slane %v3432_v15, 11  ;;  %v10338_v25 = vcombine.low %v891_v6, %v900_v58  ;;  %772 = vst.msk [vmem:[#allocation2 + $0xd4] sm:$0xf] %vm462_vm0, %v10914_v41 }
  0xd3   : > { %v1696_v26 = vrot.slane %v1695_v14, 4  ;;  %v1704_v27 = vrot.slane %v1702_v3, 4  ;;  %v3439_v28 = vrot.slane %v3437_v16, 7  ;;  %3868 = vrot.lane.b32.xlu1 %v11227_v47, %s11557_s23  ;;  %v1710_v31 = vrot.slane %v1708_v8, 5  ;;  %v2019_v36 = vld [vmem:[#allocation2 + $0xc0] sm:$0xf] }
  0xd4   : > { %v3448_v29 = vrot.slane %v3446_v18, 7  ;;  %v2218_v30 = vshrl.u32 %v2017_v10, 16  ;;  %1254 = vst.msk [vmem:[#allocation3 + $0x20] sm:$0xff] %vm1251_vm12, %v10338_v25  ;;  %v2223_v37 = vshrl.u32 %v2018_v32, 16  ;;  %v2226_v38 = vshll.u32 %v2018_v32, 16  ;;  %v11229_v13 = vld [vmem:[#allocation2 + $0xa8] sm:$0xff]  }
  0xd5   : > { %v1701_v34 = vsel %vm11801_vm10, %v1696_v26, %v1700_v7  ;;  %v1705_v35 = vor.u32 %v1704_v27, %v1700_v7  ;;  %v3442_v40 = vor.u32 %v3440_v17, %v3439_v28  ;;  %v3444_v42 = vrot.slane %v3439_v28, 4  ;;  %1431 = vst.msk [vmem:[#allocation3 + $0x20] sm:$0xff] %vm1428_vm13, %v12093_v21  ;;  %v2707_v46 = vld [vmem:[#allocation2 + $0xbc] sm:$0xf]  ;;  %v514_v48 = vld [vmem:[#allocation2 + $0xcc] sm:$0x8] }
  0xd6   : > { %v3451_v43 = vor.u32 %v3449_v22, %v3448_v29  ;;  %v10392_v44 = vrot.slane %v2218_v30, 11  ;;  %v2225_v50 = vrot.slane %v2223_v37, 7  ;;  %v2232_v51 = vshrl.u32 %v2019_v36, 16  ;;  %v2708_v54 = vld [vmem:[#allocation2 + $0xc0] sm:$0xf] }
  0xd7   : > { %v1706_v49 = vrot.slane %v1705_v35, 4  ;;  %v2235_v52 = vshll.u32 %v2019_v36, 16  ;;  %v3443_v55 = vsel %vm11813_vm11, %v10455_v23, %v3442_v40  ;;  %v566_v59 = vsel %vm11746_vm6, 0, %v565_v60  ;;  %v3254_v5 = vld [vmem:[#allocation2 + $0xd0] sm:$0xf]  ;;  %v12144_v41 = vpop.permute.xlu0 %3163  ;;  %v11231_v17 = vld [vmem:[#allocation2 + $0xbc] sm:$0xff]  }
  0xd8   : > { %v3452_v56 = vsel %vm11813_vm11, %v3444_v42, %v3451_v43  ;;  %v2924_v61 = vshrl.u32 %v2707_v46, 16  ;;  %v2228_v63 = vor.u32 %v2226_v38, %v2225_v50  ;;  %v2230_v3 = vrot.slane %v2225_v50, 4  ;;  %567 = vst [vmem:[#allocation2 + $0xc4] sm:$0x1] %v566_v59  ;;  %v1472_v32 = vld [vmem:[#allocation2 + $0xbc] sm:$0xf] }
  0xd9   : > { %v10471_v62 = vcombine.low %v3443_v55, %v3452_v56  ;;  %v1711_v21 = vsel %vm11801_vm10, %v1706_v49, %v1710_v31  ;;  %v2234_v7 = vrot.slane %v2232_v51, 7  ;;  %v2927_v10 = vshll.u32 %v2707_v46, 16  ;;  %v3255_v11 = vld [vmem:[#allocation2 + $0xd4] sm:$0xf]  ;;  %v1473_v30 = vld [vmem:[#allocation2 + $0xc0] sm:$0xf] }
  0xda   : > { %v10376_v6 = vcombine.low %v1701_v34, %v1711_v21  ;;  %v2926_v8 = vrot.slane %v2924_v61, 4  ;;  %v2229_v15 = vsel %vm11813_vm11, %v10392_v44, %v2228_v63  ;;  %v2933_v47 = vshll.u32 %v2708_v54, 16  ;;  %v2022_v21 = vld [vmem:[#allocation2 + $0xd4] sm:$0xf] }
  0xdb   : > { %3691 = vrot.lane.b32.xlu0 %v10471_v62, %s11559_s14  ;;  %v2937_v58 = vshrl.u32 %v2708_v54, 16  ;;  %v515_v14 = vsel %vm11741_vm5, 0, %v514_v48  ;;  %v2237_v16 = vor.u32 %v2235_v52, %v2234_v7  ;;  %v2929_v18 = vrot.slane %v2927_v10, 5  ;;  %v3166_v43 = vpop.permute.xlu1 %3165  ;;  %v2021_v54 = vld [vmem:[#allocation2 + $0xd0] sm:$0xf] }
  0xdc   : > { %1944 = vrot.lane.b32.xlu1 %v10376_v6, %s11561_s22  ;;  %516 = vst [vmem:[#allocation2 + $0xcc] sm:$0x8] %v515_v14  ;;  %v3459_v22 = vshrl.u32 %v3254_v5, 16  ;;  %v3462_v23 = vshll.u32 %v3254_v5, 16  ;;  %v2935_v25 = vrot.slane %v2933_v47, 5  ;;  %v3468_v27 = vshrl.u32 %v3255_v11, 16 }
  0xdd   : > { %v2939_v26 = vrot.slane %v2937_v58, 4  ;;  %v3471_v60 = vshll.u32 %v3255_v11, 16  ;;  %v2238_v28 = vsel %vm11813_vm11, %v2230_v3, %v2237_v16  ;;  %v2930_v29 = vor.u32 %v2929_v18, %v2926_v8  ;;  %v568_v8 = vld [vmem:[#allocation2 + $0xd8] sm:$0x1] }
  0xde   : > { %v3461_v31 = vrot.slane %v3459_v22, 7  ;;  %vm1976_vm14 = vcmask 392448   ;;  %v10408_v34 = vcombine.low %v2229_v15, %v2238_v28  ;;  %v3470_v36 = vrot.slane %v3468_v27, 7  ;;  %v2710_v15 = vld [vmem:[#allocation2 + $0xd0] sm:$0xf] }
  0xdf   : > { %1396 = vrot.lane.b32.xlu0 %v11229_v13, %s11555_s28  ;;  %v2940_v35 = vor.u32 %v2939_v26, %v2935_v25  ;;  %vm2489_vm15 = vcmask 523648   ;;  %v2709_v37 = vld [vmem:[#allocation2 + $0xc4] sm:$0x1]  ;;  %v2931_v38 = vrot.slane %v2930_v29, 4  ;;  %vm2666_vm1 = vcmask 654848   ;;  %v11234_v26 = vld [vmem:[#allocation2 + $0xd0] sm:$0xff]  }
  0xe0   : > { %2634 = vrot.lane.b32.xlu1 %v11231_v17, %s11556_s17  ;;  %v3464_v40 = vor.u32 %v3462_v23, %v3461_v31  ;;  %v3466_v42 = vrot.slane %v3461_v31, 4  ;;  %v2943_v46 = vshll.u32 %v2709_v37, 16  ;;  %v3473_v48 = vor.u32 %v3471_v60, %v3470_v36  ;;  %v1931_v49 = vpop.permute.xlu0 %1930  ;;  %v1474_v50 = vld [vmem:[#allocation2 + $0xc4] sm:$0x1]  ;;  %v2711_v28 = vld [vmem:[#allocation2 + $0xd4] sm:$0xf] }
  0xe1   : > { %v2941_v44 = vrot.slane %v2940_v35, 4  ;;  %vm3211_vm2 = vcmask 786048   ;;  %v2936_v51 = vsel %vm11801_vm10, %v2931_v38, %v2935_v25  ;;  %vm3725_vm3 = vcmask 917248   ;;  %1978 = vst.msk [vmem:[#allocation3 + $0x10] sm:$0xff] %vm1976_vm14, %v1931_v49  ;;  %v11235_v38 = vld [vmem:[#allocation2 + $0xbc] sm:$0xff]  }
  0xe2   : > { %vm3902_vm4 = vcmask 1048448   ;;  %v1713_v52 = vshrl.u32 %v1472_v32, 16  ;;  %v2945_v55 = vrot.slane %v2943_v46, 5  ;;  %v3474_v59 = vsel %vm11813_vm11, %v3466_v42, %v3473_v48  ;;  %2491 = vst.msk [vmem:[#allocation3 + $0x10] sm:$0xff] %vm2489_vm15, %v2444_v12  ;;  %v517_v46 = vld [vmem:[#allocation2 + $0xe0] sm:$0x8] }
  0xe3   : > { %2457 = vrot.lane.b32.xlu0 %v10408_v34, %s11558_s25  ;;  %v3253_v56 = vld [vmem:[#allocation2 + $0xcc] sm:$0x8]  ;;  %v1716_v61 = vshll.u32 %v1472_v32, 16  ;;  %v1722_v62 = vshll.u32 %v1473_v30, 16  ;;  %2668 = vst.msk [vmem:[#allocation3 + $0x10] sm:$0xff] %vm2666_vm1, %v12076_v53  ;;  %v1726_v5 = vshrl.u32 %v1473_v30, 16 }
  0xe4   : > { %v3454_v63 = vshrl.u32 %v3253_v56, 16  ;;  %v1715_v3 = vrot.slane %v1713_v52, 4  ;;  %v1732_v6 = vshll.u32 %v1474_v50, 16  ;;  %v2020_v7 = vld [vmem:[#allocation2 + $0xcc] sm:$0x8]  ;;  %v2946_v10 = vsel %vm11801_vm10, %v2941_v44, %v2945_v55  ;;  %3213 = vst.msk [vmem:[#allocation3 + $0x10] sm:$0xff] %vm3211_vm2, %v3166_v43 }
  0xe5   : > { %v1718_v11 = vrot.slane %v1716_v61, 5  ;;  %v1724_v13 = vrot.slane %v1722_v62, 5  ;;  %v2240_v12 = vshrl.u32 %v2020_v7, 16  ;;  %v10440_v47 = vcombine.low %v2936_v51, %v2946_v10  ;;  %3727 = vst.msk [vmem:[#allocation3 + $0x10] sm:$0xff] %vm3725_vm3, %v12112_v4  ;;  %v1933_v16 = vpop.permute.xlu1 %1932  ;;  %v612_v48 = vld [vmem:[%s11721_s20 + $0xa0] sm:$0xff] }
  0xe6   : > { %v10456_v58 = vrot.slane %v3454_v63, 11  ;;  %v1728_v53 = vrot.slane %v1726_v5, 4  ;;  %v1734_v14 = vrot.slane %v1732_v6, 5  ;;  %3904 = vst.msk [vmem:[#allocation3 + $0x10] sm:$0xff] %vm3902_vm4, %v12089_v24  ;;  %v2245_v22 = vshrl.u32 %v2021_v54, 16 }
  0xe7   : > { %v1719_v17 = vor.u32 %v1718_v11, %v1715_v3  ;;  %v10393_v18 = vrot.slane %v2240_v12, 11  ;;  %v2248_v23 = vshll.u32 %v2021_v54, 16  ;;  %1979 = vst.msk [vmem:[#allocation3 + $0x20] sm:$0xff] %vm1976_vm14, %v1933_v16  ;;  %3179 = vrot.lane.b32.xlu0 %v10440_v47, %s11560_s15  ;;  %v2254_v4 = vshrl.u32 %v2022_v21, 16  ;;  %v613_v54 = vld [vmem:[%s11721_s20 + $0xa8] sm:$0xff] }
  0xe8   : > { %v3465_v25 = vsel %vm11813_vm11, %v10456_v58, %v3464_v40  ;;  %v1729_v27 = vor.u32 %v1728_v53, %v1724_v13  ;;  %v2257_v60 = vshll.u32 %v2022_v21, 16  ;;  %2492 = vst.msk [vmem:[#allocation3 + $0x20] sm:$0xff] %vm2489_vm15, %v12127_v39  ;;  %v2247_v31 = vrot.slane %v2245_v22, 7  ;;  %v1475_v55 = vld [vmem:[#allocation2 + $0xd0] sm:$0xf] }
  0xe9   : > { %v10472_v24 = vcombine.low %v3465_v25, %v3474_v59  ;;  %v1720_v29 = vrot.slane %v1719_v17, 4  ;;  %v569_v32 = vsel %vm11746_vm6, 0, %v568_v8  ;;  %v2256_v34 = vrot.slane %v2254_v4, 7  ;;  %v2623_v37 = vpop.permute.xlu1 %2622  ;;  %v1476_v21 = vld [vmem:[#allocation2 + $0xd4] sm:$0xf]  ;;  %v614_v8 = vld [vmem:[%s11721_s20 + $0xb0] sm:$0xff] }
  0xea   : > { %v1730_v30 = vrot.slane %v1729_v27, 4  ;;  %570 = vst [vmem:[#allocation2 + $0xd8] sm:$0x1] %v569_v32  ;;  %v2948_v35 = vshrl.u32 %v2710_v15, 16  ;;  %v2951_v36 = vshll.u32 %v2710_v15, 16  ;;  %v2250_v40 = vor.u32 %v2248_v23, %v2247_v31  ;;  %v1929_v43 = vpop.permute.xlu0 %1928  ;;  %2669 = vst.msk [vmem:[#allocation3 + $0x20] sm:$0xff] %vm2666_vm1, %v2623_v37 }
  0xeb   : > { %3693 = vrot.lane.b32.xlu1 %v10472_v24, %s11559_s14  ;;  %v1725_v39 = vsel %vm11801_vm10, %v1720_v29, %v1724_v13  ;;  %v2252_v42 = vrot.slane %v2247_v31, 4  ;;  %v2957_v44 = vshll.u32 %v2711_v28, 16  ;;  %3870 = vrot.lane.b32.xlu0 %v11234_v26, %s11557_s23  ;;  %v2259_v50 = vor.u32 %v2257_v60, %v2256_v34  ;;  %1977 = vst.msk [vmem:[#allocation3] sm:$0xff] %vm1976_vm14, %v1929_v43  ;;  %v3919_v7 = vld [vmem:[#allocation2 + $0x30] sm:$0xf]  ;;  %v615_v37 = vld [vmem:[%s11721_s20 + $0xb8] sm:$0xff] }
  0xec   : > { %v1735_v49 = vsel %vm11801_vm10, %v1730_v30, %v1734_v14  ;;  %v2950_v51 = vrot.slane %v2948_v35, 4  ;;  %v2953_v52 = vrot.slane %v2951_v36, 5  ;;  %v2251_v59 = vsel %vm11813_vm11, %v10393_v18, %v2250_v40  ;;  %2490 = vst.msk [vmem:[#allocation3] sm:$0xff] %vm2489_vm15, %v12107_v57  ;;  %v12201_v15 = vld [vmem:[#allocation2 + $0x34] sm:$0xf] }
  0xed   : > { %v10377_v56 = vcombine.low %v1725_v39, %v1735_v49  ;;  %v12189_v61 = vrot.slane %v2957_v44, 5  ;;  %v2961_v62 = vshrl.u32 %v2711_v28, 16  ;;  %v2260_v63 = vsel %vm11813_vm11, %v2252_v42, %v2259_v50  ;;  %2667 = vst.msk [vmem:[#allocation3] sm:$0xff] %vm2666_vm1, %v12055_v45  ;;  %v3682_v10 = vpop.permute.xlu1 %3681  ;;  %v11238_v47 = vld [vmem:[#allocation2 + $0xd0] sm:$0xff]  }
  0xee   : > { %v2954_v3 = vor.u32 %v2953_v52, %v2950_v51  ;;  %v518_v5 = vsel %vm11741_vm5, 0, %v517_v46  ;;  %v10915_v6 = vpack.c.bf16 %v612_v48, %v612_v48  ;;  %v10409_v57 = vcombine.low %v2251_v59, %v2260_v63  ;;  %3212 = vst.msk [vmem:[#allocation3] sm:$0xff] %vm3211_vm2, %v12144_v41  ;;  %v3168_v45 = vpop.permute.xlu0 %3167 }
  0xef   : > { %1398 = vrot.lane.b32.xlu1 %v11235_v38, %s11555_s28  ;;  %v2963_v11 = vrot.slane %v2961_v62, 4  ;;  %519 = vst [vmem:[#allocation2 + $0xe0] sm:$0x8] %v518_v5  ;;  %v10916_v13 = vpack.c.bf16 %v613_v54, %v613_v54  ;;  %v1737_v12 = vshrl.u32 %v1475_v55, 16  ;;  %1946 = vrot.lane.b32.xlu0 %v10377_v56, %s11561_s22  ;;  %3726 = vst.msk [vmem:[#allocation3] sm:$0xff] %vm3725_vm3, %v12122_v33  ;;  %v1740_v53 = vshll.u32 %v1475_v55, 16 }
  0xf0   : > { %v2955_v58 = vrot.slane %v2954_v3, 4  ;;  %773 = vst.msk [vmem:[#allocation2 + $0xe4] sm:$0xf] %vm462_vm0, %v10915_v6  ;;  %v1746_v14 = vshll.u32 %v1476_v21, 16  ;;  %v1750_v16 = vshrl.u32 %v1476_v21, 16  ;;  %v3968_v33 = vshrl.u32 %v3919_v7, 16 }
  0xf1   : > { %3214 = vst.msk [vmem:[#allocation3 + $0x20] sm:$0xff] %vm3211_vm2, %v3168_v45  ;;  %v2712_v41 = vld [vmem:[#allocation2 + $0xd8] sm:$0x1]  ;;  %v2964_v17 = vor.u32 %v2963_v11, %v12189_v61  ;;  %v1739_v22 = vrot.slane %v1737_v12, 4  ;;  %v10917_v23 = vpack.c.bf16 %v614_v8, %v614_v8  ;;  %v1742_v27 = vrot.slane %v1740_v53, 5  ;;  %v12216_v60 = vpop.permute.xlu1 %1386 }
  0xf2   : > { %3903 = vst.msk [vmem:[#allocation3] sm:$0xff] %vm3902_vm4, %v12060_v19  ;;  %v1477_v18 = vld [vmem:[#allocation2 + $0xd8] sm:$0x1]  ;;  %v2960_v25 = vsel %vm11801_vm10, %v2955_v58, %v12189_v61  ;;  %v2967_v26 = vshll.u32 %v2712_v41, 16  ;;  %v1748_v4 = vrot.slane %v1746_v14, 5  ;;  %v1752_v24 = vrot.slane %v1750_v16, 4  ;;  %v3859_v32 = vpop.permute.xlu0 %3858 }
  0xf3   : > { %774 = vst.msk [vmem:[#allocation2 + $0xe8] sm:$0xf] %vm462_vm0, %v10916_v13  ;;  %v3921_v19 = vld [vmem:[#allocation2 + $0x38] sm:$0x1]  ;;  %2459 = vrot.lane.b32.xlu1 %v10409_v57, %s11558_s25  ;;  %v2965_v28 = vrot.slane %v2964_v17, 4  ;;  %v1756_v29 = vshll.u32 %v1477_v18, 16  ;;  %2636 = vrot.lane.b32.xlu0 %v11238_v47, %s11556_s17  ;;  %v1743_v34 = vor.u32 %v1742_v27, %v1739_v22  ;;  %v10918_v56 = vpack.c.bf16 %v615_v37, %v615_v37 }
  0xf4   : > { %3728 = vst.msk [vmem:[#allocation3 + $0x20] sm:$0xff] %vm3725_vm3, %v3682_v10  ;;  %v3970_v31 = vrot.slane %v3968_v33, 4  ;;  %v2969_v30 = vrot.slane %v2967_v26, 5  ;;  %v3971_v35 = vshll.u32 %v3919_v7, 16  ;;  %v3977_v36 = vshll.u32 %v12201_v15, 16 }
  0xf5   : > { %775 = vst.msk [vmem:[#allocation2 + $0xf8] sm:$0xf] %vm462_vm0, %v10917_v23  ;;  %v1753_v38 = vor.u32 %v1752_v24, %v1748_v4  ;;  %v1758_v39 = vrot.slane %v1756_v29, 5  ;;  %v3981_v40 = vshrl.u32 %v12201_v15, 16  ;;  %v3987_v42 = vshll.u32 %v3921_v19, 16  ;;  %v12229_v50 = vpop.permute.xlu1 %2447 }
  0xf6   : > { %3905 = vst.msk [vmem:[#allocation3 + $0x20] sm:$0xff] %vm3902_vm4, %v3859_v32  ;;  %v2970_v43 = vsel %vm11801_vm10, %v2965_v28, %v2969_v30  ;;  %v3256_v44 = vld [vmem:[#allocation2 + $0xe0] sm:$0x8]  ;;  %v1744_v46 = vrot.slane %v1743_v34, 4  ;;  %v3973_v48 = vrot.slane %v3971_v35, 5  ;;  %v12227_v49 = vrot.slane %v3977_v36, 5  ;;  %v12233_v3 = vpop.permute.xlu0 %1934 }
  0xf7   : > { %v10441_v51 = vcombine.low %v2960_v25, %v2970_v43  ;;  %v3257_v52 = vld [vmem:[#allocation2 + $0xe4] sm:$0xf]  ;;  %v3476_v54 = vshrl.u32 %v3256_v44, 16  ;;  %v1754_v55 = vrot.slane %v1753_v38, 4  ;;  %v2023_v57 = vld [vmem:[#allocation2 + $0xe0] sm:$0x8] }
  0xf8   : > { %v3481_v61 = vshrl.u32 %v3257_v52, 16  ;;  %v3484_v62 = vshll.u32 %v3257_v52, 16  ;;  %v1749_v21 = vsel %vm11801_vm10, %v1744_v46, %v1748_v4  ;;  %v3974_v63 = vor.u32 %v3973_v48, %v3970_v31  ;;  %776 = vst.msk [vmem:[#allocation2 + $0xfc] sm:$0xf] %vm462_vm0, %v10918_v56  ;;  %v2024_v45 = vld [vmem:[#allocation2 + $0xe4] sm:$0xf] }
  0xf9   : > { %3181 = vrot.lane.b32.xlu1 %v10441_v51, %s11560_s15  ;;  %v10457_v5 = vrot.slane %v3476_v54, 11  ;;  %v1759_v10 = vsel %vm11801_vm10, %v1754_v55, %v1758_v39  ;;  %v3983_v15 = vrot.slane %v3981_v40, 4  ;;  %v571_v47 = vld [vmem:[#allocation2 + $0xec] sm:$0x1]  ;;  %v3989_v53 = vrot.slane %v3987_v42, 5 }
  0xfa   : > { %v3258_v59 = vld [vmem:[#allocation2 + $0xe8] sm:$0xf]  ;;  %v3483_v11 = vrot.slane %v3481_v61, 7  ;;  %v10378_v13 = vcombine.low %v1749_v21, %v1759_v10  ;;  %v3975_v12 = vrot.slane %v3974_v63, 4  ;;  %v2262_v16 = vshrl.u32 %v2023_v57, 16  ;;  %v12239_v17 = vpop.permute.xlu1 %3169  ;;  %v12248_v34 = vpop.permute.xlu0 %2624 }
  0xfb   : > { %v3490_v6 = vshrl.u32 %v3258_v59, 16  ;;  %v3493_v7 = vshll.u32 %v3258_v59, 16  ;;  %v11240_v8 = vld [vmem:[#allocation2 + $0xe4] sm:$0xff]   ;;  %v2267_v41 = vshrl.u32 %v2024_v45, 16  ;;  %v3984_v23 = vor.u32 %v3983_v15, %v12227_v49  ;;  %v520_v28 = vld [vmem:[#allocation2 + $0xf4] sm:$0x8] }
  0xfc   : > { %v2025_v14 = vld [vmem:[#allocation2 + $0xe8] sm:$0xf]  ;;  %v3486_v18 = vor.u32 %v3484_v62, %v3483_v11  ;;  %v3488_v22 = vrot.slane %v3483_v11, 4  ;;  %v3980_v33 = vsel %vm11801_vm10, %v3975_v12, %v12227_v49  ;;  %v10394_v26 = vrot.slane %v2262_v16, 11  ;;  %v2713_v19 = vld [vmem:[#allocation2 + $0xe4] sm:$0xf] }
  0xfd   : > { %v3492_v58 = vrot.slane %v3490_v6, 7  ;;  %3872 = vrot.lane.b32.xlu1 %v11240_v8, %s11557_s23  ;;  %v2269_v27 = vrot.slane %v2267_v41, 7  ;;  %v2270_v4 = vshll.u32 %v2024_v45, 16  ;;  %v3985_v29 = vrot.slane %v3984_v23, 4  ;;  %v2714_v30 = vld [vmem:[#allocation2 + $0xe8] sm:$0xf] }
  0xfe   : > { %v3487_v24 = vsel %vm11813_vm11, %v10457_v5, %v3486_v18  ;;  %v2276_v31 = vshrl.u32 %v2025_v14, 16  ;;  %v2279_v32 = vshll.u32 %v2025_v14, 16  ;;  %v11244_v38 = vld [vmem:[#allocation2 + $0xe4] sm:$0xff]   ;;  %v572_v39 = vsel %vm11746_vm6, 0, %v571_v47  ;;  %v12254_v40 = vpop.permute.xlu1 %3860  ;;  %v3260_v48 = vld [vmem:[#allocation2 + $0xf8] sm:$0xf] }
  0xff   : > { %v3495_v25 = vor.u32 %v3493_v7, %v3492_v58  ;;  %v2272_v36 = vor.u32 %v2270_v4, %v2269_v27  ;;  %v2274_v37 = vrot.slane %v2269_v27, 4  ;;  %v3990_v43 = vsel %vm11801_vm10, %v3985_v29, %v3989_v53  ;;  %573 = vst [vmem:[#allocation2 + $0xec] sm:$0x1] %v572_v39  ;;  %v3922_v49 = vld [vmem:[#allocation2 + $0x44] sm:$0xf]  ;;  %v11242_v59 = vld [vmem:[#allocation2 + $0xd0] sm:$0xff]  }
 0x100   : > { %v2278_v44 = vrot.slane %v2276_v31, 7  ;;  %v2972_v46 = vshrl.u32 %v2713_v19, 16  ;;  %v10496_v51 = vcombine.low %v3980_v33, %v3990_v43  ;;  %v2975_v54 = vshll.u32 %v2713_v19, 16  ;;  %v3261_v56 = vld [vmem:[#allocation2 + $0xfc] sm:$0xf] }
 0x101   : > { %v3496_v35 = vsel %vm11813_vm11, %v3488_v22, %v3495_v25  ;;  %1948 = vrot.lane.b32.xlu1 %v10378_v13, %s11561_s22  ;;  %v2273_v52 = vsel %vm11813_vm11, %v10394_v26, %v2272_v36  ;;  %v2981_v55 = vshll.u32 %v2714_v30, 16  ;;  %v2985_v21 = vshrl.u32 %v2714_v30, 16  ;;  %v3923_v10 = vld [vmem:[#allocation2 + $0x48] sm:$0xf]  ;;  %v3924_v14 = vld [vmem:[#allocation2 + $0x4c] sm:$0x1] }
 0x102   : > { %v10473_v42 = vcombine.low %v3487_v24, %v3496_v35  ;;  %v2281_v61 = vor.u32 %v2279_v32, %v2278_v44  ;;  %v2974_v62 = vrot.slane %v2972_v46, 4  ;;  %v521_v63 = vsel %vm11741_vm5, 0, %v520_v28  ;;  %4415 = vst.msk [vmem:[#allocation3 + $0x8] sm:$0xff] %vm1251_vm12, %v10496_v51  ;;  %v12269_v45 = vpop.permute.xlu1 %1936  ;;  %v794_v41 = vld [vmem:[#allocation2 + $0x40] sm:$0x8]  ;;  %v4431_v35 = vld [vmem:[#allocation3] sm:$0xff] }
 0x103   : > { %v2977_v5 = vrot.slane %v2975_v54, 5  ;;  %v2983_v6 = vrot.slane %v2981_v55, 5  ;;  %522 = vst [vmem:[#allocation2 + $0xf4] sm:$0x8] %v521_v63  ;;  %v3503_v7 = vshrl.u32 %v3260_v48, 16  ;;  %v3506_v8 = vshll.u32 %v3260_v48, 16  ;;  %v12267_v15 = vpop.permute.xlu0 %3683 }
 0x104   : > { %3695 = vrot.lane.b32.xlu0 %v10473_v42, %s11559_s14  ;;  %v2282_v57 = vsel %vm11813_vm11, %v2274_v37, %v2281_v61  ;;  %v2987_v11 = vrot.slane %v2985_v21, 4  ;;  %v3512_v13 = vshrl.u32 %v3261_v56, 16  ;;  %v3515_v12 = vshll.u32 %v3261_v56, 16  ;;  %v795_v32 = vld [vmem:[#allocation2 + $0x44] sm:$0xf] }
 0x105   : > { %v10410_v47 = vcombine.low %v2273_v52, %v2282_v57  ;;  %2638 = vrot.lane.b32.xlu1 %v11244_v38, %s11556_s17  ;;  %v2978_v58 = vor.u32 %v2977_v5, %v2974_v62  ;;  %v3505_v53 = vrot.slane %v3503_v7, 7  ;;  %v3992_v16 = vshrl.u32 %v3922_v49, 16  ;;  %v796_v42 = vld [vmem:[#allocation2 + $0x48] sm:$0xf]  ;;  %v1478_v61 = vld [vmem:[#allocation2 + $0xe4] sm:$0xf] }
 0x106   : > { %v2988_v18 = vor.u32 %v2987_v11, %v2983_v6  ;;  %v3514_v22 = vrot.slane %v3512_v13, 7  ;;  %v3995_v33 = vshll.u32 %v3922_v49, 16  ;;  %v4001_v23 = vshll.u32 %v3923_v10, 16  ;;  %v2715_v25 = vld [vmem:[#allocation2 + $0xec] sm:$0x1]  ;;  %v12280_v52 = vpop.permute.xlu1 %2626  ;;  %v11245_v13 = vld [vmem:[#allocation2 + $0xf8] sm:$0xff]  }
 0x107   : > { %v2979_v26 = vrot.slane %v2978_v58, 4  ;;  %v3508_v27 = vor.u32 %v3506_v8, %v3505_v53  ;;  %v3510_v4 = vrot.slane %v3505_v53, 4  ;;  %v3994_v19 = vrot.slane %v3992_v16, 4  ;;  %v12273_v30 = vpop.permute.xlu0 %1388  ;;  %v1479_v11 = vld [vmem:[#allocation2 + $0xe8] sm:$0xf] }
 0x108   : > { %1400 = vrot.lane.b32.xlu0 %v11242_v59, %s11555_s28  ;;  %v2989_v28 = vrot.slane %v2988_v18, 4  ;;  %v2991_v24 = vshll.u32 %v2715_v25, 16  ;;  %v3517_v29 = vor.u32 %v3515_v12, %v3514_v22  ;;  %v3997_v31 = vrot.slane %v3995_v33, 5  ;;  %v1480_v22 = vld [vmem:[#allocation2 + $0xec] sm:$0x1] }
 0x109   : > { %v2984_v36 = vsel %vm11801_vm10, %v2979_v26, %v2983_v6  ;;  %v4003_v37 = vrot.slane %v4001_v23, 5  ;;  %v4005_v38 = vshrl.u32 %v3923_v10, 16  ;;  %v4011_v39 = vshll.u32 %v3924_v14, 16  ;;  %v4432_v43 = vld [vmem:[#allocation3 + $0x8] sm:$0xff]  ;;  %v2027_v33 = vld [vmem:[#allocation2 + $0xf8] sm:$0xf] }
 0x10a   : > { %v2993_v44 = vrot.slane %v2991_v24, 5  ;;  %v3259_v46 = vld [vmem:[#allocation2 + $0xf4] sm:$0x8]  ;;  %v3518_v48 = vsel %vm11813_vm11, %v3510_v4, %v3517_v29  ;;  %v3998_v49 = vor.u32 %v3997_v31, %v3994_v19  ;;  %v902_v51 = vshrl.u32 %v794_v41, 16  ;;  %10522 = vmatprep.mubr.msk.bf16.mxu0 %vm1251_vm12, %v4432_v43 }
 0x10b   : > { %v3498_v54 = vshrl.u32 %v3259_v46, 16  ;;  %v4007_v55 = vrot.slane %v4005_v38, 4  ;;  %v4013_v56 = vrot.slane %v4011_v39, 5  ;;  %v907_v59 = vshrl.u32 %v795_v32, 16  ;;  %4623 = vmatmul.mubr.bf16.vlgmr.msra.gmra.mrb[0].mxu0 %v4431_v35  ;;  %v12285_v6 = vpop.permute.xlu0 %2449  ;;  %v2026_v19 = vld [vmem:[#allocation2 + $0xf4] sm:$0x8] }
 0x10c   : > { %2461 = vrot.lane.b32.xlu0 %v10410_v47, %s11558_s25  ;;  %v2994_v62 = vsel %vm11801_vm10, %v2989_v28, %v2993_v44  ;;  %v3999_v21 = vrot.slane %v3998_v49, 4  ;;  %v10323_v63 = vrot.slane %v902_v51, 11  ;;  %v910_v5 = vshll.u32 %v795_v32, 16  ;;  %v2028_v46 = vld [vmem:[#allocation2 + $0xfc] sm:$0xf] }
 0x10d   : > { %v10442_v7 = vcombine.low %v2984_v36, %v2994_v62  ;;  %v10458_v8 = vrot.slane %v3498_v54, 11  ;;  %v4008_v10 = vor.u32 %v4007_v55, %v4003_v37  ;;  %v909_v57 = vrot.slane %v907_v59, 7  ;;  %v11246_v36 = vld [vmem:[#allocation2 + $0xe4] sm:$0xff]   ;;  %v2716_v59 = vld [vmem:[#allocation2 + $0xf8] sm:$0xf] }
 0x10e   : > { %v4004_v12 = vsel %vm11801_vm10, %v3999_v21, %v4003_v37  ;;  %v916_v47 = vshrl.u32 %v796_v42, 16  ;;  %v919_v58 = vshll.u32 %v796_v42, 16  ;;  %v1761_v53 = vshrl.u32 %v1478_v61, 16  ;;  %v574_v42 = vld [vmem:[#allocation2 + $0x100] sm:$0x1] }
 0x10f   : > { %v3509_v14 = vsel %vm11813_vm11, %v10458_v8, %v3508_v27  ;;  %v4009_v16 = vrot.slane %v4008_v10, 4  ;;  %v912_v41 = vor.u32 %v910_v5, %v909_v57  ;;  %v914_v18 = vrot.slane %v909_v57, 4  ;;  %v12292_v28 = vpop.permute.xlu0 %3171  ;;  %v12294_v24 = vpop.permute.xlu1 %3685  ;;  %v2717_v5 = vld [vmem:[#allocation2 + $0xfc] sm:$0xf] }
 0x110   : > { %3183 = vrot.lane.b32.xlu0 %v10442_v7, %s11560_s15  ;;  %v10474_v23 = vcombine.low %v3509_v14, %v3518_v48  ;;  %v918_v25 = vrot.slane %v916_v47, 7  ;;  %v1763_v26 = vrot.slane %v1761_v53, 4  ;;  %v1764_v4 = vshll.u32 %v1478_v61, 16  ;;  %v3925_v14 = vld [vmem:[#allocation2 + $0x58] sm:$0xf] }
 0x111   : > { %v4014_v29 = vsel %vm11801_vm10, %v4009_v16, %v4013_v56  ;;  %v913_v27 = vsel %vm11813_vm11, %v10323_v63, %v912_v41  ;;  %v1770_v31 = vshll.u32 %v1479_v11, 16  ;;  %v1774_v32 = vshrl.u32 %v1479_v11, 16 }
 0x112   : > { %3697 = vrot.lane.b32.xlu1 %v10474_v23, %s11559_s14  ;;  %v10497_v35 = vcombine.low %v4004_v12, %v4014_v29  ;;  %v921_v37 = vor.u32 %v919_v58, %v918_v25  ;;  %v1766_v38 = vrot.slane %v1764_v4, 5  ;;  %v1780_v39 = vshll.u32 %v1480_v22, 16  ;;  %v3927_v4 = vld [vmem:[#allocation2 + $0x60] sm:$0x1] }
 0x113   : > { %v1772_v43 = vrot.slane %v1770_v31, 5  ;;  %v1776_v44 = vrot.slane %v1774_v32, 4  ;;  %v2284_v48 = vshrl.u32 %v2026_v19, 16  ;;  %v2289_v49 = vshrl.u32 %v2027_v33, 16  ;;  %v12305_v7 = vpop.permute.xlu0 %3862  ;;  %v12307_v8 = vpop.permute.xlu1 %1390  ;;  %v523_v32 = vld [vmem:[#allocation2 + $0x108] sm:$0x8] }
 0x114   : > { %3874 = vrot.lane.b32.xlu0 %v11245_v13, %s11557_s23  ;;  %4416 = vst.msk [vmem:[#allocation3 + $0x18] sm:$0xff] %vm1251_vm12, %v10497_v35  ;;  %v922_v51 = vsel %vm11813_vm11, %v914_v18, %v921_v37  ;;  %v1767_v54 = vor.u32 %v1766_v38, %v1763_v26  ;;  %v1782_v55 = vrot.slane %v1780_v39, 5  ;;  %v2292_v56 = vshll.u32 %v2027_v33, 16  ;;  %v3926_v33 = vld [vmem:[#allocation2 + $0x5c] sm:$0xf]  ;;  %v616_v39 = vld [vmem:[%s11721_s20 + $0xc0] sm:$0xff] }
 0x115   : > { %v10339_v61 = vcombine.low %v913_v27, %v922_v51  ;;  %v1777_v62 = vor.u32 %v1776_v44, %v1772_v43  ;;  %v10395_v21 = vrot.slane %v2284_v48, 11  ;;  %v2291_v63 = vrot.slane %v2289_v49, 7  ;;  %v11247_v48 = vld [vmem:[#allocation2 + $0xf8] sm:$0xff]  }
 0x116   : > { %1402 = vrot.lane.b32.xlu1 %v11246_v36, %s11555_s28  ;;  %v1768_v10 = vrot.slane %v1767_v54, 4  ;;  %v2298_v57 = vshrl.u32 %v2028_v46, 16  ;;  %v2301_v11 = vshll.u32 %v2028_v46, 16  ;;  %v575_v13 = vsel %vm11746_vm6, 0, %v574_v42  ;;  %v617_v42 = vld [vmem:[%s11721_s20 + $0xc8] sm:$0xff] }
 0x117   : > { %1255 = vst.msk [vmem:[#allocation3 + $0x30] sm:$0xff] %vm1251_vm12, %v10339_v61  ;;  %v1778_v12 = vrot.slane %v1777_v62, 4  ;;  %v2294_v47 = vor.u32 %v2292_v56, %v2291_v63  ;;  %v2296_v58 = vrot.slane %v2291_v63, 4  ;;  %576 = vst [vmem:[#allocation2 + $0x100] sm:$0x1] %v575_v13  ;;  %v2996_v53 = vshrl.u32 %v2716_v59, 16  ;;  %v12333_v44 = vpop.permute.xlu1 %2451 }
 0x118   : > { %1432 = vst.msk [vmem:[#allocation3 + $0x30] sm:$0xff] %vm1428_vm13, %v12216_v60  ;;  %v1773_v16 = vsel %vm11801_vm10, %v1768_v10, %v1772_v43  ;;  %v2300_v41 = vrot.slane %v2298_v57, 7  ;;  %v2999_v18 = vshll.u32 %v2716_v59, 16  ;;  %v3005_v22 = vshll.u32 %v2717_v5, 16  ;;  %v12331_v43 = vpop.permute.xlu0 %1938  ;;  %v1481_v54 = vld [vmem:[#allocation2 + $0xf8] sm:$0xf] }
 0x119   : > { %v1783_v23 = vsel %vm11801_vm10, %v1778_v12, %v1782_v55  ;;  %v2295_v25 = vsel %vm11813_vm11, %v10395_v21, %v2294_v47  ;;  %1980 = vst.msk [vmem:[#allocation3 + $0x30] sm:$0xff] %vm1976_vm14, %v12233_v3  ;;  %v2998_v26 = vrot.slane %v2996_v53, 4  ;;  %v3009_v60 = vshrl.u32 %v2717_v5, 16  ;;  %v1482_v62 = vld [vmem:[#allocation2 + $0xfc] sm:$0xf] }
 0x11a   : > { %v10379_v19 = vcombine.low %v1773_v16, %v1783_v23  ;;  %v2303_v29 = vor.u32 %v2301_v11, %v2300_v41  ;;  %2493 = vst.msk [vmem:[#allocation3 + $0x30] sm:$0xff] %vm2489_vm15, %v12229_v50  ;;  %v3001_v27 = vrot.slane %v2999_v18, 5  ;;  %v12325_v31 = vrot.slane %v3005_v22, 5  ;;  %v4433_v50 = vld [vmem:[#allocation3 + $0x10] sm:$0xff] }
 0x11b   : > { %v4434_v35 = vld [vmem:[#allocation3 + $0x18] sm:$0xff]  ;;  %v3011_v36 = vrot.slane %v3009_v60, 4  ;;  %2670 = vst.msk [vmem:[#allocation3 + $0x30] sm:$0xff] %vm2666_vm1, %v12248_v34  ;;  %v4016_v3 = vshrl.u32 %v3925_v14, 16  ;;  %v4019_v37 = vshll.u32 %v3925_v14, 16  ;;  %v4025_v38 = vshll.u32 %v3926_v33, 16 }
 0x11c   : > { %10523 = vmatprep.mubr.msk.bf16.mxu0 %vm1251_vm12, %v4434_v35  ;;  %1950 = vrot.lane.b32.xlu0 %v10379_v19, %s11561_s22  ;;  %v2304_v46 = vsel %vm11813_vm11, %v2296_v58, %v2303_v29  ;;  %v3002_v49 = vor.u32 %v3001_v27, %v2998_v26  ;;  %v4029_v34 = vshrl.u32 %v3926_v33, 16  ;;  %v4035_v51 = vshll.u32 %v3927_v4, 16  ;;  %3215 = vst.msk [vmem:[#allocation3 + $0x30] sm:$0xff] %vm3211_vm2, %v12239_v17  ;;  %v798_v33 = vld [vmem:[#allocation2 + $0x58] sm:$0xf] }
 0x11d   : > { %4631 = vmatmul.mubr.bf16.gmra.mrb[4].mxu0 %v4433_v50  ;;  %v10411_v55 = vcombine.low %v2295_v25, %v2304_v46  ;;  %v3012_v56 = vor.u32 %v3011_v36, %v12325_v31  ;;  %v4018_v59 = vrot.slane %v4016_v3, 4  ;;  %v4021_v61 = vrot.slane %v4019_v37, 5  ;;  %3729 = vst.msk [vmem:[#allocation3 + $0x30] sm:$0xff] %vm3725_vm3, %v12267_v15  ;;  %v12353_v23 = vld [vmem:[#allocation2 + $0x5c] sm:$0xf]  ;;  %v12355_v25 = vpop.permute.xlu0 %2628  ;;  %v12357_v26 = vpop.permute.xlu1 %3173 }
 0x11e   : > { %v2718_v21 = vld [vmem:[#allocation2 + $0x100] sm:$0x1]  ;;  %v3003_v63 = vrot.slane %v3002_v49, 4  ;;  %v4027_v5 = vrot.slane %v4025_v38, 5  ;;  %v4031_v10 = vrot.slane %v4029_v34, 4  ;;  %v4037_v57 = vrot.slane %v4035_v51, 5 }
 0x11f   : > { %3906 = vst.msk [vmem:[#allocation3 + $0x30] sm:$0xff] %vm3902_vm4, %v12254_v40  ;;  %2463 = vrot.lane.b32.xlu1 %v10411_v55, %s11558_s25  ;;  %v3013_v17 = vrot.slane %v3012_v56, 4  ;;  %v3015_v11 = vshll.u32 %v2718_v21, 16  ;;  %v4022_v13 = vor.u32 %v4021_v61, %v4018_v59  ;;  %v524_v12 = vsel %vm11741_vm5, 0, %v523_v32  ;;  %v1483_v47 = vld [vmem:[#allocation2 + $0x100] sm:$0x1] }
 0x120   : > { %2640 = vrot.lane.b32.xlu0 %v11247_v48, %s11556_s17  ;;  %v3008_v15 = vsel %vm11801_vm10, %v3003_v63, %v12325_v31  ;;  %v4032_v58 = vor.u32 %v4031_v10, %v4027_v5  ;;  %525 = vst [vmem:[#allocation2 + $0x108] sm:$0x8] %v524_v12  ;;  %v10919_v53 = vpack.c.bf16 %v616_v39, %v616_v39  ;;  %v797_v40 = vld [vmem:[#allocation2 + $0x54] sm:$0x8]  ;;  %v1785_v18 = vshrl.u32 %v1481_v54, 16  ;;  %v618_v55 = vld [vmem:[%s11721_s20 + $0xd0] sm:$0xff] }
 0x121   : > { %v10920_v14 = vpack.c.bf16 %v617_v42, %v617_v42  ;;  %v3017_v16 = vrot.slane %v3015_v11, 5  ;;  %v4023_v41 = vrot.slane %v4022_v13, 4  ;;  %v1788_v22 = vshll.u32 %v1481_v54, 16  ;;  %v12361_v27 = vld [vmem:[#allocation2 + $0x6c] sm:$0xf]  ;;  %v619_v56 = vld [vmem:[%s11721_s20 + $0xd8] sm:$0xff]  ;;  %v12377_v10 = vpop.permute.xlu0 %3687 }
 0x122   : > { %v4033_v60 = vrot.slane %v4032_v58, 4  ;;  %777 = vst.msk [vmem:[#allocation2 + $0x10c] sm:$0xf] %vm462_vm0, %v10919_v53  ;;  %v1794_v4 = vshll.u32 %v1482_v62, 16  ;;  %v1798_v19 = vshrl.u32 %v1482_v62, 16  ;;  %v1804_v29 = vshll.u32 %v1483_v47, 16 }
 0x123   : > { %778 = vst.msk [vmem:[#allocation2 + $0x110] sm:$0xf] %vm462_vm0, %v10920_v14  ;;  %v3018_v31 = vsel %vm11801_vm10, %v3013_v17, %v3017_v16  ;;  %v4028_v32 = vsel %vm11801_vm10, %v4023_v41, %v4027_v5  ;;  %v1787_v35 = vrot.slane %v1785_v18, 4  ;;  %v1790_v36 = vrot.slane %v1788_v22, 5  ;;  %v620_v59 = vld [vmem:[%s11721_s20 + $0xe0] sm:$0xff] }
 0x124   : > { %v10443_v3 = vcombine.low %v3008_v15, %v3018_v31  ;;  %v4038_v37 = vsel %vm11801_vm10, %v4033_v60, %v4037_v57  ;;  %v1796_v38 = vrot.slane %v1794_v4, 5  ;;  %v1800_v39 = vrot.slane %v1798_v19, 4  ;;  %v12379_v57 = vpop.permute.xlu1 %3864 }
 0x125   : > { %v10498_v42 = vcombine.low %v4028_v32, %v4038_v37  ;;  %v1791_v50 = vor.u32 %v1790_v36, %v1787_v35  ;;  %v1806_v46 = vrot.slane %v1804_v29, 5  ;;  %v924_v48 = vshrl.u32 %v797_v40, 16 }
 0x126   : > { %3185 = vrot.lane.b32.xlu1 %v10443_v3, %s11560_s15  ;;  %v1801_v49 = vor.u32 %v1800_v39, %v1796_v38  ;;  %v929_v34 = vshrl.u32 %v798_v33, 16  ;;  %v932_v51 = vshll.u32 %v798_v33, 16  ;;  %v938_v54 = vshrl.u32 %v12353_v23, 16 }
 0x127   : > { %4417 = vst.msk [vmem:[#allocation3 + $0x28] sm:$0xff] %vm1251_vm12, %v10498_v42  ;;  %v3262_v61 = vld [vmem:[#allocation2 + $0x108] sm:$0x8]  ;;  %v1792_v62 = vrot.slane %v1791_v50, 4  ;;  %v10324_v21 = vrot.slane %v924_v48, 11  ;;  %v941_v63 = vshll.u32 %v12353_v23, 16  ;;  %v10921_v14 = vpack.c.bf16 %v618_v55, %v618_v55 }
 0x128   : > { %v4040_v5 = vshrl.u32 %v12361_v27, 16  ;;  %v3520_v17 = vshrl.u32 %v3262_v61, 16  ;;  %v1802_v11 = vrot.slane %v1801_v49, 4  ;;  %v931_v13 = vrot.slane %v929_v34, 7  ;;  %v2029_v47 = vld [vmem:[#allocation2 + $0x108] sm:$0x8]  ;;  %v12391_v49 = vpop.permute.xlu0 %1392  ;;  %v12393_v34 = vpop.permute.xlu1 %1940 }
 0x129   : > { %v940_v12 = vrot.slane %v938_v54, 7  ;;  %v3263_v15 = vld [vmem:[#allocation2 + $0x10c] sm:$0xf]  ;;  %v1797_v53 = vsel %vm11801_vm10, %v1792_v62, %v1796_v38  ;;  %v10922_v40 = vpack.c.bf16 %v619_v56, %v619_v56  ;;  %v10923_v16 = vpack.c.bf16 %v620_v59, %v620_v59  ;;  %779 = vst.msk [vmem:[#allocation2 + $0x120] sm:$0xf] %vm462_vm0, %v10921_v14  ;;  %v11249_v14 = vld [vmem:[#allocation2 + $0xf8] sm:$0xff]  }
 0x12a   : > { %v3264_v58 = vld [vmem:[#allocation2 + $0x110] sm:$0xf]  ;;  %v10459_v41 = vrot.slane %v3520_v17, 11  ;;  %v3525_v18 = vshrl.u32 %v3263_v15, 16  ;;  %v3528_v22 = vshll.u32 %v3263_v15, 16  ;;  %v1807_v4 = vsel %vm11801_vm10, %v1802_v11, %v1806_v46  ;;  %v4435_v38 = vld [vmem:[#allocation3 + $0x20] sm:$0xff] }
 0x12b   : > { %v3534_v33 = vshrl.u32 %v3264_v58, 16  ;;  %v3537_v23 = vshll.u32 %v3264_v58, 16  ;;  %v11248_v60 = vld [vmem:[#allocation2 + $0x10c] sm:$0xff]   ;;  %v934_v19 = vor.u32 %v932_v51, %v931_v13  ;;  %v936_v29 = vrot.slane %v931_v13, 4  ;;  %780 = vst.msk [vmem:[#allocation2 + $0x124] sm:$0xf] %vm462_vm0, %v10922_v40 }
 0x12c   : > { %v2030_v31 = vld [vmem:[#allocation2 + $0x10c] sm:$0xf]  ;;  %781 = vst.msk [vmem:[#allocation2 + $0x134] sm:$0xf] %vm462_vm0, %v10923_v16  ;;  %v3527_v32 = vrot.slane %v3525_v18, 7  ;;  %v10380_v36 = vcombine.low %v1797_v53, %v1807_v4  ;;  %v943_v3 = vor.u32 %v941_v63, %v940_v12  ;;  %3876 = vrot.lane.b32.xlu1 %v11248_v60, %s11557_s23  ;;  %v2306_v42 = vshrl.u32 %v2029_v47, 16 }
 0x12d   : > { %v3536_v35 = vrot.slane %v3534_v33, 7  ;;  %v2031_v37 = vld [vmem:[#allocation2 + $0x110] sm:$0xf]  ;;  %v935_v39 = vsel %vm11813_vm11, %v10324_v21, %v934_v19  ;;  %v2311_v50 = vshrl.u32 %v2030_v31, 16  ;;  %v2314_v46 = vshll.u32 %v2030_v31, 16 }
 0x12e   : > { %v3929_v48 = vld [vmem:[#allocation2 + $0x70] sm:$0xf]  ;;  %v3530_v54 = vor.u32 %v3528_v22, %v3527_v32  ;;  %v3532_v55 = vrot.slane %v3527_v32, 4  ;;  %v944_v59 = vsel %vm11813_vm11, %v936_v29, %v943_v3  ;;  %v3930_v61 = vld [vmem:[#allocation2 + $0x74] sm:$0x1]  ;;  %v10396_v63 = vrot.slane %v2306_v42, 11 }
 0x12f   : > { %v4436_v51 = vld [vmem:[#allocation3 + $0x28] sm:$0xff]  ;;  %v3539_v56 = vor.u32 %v3537_v23, %v3536_v35  ;;  %v10340_v21 = vcombine.low %v935_v39, %v944_v59  ;;  %v2313_v17 = vrot.slane %v2311_v50, 7  ;;  %v2320_v11 = vshrl.u32 %v2031_v37, 16  ;;  %v2719_v58 = vld [vmem:[#allocation2 + $0x10c] sm:$0xf]  ;;  %v12416_v35 = vpop.permute.xlu1 %2630 }
 0x130   : > { %v577_v62 = vld [vmem:[#allocation2 + $0x114] sm:$0x1]  ;;  %10524 = vmatprep.mubr.msk.bf16.mxu0 %vm1251_vm12, %v4436_v51  ;;  %v3531_v13 = vsel %vm11813_vm11, %v10459_v41, %v3530_v54  ;;  %v2323_v47 = vshll.u32 %v2031_v37, 16  ;;  %v4042_v15 = vrot.slane %v4040_v5, 4  ;;  %1952 = vrot.lane.b32.xlu1 %v10380_v36, %s11561_s22  ;;  %v11250_v22 = vld [vmem:[#allocation2 + $0x10c] sm:$0xff]   ;;  %v4043_v41 = vshll.u32 %v12361_v27, 16  ;;  %v12414_v27 = vpop.permute.xlu0 %2453 }
 0x131   : > { %4639 = vmatmul.mubr.bf16.gmra.mrb[8].mxu0 %v4435_v38  ;;  %v3540_v12 = vsel %vm11813_vm11, %v3532_v55, %v3539_v56  ;;  %1256 = vst.msk [vmem:[#allocation3 + $0x40] sm:$0xff] %vm1251_vm12, %v10340_v21  ;;  %v2316_v40 = vor.u32 %v2314_v46, %v2313_v17  ;;  %v2318_v16 = vrot.slane %v2313_v17, 4  ;;  %v2322_v18 = vrot.slane %v2320_v11, 7  ;;  %v2720_v5 = vld [vmem:[#allocation2 + $0x110] sm:$0xf] }
 0x132   : > { %v10475_v53 = vcombine.low %v3531_v13, %v3540_v12  ;;  %1433 = vst.msk [vmem:[#allocation3 + $0x40] sm:$0xff] %vm1428_vm13, %v12273_v30  ;;  %v4049_v33 = vshll.u32 %v3929_v48, 16  ;;  %v4053_v23 = vshrl.u32 %v3929_v48, 16  ;;  %v4059_v60 = vshll.u32 %v3930_v61, 16  ;;  %v526_v4 = vld [vmem:[#allocation2 + $0x11c] sm:$0x8] }
 0x133   : > { %1981 = vst.msk [vmem:[#allocation3 + $0x40] sm:$0xff] %vm1976_vm14, %v12269_v45  ;;  %v2317_v19 = vsel %vm11813_vm11, %v10396_v63, %v2316_v40  ;;  %v2325_v29 = vor.u32 %v2323_v47, %v2322_v18  ;;  %v578_v31 = vsel %vm11746_vm6, 0, %v577_v62  ;;  %v3020_v30 = vshrl.u32 %v2719_v58, 16  ;;  %v3266_v32 = vld [vmem:[#allocation2 + $0x120] sm:$0xf] }
 0x134   : > { %3699 = vrot.lane.b32.xlu0 %v10475_v53, %s11559_s14  ;;  %2494 = vst.msk [vmem:[#allocation3 + $0x40] sm:$0xff] %vm2489_vm15, %v12285_v6  ;;  %v4045_v36 = vrot.slane %v4043_v41, 5  ;;  %v4051_v3 = vrot.slane %v4049_v33, 5  ;;  %v4055_v37 = vrot.slane %v4053_v23, 4  ;;  %v4061_v45 = vrot.slane %v4059_v60, 5  ;;  %2642 = vrot.lane.b32.xlu1 %v11250_v22, %s11556_s17  ;;  %v12436_v53 = vpop.permute.xlu1 %3689 }
 0x135   : > { %579 = vst [vmem:[#allocation2 + $0x114] sm:$0x1] %v578_v31  ;;  %v2326_v38 = vsel %vm11813_vm11, %v2318_v16, %v2325_v29  ;;  %2671 = vst.msk [vmem:[#allocation3 + $0x40] sm:$0xff] %vm2666_vm1, %v12280_v52  ;;  %v3022_v39 = vrot.slane %v3020_v30, 4  ;;  %v3023_v42 = vshll.u32 %v2719_v58, 16  ;;  %v3029_v50 = vshll.u32 %v2720_v5, 16  ;;  %v12434_v58 = vpop.permute.xlu0 %3175 }
 0x136   : > { %v800_v46 = vld [vmem:[#allocation2 + $0x68] sm:$0x8]  ;;  %v10412_v48 = vcombine.low %v2317_v19, %v2326_v38  ;;  %v4046_v51 = vor.u32 %v4045_v36, %v4042_v15  ;;  %v4056_v6 = vor.u32 %v4055_v37, %v4051_v3  ;;  %v3033_v54 = vshrl.u32 %v2720_v5, 16  ;;  %v3267_v55 = vld [vmem:[#allocation2 + $0x124] sm:$0xf]  ;;  %3216 = vst.msk [vmem:[#allocation3 + $0x40] sm:$0xff] %vm3211_vm2, %v12292_v28 }
 0x137   : > { %v3025_v56 = vrot.slane %v3023_v42, 5  ;;  %v3031_v59 = vrot.slane %v3029_v50, 5  ;;  %v527_v61 = vsel %vm11741_vm5, 0, %v526_v4  ;;  %v3547_v52 = vshrl.u32 %v3266_v32, 16  ;;  %3730 = vst.msk [vmem:[#allocation3 + $0x40] sm:$0xff] %vm3725_vm3, %v12294_v24 }
 0x138   : > { %1404 = vrot.lane.b32.xlu0 %v11249_v14, %s11555_s28  ;;  %v4047_v62 = vrot.slane %v4046_v51, 4  ;;  %v4057_v21 = vrot.slane %v4056_v6, 4  ;;  %v3035_v63 = vrot.slane %v3033_v54, 4  ;;  %528 = vst [vmem:[#allocation2 + $0x11c] sm:$0x8] %v527_v61  ;;  %v3550_v17 = vshll.u32 %v3266_v32, 16  ;;  %v12448_v6 = vpop.permute.xlu1 %1394 }
 0x139   : > { %3907 = vst.msk [vmem:[#allocation3 + $0x40] sm:$0xff] %vm3902_vm4, %v12305_v7  ;;  %v801_v28 = vld [vmem:[#allocation2 + $0x6c] sm:$0xf]  ;;  %v3026_v11 = vor.u32 %v3025_v56, %v3022_v39  ;;  %v3549_v13 = vrot.slane %v3547_v52, 7  ;;  %v3556_v12 = vshrl.u32 %v3267_v55, 16  ;;  %v3559_v47 = vshll.u32 %v3267_v55, 16  ;;  %v12446_v51 = vpop.permute.xlu0 %3866 }
 0x13a   : > { %v802_v15 = vld [vmem:[#allocation2 + $0x70] sm:$0xf]  ;;  %v4052_v24 = vsel %vm11801_vm10, %v4047_v62, %v4051_v3  ;;  %v4062_v14 = vsel %vm11801_vm10, %v4057_v21, %v4061_v45  ;;  %v3036_v40 = vor.u32 %v3035_v63, %v3031_v59  ;;  %v946_v16 = vshrl.u32 %v800_v46, 16  ;;  %v1484_v18 = vld [vmem:[#allocation2 + $0x10c] sm:$0xf]  ;;  %v4437_v21 = vld [vmem:[#allocation3 + $0x30] sm:$0xff] }
 0x13b   : > { %v10499_v7 = vcombine.low %v4052_v24, %v4062_v14  ;;  %v3027_v41 = vrot.slane %v3026_v11, 4  ;;  %v3552_v33 = vor.u32 %v3550_v17, %v3549_v13  ;;  %v3554_v23 = vrot.slane %v3549_v13, 4  ;;  %v1485_v60 = vld [vmem:[#allocation2 + $0x110] sm:$0xf]  ;;  %v11251_v63 = vld [vmem:[#allocation2 + $0x120] sm:$0xff]  }
 0x13c   : > { %2465 = vrot.lane.b32.xlu0 %v10412_v48, %s11558_s25  ;;  %v2721_v22 = vld [vmem:[#allocation2 + $0x114] sm:$0x1]  ;;  %v3037_v5 = vrot.slane %v3036_v40, 4  ;;  %v3558_v19 = vrot.slane %v3556_v12, 7  ;;  %v10325_v29 = vrot.slane %v946_v16, 11  ;;  %v951_v30 = vshrl.u32 %v801_v28, 16 }
 0x13d   : > { %v3039_v4 = vshll.u32 %v2721_v22, 16  ;;  %4418 = vst.msk [vmem:[#allocation3 + $0x38] sm:$0xff] %vm1251_vm12, %v10499_v7  ;;  %v3032_v31 = vsel %vm11801_vm10, %v3027_v41, %v3031_v59  ;;  %v954_v32 = vshll.u32 %v801_v28, 16  ;;  %v960_v36 = vshrl.u32 %v802_v15, 16  ;;  %v1486_v59 = vld [vmem:[#allocation2 + $0x114] sm:$0x1] }
 0x13e   : > { %v3561_v37 = vor.u32 %v3559_v47, %v3558_v19  ;;  %v963_v45 = vshll.u32 %v802_v15, 16  ;;  %v1809_v38 = vshrl.u32 %v1484_v18, 16  ;;  %v953_v42 = vrot.slane %v951_v30, 7  ;;  %v2033_v13 = vld [vmem:[#allocation2 + $0x120] sm:$0xf] }
 0x13f   : > { %v3041_v3 = vrot.slane %v3039_v4, 5  ;;  %v3265_v39 = vld [vmem:[#allocation2 + $0x11c] sm:$0x8]  ;;  %v962_v50 = vrot.slane %v960_v36, 7  ;;  %v1812_v46 = vshll.u32 %v1484_v18, 16  ;;  %v1818_v48 = vshll.u32 %v1485_v60, 16  ;;  %v12462_v36 = vpop.permute.xlu0 %1942 }
 0x140   : > { %v3542_v55 = vshrl.u32 %v3265_v39, 16  ;;  %v3562_v56 = vsel %vm11813_vm11, %v3554_v23, %v3561_v37  ;;  %v1811_v61 = vrot.slane %v1809_v38, 4  ;;  %v2032_v52 = vld [vmem:[#allocation2 + $0x11c] sm:$0x8]  ;;  %v956_v17 = vor.u32 %v954_v32, %v953_v42  ;;  %v2034_v18 = vld [vmem:[#allocation2 + $0x124] sm:$0xf] }
 0x141   : > { %v3042_v54 = vsel %vm11801_vm10, %v3037_v5, %v3041_v3  ;;  %v958_v28 = vrot.slane %v953_v42, 4  ;;  %v965_v11 = vor.u32 %v963_v45, %v962_v50  ;;  %v1814_v47 = vrot.slane %v1812_v46, 5  ;;  %v580_v19 = vld [vmem:[#allocation2 + $0x128] sm:$0x1]  ;;  %v12464_v3 = vpop.permute.xlu1 %2455  ;;  %v2723_v39 = vld [vmem:[#allocation2 + $0x124] sm:$0xf] }
 0x142   : > { %v10444_v62 = vcombine.low %v3032_v31, %v3042_v54  ;;  %v10460_v12 = vrot.slane %v3542_v55, 11  ;;  %v1820_v15 = vrot.slane %v1818_v48, 5  ;;  %v1822_v24 = vshrl.u32 %v1485_v60, 16  ;;  %v2722_v60 = vld [vmem:[#allocation2 + $0x120] sm:$0xf]  ;;  %v11252_v42 = vld [vmem:[#allocation2 + $0x10c] sm:$0xff]  }
 0x143   : > { %v957_v14 = vsel %vm11813_vm11, %v10325_v29, %v956_v17  ;;  %v966_v40 = vsel %vm11813_vm11, %v958_v28, %v965_v11  ;;  %v1828_v16 = vshll.u32 %v1486_v59, 16  ;;  %v2328_v7 = vshrl.u32 %v2032_v52, 16  ;;  %v3931_v52 = vld [vmem:[#allocation2 + $0x80] sm:$0xf] }
 0x144   : > { %3187 = vrot.lane.b32.xlu0 %v10444_v62, %s11560_s15  ;;  %v4438_v22 = vld [vmem:[#allocation3 + $0x38] sm:$0xff]  ;;  %v3553_v41 = vsel %vm11813_vm11, %v10460_v12, %v3552_v33  ;;  %v10341_v23 = vcombine.low %v957_v14, %v966_v40  ;;  %v1815_v5 = vor.u32 %v1814_v47, %v1811_v61  ;;  %v1824_v4 = vrot.slane %v1822_v24, 4  ;;  %v12488_v14 = vpop.permute.xlu0 %2632 }
 0x145   : > { %10525 = vmatprep.mubr.msk.bf16.mxu0 %vm1251_vm12, %v4438_v22  ;;  %v10476_v31 = vcombine.low %v3553_v41, %v3562_v56  ;;  %v1830_v30 = vrot.slane %v1828_v16, 5  ;;  %v10397_v29 = vrot.slane %v2328_v7, 11  ;;  %v2333_v32 = vshrl.u32 %v2033_v13, 16  ;;  %v12490_v40 = vpop.permute.xlu1 %3177  ;;  %v529_v22 = vld [vmem:[#allocation2 + $0x130] sm:$0x8] }
 0x146   : > { %4647 = vmatmul.mubr.bf16.gmra.mrb[12].mxu0 %v4437_v21  ;;  %1257 = vst.msk [vmem:[#allocation3 + $0x50] sm:$0xff] %vm1251_vm12, %v10341_v23  ;;  %v1816_v37 = vrot.slane %v1815_v5, 4  ;;  %v1825_v33 = vor.u32 %v1824_v4, %v1820_v15  ;;  %v2336_v45 = vshll.u32 %v2033_v13, 16  ;;  %v2342_v38 = vshrl.u32 %v2034_v18, 16  ;;  %v621_v41 = vld [vmem:[%s11721_s20 + $0xe8] sm:$0xff]  ;;  %v11253_v5 = vld [vmem:[#allocation2 + $0x120] sm:$0xff]  }
 0x147   : > { %3701 = vrot.lane.b32.xlu1 %v10476_v31, %s11559_s14  ;;  %1434 = vst.msk [vmem:[#allocation3 + $0x50] sm:$0xff] %vm1428_vm13, %v12307_v8  ;;  %v2335_v50 = vrot.slane %v2333_v32, 7  ;;  %v2345_v46 = vshll.u32 %v2034_v18, 16  ;;  %v581_v48 = vsel %vm11746_vm6, 0, %v580_v19  ;;  %v3044_v54 = vshrl.u32 %v2722_v60, 16 }
 0x148   : > { %3878 = vrot.lane.b32.xlu0 %v11251_v63, %s11557_s23  ;;  %v1821_v55 = vsel %vm11801_vm10, %v1816_v37, %v1820_v15  ;;  %v1826_v56 = vrot.slane %v1825_v33, 4  ;;  %v2344_v59 = vrot.slane %v2342_v38, 7  ;;  %1982 = vst.msk [vmem:[#allocation3 + $0x50] sm:$0xff] %vm1976_vm14, %v12331_v43  ;;  %582 = vst [vmem:[#allocation2 + $0x128] sm:$0x1] %v581_v48  ;;  %v3047_v61 = vshll.u32 %v2722_v60, 16 }
 0x149   : > { %v2338_v62 = vor.u32 %v2336_v45, %v2335_v50  ;;  %v2340_v21 = vrot.slane %v2335_v50, 4  ;;  %2495 = vst.msk [vmem:[#allocation3 + $0x50] sm:$0xff] %vm2489_vm15, %v12333_v44  ;;  %v3046_v8 = vrot.slane %v3044_v54, 4  ;;  %v3053_v63 = vshll.u32 %v2723_v39, 16  ;;  %v3932_v43 = vld [vmem:[#allocation2 + $0x84] sm:$0xf] }
 0x14a   : > { %v1831_v17 = vsel %vm11801_vm10, %v1826_v56, %v1830_v30  ;;  %v2347_v28 = vor.u32 %v2345_v46, %v2344_v59  ;;  %v3049_v11 = vrot.slane %v3047_v61, 5  ;;  %v3057_v13 = vshrl.u32 %v2723_v39, 16  ;;  %2672 = vst.msk [vmem:[#allocation3 + $0x50] sm:$0xff] %vm2666_vm1, %v12355_v25  ;;  %v3933_v15 = vld [vmem:[#allocation2 + $0x88] sm:$0x1] }
 0x14b   : > { %1406 = vrot.lane.b32.xlu1 %v11252_v42, %s11555_s28  ;;  %v10381_v12 = vcombine.low %v1821_v55, %v1831_v17  ;;  %v2339_v47 = vsel %vm11813_vm11, %v10397_v29, %v2338_v62  ;;  %v3055_v44 = vrot.slane %v3053_v63, 5  ;;  %v4064_v24 = vshrl.u32 %v3931_v52, 16  ;;  %3217 = vst.msk [vmem:[#allocation3 + $0x50] sm:$0xff] %vm3211_vm2, %v12357_v26  ;;  %v3269_v60 = vld [vmem:[#allocation2 + $0x134] sm:$0xf] }
 0x14c   : > { %v2348_v25 = vsel %vm11813_vm11, %v2340_v21, %v2347_v28  ;;  %v3050_v16 = vor.u32 %v3049_v11, %v3046_v8  ;;  %v3059_v18 = vrot.slane %v3057_v13, 4  ;;  %v4067_v7 = vshll.u32 %v3931_v52, 16  ;;  %3731 = vst.msk [vmem:[#allocation3 + $0x50] sm:$0xff] %vm3725_vm3, %v12377_v10  ;;  %v1487_v37 = vld [vmem:[#allocation2 + $0x120] sm:$0xf]  ;;  %v12509_v52 = vpop.permute.xlu1 %3868 }
 0x14d   : > { %1954 = vrot.lane.b32.xlu0 %v10381_v12, %s11561_s22  ;;  %v10413_v23 = vcombine.low %v2339_v47, %v2348_v25  ;;  %v4066_v26 = vrot.slane %v4064_v24, 4  ;;  %v4073_v4 = vshll.u32 %v3932_v43, 16  ;;  %v4077_v19 = vshrl.u32 %v3932_v43, 16  ;;  %3908 = vst.msk [vmem:[#allocation3 + $0x50] sm:$0xff] %vm3902_vm4, %v12379_v57  ;;  %v1488_v48 = vld [vmem:[#allocation2 + $0x124] sm:$0xf]  ;;  %v12507_v61 = vpop.permute.xlu0 %3691 }
 0x14e   : > { %v3051_v31 = vrot.slane %v3050_v16, 4  ;;  %v3060_v30 = vor.u32 %v3059_v18, %v3055_v44  ;;  %v4069_v29 = vrot.slane %v4067_v7, 5  ;;  %v4083_v32 = vshll.u32 %v3933_v15, 16  ;;  %v803_v43 = vld [vmem:[#allocation2 + $0x7c] sm:$0x8] }
 0x14f   : > { %2467 = vrot.lane.b32.xlu1 %v10413_v23, %s11558_s25  ;;  %v2724_v33 = vld [vmem:[#allocation2 + $0x128] sm:$0x1]  ;;  %v4075_v10 = vrot.slane %v4073_v4, 5  ;;  %v4079_v45 = vrot.slane %v4077_v19, 4  ;;  %v530_v38 = vsel %vm11741_vm5, 0, %v529_v22  ;;  %v10924_v39 = vpack.c.bf16 %v621_v41, %v621_v41  ;;  %v622_v41 = vld [vmem:[%s11721_s20 + $0xf0] sm:$0xff] }
 0x150   : > { %v3056_v42 = vsel %vm11801_vm10, %v3051_v31, %v3055_v44  ;;  %v3061_v50 = vrot.slane %v3060_v30, 4  ;;  %v3063_v46 = vshll.u32 %v2724_v33, 16  ;;  %v4070_v57 = vor.u32 %v4069_v29, %v4066_v26  ;;  %531 = vst [vmem:[#allocation2 + $0x130] sm:$0x8] %v530_v38  ;;  %v1489_v44 = vld [vmem:[#allocation2 + $0x128] sm:$0x1] }
 0x151   : > { %2644 = vrot.lane.b32.xlu0 %v11253_v5, %s11556_s17  ;;  %v4080_v54 = vor.u32 %v4079_v45, %v4075_v10  ;;  %v4085_v55 = vrot.slane %v4083_v32, 5  ;;  %782 = vst.msk [vmem:[#allocation2 + $0x138] sm:$0xf] %vm462_vm0, %v10924_v39  ;;  %v3569_v56 = vshrl.u32 %v3269_v60, 16  ;;  %v3572_v59 = vshll.u32 %v3269_v60, 16  ;;  %v623_v23 = vld [vmem:[%s11721_s20 + $0xf8] sm:$0xff]  ;;  %v12526_v33 = vpop.permute.xlu0 %1396 }
 0x152   : > { %v3065_v62 = vrot.slane %v3063_v46, 5  ;;  %v4071_v21 = vrot.slane %v4070_v57, 4  ;;  %v1833_v8 = vshrl.u32 %v1487_v37, 16  ;;  %v1836_v63 = vshll.u32 %v1487_v37, 16  ;;  %v804_v25 = vld [vmem:[#allocation2 + $0x80] sm:$0xf] }
 0x153   : > { %v4081_v17 = vrot.slane %v4080_v54, 4  ;;  %v12511_v28 = vrot.slane %v3569_v56, 7  ;;  %v1842_v11 = vshll.u32 %v1488_v48, 16  ;;  %v1846_v13 = vshrl.u32 %v1488_v48, 16  ;;  %v805_v60 = vld [vmem:[#allocation2 + $0x84] sm:$0xf] }
 0x154   : > { %v3066_v12 = vsel %vm11801_vm10, %v3061_v50, %v3065_v62  ;;  %v4076_v47 = vsel %vm11801_vm10, %v4071_v21, %v4075_v10  ;;  %v1835_v15 = vrot.slane %v1833_v8, 4  ;;  %v1838_v24 = vrot.slane %v1836_v63, 5  ;;  %v12528_v10 = vpop.permute.xlu1 %1944 }
 0x155   : > { %v10445_v16 = vcombine.low %v3056_v42, %v3066_v12  ;;  %v4086_v18 = vsel %vm11801_vm10, %v4081_v17, %v4085_v55  ;;  %v12520_v7 = vor.u32 %v3572_v59, %v12511_v28  ;;  %v3576_v22 = vrot.slane %v12511_v28, 4  ;;  %v2036_v59 = vld [vmem:[#allocation2 + $0x134] sm:$0xf] }
 0x156   : > { %v10500_v5 = vcombine.low %v4076_v47, %v4086_v18  ;;  %v1839_v26 = vor.u32 %v1838_v24, %v1835_v15  ;;  %v1844_v4 = vrot.slane %v1842_v11, 5  ;;  %v1848_v19 = vrot.slane %v1846_v13, 4 }
 0x157   : > { %3189 = vrot.lane.b32.xlu1 %v10445_v16, %s11560_s15  ;;  %v3268_v31 = vld [vmem:[#allocation2 + $0x130] sm:$0x8]  ;;  %v1852_v30 = vshll.u32 %v1489_v44, 16  ;;  %v968_v29 = vshrl.u32 %v803_v43, 16  ;;  %v973_v32 = vshrl.u32 %v804_v25, 16  ;;  %v976_v37 = vshll.u32 %v804_v25, 16 }
 0x158   : > { %4419 = vst.msk [vmem:[#allocation3 + $0x48] sm:$0xff] %vm1251_vm12, %v10500_v5  ;;  %v3270_v45 = vld [vmem:[#allocation2 + $0x138] sm:$0xf]  ;;  %v3564_v38 = vshrl.u32 %v3268_v31, 16  ;;  %v1849_v42 = vor.u32 %v1848_v19, %v1844_v4  ;;  %v10925_v50 = vpack.c.bf16 %v622_v41, %v622_v41  ;;  %v10926_v46 = vpack.c.bf16 %v623_v23, %v623_v23  ;;  %v2035_v56 = vld [vmem:[#allocation2 + $0x130] sm:$0x8]  ;;  %v12541_v23 = vpop.permute.xlu0 %2457  ;;  %v12543_v5 = vpop.permute.xlu1 %2634 }
 0x159   : > { %v11254_v39 = vld [vmem:[#allocation2 + $0x134] sm:$0xff]   ;;  %v3578_v57 = vshrl.u32 %v3270_v45, 16  ;;  %v3581_v48 = vshll.u32 %v3270_v45, 16  ;;  %v1840_v54 = vrot.slane %v1839_v26, 4  ;;  %v1854_v55 = vrot.slane %v1852_v30, 5  ;;  %v4439_v26 = vld [vmem:[#allocation3 + $0x40] sm:$0xff] }
 0x15a   : > { %v10461_v62 = vrot.slane %v3564_v38, 11  ;;  %v1850_v21 = vrot.slane %v1849_v42, 4  ;;  %v10326_v8 = vrot.slane %v968_v29, 11  ;;  %v975_v63 = vrot.slane %v973_v32, 7  ;;  %v2037_v17 = vld [vmem:[#allocation2 + $0x138] sm:$0xf] }
 0x15b   : > { %783 = vst.msk [vmem:[#allocation2 + $0x148] sm:$0xf] %vm462_vm0, %v10925_v50  ;;  %784 = vst.msk [vmem:[#allocation2 + $0x14c] sm:$0xf] %vm462_vm0, %v10926_v46  ;;  %v3580_v28 = vrot.slane %v3578_v57, 7  ;;  %3880 = vrot.lane.b32.xlu1 %v11254_v39, %s11557_s23  ;;  %v1845_v11 = vsel %vm11801_vm10, %v1840_v54, %v1844_v4  ;;  %v982_v13 = vshrl.u32 %v805_v60, 16 }
 0x15c   : > { %v985_v43 = vshll.u32 %v805_v60, 16  ;;  %v3575_v12 = vsel %vm11813_vm11, %v10461_v62, %v12520_v7  ;;  %v1855_v47 = vsel %vm11801_vm10, %v1850_v21, %v1854_v55  ;;  %v978_v44 = vor.u32 %v976_v37, %v975_v63  ;;  %v3934_v41 = vld [vmem:[#allocation2 + $0x94] sm:$0xf]  ;;  %v3935_v31 = vld [vmem:[#allocation2 + $0x98] sm:$0xf]  ;;  %v11255_v62 = vld [vmem:[#allocation2 + $0x120] sm:$0xff]  }
 0x15d   : > { %v980_v15 = vrot.slane %v975_v63, 4  ;;  %v3583_v24 = vor.u32 %v3581_v48, %v3580_v28  ;;  %v10382_v25 = vcombine.low %v1845_v11, %v1855_v47  ;;  %v984_v16 = vrot.slane %v982_v13, 7  ;;  %v11256_v38 = vld [vmem:[#allocation2 + $0x134] sm:$0xff]   ;;  %v3936_v39 = vld [vmem:[#allocation2 + $0x9c] sm:$0x1]  ;;  %v12555_v47 = vpop.permute.xlu0 %3179 }
 0x15e   : > { %v2350_v18 = vshrl.u32 %v2035_v56, 16  ;;  %v979_v4 = vsel %vm11813_vm11, %v10326_v8, %v978_v44  ;;  %v2355_v19 = vshrl.u32 %v2036_v59, 16  ;;  %v2358_v7 = vshll.u32 %v2036_v59, 16  ;;  %v583_v42 = vld [vmem:[#allocation2 + $0x13c] sm:$0x1]  ;;  %v12557_v44 = vpop.permute.xlu1 %3693 }
 0x15f   : > { %v2364_v60 = vshrl.u32 %v2037_v17, 16  ;;  %v4440_v30 = vld [vmem:[#allocation3 + $0x48] sm:$0xff]  ;;  %v3584_v29 = vsel %vm11813_vm11, %v3576_v22, %v3583_v24  ;;  %1956 = vrot.lane.b32.xlu1 %v10382_v25, %s11561_s22  ;;  %v987_v32 = vor.u32 %v985_v43, %v984_v16  ;;  %v2367_v45 = vshll.u32 %v2037_v17, 16  ;;  %v2726_v28 = vld [vmem:[#allocation2 + $0x138] sm:$0xf] }
 0x160   : > { %v10398_v37 = vrot.slane %v2350_v18, 11  ;;  %10526 = vmatprep.mubr.msk.bf16.mxu0 %vm1251_vm12, %v4440_v30  ;;  %v10477_v50 = vcombine.low %v3575_v12, %v3584_v29  ;;  %v2357_v46 = vrot.slane %v2355_v19, 7  ;;  %v4088_v48 = vshrl.u32 %v3934_v41, 16  ;;  %v2725_v59 = vld [vmem:[#allocation2 + $0x134] sm:$0xf] }
 0x161   : > { %v2366_v57 = vrot.slane %v2364_v60, 7  ;;  %4655 = vmatmul.mubr.bf16.gmra.mrb[16].mxu0 %v4439_v26  ;;  %v988_v54 = vsel %vm11813_vm11, %v980_v15, %v987_v32  ;;  %v4091_v55 = vshll.u32 %v3934_v41, 16  ;;  %v4097_v22 = vshll.u32 %v3935_v31, 16  ;;  %v532_v18 = vld [vmem:[#allocation2 + $0x144] sm:$0x8] }
 0x162   : > { %v4101_v56 = vshrl.u32 %v3935_v31, 16  ;;  %3703 = vrot.lane.b32.xlu0 %v10477_v50, %s11559_s14  ;;  %v10342_v21 = vcombine.low %v979_v4, %v988_v54  ;;  %v2360_v8 = vor.u32 %v2358_v7, %v2357_v46  ;;  %v2362_v63 = vrot.slane %v2357_v46, 4  ;;  %v3272_v41 = vld [vmem:[#allocation2 + $0x148] sm:$0xf]  ;;  %v3273_v32 = vld [vmem:[#allocation2 + $0x14c] sm:$0xf] }
 0x163   : > { %v2369_v17 = vor.u32 %v2367_v45, %v2366_v57  ;;  %2646 = vrot.lane.b32.xlu1 %v11256_v38, %s11556_s17  ;;  %v4090_v11 = vrot.slane %v4088_v48, 4  ;;  %v4093_v13 = vrot.slane %v4091_v55, 5  ;;  %v4099_v43 = vrot.slane %v4097_v22, 5  ;;  %v808_v22 = vld [vmem:[#allocation2 + $0x98] sm:$0xf] }
 0x164   : > { %v4103_v12 = vrot.slane %v4101_v56, 4  ;;  %1258 = vst.msk [vmem:[#allocation3 + $0x60] sm:$0xff] %vm1251_vm12, %v10342_v21  ;;  %v2361_v15 = vsel %vm11813_vm11, %v10398_v37, %v2360_v8  ;;  %v4107_v25 = vshll.u32 %v3936_v39, 16  ;;  %v584_v16 = vsel %vm11746_vm6, 0, %v583_v42  ;;  %v806_v37 = vld [vmem:[#allocation2 + $0x90] sm:$0x8]  ;;  %v12583_v56 = vpop.permute.xlu0 %3870 }
 0x165   : > { %v2370_v24 = vsel %vm11813_vm11, %v2362_v63, %v2369_v17  ;;  %1435 = vst.msk [vmem:[#allocation3 + $0x60] sm:$0xff] %vm1428_vm13, %v12391_v49  ;;  %v4094_v4 = vor.u32 %v4093_v13, %v4090_v11  ;;  %585 = vst [vmem:[#allocation2 + $0x13c] sm:$0x1] %v584_v16  ;;  %v3068_v7 = vshrl.u32 %v2725_v59, 16  ;;  %v3071_v31 = vshll.u32 %v2725_v59, 16 }
 0x166   : > { %v10414_v26 = vcombine.low %v2361_v15, %v2370_v24  ;;  %v4104_v19 = vor.u32 %v4103_v12, %v4099_v43  ;;  %1408 = vrot.lane.b32.xlu0 %v11255_v62, %s11555_s28  ;;  %1983 = vst.msk [vmem:[#allocation3 + $0x60] sm:$0xff] %vm1976_vm14, %v12393_v34  ;;  %v4109_v60 = vrot.slane %v4107_v25, 5  ;;  %v3077_v30 = vshll.u32 %v2726_v28, 16  ;;  %v807_v42 = vld [vmem:[#allocation2 + $0x94] sm:$0xf] }
 0x167   : > { %v3081_v29 = vshrl.u32 %v2726_v28, 16  ;;  %2496 = vst.msk [vmem:[#allocation3 + $0x60] sm:$0xff] %vm2489_vm15, %v12414_v27  ;;  %v4095_v49 = vrot.slane %v4094_v4, 4  ;;  %v3070_v38 = vrot.slane %v3068_v7, 4  ;;  %v533_v39 = vsel %vm11741_vm5, 0, %v532_v18 }
 0x168   : > { %v4105_v45 = vrot.slane %v4104_v19, 4  ;;  %2673 = vst.msk [vmem:[#allocation3 + $0x60] sm:$0xff] %vm2666_vm1, %v12416_v35  ;;  %v3073_v34 = vrot.slane %v3071_v31, 5  ;;  %v3079_v50 = vrot.slane %v3077_v30, 5  ;;  %534 = vst [vmem:[#allocation2 + $0x144] sm:$0x8] %v533_v39  ;;  %v12585_v35 = vpop.permute.xlu1 %1398 }
 0x169   : > { %v3083_v46 = vrot.slane %v3081_v29, 4  ;;  %v3591_v57 = vshrl.u32 %v3272_v41, 16  ;;  %v4100_v48 = vsel %vm11801_vm10, %v4095_v49, %v4099_v43  ;;  %v3594_v54 = vshll.u32 %v3272_v41, 16  ;;  %3218 = vst.msk [vmem:[#allocation3 + $0x60] sm:$0xff] %vm3211_vm2, %v12434_v58  ;;  %v1490_v11 = vld [vmem:[#allocation2 + $0x134] sm:$0xf] }
 0x16a   : > { %v4110_v27 = vsel %vm11801_vm10, %v4105_v45, %v4109_v60  ;;  %v3600_v55 = vshrl.u32 %v3273_v32, 16  ;;  %2469 = vrot.lane.b32.xlu0 %v10414_v26, %s11558_s25  ;;  %v3074_v62 = vor.u32 %v3073_v34, %v3070_v38  ;;  %3732 = vst.msk [vmem:[#allocation3 + $0x60] sm:$0xff] %vm3725_vm3, %v12436_v53  ;;  %v3603_v17 = vshll.u32 %v3273_v32, 16  ;;  %v1491_v19 = vld [vmem:[#allocation2 + $0x138] sm:$0xf] }
 0x16b   : > { %v10501_v59 = vcombine.low %v4100_v48, %v4110_v27  ;;  %v3084_v21 = vor.u32 %v3083_v46, %v3079_v50  ;;  %v3593_v8 = vrot.slane %v3591_v57, 7  ;;  %3909 = vst.msk [vmem:[#allocation3 + $0x60] sm:$0xff] %vm3902_vm4, %v12446_v51  ;;  %v990_v58 = vshrl.u32 %v806_v37, 16  ;;  %v2039_v32 = vld [vmem:[#allocation2 + $0x148] sm:$0xf]  ;;  %v12597_v37 = vpop.permute.xlu0 %1946 }
 0x16c   : > { %v3602_v63 = vrot.slane %v3600_v55, 7  ;;  %v995_v28 = vshrl.u32 %v807_v42, 16  ;;  %v2727_v13 = vld [vmem:[#allocation2 + $0x13c] sm:$0x1]  ;;  %v3075_v43 = vrot.slane %v3074_v62, 4  ;;  %v998_v26 = vshll.u32 %v807_v42, 16  ;;  %v12599_v49 = vpop.permute.xlu1 %2459 }
 0x16d   : > { %4420 = vst.msk [vmem:[#allocation3 + $0x58] sm:$0xff] %vm1251_vm12, %v10501_v59  ;;  %v3085_v12 = vrot.slane %v3084_v21, 4  ;;  %v3596_v15 = vor.u32 %v3594_v54, %v3593_v8  ;;  %v3598_v24 = vrot.slane %v3593_v8, 4  ;;  %v3087_v25 = vshll.u32 %v2727_v13, 16  ;;  %v1492_v34 = vld [vmem:[#allocation2 + $0x13c] sm:$0x1] }
 0x16e   : > { %v3605_v16 = vor.u32 %v3603_v17, %v3602_v63  ;;  %v10327_v18 = vrot.slane %v990_v58, 11  ;;  %v997_v41 = vrot.slane %v995_v28, 7  ;;  %v3080_v53 = vsel %vm11801_vm10, %v3075_v43, %v3079_v50  ;;  %v4441_v55 = vld [vmem:[#allocation3 + $0x50] sm:$0xff]  ;;  %v11257_v8 = vld [vmem:[#allocation2 + $0x148] sm:$0xff]  }
 0x16f   : > { %v1004_v4 = vshrl.u32 %v808_v22, 16  ;;  %v1007_v51 = vshll.u32 %v808_v22, 16  ;;  %v3089_v7 = vrot.slane %v3087_v25, 5  ;;  %v3271_v60 = vld [vmem:[#allocation2 + $0x144] sm:$0x8]  ;;  %v1857_v29 = vshrl.u32 %v1490_v11, 16 }
 0x170   : > { %v3606_v31 = vsel %vm11813_vm11, %v3598_v24, %v3605_v16  ;;  %v1002_v30 = vrot.slane %v997_v41, 4  ;;  %v3586_v45 = vshrl.u32 %v3271_v60, 16  ;;  %v1000_v38 = vor.u32 %v998_v26, %v997_v41  ;;  %v2038_v27 = vld [vmem:[#allocation2 + $0x144] sm:$0x8]  ;;  %v2728_v16 = vld [vmem:[#allocation2 + $0x148] sm:$0xf] }
 0x171   : > { %v1006_v39 = vrot.slane %v1004_v4, 7  ;;  %v1860_v42 = vshll.u32 %v1490_v11, 16  ;;  %v3090_v50 = vsel %vm11801_vm10, %v3085_v12, %v3089_v7  ;;  %v1859_v46 = vrot.slane %v1857_v29, 4  ;;  %v586_v11 = vld [vmem:[#allocation2 + $0x150] sm:$0x1]  ;;  %v11258_v41 = vld [vmem:[#allocation2 + $0x134] sm:$0xff]   ;;  %v12613_v7 = vpop.permute.xlu1 %3181 }
 0x172   : > { %v1866_v57 = vshll.u32 %v1491_v19, 16  ;;  %v1870_v48 = vshrl.u32 %v1491_v19, 16  ;;  %v10446_v54 = vcombine.low %v3080_v53, %v3090_v50  ;;  %v10462_v22 = vrot.slane %v3586_v45, 11  ;;  %v2040_v12 = vld [vmem:[#allocation2 + $0x14c] sm:$0xf]  ;;  %v12611_v19 = vpop.permute.xlu0 %2636 }
 0x173   : > { %v1001_v59 = vsel %vm11813_vm11, %v10327_v18, %v1000_v38  ;;  %v1009_v62 = vor.u32 %v1007_v51, %v1006_v39  ;;  %v1862_v63 = vrot.slane %v1860_v42, 5  ;;  %v1876_v28 = vshll.u32 %v1492_v34, 16  ;;  %v2729_v51 = vld [vmem:[#allocation2 + $0x14c] sm:$0xf] }
 0x174   : > { %v4442_v21 = vld [vmem:[#allocation3 + $0x58] sm:$0xff]  ;;  %v1868_v17 = vrot.slane %v1866_v57, 5  ;;  %v1872_v58 = vrot.slane %v1870_v48, 4  ;;  %3191 = vrot.lane.b32.xlu0 %v10446_v54, %s11560_s15  ;;  %v3597_v13 = vsel %vm11813_vm11, %v10462_v22, %v3596_v15  ;;  %v2372_v24 = vshrl.u32 %v2038_v27, 16 }
 0x175   : > { %10527 = vmatprep.mubr.msk.bf16.mxu0 %vm1251_vm12, %v4442_v21  ;;  %v1010_v43 = vsel %vm11813_vm11, %v1002_v30, %v1009_v62  ;;  %v2377_v25 = vshrl.u32 %v2039_v32, 16  ;;  %v10478_v18 = vcombine.low %v3597_v13, %v3606_v31  ;;  %v1863_v26 = vor.u32 %v1862_v63, %v1859_v46  ;;  %v3937_v30 = vld [vmem:[#allocation2 + $0xa8] sm:$0xf]  ;;  %v3939_v21 = vld [vmem:[#allocation2 + $0xb0] sm:$0x1] }
 0x176   : > { %4663 = vmatmul.mubr.bf16.gmra.mrb[20].mxu0 %v4441_v55  ;;  %v10343_v53 = vcombine.low %v1001_v59, %v1010_v43  ;;  %v1873_v4 = vor.u32 %v1872_v58, %v1868_v17  ;;  %v1878_v60 = vrot.slane %v1876_v28, 5  ;;  %v10399_v15 = vrot.slane %v2372_v24, 11  ;;  %v3938_v55 = vld [vmem:[#allocation2 + $0xac] sm:$0xf]  ;;  %v12635_v28 = vpop.permute.xlu0 %3695 }
 0x177   : > { %v2379_v29 = vrot.slane %v2377_v25, 7  ;;  %v2380_v45 = vshll.u32 %v2039_v32, 16  ;;  %3705 = vrot.lane.b32.xlu1 %v10478_v18, %s11559_s14  ;;  %v1864_v38 = vrot.slane %v1863_v26, 4  ;;  %v2386_v39 = vshrl.u32 %v2040_v12, 16 }
 0x178   : > { %1259 = vst.msk [vmem:[#allocation3 + $0x70] sm:$0xff] %vm1251_vm12, %v10343_v53  ;;  %v1874_v31 = vrot.slane %v1873_v4, 4  ;;  %v2389_v34 = vshll.u32 %v2040_v12, 16  ;;  %3882 = vrot.lane.b32.xlu0 %v11257_v8, %s11557_s23  ;;  %v587_v46 = vsel %vm11746_vm6, 0, %v586_v11  ;;  %v3092_v32 = vshrl.u32 %v2728_v16, 16  ;;  %v12637_v11 = vpop.permute.xlu1 %3872 }
 0x179   : > { %1436 = vst.msk [vmem:[#allocation3 + $0x70] sm:$0xff] %vm1428_vm13, %v12448_v6  ;;  %v2382_v42 = vor.u32 %v2380_v45, %v2379_v29  ;;  %v2384_v50 = vrot.slane %v2379_v29, 4  ;;  %v1869_v57 = vsel %vm11801_vm10, %v1864_v38, %v1868_v17  ;;  %v2388_v27 = vrot.slane %v2386_v39, 7  ;;  %588 = vst [vmem:[#allocation2 + $0x150] sm:$0x1] %v587_v46 }
 0x17a   : > { %v1879_v48 = vsel %vm11801_vm10, %v1874_v31, %v1878_v60  ;;  %1984 = vst.msk [vmem:[#allocation3 + $0x70] sm:$0xff] %vm1976_vm14, %v12462_v36  ;;  %v3095_v54 = vshll.u32 %v2728_v16, 16  ;;  %v3094_v59 = vrot.slane %v3092_v32, 4  ;;  %v3101_v62 = vshll.u32 %v2729_v51, 16  ;;  %v535_v8 = vld [vmem:[#allocation2 + $0x158] sm:$0x8]  ;;  %v12654_v1 = vpop.permute.xlu0 %1400 }
 0x17b   : > { %v10383_v6 = vcombine.low %v1869_v57, %v1879_v48  ;;  %v2383_v22 = vsel %vm11813_vm11, %v10399_v15, %v2382_v42  ;;  %2497 = vst.msk [vmem:[#allocation3 + $0x70] sm:$0xff] %vm2489_vm15, %v12464_v3  ;;  %1410 = vrot.lane.b32.xlu1 %v11258_v41, %s11555_s28  ;;  %v2391_v63 = vor.u32 %v2389_v34, %v2388_v27  ;;  %v3105_v58 = vshrl.u32 %v2729_v51, 16  ;;  %v11259_v3 = vld [vmem:[#allocation2 + $0x148] sm:$0xff]   ;;  %v3275_v41 = vld [vmem:[#allocation2 + $0x15c] sm:$0xf] }
 0x17c   : > { %v3097_v17 = vrot.slane %v3095_v54, 5  ;;  %2674 = vst.msk [vmem:[#allocation3 + $0x70] sm:$0xff] %vm2666_vm1, %v12488_v14  ;;  %v4112_v36 = vshrl.u32 %v3937_v30, 16  ;;  %v3103_v13 = vrot.slane %v3101_v62, 5  ;;  %v4115_v43 = vshll.u32 %v3937_v30, 16  ;;  %v12656_v57 = vpop.permute.xlu1 %1948 }
 0x17d   : > { %1958 = vrot.lane.b32.xlu0 %v10383_v6, %s11561_s22  ;;  %v4121_v12 = vshll.u32 %v3938_v55, 16  ;;  %v4125_v24 = vshrl.u32 %v3938_v55, 16  ;;  %3219 = vst.msk [vmem:[#allocation3 + $0x70] sm:$0xff] %vm3211_vm2, %v12490_v40  ;;  %v2392_v25 = vsel %vm11813_vm11, %v2384_v50, %v2391_v63  ;;  %v3107_v14 = vrot.slane %v3105_v58, 4  ;;  %v3276_v60 = vld [vmem:[#allocation2 + $0x160] sm:$0xf] }
 0x17e   : > { %v3098_v16 = vor.u32 %v3097_v17, %v3094_v59  ;;  %v4114_v18 = vrot.slane %v4112_v36, 4  ;;  %3733 = vst.msk [vmem:[#allocation3 + $0x70] sm:$0xff] %vm3725_vm3, %v12507_v61  ;;  %v10415_v53 = vcombine.low %v2383_v22, %v2392_v25  ;;  %v4117_v26 = vrot.slane %v4115_v43, 5  ;;  %v809_v30 = vld [vmem:[#allocation2 + $0xa4] sm:$0x8] }
 0x17f   : > { %v4123_v4 = vrot.slane %v4121_v12, 5  ;;  %v4127_v51 = vrot.slane %v4125_v24, 4  ;;  %3910 = vst.msk [vmem:[#allocation3 + $0x70] sm:$0xff] %vm3902_vm4, %v12509_v52  ;;  %v3108_v40 = vor.u32 %v3107_v14, %v3103_v13  ;;  %v4131_v29 = vshll.u32 %v3939_v21, 16  ;;  %v810_v42 = vld [vmem:[#allocation2 + $0xa8] sm:$0xf] }
 0x180   : > { %v3099_v15 = vrot.slane %v3098_v16, 4  ;;  %v536_v45 = vsel %vm11741_vm5, 0, %v535_v8  ;;  %2471 = vrot.lane.b32.xlu1 %v10415_v53, %s11558_s25  ;;  %v2730_v61 = vld [vmem:[#allocation2 + $0x150] sm:$0x1]  ;;  %v4118_v38 = vor.u32 %v4117_v26, %v4114_v18  ;;  %v3613_v39 = vshrl.u32 %v3275_v41, 16 }
 0x181   : > { %2648 = vrot.lane.b32.xlu0 %v11259_v3, %s11556_s17  ;;  %v4128_v31 = vor.u32 %v4127_v51, %v4123_v4  ;;  %537 = vst [vmem:[#allocation2 + $0x158] sm:$0x8] %v536_v45  ;;  %v3616_v34 = vshll.u32 %v3275_v41, 16  ;;  %v3109_v50 = vrot.slane %v3108_v40, 4  ;;  %v3111_v46 = vshll.u32 %v2730_v61, 16  ;;  %v12667_v40 = vpop.permute.xlu1 %2638  ;;  %v11260_v45 = vld [vmem:[#allocation2 + $0x15c] sm:$0xff]  }
 0x182   : > { %v3104_v52 = vsel %vm11801_vm10, %v3099_v15, %v3103_v13  ;;  %v4133_v32 = vrot.slane %v4131_v29, 5  ;;  %v4119_v48 = vrot.slane %v4118_v38, 4  ;;  %v3615_v54 = vrot.slane %v3613_v39, 7  ;;  %v811_v59 = vld [vmem:[#allocation2 + $0xac] sm:$0xf]  ;;  %v12665_v15 = vpop.permute.xlu0 %2461 }
 0x183   : > { %v4129_v27 = vrot.slane %v4128_v31, 4  ;;  %v3622_v55 = vshrl.u32 %v3276_v60, 16  ;;  %v3113_v6 = vrot.slane %v3111_v46, 5  ;;  %v3625_v22 = vshll.u32 %v3276_v60, 16  ;;  %v3940_v36 = vld [vmem:[#allocation2 + $0xbc] sm:$0xf] }
 0x184   : > { %v1012_v62 = vshrl.u32 %v809_v30, 16  ;;  %v1017_v21 = vshrl.u32 %v810_v42, 16  ;;  %v4124_v8 = vsel %vm11801_vm10, %v4119_v48, %v4123_v4  ;;  %v3618_v17 = vor.u32 %v3616_v34, %v3615_v54  ;;  %v3941_v24 = vld [vmem:[#allocation2 + $0xc0] sm:$0xf]  ;;  %v3942_v41 = vld [vmem:[#allocation2 + $0xc4] sm:$0x1] }
 0x185   : > { %v4134_v63 = vsel %vm11801_vm10, %v4129_v27, %v4133_v32  ;;  %v3620_v58 = vrot.slane %v3615_v54, 4  ;;  %v3114_v3 = vsel %vm11801_vm10, %v3109_v50, %v3113_v6  ;;  %v3624_v43 = vrot.slane %v3622_v55, 7  ;;  %v812_v31 = vld [vmem:[#allocation2 + $0xb8] sm:$0x8]  ;;  %v813_v50 = vld [vmem:[#allocation2 + $0xbc] sm:$0xf] }
 0x186   : > { %v10502_v13 = vcombine.low %v4124_v8, %v4134_v63  ;;  %v10328_v12 = vrot.slane %v1012_v62, 11  ;;  %v10447_v25 = vcombine.low %v3104_v52, %v3114_v3  ;;  %v1019_v16 = vrot.slane %v1017_v21, 7  ;;  %v814_v8 = vld [vmem:[#allocation2 + $0xc0] sm:$0xf] }
 0x187   : > { %v1020_v14 = vshll.u32 %v810_v42, 16  ;;  %v1026_v18 = vshrl.u32 %v811_v59, 16  ;;  %v3627_v26 = vor.u32 %v3625_v22, %v3624_v43  ;;  %v1029_v4 = vshll.u32 %v811_v59, 16 }
 0x188   : > { %4421 = vst.msk [vmem:[#allocation3 + $0x68] sm:$0xff] %vm1251_vm12, %v10502_v13  ;;  %v3274_v53 = vld [vmem:[#allocation2 + $0x158] sm:$0x8]  ;;  %v4136_v51 = vshrl.u32 %v3940_v36, 16  ;;  %v4139_v60 = vshll.u32 %v3940_v36, 16  ;;  %3193 = vrot.lane.b32.xlu1 %v10447_v25, %s11560_s15  ;;  %v1024_v61 = vrot.slane %v1019_v16, 4  ;;  %v12681_v25 = vpop.permute.xlu1 %3697 }
 0x189   : > { %v3608_v29 = vshrl.u32 %v3274_v53, 16  ;;  %v1022_v30 = vor.u32 %v1020_v14, %v1019_v16  ;;  %v1028_v38 = vrot.slane %v1026_v18, 7  ;;  %v3628_v39 = vsel %vm11813_vm11, %v3620_v58, %v3627_v26  ;;  %v3943_v58 = vld [vmem:[#allocation2 + $0xd0] sm:$0xf]  ;;  %v4443_v36 = vld [vmem:[#allocation3 + $0x60] sm:$0xff] }
 0x18a   : > { %v4138_v34 = vrot.slane %v4136_v51, 4  ;;  %v4141_v42 = vrot.slane %v4139_v60, 5  ;;  %v4145_v52 = vshll.u32 %v3941_v24, 16  ;;  %v4149_v27 = vshrl.u32 %v3941_v24, 16  ;;  %v12679_v24 = vpop.permute.xlu0 %3183  ;;  %v3944_v53 = vld [vmem:[#allocation2 + $0xd4] sm:$0xf] }
 0x18b   : > { %v10463_v46 = vrot.slane %v3608_v29, 11  ;;  %v1023_v32 = vsel %vm11813_vm11, %v10328_v12, %v1022_v30  ;;  %v1031_v48 = vor.u32 %v1029_v4, %v1028_v38  ;;  %v4155_v6 = vshll.u32 %v3942_v41, 16  ;;  %v3945_v60 = vld [vmem:[#allocation2 + $0xd8] sm:$0x1] }
 0x18c   : > { %v4142_v54 = vor.u32 %v4141_v42, %v4138_v34  ;;  %v4147_v55 = vrot.slane %v4145_v52, 5  ;;  %v1034_v22 = vshrl.u32 %v812_v31, 16  ;;  %3884 = vrot.lane.b32.xlu1 %v11260_v45, %s11557_s23  ;;  %v4151_v21 = vrot.slane %v4149_v27, 4  ;;  %v11262_v45 = vld [vmem:[#allocation2 + $0x8] sm:$0xff]  }
 0x18d   : > { %v3619_v59 = vsel %vm11813_vm11, %v10463_v46, %v3618_v17  ;;  %v1032_v62 = vsel %vm11813_vm11, %v1024_v61, %v1031_v48  ;;  %v1039_v63 = vshrl.u32 %v813_v50, 16  ;;  %v4157_v12 = vrot.slane %v4155_v6, 5  ;;  %v816_v46 = vld [vmem:[#allocation2 + $0xd0] sm:$0xf] }
 0x18e   : > { %v10479_v3 = vcombine.low %v3619_v59, %v3628_v39  ;;  %v10344_v13 = vcombine.low %v1023_v32, %v1032_v62  ;;  %v4143_v43 = vrot.slane %v4142_v54, 4  ;;  %v4152_v17 = vor.u32 %v4151_v21, %v4147_v55  ;;  %v815_v39 = vld [vmem:[#allocation2 + $0xcc] sm:$0x8]  ;;  %v817_v54 = vld [vmem:[#allocation2 + $0xd4] sm:$0xf]  ;;  %v12700_v59 = vpop.permute.xlu0 %3874  ;;  %v12702_v62 = vpop.permute.xlu1 %1402 }
 0x18f   : > { %v4444_v16 = vld [vmem:[#allocation3 + $0x68] sm:$0xff]  ;;  %v10329_v14 = vrot.slane %v1034_v22, 11  ;;  %v1041_v18 = vrot.slane %v1039_v63, 7  ;;  %v1042_v41 = vshll.u32 %v813_v50, 16  ;;  %v1048_v4 = vshrl.u32 %v814_v8, 16 }
 0x190   : > { %10528 = vmatprep.mubr.msk.bf16.mxu0 %vm1251_vm12, %v4444_v16  ;;  %3707 = vrot.lane.b32.xlu0 %v10479_v3, %s11559_s14  ;;  %1260 = vst.msk [vmem:[#allocation3 + $0x80] sm:$0xff] %vm1251_vm12, %v10344_v13  ;;  %v4148_v26 = vsel %vm11801_vm10, %v4143_v43, %v4147_v55  ;;  %v1051_v51 = vshll.u32 %v814_v8, 16  ;;  %v4160_v29 = vshrl.u32 %v3943_v58, 16  ;;  %v4153_v30 = vrot.slane %v4152_v17, 4  ;;  %v3947_v17 = vld [vmem:[#allocation2 + $0xe8] sm:$0xf] }
 0x191   : > { %4671 = vmatmul.mubr.bf16.gmra.mrb[24].mxu0 %v4443_v36  ;;  %1437 = vst.msk [vmem:[#allocation3 + $0x80] sm:$0xff] %vm1428_vm13, %v12526_v33  ;;  %v1044_v61 = vor.u32 %v1042_v41, %v1041_v18  ;;  %v1046_v38 = vrot.slane %v1041_v18, 4  ;;  %v4163_v31 = vshll.u32 %v3943_v58, 16  ;;  %v1050_v34 = vrot.slane %v1048_v4, 7  ;;  %v3946_v58 = vld [vmem:[#allocation2 + $0xe4] sm:$0xf] }
 0x192   : > { %1985 = vst.msk [vmem:[#allocation3 + $0x80] sm:$0xff] %vm1976_vm14, %v12528_v10  ;;  %v4162_v42 = vrot.slane %v4160_v29, 4  ;;  %v4169_v52 = vshll.u32 %v3944_v53, 16  ;;  %v4173_v50 = vshrl.u32 %v3944_v53, 16  ;;  %v4158_v32 = vsel %vm11801_vm10, %v4153_v30, %v4157_v12  ;;  %v818_v29 = vld [vmem:[#allocation2 + $0xe0] sm:$0x8] }
 0x193   : > { %2498 = vst.msk [vmem:[#allocation3 + $0x80] sm:$0xff] %vm2489_vm15, %v12541_v23  ;;  %v1045_v33 = vsel %vm11813_vm11, %v10329_v14, %v1044_v61  ;;  %v4165_v48 = vrot.slane %v4163_v31, 5  ;;  %v4179_v27 = vshll.u32 %v3945_v60, 16  ;;  %v10503_v10 = vcombine.low %v4148_v26, %v4158_v32  ;;  %v12721_v31 = vpop.permute.xlu0 %1950 }
 0x194   : > { %2675 = vst.msk [vmem:[#allocation3 + $0x80] sm:$0xff] %vm2666_vm1, %v12543_v5  ;;  %v1053_v55 = vor.u32 %v1051_v51, %v1050_v34  ;;  %v4171_v6 = vrot.slane %v4169_v52, 5  ;;  %v4175_v22 = vrot.slane %v4173_v50, 4  ;;  %5567 = vrot.lane.b32.xlu0 %v11262_v45, %s11555_s28  ;;  %v1056_v8 = vshrl.u32 %v815_v39, 16  ;;  %v3948_v51 = vld [vmem:[#allocation2 + $0xec] sm:$0x1]  ;;  %v12723_v39 = vpop.permute.xlu1 %2463 }
 0x195   : > { %3220 = vst.msk [vmem:[#allocation3 + $0x80] sm:$0xff] %vm3211_vm2, %v12555_v47  ;;  %v4166_v23 = vor.u32 %v4165_v48, %v4162_v42  ;;  %v4181_v21 = vrot.slane %v4179_v27, 5  ;;  %v1061_v63 = vshrl.u32 %v816_v46, 16  ;;  %v1064_v3 = vshll.u32 %v816_v46, 16  ;;  %v820_v50 = vld [vmem:[#allocation2 + $0xe8] sm:$0xf] }
 0x196   : > { %4422 = vst.msk [vmem:[#allocation3 + $0x78] sm:$0xff] %vm1251_vm12, %v10503_v10  ;;  %v1054_v5 = vsel %vm11813_vm11, %v1046_v38, %v1053_v55  ;;  %v4176_v36 = vor.u32 %v4175_v22, %v4171_v6  ;;  %v1070_v13 = vshrl.u32 %v817_v54, 16  ;;  %v10330_v12 = vrot.slane %v1056_v8, 11  ;;  %v819_v38 = vld [vmem:[#allocation2 + $0xe4] sm:$0xf]  ;;  %v4445_v46 = vld [vmem:[#allocation3 + $0x70] sm:$0xff] }
 0x197   : > { %3734 = vst.msk [vmem:[#allocation3 + $0x80] sm:$0xff] %vm3725_vm3, %v12557_v44  ;;  %v10345_v47 = vcombine.low %v1045_v33, %v1054_v5  ;;  %v4167_v43 = vrot.slane %v4166_v23, 4  ;;  %v1063_v16 = vrot.slane %v1061_v63, 7  ;;  %v1073_v41 = vshll.u32 %v817_v54, 16  ;;  %v3949_v54 = vld [vmem:[#allocation2 + $0xf8] sm:$0xf] }
 0x198   : > { %3911 = vst.msk [vmem:[#allocation3 + $0x80] sm:$0xff] %vm3902_vm4, %v12583_v56  ;;  %v4177_v14 = vrot.slane %v4176_v36, 4  ;;  %v1072_v18 = vrot.slane %v1070_v13, 7  ;;  %v4184_v53 = vshrl.u32 %v3946_v58, 16  ;;  %v4187_v60 = vshll.u32 %v3946_v58, 16 }
 0x199   : > { %1261 = vst.msk [vmem:[#allocation3 + $0x90] sm:$0xff] %vm1251_vm12, %v10345_v47  ;;  %v4172_v44 = vsel %vm11801_vm10, %v4167_v43, %v4171_v6  ;;  %v1066_v26 = vor.u32 %v1064_v3, %v1063_v16  ;;  %v1068_v4 = vrot.slane %v1063_v16, 4  ;;  %v4193_v61 = vshll.u32 %v3947_v17, 16  ;;  %v3950_v23 = vld [vmem:[#allocation2 + $0xfc] sm:$0xf]  ;;  %v12746_v3 = vpop.permute.xlu0 %2640 }
 0x19a   : > { %1438 = vst.msk [vmem:[#allocation3 + $0x90] sm:$0xff] %vm1428_vm13, %v12585_v35  ;;  %v4182_v56 = vsel %vm11801_vm10, %v4177_v14, %v4181_v21  ;;  %v1075_v45 = vor.u32 %v1073_v41, %v1072_v18  ;;  %v4186_v30 = vrot.slane %v4184_v53, 4  ;;  %v4189_v52 = vrot.slane %v4187_v60, 5  ;;  %v3951_v13 = vld [vmem:[#allocation2 + $0x100] sm:$0x1] }
 0x19b   : > { %1986 = vst.msk [vmem:[#allocation3 + $0x90] sm:$0xff] %vm1976_vm14, %v12597_v37  ;;  %v10504_v34 = vcombine.low %v4172_v44, %v4182_v56  ;;  %v1067_v42 = vsel %vm11813_vm11, %v10330_v12, %v1066_v26  ;;  %v4197_v35 = vshrl.u32 %v3947_v17, 16  ;;  %v4195_v33 = vrot.slane %v4193_v61, 5  ;;  %v821_v18 = vld [vmem:[#allocation2 + $0xf4] sm:$0x8] }
 0x19c   : > { %2499 = vst.msk [vmem:[#allocation3 + $0x90] sm:$0xff] %vm2489_vm15, %v12599_v49  ;;  %v1076_v32 = vsel %vm11813_vm11, %v1068_v4, %v1075_v45  ;;  %v4203_v48 = vshll.u32 %v3948_v51, 16  ;;  %v1078_v27 = vshrl.u32 %v818_v29, 16  ;;  %v4190_v55 = vor.u32 %v4189_v52, %v4186_v30  ;;  %v822_v26 = vld [vmem:[#allocation2 + $0xf8] sm:$0xf] }
 0x19d   : > { %v4446_v10 = vld [vmem:[#allocation3 + $0x78] sm:$0xff]  ;;  %2676 = vst.msk [vmem:[#allocation3 + $0x90] sm:$0xff] %vm2666_vm1, %v12611_v19  ;;  %v10346_v37 = vcombine.low %v1067_v42, %v1076_v32  ;;  %v4199_v6 = vrot.slane %v4197_v35, 4  ;;  %v1083_v22 = vshrl.u32 %v819_v38, 16  ;;  %v1086_v8 = vshll.u32 %v819_v38, 16 }
 0x19e   : > { %4423 = vst.msk [vmem:[#allocation3 + $0x88] sm:$0xff] %vm1251_vm12, %v10504_v34  ;;  %10529 = vmatprep.mubr.msk.bf16.mxu0 %vm1251_vm12, %v4446_v10  ;;  %v4205_v49 = vrot.slane %v4203_v48, 5  ;;  %v10331_v21 = vrot.slane %v1078_v27, 11  ;;  %v1092_v63 = vshrl.u32 %v820_v50, 16  ;;  %v4191_v19 = vrot.slane %v4190_v55, 4 }
 0x19f   : > { %3221 = vst.msk [vmem:[#allocation3 + $0x90] sm:$0xff] %vm3211_vm2, %v12613_v7  ;;  %4679 = vmatmul.mubr.bf16.gmra.mrb[28].mxu0 %v4445_v46  ;;  %v4200_v58 = vor.u32 %v4199_v6, %v4195_v33  ;;  %v1085_v5 = vrot.slane %v1083_v22, 7  ;;  %v1095_v36 = vshll.u32 %v820_v50, 16  ;;  %v4208_v47 = vshrl.u32 %v3949_v54, 16  ;;  %v823_v29 = vld [vmem:[#allocation2 + $0xfc] sm:$0xf] }
 0x1a0   : > { %3735 = vst.msk [vmem:[#allocation3 + $0x90] sm:$0xff] %vm3725_vm3, %v12635_v28  ;;  %v1094_v7 = vrot.slane %v1092_v63, 7  ;;  %v4211_v43 = vshll.u32 %v3949_v54, 16  ;;  %v4217_v12 = vshll.u32 %v3950_v23, 16  ;;  %v12748_v28 = vpop.permute.xlu1 %3185  ;;  %v4196_v16 = vsel %vm11801_vm10, %v4191_v19, %v4195_v33  ;;  %v3952_v38 = vld [vmem:[#allocation2 + $0x10c] sm:$0xf] }
 0x1a1   : > { %1262 = vst.msk [vmem:[#allocation3 + $0xa0] sm:$0xff] %vm1251_vm12, %v10346_v37  ;;  %v4201_v17 = vrot.slane %v4200_v58, 4  ;;  %v1090_v14 = vrot.slane %v1085_v5, 4  ;;  %v4210_v41 = vrot.slane %v4208_v47, 4  ;;  %v4221_v51 = vshrl.u32 %v3950_v23, 16 }
 0x1a2   : > { %3912 = vst.msk [vmem:[#allocation3 + $0x90] sm:$0xff] %vm3902_vm4, %v12637_v11  ;;  %v1088_v11 = vor.u32 %v1086_v8, %v1085_v5  ;;  %v4213_v53 = vrot.slane %v4211_v43, 5  ;;  %v12756_v44 = vrot.slane %v4217_v12, 5  ;;  %v4227_v60 = vshll.u32 %v3951_v13, 16  ;;  %v3953_v50 = vld [vmem:[#allocation2 + $0x110] sm:$0xf] }
 0x1a3   : > { %1439 = vst.msk [vmem:[#allocation3 + $0xa0] sm:$0xff] %vm1428_vm13, %v12654_v1  ;;  %v1097_v1 = vor.u32 %v1095_v36, %v1094_v7  ;;  %v4223_v42 = vrot.slane %v4221_v51, 4  ;;  %v1105_v35 = vshrl.u32 %v822_v26, 16  ;;  %v1108_v48 = vshll.u32 %v822_v26, 16  ;;  %v3954_v37 = vld [vmem:[#allocation2 + $0x114] sm:$0x1] }
 0x1a4   : > { %1987 = vst.msk [vmem:[#allocation3 + $0xa0] sm:$0xff] %vm1976_vm14, %v12656_v57  ;;  %v4206_v57 = vsel %vm11801_vm10, %v4201_v17, %v4205_v49  ;;  %v1089_v4 = vsel %vm11813_vm11, %v10331_v21, %v1088_v11  ;;  %v4214_v61 = vor.u32 %v4213_v53, %v4210_v41  ;;  %v4229_v52 = vrot.slane %v4227_v60, 5  ;;  %v3877_v32 = vpop.permute.xlu1 %3876  ;;  %v824_v49 = vld [vmem:[#allocation2 + $0x108] sm:$0x8]  ;;  %v825_v13 = vld [vmem:[#allocation2 + $0x10c] sm:$0xf] }
 0x1a5   : > { %2500 = vst.msk [vmem:[#allocation3 + $0xa0] sm:$0xff] %vm2489_vm15, %v12665_v15  ;;  %v4448_v56 = vld [vmem:[#allocation3 + $0x88] sm:$0xff]  ;;  %v4447_v15 = vld [vmem:[#allocation3 + $0x80] sm:$0xff]  ;;  %v10505_v45 = vcombine.low %v4196_v16, %v4206_v57  ;;  %v1098_v30 = vsel %vm11813_vm11, %v1090_v14, %v1097_v1  ;;  %v1114_v27 = vshrl.u32 %v823_v29, 16  ;;  %v1107_v54 = vrot.slane %v1105_v35, 7 }
 0x1a6   : > { %2677 = vst.msk [vmem:[#allocation3 + $0xa0] sm:$0xff] %vm2666_vm1, %v12667_v40  ;;  %v1100_v40 = vshrl.u32 %v821_v18, 16  ;;  %10530 = vmatprep.mubr.msk.bf16.mxu0 %vm1251_vm12, %v4448_v56  ;;  %v10347_v34 = vcombine.low %v1089_v4, %v1098_v30  ;;  %v3700_v46 = vpop.permute.xlu0 %3699  ;;  %v1117_v10 = vshll.u32 %v823_v29, 16  ;;  %v4232_v55 = vshrl.u32 %v3952_v38, 16  ;;  %v826_v12 = vld [vmem:[#allocation2 + $0x110] sm:$0xf] }
 0x1a7   : > { %3222 = vst.msk [vmem:[#allocation3 + $0xa0] sm:$0xff] %vm3211_vm2, %v12679_v24  ;;  %v4215_v24 = vrot.slane %v4214_v61, 4  ;;  %4687 = vmatmul.mubr.bf16.gmra.mrb[32].mxu0 %v4447_v15  ;;  %v1116_v6 = vrot.slane %v1114_v27, 7  ;;  %v4235_v22 = vshll.u32 %v3952_v38, 16  ;;  %v4241_v23 = vshll.u32 %v3953_v50, 16 }
 0x1a8   : > { %3736 = vst.msk [vmem:[#allocation3 + $0xa0] sm:$0xff] %vm3725_vm3, %v12681_v25  ;;  %v10332_v33 = vrot.slane %v1100_v40, 11  ;;  %v4224_v25 = vor.u32 %v4223_v42, %v12756_v44  ;;  %v1110_v8 = vor.u32 %v1108_v48, %v1107_v54  ;;  %v1112_v63 = vrot.slane %v1107_v54, 4  ;;  %v1953_v14 = vpop.permute.xlu1 %1952  ;;  %v3955_v1 = vld [vmem:[#allocation2 + $0x120] sm:$0xf] }
 0x1a9   : > { %4424 = vst.msk [vmem:[#allocation3 + $0x98] sm:$0xff] %vm1251_vm12, %v10505_v45  ;;  %1263 = vst.msk [vmem:[#allocation3 + $0xb0] sm:$0xff] %vm1251_vm12, %v10347_v34  ;;  %v4234_v19 = vrot.slane %v4232_v55, 4  ;;  %v1119_v58 = vor.u32 %v1117_v10, %v1116_v6  ;;  %v4237_v5 = vrot.slane %v4235_v22, 5  ;;  %v4243_v36 = vrot.slane %v4241_v23, 5  ;;  %v4449_v17 = vld [vmem:[#allocation3 + $0x90] sm:$0xff] }
 0x1aa   : > { %3913 = vst.msk [vmem:[#allocation3 + $0xa0] sm:$0xff] %vm3902_vm4, %v12700_v59  ;;  %v4220_v59 = vsel %vm11801_vm10, %v4215_v24, %v12756_v44  ;;  %v4225_v21 = vrot.slane %v4224_v25, 4  ;;  %v4245_v7 = vshrl.u32 %v3953_v50, 16  ;;  %v4251_v43 = vshll.u32 %v3954_v37, 16  ;;  %v3956_v4 = vld [vmem:[#allocation2 + $0x124] sm:$0xf] }
 0x1ab   : > { %1440 = vst.msk [vmem:[#allocation3 + $0xb0] sm:$0xff] %vm1428_vm13, %v12702_v62  ;;  %v1405_v62 = vpop.permute.xlu0 %1404  ;;  %v1122_v16 = vshrl.u32 %v824_v49, 16  ;;  %v1120_v11 = vsel %vm11813_vm11, %v1112_v63, %v1119_v58  ;;  %v4238_v18 = vor.u32 %v4237_v5, %v4234_v19  ;;  %v1127_v57 = vshrl.u32 %v825_v13, 16  ;;  %v3957_v45 = vld [vmem:[#allocation2 + $0x128] sm:$0x1] }
 0x1ac   : > { %1988 = vst.msk [vmem:[#allocation3 + $0xb0] sm:$0xff] %vm1976_vm14, %v12721_v31  ;;  %v4230_v47 = vsel %vm11801_vm10, %v4225_v21, %v4229_v52  ;;  %v1111_v31 = vsel %vm11813_vm11, %v10332_v33, %v1110_v8  ;;  %v4253_v44 = vrot.slane %v4251_v43, 5  ;;  %v1130_v60 = vshll.u32 %v825_v13, 16  ;;  %v827_v35 = vld [vmem:[#allocation2 + $0x11c] sm:$0x8]  ;;  %v2643_v48 = vpop.permute.xlu1 %2642 }
 0x1ad   : > { %2501 = vst.msk [vmem:[#allocation3 + $0xb0] sm:$0xff] %vm2489_vm15, %v12723_v39  ;;  %v10506_v39 = vcombine.low %v4220_v59, %v4230_v47  ;;  %v10348_v53 = vcombine.low %v1111_v31, %v1120_v11  ;;  %v10333_v26 = vrot.slane %v1122_v16, 11  ;;  %v1136_v29 = vshrl.u32 %v826_v12, 16  ;;  %v828_v33 = vld [vmem:[#allocation2 + $0x120] sm:$0xf] }
 0x1ae   : > { %2678 = vst.msk [vmem:[#allocation3 + $0xb0] sm:$0xff] %vm2666_vm1, %v12746_v3  ;;  %v4247_v3 = vrot.slane %v4245_v7, 4  ;;  %v1129_v56 = vrot.slane %v1127_v57, 7  ;;  %v1139_v15 = vshll.u32 %v826_v12, 16  ;;  %v4256_v30 = vshrl.u32 %v3955_v1, 16 }
 0x1af   : > { %3223 = vst.msk [vmem:[#allocation3 + $0xb0] sm:$0xff] %vm3211_vm2, %v12748_v28  ;;  %v4239_v28 = vrot.slane %v4238_v18, 4  ;;  %v4259_v61 = vshll.u32 %v3955_v1, 16  ;;  %v2466_v40 = vpop.permute.xlu0 %2465  ;;  %v1138_v42 = vrot.slane %v1136_v29, 7  ;;  %v4265_v52 = vshll.u32 %v3956_v4, 16 }
 0x1b0   : > { %v4450_v41 = vld [vmem:[#allocation3 + $0x98] sm:$0xff]  ;;  %3737 = vst.msk [vmem:[#allocation3 + $0xb0] sm:$0xff] %vm3725_vm3, %v3700_v46  ;;  %v4248_v51 = vor.u32 %v4247_v3, %v4243_v36  ;;  %v1132_v50 = vor.u32 %v1130_v60, %v1129_v56  ;;  %v1134_v24 = vrot.slane %v1129_v56, 4  ;;  %v4258_v46 = vrot.slane %v4256_v30, 4  ;;  %v3958_v19 = vld [vmem:[#allocation2 + $0x134] sm:$0xf] }
 0x1b1   : > { %10531 = vmatprep.mubr.msk.bf16.mxu0 %vm1251_vm12, %v4450_v41  ;;  %4425 = vst.msk [vmem:[#allocation3 + $0xa8] sm:$0xff] %vm1251_vm12, %v10506_v39  ;;  %1264 = vst.msk [vmem:[#allocation3 + $0xc0] sm:$0xff] %vm1251_vm12, %v10348_v53  ;;  %v4244_v38 = vsel %vm11801_vm10, %v4239_v28, %v4243_v36  ;;  %v1141_v25 = vor.u32 %v1139_v15, %v1138_v42  ;;  %v4267_v54 = vrot.slane %v4265_v52, 5  ;;  %v4269_v10 = vshrl.u32 %v3956_v4, 16  ;;  %v829_v22 = vld [vmem:[#allocation2 + $0x124] sm:$0xf] }
 0x1b2   : > { %3914 = vst.msk [vmem:[#allocation3 + $0xb0] sm:$0xff] %vm3902_vm4, %v3877_v32  ;;  %4695 = vmatmul.mubr.bf16.gmra.mrb[36].mxu0 %v4449_v17  ;;  %v4249_v34 = vrot.slane %v4248_v51, 4  ;;  %v4261_v32 = vrot.slane %v4259_v61, 5  ;;  %v1133_v55 = vsel %vm11813_vm11, %v10333_v26, %v1132_v50  ;;  %v4275_v6 = vshll.u32 %v3957_v45, 16  ;;  %v4451_v23 = vld [vmem:[#allocation3 + $0xa0] sm:$0xff] }
 0x1b3   : > { %1441 = vst.msk [vmem:[#allocation3 + $0xc0] sm:$0xff] %vm1428_vm13, %v1405_v62  ;;  %v1142_v49 = vsel %vm11813_vm11, %v1134_v24, %v1141_v25  ;;  %v4271_v21 = vrot.slane %v4269_v10, 4  ;;  %v1144_v8 = vshrl.u32 %v827_v35, 16  ;;  %v1149_v63 = vshrl.u32 %v828_v33, 16  ;;  %v3959_v16 = vld [vmem:[#allocation2 + $0x138] sm:$0xf] }
 0x1b4   : > { %1989 = vst.msk [vmem:[#allocation3 + $0xc0] sm:$0xff] %vm1976_vm14, %v1953_v14  ;;  %v4254_v27 = vsel %vm11801_vm10, %v4249_v34, %v4253_v44  ;;  %v4262_v59 = vor.u32 %v4261_v32, %v4258_v46  ;;  %v10349_v62 = vcombine.low %v1133_v55, %v1142_v49  ;;  %v4277_v36 = vrot.slane %v4275_v6, 5  ;;  %v3960_v11 = vld [vmem:[#allocation2 + $0x13c] sm:$0x1]  ;;  %v830_v44 = vld [vmem:[#allocation2 + $0x130] sm:$0x8] }
 0x1b5   : > { %2502 = vst.msk [vmem:[#allocation3 + $0xc0] sm:$0xff] %vm2489_vm15, %v2466_v40  ;;  %v10507_v37 = vcombine.low %v4244_v38, %v4254_v27  ;;  %v1152_v7 = vshll.u32 %v828_v33, 16  ;;  %v4272_v47 = vor.u32 %v4271_v21, %v4267_v54  ;;  %v10334_v31 = vrot.slane %v1144_v8, 11  ;;  %v831_v51 = vld [vmem:[#allocation2 + $0x134] sm:$0xf] }
 0x1b6   : > { %2679 = vst.msk [vmem:[#allocation3 + $0xc0] sm:$0xff] %vm2666_vm1, %v2643_v48  ;;  %v4263_v5 = vrot.slane %v4262_v59, 4  ;;  %v3188_v13 = vpop.permute.xlu0 %3187  ;;  %v1151_v43 = vrot.slane %v1149_v63, 7  ;;  %v1158_v12 = vshrl.u32 %v829_v22, 16  ;;  %v1161_v39 = vshll.u32 %v829_v22, 16 }
 0x1b7   : > { %4426 = vst.msk [vmem:[#allocation3 + $0xb8] sm:$0xff] %vm1251_vm12, %v10507_v37  ;;  %1265 = vst.msk [vmem:[#allocation3 + $0xd0] sm:$0xff] %vm1251_vm12, %v10349_v62  ;;  %v4280_v14 = vshrl.u32 %v3958_v19, 16  ;;  %v4283_v18 = vshll.u32 %v3958_v19, 16  ;;  %v4273_v3 = vrot.slane %v4272_v47, 4  ;;  %v4289_v4 = vshll.u32 %v3959_v16, 16 }
 0x1b8   : > { %v4452_v58 = vld [vmem:[#allocation3 + $0xa8] sm:$0xff]  ;;  %3224 = vst.msk [vmem:[#allocation3 + $0xc0] sm:$0xff] %vm3211_vm2, %v3188_v13  ;;  %v4268_v17 = vsel %vm11801_vm10, %v4263_v5, %v4267_v54  ;;  %v1154_v1 = vor.u32 %v1152_v7, %v1151_v43  ;;  %v1156_v41 = vrot.slane %v1151_v43, 4  ;;  %v1160_v53 = vrot.slane %v1158_v12, 7  ;;  %v832_v42 = vld [vmem:[#allocation2 + $0x138] sm:$0xf] }
 0x1b9   : > { %10532 = vmatprep.mubr.msk.bf16.mxu0 %vm1251_vm12, %v4452_v58  ;;  %v4282_v26 = vrot.slane %v4280_v14, 4  ;;  %v4285_v57 = vrot.slane %v4283_v18, 5  ;;  %v4293_v28 = vshrl.u32 %v3959_v16, 16  ;;  %v3702_v60 = vpop.permute.xlu1 %3701  ;;  %v4278_v56 = vsel %vm11801_vm10, %v4273_v3, %v4277_v36  ;;  %v3961_v52 = vld [vmem:[#allocation2 + $0x148] sm:$0xf]  ;;  %v4453_v50 = vld [vmem:[#allocation3 + $0xb0] sm:$0xff] }
 0x1ba   : > { %4703 = vmatmul.mubr.bf16.gmra.mrb[40].mxu0 %v4451_v23  ;;  %v3879_v29 = vpop.permute.xlu0 %3878  ;;  %v1155_v15 = vsel %vm11813_vm11, %v10334_v31, %v1154_v1  ;;  %v1163_v45 = vor.u32 %v1161_v39, %v1160_v53  ;;  %v4299_v30 = vshll.u32 %v3960_v11, 16  ;;  %3738 = vst.msk [vmem:[#allocation3 + $0xc0] sm:$0xff] %vm3725_vm3, %v3702_v60  ;;  %v10508_v61 = vcombine.low %v4268_v17, %v4278_v56  ;;  %v3962_v10 = vld [vmem:[#allocation2 + $0x14c] sm:$0xf]  ;;  %v478_v63 = vld [vmem:[#allocation2 + $0x164] sm:$0x1] }
 0x1bb   : > { %v4286_v40 = vor.u32 %v4285_v57, %v4282_v26  ;;  %v4291_v38 = vrot.slane %v4289_v4, 5  ;;  %v4295_v34 = vrot.slane %v4293_v28, 4  ;;  %3915 = vst.msk [vmem:[#allocation3 + $0xc0] sm:$0xff] %vm3902_vm4, %v3879_v29  ;;  %v1166_v32 = vshrl.u32 %v830_v44, 16  ;;  %v3963_v36 = vld [vmem:[#allocation2 + $0x150] sm:$0x1] }
 0x1bc   : > { %v1164_v24 = vsel %vm11813_vm11, %v1156_v41, %v1163_v45  ;;  %v4301_v46 = vrot.slane %v4299_v30, 5  ;;  %v1171_v33 = vshrl.u32 %v831_v51, 16  ;;  %4427 = vst.msk [vmem:[#allocation3 + $0xc8] sm:$0xff] %vm1251_vm12, %v10508_v61  ;;  %v1174_v54 = vshll.u32 %v831_v51, 16  ;;  %v3964_v12 = vld [vmem:[#allocation2 + $0x15c] sm:$0xf] }
 0x1bd   : > { %v10350_v48 = vcombine.low %v1155_v15, %v1164_v24  ;;  %v4287_v27 = vrot.slane %v4286_v40, 4  ;;  %v4296_v25 = vor.u32 %v4295_v34, %v4291_v38  ;;  %v1407_v37 = vpop.permute.xlu1 %1406  ;;  %v10335_v55 = vrot.slane %v1166_v32, 11  ;;  %v3965_v53 = vld [vmem:[#allocation2 + $0x160] sm:$0xf]  ;;  %v5631_v30 = vld [vmem:[#allocation2 + $0x8] sm:$0xf] }
 0x1be   : > { %v4454_v35 = vld [vmem:[#allocation3 + $0xb8] sm:$0xff]  ;;  %v1173_v59 = vrot.slane %v1171_v33, 7  ;;  %v1180_v6 = vshrl.u32 %v832_v42, 16  ;;  %v1183_v22 = vshll.u32 %v832_v42, 16  ;;  %1442 = vst.msk [vmem:[#allocation3 + $0xd0] sm:$0xff] %vm1428_vm13, %v1407_v37  ;;  %v4304_v21 = vshrl.u32 %v3961_v52, 16 }
 0x1bf   : > { %10533 = vmatprep.mubr.msk.bf16.mxu0 %vm1251_vm12, %v4454_v35  ;;  %1266 = vst.msk [vmem:[#allocation3 + $0xe0] sm:$0xff] %vm1251_vm12, %v10350_v48  ;;  %v4292_v23 = vsel %vm11801_vm10, %v4287_v27, %v4291_v38  ;;  %v4297_v49 = vrot.slane %v4296_v25, 4  ;;  %v4307_v8 = vshll.u32 %v3961_v52, 16  ;;  %v1955_v19 = vpop.permute.xlu0 %1954  ;;  %v4313_v7 = vshll.u32 %v3962_v10, 16  ;;  %v8140_v38 = vld [vmem:[#allocation2 + $0x15c] sm:$0xf] }
 0x1c0   : > { %v1176_v58 = vor.u32 %v1174_v54, %v1173_v59  ;;  %v1178_v62 = vrot.slane %v1173_v59, 4  ;;  %v1182_v5 = vrot.slane %v1180_v6, 7  ;;  %1990 = vst.msk [vmem:[#allocation3 + $0xd0] sm:$0xff] %vm1976_vm14, %v1955_v19  ;;  %v4306_v47 = vrot.slane %v4304_v21, 4  ;;  %v8141_v35 = vld [vmem:[#allocation2 + $0x160] sm:$0xf] }
 0x1c1   : > { %v4302_v13 = vsel %vm11801_vm10, %v4297_v49, %v4301_v46  ;;  %v4309_v31 = vrot.slane %v4307_v8, 5  ;;  %v4317_v43 = vshrl.u32 %v3962_v10, 16  ;;  %v2468_v16 = vpop.permute.xlu1 %2467  ;;  %v4315_v14 = vrot.slane %v4313_v7, 5  ;;  %v5633_v25 = vld [vmem:[#allocation2 + $0x10] sm:$0x1] }
 0x1c2   : > { %4711 = vmatmul.mubr.bf16.gmra.mrb[44].mxu0 %v4453_v50  ;;  %v10509_v17 = vcombine.low %v4292_v23, %v4302_v13  ;;  %v1177_v39 = vsel %vm11813_vm11, %v10335_v55, %v1176_v58  ;;  %v1185_v11 = vor.u32 %v1183_v22, %v1182_v5  ;;  %2503 = vst.msk [vmem:[#allocation3 + $0xd0] sm:$0xff] %vm2489_vm15, %v2468_v16  ;;  %v4323_v1 = vshll.u32 %v3963_v36, 16  ;;  %v4455_v57 = vld [vmem:[#allocation3 + $0xc0] sm:$0xff] }
 0x1c3   : > { %v4310_v18 = vor.u32 %v4309_v31, %v4306_v47  ;;  %v4319_v3 = vrot.slane %v4317_v43, 4  ;;  %v479_v41 = vsel %vm11746_vm6, 0, %v478_v63  ;;  %v2645_v44 = vpop.permute.xlu0 %2644  ;;  %v4456_v26 = vld [vmem:[#allocation3 + $0xc8] sm:$0xff]  ;;  %v4328_v28 = vshrl.u32 %v3964_v12, 16  ;;  %v5632_v50 = vld [vmem:[#allocation2 + $0xc] sm:$0xf] }
 0x1c4   : > { %4428 = vst.msk [vmem:[#allocation3 + $0xd8] sm:$0xff] %vm1251_vm12, %v10509_v17  ;;  %v1186_v4 = vsel %vm11813_vm11, %v1178_v62, %v1185_v11  ;;  %480 = vst [vmem:[#allocation2 + $0x164] sm:$0x1] %v479_v41  ;;  %10534 = vmatprep.mubr.msk.bf16.mxu0 %vm1251_vm12, %v4456_v26  ;;  %v4325_v56 = vrot.slane %v4323_v1, 5  ;;  %v4331_v15 = vshll.u32 %v3964_v12, 16  ;;  %v4337_v45 = vshll.u32 %v3965_v53, 16 }
 0x1c5   : > { %2680 = vst.msk [vmem:[#allocation3 + $0xd0] sm:$0xff] %vm2666_vm1, %v2645_v44  ;;  %v10351_v51 = vcombine.low %v1177_v39, %v1186_v4  ;;  %v4311_v60 = vrot.slane %v4310_v18, 4  ;;  %v4320_v29 = vor.u32 %v4319_v3, %v4315_v14  ;;  %v4341_v34 = vshrl.u32 %v3965_v53, 16 }
 0x1c6   : > { %v4330_v52 = vrot.slane %v4328_v28, 4  ;;  %v5680_v24 = vshrl.u32 %v5631_v30, 16  ;;  %v4333_v33 = vrot.slane %v4331_v15, 5  ;;  %v4339_v48 = vrot.slane %v4337_v45, 5 }
 0x1c7   : > { %1267 = vst.msk [vmem:[#allocation3 + $0xf0] sm:$0xff] %vm1251_vm12, %v10351_v51  ;;  %v4316_v61 = vsel %vm11801_vm10, %v4311_v60, %v4315_v14  ;;  %v4321_v40 = vrot.slane %v4320_v29, 4  ;;  %v8504_v27 = vshrl.u32 %v8140_v38, 16  ;;  %v8507_v37 = vshll.u32 %v8140_v38, 16 }
 0x1c8   : > { %v5682_v55 = vrot.slane %v5680_v24, 4  ;;  %v5683_v59 = vshll.u32 %v5631_v30, 16  ;;  %v4343_v22 = vrot.slane %v4341_v34, 4  ;;  %v8513_v23 = vshll.u32 %v8141_v35, 16 }
 0x1c9   : > { %v4326_v42 = vsel %vm11801_vm10, %v4321_v40, %v4325_v56  ;;  %v3190_v46 = vpop.permute.xlu1 %3189  ;;  %v5689_v49 = vshll.u32 %v5632_v50, 16  ;;  %v8517_v21 = vshrl.u32 %v8141_v35, 16  ;;  %v5693_v63 = vshrl.u32 %v5632_v50, 16  ;;  %v6175_v35 = vld [vmem:[#allocation2 + $0x18] sm:$0x8] }
 0x1ca   : > { %4719 = vmatmul.mubr.bf16.gmra.mrb[48].mxu0 %v4455_v57  ;;  %v10510_v32 = vcombine.low %v4316_v61, %v4326_v42  ;;  %3225 = vst.msk [vmem:[#allocation3 + $0xd0] sm:$0xff] %vm3211_vm2, %v3190_v46  ;;  %v5685_v8 = vrot.slane %v5683_v59, 5  ;;  %v5699_v58 = vshll.u32 %v5633_v25, 16  ;;  %v4334_v62 = vor.u32 %v4333_v33, %v4330_v52  ;;  %v12877_v46 = vld [vmem:[%s14978_s2] ss:$0 sm:$0xff] }
 0x1cb   : > { %v4458_v54 = vld [vmem:[#allocation3 + $0xd8] sm:$0xff]  ;;  %v5691_v19 = vrot.slane %v5689_v49, 5  ;;  %v5695_v36 = vrot.slane %v5693_v63, 4  ;;  %v4344_v7 = vor.u32 %v4343_v22, %v4339_v48  ;;  %v8506_v13 = vrot.slane %v8504_v27, 4  ;;  %v6868_v63 = vld [vmem:[#allocation2 + $0x38] sm:$0x1] }
 0x1cc   : > { %v589_v10 = vld [vmem:[#allocation2 + $0x164] sm:$0x1]  ;;  %10535 = vmatprep.mubr.msk.bf16.mxu0 %vm1251_vm12, %v4458_v54  ;;  %4429 = vst.msk [vmem:[#allocation3 + $0xe8] sm:$0xff] %vm1251_vm12, %v10510_v32  ;;  %v5686_v5 = vor.u32 %v5685_v8, %v5682_v55  ;;  %v8509_v47 = vrot.slane %v8507_v37, 5  ;;  %v8515_v31 = vrot.slane %v8513_v23, 5  ;;  %v8519_v43 = vrot.slane %v8517_v21, 4 }
 0x1cd   : > { %v590_v6 = vsel %vm11746_vm6, 0, %v589_v10  ;;  %v5696_v2 = vor.u32 %v5695_v36, %v5691_v19  ;;  %v5701_v16 = vrot.slane %v5699_v58, 5  ;;  %v3881_v17 = vpop.permute.xlu1 %3880  ;;  %v4335_v39 = vrot.slane %v4334_v62, 4  ;;  %v7407_v32 = vld [vmem:[#allocation2 + $0x2c] sm:$0x8] }
 0x1ce   : > { %591 = vst [vmem:[#allocation2 + $0x164] sm:$0x1] %v590_v6  ;;  %v5687_v12 = vrot.slane %v5686_v5, 4  ;;  %v4345_v3 = vrot.slane %v4344_v7, 4  ;;  %v8510_v41 = vor.u32 %v8509_v47, %v8506_v13  ;;  %v8520_v26 = vor.u32 %v8519_v43, %v8515_v31  ;;  %v6178_v37 = vld [vmem:[#allocation2 + $0x2c] sm:$0x8] }
 0x1cf   : > { %v5697_v14 = vrot.slane %v5696_v2, 4  ;;  %v4340_v51 = vsel %vm11801_vm10, %v4335_v39, %v4339_v48  ;;  %v6224_v27 = vshrl.u32 %v6175_v35, 16  ;;  %v7456_v10 = vshrl.u32 %v7407_v32, 16  ;;  %v6865_v55 = vld [vmem:[#allocation2 + $0x24] sm:$0x1]  ;;  %v11450_v5 = vld [vmem:[%s11721_s20] sm:$0xff] }
 0x1d0   : > { %v5692_v11 = vsel %vm11801_vm10, %v5687_v12, %v5691_v19  ;;  %v8511_v45 = vrot.slane %v8510_v41, 4  ;;  %v8521_v30 = vrot.slane %v8520_v26, 4  ;;  %v8097_v6 = vld [vmem:[#allocation2 + $0x38] sm:$0x1]  ;;  %v5636_v22 = vld [vmem:[#allocation2 + $0x24] sm:$0x1] }
 0x1d1   : > { %v5702_v4 = vsel %vm11801_vm10, %v5697_v14, %v5701_v16  ;;  %v1957_v29 = vpop.permute.xlu1 %1956  ;;  %v12886_v19 = vrot.slane %v6224_v27, 11  ;;  %v7410_v58 = vld [vmem:[#allocation2 + $0x40] sm:$0x8]  ;;  %v5639_v62 = vld [vmem:[#allocation2 + $0x38] sm:$0x1]  ;;  %v12889_v13 = vrot.slane %v7456_v10, 11 }
 0x1d2   : > { %v10618_v28 = vcombine.low %v5692_v11, %v5702_v4  ;;  %v8516_v42 = vsel %vm11801_vm10, %v8511_v45, %v8515_v31  ;;  %v6246_v47 = vshrl.u32 %v6178_v37, 16  ;;  %v6181_v31 = vld [vmem:[#allocation2 + $0x40] sm:$0x8]  ;;  %v6931_v43 = vshll.u32 %v6865_v55, 16  ;;  %v7413_v2 = vld [vmem:[#allocation2 + $0x54] sm:$0x8] }
 0x1d3   : > { %v4460_v34 = vld [vmem:[#allocation3 + $0xe8] sm:$0xff]  ;;  %v8163_v12 = vshll.u32 %v8097_v6, 16  ;;  %v5642_v41 = vld [vmem:[#allocation2 + $0x4c] sm:$0x1]  ;;  %v6874_v26 = vld [vmem:[#allocation2 + $0x60] sm:$0x1] }
 0x1d4   : > { %v3704_v53 = vpop.permute.xlu0 %3703  ;;  %6111 = vrot.lane.b32.xlu1 %v10618_v28, %s11561_s22  ;;  %v6184_v16 = vld [vmem:[#allocation2 + $0x54] sm:$0x8]  ;;  %v5747_v28 = vshll.u32 %v5639_v62, 16  ;;  %v12906_v35 = vld [vmem:[#allocation2 + $0x2c] sm:$0x8]  ;;  %vm9081_vm5 = vcmask 1041408  }
 0x1d5   : > { %v3966_v18 = vld [vmem:[#allocation2 + $0x164] sm:$0x1]  ;;  %3739 = vst.msk [vmem:[#allocation3 + $0xd0] sm:$0xff] %vm3725_vm3, %v3704_v53  ;;  %v2647_v50 = vpop.permute.xlu1 %2646  ;;  %v11451_v11 = vld [vmem:[%s11721_s20 + $0x8] sm:$0xff]  ;;  %v6268_v53 = vshrl.u32 %v6181_v31, 16  ;;  %v5068_v6 = vshrl.u32 %v12906_v35, 16 }
 0x1d6   : > { %v8142_v1 = vld [vmem:[#allocation2 + $0x164] sm:$0x1]  ;;  %v4347_v44 = vshll.u32 %v3966_v18, 16  ;;  %3916 = vst.msk [vmem:[#allocation3 + $0xd0] sm:$0xff] %vm3902_vm4, %v3881_v17  ;;  %v5723_v18 = vshll.u32 %v5636_v22, 16  ;;  %v12919_v27 = vrot.slane %v5747_v28, 5 }
 0x1d7   : > { %v8523_v57 = vshll.u32 %v8142_v1, 16  ;;  %v6871_v1 = vld [vmem:[#allocation2 + $0x4c] sm:$0x1]  ;;  %v12913_v32 = vld [vmem:[#allocation2 + $0x68] sm:$0x8]  ;;  %vm9077_vm6 = vcmask 15360  }
 0x1d8   : > { %v4349_v60 = vrot.slane %v4347_v44, 5  ;;  %v1409_v56 = vpop.permute.xlu0 %1408  ;;  %v6955_v44 = vshll.u32 %v6868_v63, 16  ;;  %v6979_v45 = vshll.u32 %v6871_v1, 16 }
 0x1d9   : > { %v8525_v61 = vrot.slane %v8523_v57, 5  ;;  %1443 = vst.msk [vmem:[#allocation3 + $0xe0] sm:$0xff] %vm1428_vm13, %v1409_v56  ;;  %v5645_v57 = vld [vmem:[#allocation2 + $0x60] sm:$0x1]  ;;  %v12894_v56 = vrot.slane %v6246_v47, 11 }
 0x1da   : > { %v4350_v15 = vsel %vm11801_vm10, %v4345_v3, %v4349_v60  ;;  %1991 = vst.msk [vmem:[#allocation3 + $0xe0] sm:$0xff] %vm1976_vm14, %v1957_v29  ;;  %v7478_v3 = vshrl.u32 %v7410_v58, 16  ;;  %v6290_v60 = vshrl.u32 %v6184_v16, 16  ;;  %v12925_v37 = vrot.slane %v6979_v45, 5  ;;  %v12938_v58 = vld [vmem:[#allocation2 + $0x74] sm:$0x1] }
 0x1db   : > { %v10511_v40 = vcombine.low %v4340_v51, %v4350_v15  ;;  %v8526_v52 = vsel %vm11801_vm10, %v8521_v30, %v8525_v61  ;;  %v7500_v51 = vshrl.u32 %v7413_v2, 16  ;;  %v12896_v15 = vrot.slane %v6931_v43, 5  ;;  %v12898_v61 = vld [vmem:[#allocation2 + $0x18] sm:$0x8]  ;;  %v12941_v47 = vld [vmem:[#allocation2 + $0x74] sm:$0x1] }
 0x1dc   : > { %v2470_v38 = vpop.permute.xlu0 %2469  ;;  %v10761_v33 = vcombine.low %v8516_v42, %v8526_v52  ;;  %v5771_v30 = vshll.u32 %v5642_v41, 16  ;;  %v7003_v42 = vshll.u32 %v6874_v26, 16  ;;  %v5795_v52 = vshll.u32 %v5645_v57, 16 }
 0x1dd   : > { %4430 = vst.msk [vmem:[#allocation3 + $0xf8] sm:$0xff] %vm1251_vm12, %v10511_v40  ;;  %v4457_v24 = vld [vmem:[#allocation3 + $0xd0] sm:$0xff] }
 0x1de   : > { %2504 = vst.msk [vmem:[#allocation3 + $0xe0] sm:$0xff] %vm2489_vm15, %v2470_v38  ;;  %4727 = vmatmul.mubr.bf16.gmra.mrb[52].mxu0 %v4457_v24  ;;  %v4624_v48 = vpop.f32.mrb[0].mxu0  ;;  %v12902_v38 = vrot.slane %v8163_v12, 5  ;;  %v12911_v24 = vrot.slane %v6268_v53, 11  ;;  %v12927_v55 = vrot.slane %v5771_v30, 5  ;;  %v12936_v63 = vrot.slane %v5795_v52, 5 }
 0x1df   : > { %2681 = vst.msk [vmem:[#allocation3 + $0xe0] sm:$0xff] %vm2666_vm1, %v2647_v50  ;;  %10536 = vmatprep.mubr.msk.bf16.mxu0 %vm1251_vm12, %v4460_v34  ;;  %v4625_v25 = vadd.f32 %v12877_v46, %v4624_v48  ;;  %v4626_v54 = vpop.f32.mrb[1].mxu0  ;;  %v12904_v34 = vrot.slane %v5723_v18, 5  ;;  %v12909_v50 = vrot.slane %v7478_v3, 11  ;;  %v12917_v48 = vrot.slane %v6955_v44, 5 }
 0x1e0   : > { %v4627_v59 = vpop.f32.mrb[2].mxu0  ;;  %v12923_v54 = vrot.slane %v6290_v60, 11  ;;  %v5819_v60 = vshll.u32 %v12941_v47, 16 }
 0x1e1   : > { %v4751_v49 = vmax.f32 %v4625_v25, 0.0  ;;  %v4628_v21 = vadd.f32 %v12877_v46, %v4627_v59  ;;  %v4629_v8 = vpop.f32.mrb[3].mxu0  ;;  %v12921_v25 = vrot.slane %v7500_v51, 11  ;;  %v5046_v59 = vshrl.u32 %v12898_v61, 16 }
 0x1e2   : > { %v12934_v8 = vrot.slane %v7003_v42, 5 }
 0x1e3   : > { %v4783_v36 = vadd.f32 %v11450_v5, %v4751_v49  ;;  %v4752_v7 = vmax.f32 %v4628_v21, 0.0  ;;  %v7522_v49 = vshrl.u32 %v12913_v32, 16 }
 0x1e4   : > { %v12882_v23 = vld [vmem:[#allocation3 + $0xf8] sm:$0xff] }
 0x1e5   : > { %8606 = vst.msk [vmem:[#allocation3 + $0xf8] sm:$0xff] %vm1251_vm12, %v10761_v33  ;;  %v10927_v39 = vpack.c.bf16 %v4783_v36, %v4783_v36  ;;  %v4784_v14 = vadd.f32 %v11451_v11, %v4752_v7  ;;  %v12915_v33 = vld [vmem:[#allocation2 + $0x68] sm:$0x8] }
 0x1e6   : > { %v3192_v17 = vpop.permute.xlu0 %3191  ;;  %v6312_v21 = vshrl.u32 %v12915_v33, 16 }
 0x1e7   : > { %3226 = vst.msk [vmem:[#allocation3 + $0xe0] sm:$0xff] %vm3211_vm2, %v3192_v17  ;;  %v10928_v4 = vpack.c.bf16 %v4784_v14, %v4784_v14  ;;  %v7027_v14 = vshll.u32 %v12938_v58, 16 }
 0x1e8   : > { %4943 = vst.msk [vmem:[#allocation2 + $0x1c] sm:$0xf] %vm462_vm0, %v10927_v39  ;;  %v12985_v61 = vrot.slane %v6312_v21, 11 }
 0x1e9   : > { %v3706_v29 = vpop.permute.xlu1 %3705  ;;  %4944 = vst.msk [vmem:[#allocation2 + $0x20] sm:$0xf] %vm462_vm0, %v10928_v4 }
 0x1ea   : > { %3740 = vst.msk [vmem:[#allocation3 + $0xe0] sm:$0xff] %vm3725_vm3, %v3706_v29  ;;  %v3883_v40 = vpop.permute.xlu0 %3882  ;;  %v11452_v29 = vld [vmem:[%s11721_s20 + $0x10] sm:$0xff] }
 0x1eb   : > { %3917 = vst.msk [vmem:[#allocation3 + $0xe0] sm:$0xff] %vm3902_vm4, %v3883_v40 }
 0x1ed   : > { %v1411_v10 = vpop.permute.xlu1 %1410 }
 0x1ee   : > { %1444 = vst.msk [vmem:[#allocation3 + $0xf0] sm:$0xff] %vm1428_vm13, %v1411_v10 }
 0x1ef   : > { %v1959_v22 = vpop.permute.xlu0 %1958  ;;  %v6176_v62 = vld [vmem:[#allocation2 + $0x1c] sm:$0xf] }
 0x1f0   : > { %1992 = vst.msk [vmem:[#allocation3 + $0xf0] sm:$0xff] %vm1976_vm14, %v1959_v22  ;;  %v4632_v5 = vpop.f32.mrb[4].mxu0  ;;  %v6229_v36 = vshrl.u32 %v6176_v62, 16  ;;  %v6863_v7 = vld [vmem:[#allocation2 + $0x1c] sm:$0xf]  ;;  %v6232_v11 = vshll.u32 %v6176_v62, 16 }
 0x1f1   : > { %v4633_v31 = vadd.f32 %v12877_v46, %v4632_v5  ;;  %v4634_v43 = vpop.f32.mrb[5].mxu0  ;;  %v11261_v12 = vld [vmem:[#allocation2 + $0x1c] sm:$0xff]   ;;  %v6912_v44 = vshrl.u32 %v6863_v7, 16  ;;  %v6915_v42 = vshll.u32 %v6863_v7, 16 }
 0x1f2   : > { %v2472_v2 = vpop.permute.xlu1 %2471  ;;  %v4459_v16 = vld [vmem:[#allocation3 + $0xe0] sm:$0xff]  ;;  %v6177_v17 = vld [vmem:[#allocation2 + $0x20] sm:$0xf]  ;;  %v6231_v39 = vrot.slane %v6229_v36, 7  ;;  %v4635_v1 = vpop.f32.mrb[6].mxu0  ;;  %6799 = vrot.lane.b32.xlu1 %v11261_v12, %s11556_s17 }
 0x1f3   : > { %2505 = vst.msk [vmem:[#allocation3 + $0xf0] sm:$0xff] %vm2489_vm15, %v2472_v2  ;;  %v2649_v18 = vpop.permute.xlu0 %2648  ;;  %4735 = vmatmul.mubr.bf16.gmra.mrb[56].mxu0 %v4459_v16  ;;  %v4753_v3 = vmax.f32 %v4633_v31, 0.0  ;;  %v6238_v41 = vshrl.u32 %v6177_v17, 16  ;;  %v6864_v53 = vld [vmem:[#allocation2 + $0x20] sm:$0xf]  ;;  %v4636_v26 = vadd.f32 %v12877_v46, %v4635_v1  ;;  %v4637_v57 = vpop.f32.mrb[7].mxu0 }
 0x1f4   : > { %2682 = vst.msk [vmem:[#allocation3 + $0xf0] sm:$0xff] %vm2666_vm1, %v2649_v18  ;;  %10537 = vmatprep.mubr.msk.bf16.mxu0 %vm1251_vm12, %v12882_v23  ;;  %v6234_v4 = vor.u32 %v6232_v11, %v6231_v39  ;;  %v6241_v28 = vshll.u32 %v6177_v17, 16  ;;  %v5634_v51 = vld [vmem:[#allocation2 + $0x1c] sm:$0xf]  ;;  %v6921_v52 = vshll.u32 %v6864_v53, 16  ;;  %v6236_v22 = vrot.slane %v6231_v39, 4 }
 0x1f5   : > { %v4785_v45 = vadd.f32 %v11452_v29, %v4753_v3  ;;  %v11263_v30 = vld [vmem:[#allocation2 + $0x1c] sm:$0xff]   ;;  %v6240_v40 = vrot.slane %v6238_v41, 7  ;;  %v4754_v10 = vmax.f32 %v4636_v26, 0.0  ;;  %v6925_v62 = vshrl.u32 %v6864_v53, 16 }
 0x1f6   : > { %v5635_v5 = vld [vmem:[#allocation2 + $0x20] sm:$0xf]  ;;  %v5704_v23 = vshrl.u32 %v5634_v51, 16  ;;  %5569 = vrot.lane.b32.xlu1 %v11263_v30, %s11555_s28  ;;  %v6914_v43 = vrot.slane %v6912_v44, 4  ;;  %v6917_v12 = vrot.slane %v6915_v42, 5  ;;  %v6235_v16 = vsel %vm11813_vm11, %v12886_v19, %v6234_v4 }
 0x1f7   : > { %v10929_v36 = vpack.c.bf16 %v4785_v45, %v4785_v45  ;;  %v6243_v31 = vor.u32 %v6241_v28, %v6240_v40  ;;  %v11453_v2 = vld [vmem:[%s11721_s20 + $0x18] sm:$0xff]  ;;  %v12958_v17 = vrot.slane %v6921_v52, 5  ;;  %v5707_v7 = vshll.u32 %v5634_v51, 16  ;;  %v12972_v51 = vld [vmem:[#allocation2 + $0x7c] sm:$0x8] }
 0x1f8   : > { %v4786_v47 = vadd.f32 %v11453_v2, %v4754_v10  ;;  %v6927_v11 = vrot.slane %v6925_v62, 4  ;;  %v5713_v18 = vshll.u32 %v5635_v5, 16  ;;  %v5717_v3 = vshrl.u32 %v5635_v5, 16  ;;  %v12974_v29 = vld [vmem:[#allocation2 + $0x7c] sm:$0x8] }
 0x1f9   : > { %4945 = vst.msk [vmem:[#allocation2 + $0x30] sm:$0xf] %vm462_vm0, %v10929_v36  ;;  %v6244_v39 = vsel %vm11813_vm11, %v6236_v22, %v6243_v31  ;;  %v5706_v44 = vrot.slane %v5704_v23, 4  ;;  %v5709_v26 = vrot.slane %v5707_v7, 5  ;;  %v6918_v57 = vor.u32 %v6917_v12, %v6914_v43  ;;  %v12976_v45 = vld [vmem:[#allocation2 + $0x88] sm:$0x1] }
 0x1fa   : > { %v3194_v1 = vpop.permute.xlu1 %3193  ;;  %v10930_v41 = vpack.c.bf16 %v4786_v47, %v4786_v47  ;;  %v10650_v53 = vcombine.low %v6235_v16, %v6244_v39  ;;  %v12964_v19 = vrot.slane %v5713_v18, 5  ;;  %v5719_v4 = vrot.slane %v5717_v3, 4 }
 0x1fb   : > { %3227 = vst.msk [vmem:[#allocation3 + $0xf0] sm:$0xff] %vm3211_vm2, %v3194_v1  ;;  %v12968_v28 = vrot.slane %v5046_v59, 11  ;;  %v6928_v30 = vor.u32 %v6927_v11, %v12958_v17  ;;  %v12981_v40 = vrot.slane %v7522_v49, 11  ;;  %v12989_v59 = vrot.slane %v5068_v6, 11 }
 0x1fc   : > { %4946 = vst.msk [vmem:[#allocation2 + $0x34] sm:$0xf] %vm462_vm0, %v10930_v41  ;;  %6623 = vrot.lane.b32.xlu0 %v10650_v53, %s11558_s25  ;;  %v5710_v42 = vor.u32 %v5709_v26, %v5706_v44  ;;  %v5720_v52 = vor.u32 %v5719_v4, %v12964_v19  ;;  %v12994_v10 = vrot.slane %v7027_v14, 5  ;;  %v12996_v22 = vrot.slane %v5819_v60, 5 }
 0x1fd   : > { %v12998_v32 = vrot.slane %v6918_v57, 4  ;;  %v7544_v49 = vshrl.u32 %v12972_v51, 16  ;;  %v6334_v33 = vshrl.u32 %v12974_v29, 16  ;;  %v13003_v36 = vrot.slane %v6928_v30, 4 }
 0x1fe   : > { %v3885_v35 = vpop.permute.xlu1 %3884  ;;  %v13006_v60 = vrot.slane %v5710_v42, 4  ;;  %v13008_v31 = vrot.slane %v5720_v52, 4 }
 0x1ff   : > { %v6934_v41 = vsel %vm11801_vm10, %v13003_v36, %v12896_v15 }
 0x200   : > { %v7408_v6 = vld [vmem:[#allocation2 + $0x30] sm:$0xf] }
 0x201   : > { %v7461_v5 = vshrl.u32 %v7408_v6, 16  ;;  %v6179_v23 = vld [vmem:[#allocation2 + $0x30] sm:$0xf]  ;;  %v7464_v58 = vshll.u32 %v7408_v6, 16 }
 0x202   : > { %v3708_v62 = vpop.permute.xlu0 %3707  ;;  %v6251_v14 = vshrl.u32 %v6179_v23, 16  ;;  %v8095_v39 = vld [vmem:[#allocation2 + $0x30] sm:$0xf]  ;;  %v6254_v1 = vshll.u32 %v6179_v23, 16  ;;  %v11454_v23 = vld [vmem:[%s11721_s20 + $0x20] sm:$0xff] }
 0x203   : > { %3741 = vst.msk [vmem:[#allocation3 + $0xf0] sm:$0xff] %vm3725_vm3, %v3708_v62  ;;  %v11264_v12 = vld [vmem:[#allocation2 + $0x30] sm:$0xff]   ;;  %v7463_v7 = vrot.slane %v7461_v5, 7 }
 0x204   : > { %3918 = vst.msk [vmem:[#allocation3 + $0xf0] sm:$0xff] %vm3902_vm4, %v3885_v35  ;;  %v4640_v43 = vpop.f32.mrb[8].mxu0  ;;  %v7409_v16 = vld [vmem:[#allocation2 + $0x34] sm:$0xf]  ;;  %8031 = vrot.lane.b32.xlu0 %v11264_v12, %s11557_s23  ;;  %v6253_v3 = vrot.slane %v6251_v14, 7 }
 0x205   : > { %v4641_v2 = vadd.f32 %v12877_v46, %v4640_v43  ;;  %v4642_v47 = vpop.f32.mrb[9].mxu0  ;;  %v7470_v18 = vshrl.u32 %v7409_v16, 16  ;;  %v7466_v57 = vor.u32 %v7464_v58, %v7463_v7  ;;  %v7473_v4 = vshll.u32 %v7409_v16, 16  ;;  %v6180_v30 = vld [vmem:[#allocation2 + $0x34] sm:$0xf] }
 0x206   : > { %v4643_v11 = vpop.f32.mrb[10].mxu0  ;;  %v11265_v42 = vld [vmem:[#allocation2 + $0x30] sm:$0xff]   ;;  %v7468_v52 = vrot.slane %v7463_v7, 4  ;;  %v6256_v6 = vor.u32 %v6254_v1, %v6253_v3  ;;  %v6260_v62 = vshrl.u32 %v6180_v30, 16  ;;  %v6258_v36 = vrot.slane %v6253_v3, 4 }
 0x207   : > { %v4755_v53 = vmax.f32 %v4641_v2, 0.0  ;;  %v4644_v44 = vadd.f32 %v12877_v46, %v4643_v11  ;;  %v4645_v26 = vpop.f32.mrb[11].mxu0  ;;  %v7472_v35 = vrot.slane %v7470_v18, 7  ;;  %v8096_v5 = vld [vmem:[#allocation2 + $0x34] sm:$0xf]  ;;  %v7467_v15 = vsel %vm11813_vm11, %v12889_v13, %v7466_v57 }
 0x208   : > { %6801 = vrot.lane.b32.xlu0 %v11265_v42, %s11556_s17  ;;  %v6262_v12 = vrot.slane %v6260_v62, 7  ;;  %v6263_v2 = vshll.u32 %v6180_v30, 16  ;;  %v8144_v47 = vshrl.u32 %v8095_v39, 16  ;;  %v11455_v11 = vld [vmem:[%s11721_s20 + $0x28] sm:$0xff]  ;;  %v8147_v1 = vshll.u32 %v8095_v39, 16 }
 0x209   : > { %v4787_v14 = vadd.f32 %v11454_v23, %v4755_v53  ;;  %v4756_v43 = vmax.f32 %v4644_v44, 0.0  ;;  %v7475_v58 = vor.u32 %v7473_v4, %v7472_v35  ;;  %v8153_v26 = vshll.u32 %v8096_v5, 16  ;;  %v6866_v21 = vld [vmem:[#allocation2 + $0x30] sm:$0xf]  ;;  %v6867_v42 = vld [vmem:[#allocation2 + $0x34] sm:$0xf] }
 0x20a   : > { %v11266_v44 = vld [vmem:[#allocation2 + $0x30] sm:$0xff]   ;;  %v6265_v13 = vor.u32 %v6263_v2, %v6262_v12  ;;  %v8146_v3 = vrot.slane %v8144_v47, 4  ;;  %v8157_v57 = vshrl.u32 %v8096_v5, 16  ;;  %v8149_v35 = vrot.slane %v8147_v1, 5 }
 0x20b   : > { %v4461_v16 = vld [vmem:[#allocation3 + $0xf0] sm:$0xff]  ;;  %v10931_v7 = vpack.c.bf16 %v4787_v14, %v4787_v14  ;;  %v4788_v18 = vadd.f32 %v11455_v11, %v4756_v43  ;;  %v7476_v53 = vsel %vm11813_vm11, %v7468_v52, %v7475_v58  ;;  %v8155_v62 = vrot.slane %v8153_v26, 5  ;;  %v5637_v23 = vld [vmem:[#allocation2 + $0x30] sm:$0xf] }
 0x20c   : > { %4743 = vmatmul.mubr.bf16.gmra.mrb[60].mxu0 %v4461_v16  ;;  %v10714_v30 = vcombine.low %v7467_v15, %v7476_v53  ;;  %5571 = vrot.lane.b32.xlu0 %v11266_v44, %s11555_s28  ;;  %v6266_v39 = vsel %vm11813_vm11, %v6258_v36, %v6265_v13  ;;  %v8159_v14 = vrot.slane %v8157_v57, 4  ;;  %v6936_v43 = vshrl.u32 %v6866_v21, 16  ;;  %v13039_v16 = vld [vmem:[#allocation2 + $0x34] sm:$0xf] }
 0x20d   : > { %4947 = vst.msk [vmem:[#allocation2 + $0x44] sm:$0xf] %vm462_vm0, %v10931_v7  ;;  %v10932_v4 = vpack.c.bf16 %v4788_v18, %v4788_v18  ;;  %v6939_v52 = vshll.u32 %v6866_v21, 16  ;;  %v6924_v5 = vsel %vm11801_vm10, %v12998_v32, %v12958_v17  ;;  %v8150_v15 = vor.u32 %v8149_v35, %v8146_v3 }
 0x20e   : > { %7855 = vrot.lane.b32.xlu1 %v10714_v30, %s11559_s14  ;;  %v6945_v58 = vshll.u32 %v6867_v42, 16  ;;  %v6949_v12 = vshrl.u32 %v6867_v42, 16  ;;  %v6257_v2 = vsel %vm11813_vm11, %v12894_v56, %v6256_v6  ;;  %v10682_v36 = vcombine.low %v6924_v5, %v6934_v41 }
 0x20f   : > { %4948 = vst.msk [vmem:[#allocation2 + $0x48] sm:$0xf] %vm462_vm0, %v10932_v4  ;;  %v8160_v47 = vor.u32 %v8159_v14, %v8155_v62  ;;  %v5728_v21 = vshrl.u32 %v5637_v23, 16  ;;  %v10651_v7 = vcombine.low %v6257_v2, %v6266_v39  ;;  %v8151_v11 = vrot.slane %v8150_v15, 4 }
 0x210   : > { %v5716_v18 = vsel %vm11801_vm10, %v13006_v60, %v12964_v19  ;;  %v5726_v17 = vsel %vm11801_vm10, %v13008_v31, %v12904_v34  ;;  %7343 = vrot.lane.b32.xlu0 %v10682_v36, %s11560_s15  ;;  %v6938_v32 = vrot.slane %v6936_v43, 4  ;;  %v6941_v41 = vrot.slane %v6939_v52, 5  ;;  %v13066_v36 = vld [vmem:[#allocation2 + $0x88] sm:$0x1] }
 0x211   : > { %v8161_v56 = vrot.slane %v8160_v47, 4  ;;  %v13050_v6 = vrot.slane %v6945_v58, 5  ;;  %v6951_v1 = vrot.slane %v6949_v12, 4  ;;  %v13053_v26 = vrot.slane %v5728_v21, 4 }
 0x212   : > { %6625 = vrot.lane.b32.xlu1 %v10651_v7, %s11558_s25  ;;  %v5731_v53 = vshll.u32 %v5637_v23, 16  ;;  %v5737_v19 = vshll.u32 %v13039_v16, 16  ;;  %v8156_v60 = vsel %vm11801_vm10, %v8151_v11, %v8155_v62  ;;  %v10619_v31 = vcombine.low %v5716_v18, %v5726_v17 }
 0x213   : > { %v8166_v34 = vsel %vm11801_vm10, %v8161_v56, %v12902_v38  ;;  %v6942_v35 = vor.u32 %v6941_v41, %v6938_v32  ;;  %v6952_v5 = vor.u32 %v6951_v1, %v13050_v6  ;;  %v5741_v2 = vshrl.u32 %v13039_v16, 16 }
 0x214   : > { %v7411_v44 = vld [vmem:[#allocation2 + $0x44] sm:$0xf]  ;;  %v10746_v13 = vcombine.low %v8156_v60, %v8166_v34  ;;  %6113 = vrot.lane.b32.xlu0 %v10619_v31, %s11561_s22  ;;  %v5733_v62 = vrot.slane %v5731_v53, 5 }
 0x215   : > { %v7483_v3 = vshrl.u32 %v7411_v44, 16  ;;  %v7486_v57 = vshll.u32 %v7411_v44, 16  ;;  %v6182_v42 = vld [vmem:[#allocation2 + $0x44] sm:$0xf]  ;;  %v6943_v17 = vrot.slane %v6942_v35, 4  ;;  %v6953_v44 = vrot.slane %v6952_v5, 4 }
 0x216   : > { %v11267_v4 = vld [vmem:[#allocation2 + $0x44] sm:$0xff]   ;;  %v6273_v30 = vshrl.u32 %v6182_v42, 16  ;;  %8591 = vst.msk [vmem:[#allocation3 + $0x8] sm:$0xff] %vm1251_vm12, %v10746_v13  ;;  %v6276_v58 = vshll.u32 %v6182_v42, 16  ;;  %v5734_v1 = vor.u32 %v5733_v62, %v13053_v26  ;;  %v5743_v62 = vrot.slane %v5741_v2, 4 }
 0x217   : > { %v7412_v23 = vld [vmem:[#allocation2 + $0x48] sm:$0xf]  ;;  %v7485_v39 = vrot.slane %v7483_v3, 7  ;;  %8033 = vrot.lane.b32.xlu1 %v11267_v4, %s11557_s23  ;;  %v11287_v13 = vld [vmem:[%s14979_s3] sm:$0xff]   ;;  %v5843_v4 = vshll.u32 %v13066_v36, 16 }
 0x218   : > { %v7492_v14 = vshrl.u32 %v7412_v23, 16  ;;  %v7495_v38 = vshll.u32 %v7412_v23, 16  ;;  %v6183_v43 = vld [vmem:[#allocation2 + $0x48] sm:$0xf]  ;;  %v6275_v52 = vrot.slane %v6273_v30, 7  ;;  %v6948_v23 = vsel %vm11801_vm10, %v6943_v17, %v13050_v6  ;;  %8767 = vmatpush1.bf16.msra.mxu1 %v11287_v13 }
 0x219   : > { %v7488_v15 = vor.u32 %v7486_v57, %v7485_v39  ;;  %v6282_v12 = vshrl.u32 %v6183_v43, 16  ;;  %v4648_v47 = vpop.f32.mrb[12].mxu0  ;;  %v11268_v21 = vld [vmem:[#allocation2 + $0x44] sm:$0xff]   ;;  %v7490_v7 = vrot.slane %v7485_v39, 4  ;;  %v6285_v18 = vshll.u32 %v6183_v43, 16  ;;  %8768 = vmatprep.subr.bf16.mxu1 %v11554_v0 }
 0x21a   : > { %v7494_v11 = vrot.slane %v7492_v14, 7  ;;  %v4649_v56 = vadd.f32 %v12877_v46, %v4648_v47  ;;  %v4650_v32 = vpop.f32.mrb[13].mxu0  ;;  %v6280_v41 = vrot.slane %v6275_v52, 4  ;;  %v6278_v31 = vor.u32 %v6276_v58, %v6275_v52  ;;  %v6869_v14 = vld [vmem:[#allocation2 + $0x44] sm:$0xf]  ;;  %v11289_v6 = vld [vmem:[%s14979_s3 + $0x8] sm:$0xff]  }
 0x21b   : > { %v6284_v53 = vrot.slane %v6282_v12, 7  ;;  %v4651_v60 = vpop.f32.mrb[14].mxu0  ;;  %6803 = vrot.lane.b32.xlu1 %v11268_v21, %s11556_s17  ;;  %v7489_v16 = vsel %vm11813_vm11, %v12909_v50, %v7488_v15  ;;  %v11269_v50 = vld [vmem:[#allocation2 + $0x44] sm:$0xff]   ;;  %v5739_v39 = vrot.slane %v5737_v19, 5  ;;  %v6958_v15 = vsel %vm11801_vm10, %v6953_v44, %v12917_v48  ;;  %v7422_v21 = vld [vmem:[#allocation2 + $0x90] sm:$0x8] }
 0x21c   : > { %v7497_v34 = vor.u32 %v7495_v38, %v7494_v11  ;;  %v4757_v3 = vmax.f32 %v4649_v56, 0.0  ;;  %v4652_v57 = vadd.f32 %v12877_v46, %v4651_v60  ;;  %v4653_v42 = vpop.f32.mrb[15].mxu0  ;;  %v11456_v38 = vld [vmem:[%s11721_s20 + $0x30] sm:$0xff]  ;;  %v6870_v58 = vld [vmem:[#allocation2 + $0x48] sm:$0xf]  ;;  %v6279_v19 = vsel %vm11813_vm11, %v12911_v24, %v6278_v31  ;;  %v11457_v11 = vld [vmem:[%s11721_s20 + $0x38] sm:$0xff]  ;;  %8769 = vmatpush1.bf16.msra.mxu1 %v11289_v6 }
 0x21d   : > { %v6287_v26 = vor.u32 %v6285_v18, %v6284_v53  ;;  %v8608_v30 = vld [vmem:[#allocation3 + $0x8] sm:$0xff]  ;;  %v5735_v2 = vrot.slane %v5734_v1, 4  ;;  %v5744_v47 = vor.u32 %v5743_v62, %v5739_v39  ;;  %v6960_v17 = vshrl.u32 %v6869_v14, 16  ;;  %v5640_v32 = vld [vmem:[#allocation2 + $0x44] sm:$0xf]  ;;  %8770 = vmatprep.subr.bf16.mxu1 %v11554_v0 }
 0x21e   : > { %v7498_v35 = vsel %vm11813_vm11, %v7490_v7, %v7497_v34  ;;  %v4789_v43 = vadd.f32 %v11456_v38, %v4757_v3  ;;  %v4758_v52 = vmax.f32 %v4652_v57, 0.0  ;;  %10772 = vmatprep.mubr.msk.bf16.mxu1 %vm1251_vm12, %v8608_v30  ;;  %v6193_v48 = vld [vmem:[#allocation2 + $0x90] sm:$0x8]  ;;  %v6963_v56 = vshll.u32 %v6869_v14, 16  ;;  %v13101_v53 = vld [vmem:[#allocation2 + $0x20] sm:$0xf] }
 0x21f   : > { %v10715_v5 = vcombine.low %v7489_v16, %v7498_v35  ;;  %5573 = vrot.lane.b32.xlu1 %v11269_v50, %s11555_s28  ;;  %v6288_v12 = vsel %vm11813_vm11, %v6280_v41, %v6287_v26  ;;  %v10683_v60 = vcombine.low %v6948_v23, %v6958_v15  ;;  %v5745_v16 = vrot.slane %v5744_v47, 4  ;;  %v5641_v31 = vld [vmem:[#allocation2 + $0x48] sm:$0xf] }
 0x220   : > { %v10933_v7 = vpack.c.bf16 %v4789_v43, %v4789_v43  ;;  %v4790_v18 = vadd.f32 %v11457_v11, %v4758_v52  ;;  %v6969_v24 = vshll.u32 %v6870_v58, 16  ;;  %v6973_v34 = vshrl.u32 %v6870_v58, 16 }
 0x221   : > { %7857 = vrot.lane.b32.xlu0 %v10715_v5, %s11559_s14  ;;  %v10652_v1 = vcombine.low %v6279_v19, %v6288_v12  ;;  %v7566_v44 = vshrl.u32 %v7422_v21, 16  ;;  %v6356_v13 = vshrl.u32 %v6193_v48, 16  ;;  %v5750_v3 = vsel %vm11801_vm10, %v5745_v16, %v12919_v27  ;;  %v11290_v27 = vld [vmem:[%s14979_s3 + $0x10] sm:$0xff]  }
 0x222   : > { %4949 = vst.msk [vmem:[#allocation2 + $0x58] sm:$0xf] %vm462_vm0, %v10933_v7  ;;  %v10934_v41 = vpack.c.bf16 %v4790_v18, %v4790_v18  ;;  %v5752_v57 = vshrl.u32 %v5640_v32, 16  ;;  %v5755_v42 = vshll.u32 %v5640_v32, 16  ;;  %v5060_v26 = vshrl.u32 %v13101_v53, 16  ;;  %8771 = vmatpush1.bf16.msra.mxu1 %v11290_v27 }
 0x223   : > { %7345 = vrot.lane.b32.xlu1 %v10683_v60, %s11560_s15  ;;  %v5740_v30 = vsel %vm11801_vm10, %v5735_v2, %v5739_v39  ;;  %v6962_v35 = vrot.slane %v6960_v17, 4  ;;  %v6965_v50 = vrot.slane %v6963_v56, 5  ;;  %v5761_v23 = vshll.u32 %v5641_v31, 16  ;;  %8772 = vmatprep.subr.bf16.mxu1 %v11554_v0 }
 0x224   : > { %4950 = vst.msk [vmem:[#allocation2 + $0x5c] sm:$0xf] %vm462_vm0, %v10934_v41  ;;  %v10620_v62 = vcombine.low %v5740_v30, %v5750_v3  ;;  %v13114_v14 = vrot.slane %v6969_v24, 5  ;;  %v6975_v38 = vrot.slane %v6973_v34, 4  ;;  %v5765_v43 = vshrl.u32 %v5641_v31, 16  ;;  %v11292_v3 = vld [vmem:[%s14979_s3 + $0x18] sm:$0xff]  }
 0x225   : > { %6627 = vrot.lane.b32.xlu0 %v10652_v1, %s11558_s25  ;;  %v13121_v52 = vrot.slane %v7544_v49, 11  ;;  %v13125_v5 = vrot.slane %v6334_v33, 11  ;;  %v15002_v39 = vshll.u32 %v12976_v45, 16  ;;  %v13133_v58 = vrot.slane %v5843_v4, 5 }
 0x226   : > { %v5754_v6 = vrot.slane %v5752_v57, 4  ;;  %v5757_v19 = vrot.slane %v5755_v42, 5  ;;  %v13136_v12 = vrot.slane %v7566_v44, 11  ;;  %v13138_v51 = vrot.slane %v6356_v13, 11  ;;  %8773 = vmatpush1.bf16.msra.mxu1 %v11292_v3  ;;  %v13195_v3 = vld [vmem:[#allocation2 + $0xa4] sm:$0x8] }
 0x227   : > { %v13129_v15 = vrot.slane %v15002_v39, 5  ;;  %6115 = vrot.lane.b32.xlu1 %v10620_v62, %s11561_s22  ;;  %v6966_v29 = vor.u32 %v6965_v50, %v6962_v35  ;;  %v13140_v49 = vrot.slane %v5761_v23, 5  ;;  %v5767_v33 = vrot.slane %v5765_v43, 4  ;;  %8774 = vmatprep.subr.bf16.mxu1 %v11554_v0 }
 0x228   : > { %v5062_v45 = vrot.slane %v5060_v26, 7  ;;  %v6976_v36 = vor.u32 %v6975_v38, %v13114_v14  ;;  %v5758_v11 = vor.u32 %v5757_v19, %v5754_v6  ;;  %v5063_v43 = vshll.u32 %v13101_v53, 16 }
 0x229   : > { %v7414_v2 = vld [vmem:[#allocation2 + $0x58] sm:$0xf]  ;;  %v13144_v56 = vrot.slane %v6966_v29, 4  ;;  %v5768_v44 = vor.u32 %v5767_v33, %v13140_v49  ;;  %v11294_v29 = vld [vmem:[%s14979_s3 + $0x20] sm:$0xff]  }
 0x22a   : > { %v7505_v4 = vshrl.u32 %v7414_v2, 16  ;;  %v7508_v47 = vshll.u32 %v7414_v2, 16  ;;  %v6185_v21 = vld [vmem:[#allocation2 + $0x58] sm:$0xf]  ;;  %v6977_v34 = vrot.slane %v6976_v36, 4  ;;  %v13151_v35 = vrot.slane %v5758_v11, 4  ;;  %8775 = vmatpush1.bf16.msra.mxu1 %v11294_v29 }
 0x22b   : > { %v11270_v48 = vld [vmem:[#allocation2 + $0x58] sm:$0xff]   ;;  %v6295_v7 = vshrl.u32 %v6185_v21, 16  ;;  %v6298_v41 = vshll.u32 %v6185_v21, 16  ;;  %v6972_v53 = vsel %vm11801_vm10, %v13144_v56, %v13114_v14  ;;  %v5769_v2 = vrot.slane %v5768_v44, 4  ;;  %8776 = vmatprep.subr.bf16.mxu1 %v11554_v0 }
 0x22c   : > { %v7415_v18 = vld [vmem:[#allocation2 + $0x5c] sm:$0xf]  ;;  %v7507_v17 = vrot.slane %v7505_v4, 7  ;;  %8035 = vrot.lane.b32.xlu0 %v11270_v48, %s11557_s23  ;;  %v6872_v13 = vld [vmem:[#allocation2 + $0x58] sm:$0xf]  ;;  %v13166_v36 = vor.u32 %v5063_v43, %v5062_v45  ;;  %v6982_v21 = vsel %vm11801_vm10, %v6977_v34, %v12925_v37  ;;  %v5764_v48 = vsel %vm11801_vm10, %v13151_v35, %v13140_v49  ;;  %v11458_v43 = vld [vmem:[%s11721_s20 + $0x40] sm:$0xff] }
 0x22d   : > { %v7514_v32 = vshrl.u32 %v7415_v18, 16  ;;  %v7517_v60 = vshll.u32 %v7415_v18, 16  ;;  %v6186_v16 = vld [vmem:[#allocation2 + $0x5c] sm:$0xf]  ;;  %v6297_v24 = vrot.slane %v6295_v7, 7  ;;  %v6984_v38 = vshrl.u32 %v6872_v13, 16 }
 0x22e   : > { %v7510_v31 = vor.u32 %v7508_v47, %v7507_v17  ;;  %v6304_v1 = vshrl.u32 %v6186_v16, 16  ;;  %v11271_v57 = vld [vmem:[#allocation2 + $0x58] sm:$0xff]   ;;  %v7512_v42 = vrot.slane %v7507_v17, 4  ;;  %v6307_v30 = vshll.u32 %v6186_v16, 16  ;;  %v4976_v35 = vld [vmem:[#allocation2 + $0x8] sm:$0xf] }
 0x22f   : > { %v7516_v26 = vrot.slane %v7514_v32, 7  ;;  %v6302_v50 = vrot.slane %v6297_v24, 4  ;;  %v6873_v62 = vld [vmem:[#allocation2 + $0x5c] sm:$0xf]  ;;  %v6300_v6 = vor.u32 %v6298_v41, %v6297_v24  ;;  %v6987_v19 = vshll.u32 %v6872_v13, 16 }
 0x230   : > { %v6306_v23 = vrot.slane %v6304_v1, 7  ;;  %6805 = vrot.lane.b32.xlu0 %v11271_v57, %s11556_s17  ;;  %v7511_v27 = vsel %vm11813_vm11, %v12921_v25, %v7510_v31  ;;  %v13168_v4 = vld [vmem:[#allocation2 + $0x1c] sm:$0xf]  ;;  %v6993_v7 = vshll.u32 %v6873_v62, 16  ;;  %v5643_v14 = vld [vmem:[#allocation2 + $0x58] sm:$0xf]  ;;  %v5774_v41 = vsel %vm11801_vm10, %v5769_v2, %v12927_v55 }
 0x231   : > { %v7519_v39 = vor.u32 %v7517_v60, %v7516_v26  ;;  %v11272_v47 = vld [vmem:[#allocation2 + $0x58] sm:$0xff]   ;;  %v6986_v17 = vrot.slane %v6984_v38, 4  ;;  %v6989_v56 = vrot.slane %v6987_v19, 5  ;;  %v6997_v32 = vshrl.u32 %v6873_v62, 16  ;;  %v11296_v60 = vld [vmem:[%s14979_s3 + $0x28] sm:$0xff]   ;;  %v11298_v55 = vld [vmem:[%s14979_s3 + $0x30] sm:$0xff]  }
 0x232   : > { %v6309_v33 = vor.u32 %v6307_v30, %v6306_v23  ;;  %v5644_v11 = vld [vmem:[#allocation2 + $0x5c] sm:$0xf]  ;;  %v6301_v49 = vsel %vm11813_vm11, %v12923_v54, %v6300_v6  ;;  %v5051_v34 = vshrl.u32 %v13168_v4, 16  ;;  %v5776_v1 = vshrl.u32 %v5643_v14, 16  ;;  %8777 = vmatpush1.bf16.msra.mxu1 %v11296_v60  ;;  %v6196_v19 = vld [vmem:[#allocation2 + $0xa4] sm:$0x8] }
 0x233   : > { %v7520_v25 = vsel %vm11813_vm11, %v7512_v42, %v7519_v39  ;;  %v5779_v44 = vshll.u32 %v5643_v14, 16  ;;  %v5785_v13 = vshll.u32 %v5644_v11, 16  ;;  %v10684_v26 = vcombine.low %v6972_v53, %v6982_v21  ;;  %v13206_v29 = vld [vmem:[#allocation2 + $0x9c] sm:$0x1]  ;;  %8778 = vmatprep.subr.bf16.mxu1 %v11554_v0 }
 0x234   : > { %v4656_v45 = vpop.f32.mrb[16].mxu0  ;;  %v10716_v18 = vcombine.low %v7511_v27, %v7520_v25  ;;  %5575 = vrot.lane.b32.xlu0 %v11272_v47, %s11555_s28  ;;  %v6310_v24 = vsel %vm11813_vm11, %v6302_v50, %v6309_v33  ;;  %v5789_v30 = vshrl.u32 %v5644_v11, 16  ;;  %v6990_v23 = vor.u32 %v6989_v56, %v6986_v17  ;;  %v4977_v25 = vld [vmem:[#allocation2 + $0xc] sm:$0xf]  ;;  %v11300_v60 = vld [vmem:[%s14979_s3 + $0x38] sm:$0xff]  }
 0x235   : > { %v4657_v37 = vadd.f32 %v12877_v46, %v4656_v45  ;;  %v4658_v16 = vpop.f32.mrb[17].mxu0  ;;  %v10653_v50 = vcombine.low %v6301_v49, %v6310_v24  ;;  %v13198_v62 = vrot.slane %v6993_v7, 5  ;;  %v6999_v38 = vrot.slane %v6997_v32, 4  ;;  %v11459_v7 = vld [vmem:[%s11721_s20 + $0x48] sm:$0xff]  ;;  %v4975_v45 = vld [vmem:[#allocation2 + $0x4] sm:$0x8] }
 0x236   : > { %v4659_v31 = vpop.f32.mrb[18].mxu0  ;;  %7859 = vrot.lane.b32.xlu1 %v10716_v18, %s11559_s14  ;;  %v7588_v6 = vshrl.u32 %v13195_v3, 16  ;;  %v5778_v33 = vrot.slane %v5776_v1, 4  ;;  %v5781_v53 = vrot.slane %v5779_v44, 5  ;;  %v13210_v2 = vrot.slane %v5785_v13, 5  ;;  %8779 = vmatpush1.bf16.msra.mxu1 %v11298_v55 }
 0x237   : > { %v4759_v54 = vmax.f32 %v4657_v37, 0.0  ;;  %v4660_v57 = vadd.f32 %v12877_v46, %v4659_v31  ;;  %v4661_v42 = vpop.f32.mrb[19].mxu0  ;;  %v10621_v46 = vcombine.low %v5764_v48, %v5774_v41  ;;  %v5029_v47 = vshrl.u32 %v4976_v35, 16  ;;  %8780 = vmatprep.subr.bf16.mxu1 %v11554_v0  ;;  %v13221_v41 = vld [vmem:[#allocation2 + $0x9c] sm:$0x1] }
 0x238   : > { %7347 = vrot.lane.b32.xlu0 %v10684_v26, %s11560_s15  ;;  %v5791_v11 = vrot.slane %v5789_v30, 4  ;;  %v5032_v48 = vshll.u32 %v4976_v35, 16  ;;  %v6991_v18 = vrot.slane %v6990_v23, 4  ;;  %v7000_v17 = vor.u32 %v6999_v38, %v13198_v62  ;;  %v13226_v30 = vld [vmem:[#allocation2 + $0xb8] sm:$0x8] }
 0x239   : > { %v4791_v27 = vadd.f32 %v11458_v43, %v4759_v54  ;;  %v4760_v39 = vmax.f32 %v4660_v57, 0.0  ;;  %v6378_v56 = vshrl.u32 %v6196_v19, 16  ;;  %v7075_v32 = vshll.u32 %v13206_v29, 16 }
 0x23a   : > { %6629 = vrot.lane.b32.xlu1 %v10653_v50, %s11558_s25  ;;  %v5031_v16 = vrot.slane %v5029_v47, 7  ;;  %v5038_v49 = vshrl.u32 %v4977_v25, 16  ;;  %v5041_v24 = vshll.u32 %v4977_v25, 16  ;;  %v5782_v31 = vor.u32 %v5781_v53, %v5778_v33  ;;  %8781 = vmatpush1.bf16.msra.mxu1 %v11300_v60  ;;  %v13252_v25 = vld [vmem:[#allocation2 + $0xb8] sm:$0x8] }
 0x23b   : > { %v10935_v21 = vpack.c.bf16 %v4791_v27, %v4791_v27  ;;  %v4792_v14 = vadd.f32 %v11459_v7, %v4760_v39  ;;  %v5024_v1 = vshrl.u32 %v4975_v45, 16  ;;  %v5053_v44 = vrot.slane %v5051_v34, 7  ;;  %v11302_v34 = vld [vmem:[%s14979_s3 + $0x40] sm:$0xff]   ;;  %8782 = vmatprep.subr.bf16.mxu1 %v11554_v0  ;;  %v13254_v47 = vld [vmem:[#allocation2 + $0xb0] sm:$0x1]  ;;  %v5568_v7 = vpop.permute.xlu0 %5567 }
 0x23c   : > { %6117 = vrot.lane.b32.xlu0 %v10621_v46, %s11561_s22  ;;  %v5054_v13 = vshll.u32 %v13168_v4, 16  ;;  %v5792_v3 = vor.u32 %v5791_v11, %v13210_v2  ;;  %v5034_v54 = vor.u32 %v5032_v48, %v5031_v16  ;;  %v5036_v57 = vrot.slane %v5031_v16, 4 }
 0x23d   : > { %4951 = vst.msk [vmem:[#allocation2 + $0x6c] sm:$0xf] %vm462_vm0, %v10935_v21  ;;  %v10936_v37 = vpack.c.bf16 %v4792_v14, %v4792_v14  ;;  %v5040_v42 = vrot.slane %v5038_v49, 7  ;;  %v7001_v26 = vrot.slane %v7000_v17, 4  ;;  %v10570_v35 = vrot.slane %v5024_v1, 11 }
 0x23e   : > { %v5056_v50 = vor.u32 %v5054_v13, %v5053_v44  ;;  %v5058_v23 = vrot.slane %v5053_v44, 4  ;;  %v13231_v38 = vrot.slane %v7588_v6, 11  ;;  %v13233_v4 = vrot.slane %v6378_v56, 11  ;;  %8783 = vmatpush1.bf16.msra.mxu1 %v11302_v34  ;;  %v13281_v13 = vld [vmem:[%s14978_s2] ss:$0 sm:$0xff] }
 0x23f   : > { %4952 = vst.msk [vmem:[#allocation2 + $0x70] sm:$0xf] %vm462_vm0, %v10936_v37  ;;  %v5867_v55 = vshll.u32 %v13221_v41, 16  ;;  %v5043_v43 = vor.u32 %v5041_v24, %v5040_v42  ;;  %v13237_v27 = vrot.slane %v5782_v31, 4  ;;  %v5035_v39 = vsel %vm11813_vm11, %v10570_v35, %v5034_v54 }
 0x240   : > { %v5057_v46 = vsel %vm11813_vm11, %v12968_v28, %v5056_v50  ;;  %v5066_v6 = vsel %vm11813_vm11, %v5058_v23, %v13166_v36  ;;  %v13247_v19 = vrot.slane %v5792_v3, 4  ;;  %v7610_v33 = vshrl.u32 %v13226_v30, 16  ;;  %v13284_v23 = vld [vmem:[#allocation2 + $0xb0] sm:$0x1] }
 0x241   : > { %v5044_v0 = vsel %vm11813_vm11, %v5036_v57, %v5043_v43  ;;  %v10587_v53 = vcombine.low %v5057_v46, %v5066_v6  ;;  %v6996_v28 = vsel %vm11801_vm10, %v6991_v18, %v13198_v62  ;;  %v7006_v36 = vsel %vm11801_vm10, %v7001_v26, %v12934_v8 }
 0x242   : > { %v10586_v14 = vcombine.low %v5035_v39, %v5044_v0  ;;  %v13264_v16 = vcombine.low %v6996_v28, %v7006_v36  ;;  %v5788_v8 = vsel %vm11801_vm10, %v13237_v27, %v13210_v2  ;;  %v6400_v62 = vshrl.u32 %v13252_v25, 16 }
 0x243   : > { %5440 = vst.msk [vmem:[#allocation3 + $0x10] sm:$0xff] %vm1251_vm12, %v10587_v53  ;;  %v5798_v1 = vsel %vm11801_vm10, %v13247_v19, %v12936_v63  ;;  %v7099_v44 = vshll.u32 %v13254_v47, 16  ;;  %v13331_v41 = vrot.slane %v7610_v33, 11 }
 0x244   : > { %v7417_v21 = vld [vmem:[#allocation2 + $0x6c] sm:$0xf]  ;;  %5439 = vst.msk [vmem:[#allocation3] sm:$0xff] %vm1251_vm12, %v10586_v14  ;;  %v10622_v29 = vcombine.low %v5788_v8, %v5798_v1  ;;  %v13350_v1 = vld [vmem:[#allocation2 + $0x34] sm:$0xf] }
 0x245   : > { %v7527_v11 = vshrl.u32 %v7417_v21, 16  ;;  %v7530_v48 = vshll.u32 %v7417_v21, 16  ;;  %v6188_v45 = vld [vmem:[#allocation2 + $0x6c] sm:$0xf]  ;;  %5615 = vst.msk [vmem:[#allocation3] sm:$0xff] %vm1428_vm13, %v5568_v7 }
 0x246   : > { %v11273_v17 = vld [vmem:[#allocation2 + $0x6c] sm:$0xff]   ;;  %v6317_v56 = vshrl.u32 %v6188_v45, 16  ;;  %v6112_v50 = vpop.permute.xlu1 %6111  ;;  %v6320_v46 = vshll.u32 %v6188_v45, 16 }
 0x247   : > { %v7418_v60 = vld [vmem:[#allocation2 + $0x70] sm:$0xf]  ;;  %v7529_v37 = vrot.slane %v7527_v11, 7  ;;  %8037 = vrot.lane.b32.xlu1 %v11273_v17, %s11557_s23  ;;  %v6875_v35 = vld [vmem:[#allocation2 + $0x6c] sm:$0xf]  ;;  %6159 = vst.msk [vmem:[#allocation3] sm:$0xff] %vm1976_vm14, %v6112_v50 }
 0x248   : > { %v7536_v49 = vshrl.u32 %v7418_v60, 16  ;;  %v7539_v24 = vshll.u32 %v7418_v60, 16  ;;  %v6189_v31 = vld [vmem:[#allocation2 + $0x70] sm:$0xf]  ;;  %v6319_v26 = vrot.slane %v6317_v56, 7  ;;  %v7008_v17 = vshrl.u32 %v6875_v35, 16 }
 0x249   : > { %v4664_v18 = vpop.f32.mrb[20].mxu0  ;;  %v7532_v57 = vor.u32 %v7530_v48, %v7529_v37  ;;  %v7534_v42 = vrot.slane %v7529_v37, 4  ;;  %v11274_v43 = vld [vmem:[#allocation2 + $0x6c] sm:$0xff]   ;;  %v6326_v6 = vshrl.u32 %v6189_v31, 16  ;;  %v6329_v0 = vshll.u32 %v6189_v31, 16  ;;  %v11461_v56 = vld [vmem:[%s11721_s20 + $0x50] sm:$0xff] }
 0x24a   : > { %v4665_v3 = vadd.f32 %v13281_v13, %v4664_v18  ;;  %v4666_v54 = vpop.f32.mrb[21].mxu0  ;;  %v7538_v39 = vrot.slane %v7536_v49, 7  ;;  %v6324_v7 = vrot.slane %v6319_v26, 4  ;;  %v6876_v14 = vld [vmem:[#allocation2 + $0x70] sm:$0xf]  ;;  %v6322_v48 = vor.u32 %v6320_v46, %v6319_v26  ;;  %v11462_v26 = vld [vmem:[%s11721_s20 + $0x58] sm:$0xff] }
 0x24b   : > { %v4667_v34 = vpop.f32.mrb[22].mxu0  ;;  %v7533_v36 = vsel %vm11813_vm11, %v12981_v40, %v7532_v57  ;;  %6807 = vrot.lane.b32.xlu1 %v11274_v43, %s11556_s17  ;;  %v6328_v45 = vrot.slane %v6326_v6, 7  ;;  %v7011_v18 = vshll.u32 %v6875_v35, 16  ;;  %v7017_v49 = vshll.u32 %v6876_v14, 16  ;;  %v7431_v31 = vld [vmem:[#allocation2 + $0xcc] sm:$0x8] }
 0x24c   : > { %v4761_v53 = vmax.f32 %v4665_v3, 0.0  ;;  %v4668_v21 = vadd.f32 %v13281_v13, %v4667_v34  ;;  %v4669_v28 = vpop.f32.mrb[23].mxu0  ;;  %v7541_v11 = vor.u32 %v7539_v24, %v7538_v39  ;;  %v11275_v54 = vld [vmem:[#allocation2 + $0x6c] sm:$0xff]   ;;  %v7010_v57 = vrot.slane %v7008_v17, 4 }
 0x24d   : > { %v6331_v40 = vor.u32 %v6329_v0, %v6328_v45  ;;  %v5646_v50 = vld [vmem:[#allocation2 + $0x6c] sm:$0xf]  ;;  %v5891_v34 = vshll.u32 %v13284_v23, 16  ;;  %v7013_v46 = vrot.slane %v7011_v18, 5  ;;  %v5647_v6 = vld [vmem:[#allocation2 + $0x70] sm:$0xf]  ;;  %v6323_v35 = vsel %vm11813_vm11, %v12985_v61, %v6322_v48 }
 0x24e   : > { %v4793_v60 = vadd.f32 %v11461_v56, %v4761_v53  ;;  %v4762_v37 = vmax.f32 %v4668_v21, 0.0  ;;  %v7542_v3 = vsel %vm11813_vm11, %v7534_v42, %v7541_v11  ;;  %v13303_v0 = vrot.slane %v7017_v49, 5  ;;  %v6202_v21 = vld [vmem:[#allocation2 + $0xcc] sm:$0x8] }
 0x24f   : > { %v10717_v39 = vcombine.low %v7533_v36, %v7542_v3  ;;  %5577 = vrot.lane.b32.xlu1 %v11275_v54, %s11555_s28  ;;  %v6332_v42 = vsel %vm11813_vm11, %v6324_v7, %v6331_v40  ;;  %v7021_v53 = vshrl.u32 %v6876_v14, 16  ;;  %v5800_v28 = vshrl.u32 %v5646_v50, 16 }
 0x250   : > { %v10937_v24 = vpack.c.bf16 %v4793_v60, %v4793_v60  ;;  %v4794_v43 = vadd.f32 %v11462_v26, %v4762_v37  ;;  %v5803_v36 = vshll.u32 %v5646_v50, 16  ;;  %v7632_v11 = vshrl.u32 %v7431_v31, 16 }
 0x251   : > { %7861 = vrot.lane.b32.xlu0 %v10717_v39, %s11559_s14  ;;  %v7014_v45 = vor.u32 %v7013_v46, %v7010_v57  ;;  %v7023_v17 = vrot.slane %v7021_v53, 4  ;;  %v5809_v56 = vshll.u32 %v5647_v6, 16  ;;  %v5813_v60 = vshrl.u32 %v5647_v6, 16 }
 0x252   : > { %4953 = vst.msk [vmem:[#allocation2 + $0x80] sm:$0xf] %vm462_vm0, %v10937_v24  ;;  %v10938_v23 = vpack.c.bf16 %v4794_v43, %v4794_v43  ;;  %v10654_v61 = vcombine.low %v6323_v35, %v6332_v42  ;;  %v13310_v7 = vrot.slane %v7075_v32, 5  ;;  %v13314_v14 = vrot.slane %v5867_v55, 5 }
 0x253   : > { %v6422_v48 = vshrl.u32 %v6202_v21, 16  ;;  %7349 = vrot.lane.b32.xlu1 %v13264_v16, %s11560_s15  ;;  %v7024_v32 = vor.u32 %v7023_v17, %v13303_v0  ;;  %v13335_v55 = vrot.slane %v6400_v62, 11  ;;  %v4982_v16 = vld [vmem:[#allocation2 + $0x30] sm:$0xf]  ;;  %v5802_v63 = vrot.slane %v5800_v28, 4 }
 0x254   : > { %4954 = vst.msk [vmem:[#allocation2 + $0x84] sm:$0xf] %vm462_vm0, %v10938_v23  ;;  %v5805_v19 = vrot.slane %v5803_v36, 5  ;;  %v13340_v37 = vrot.slane %v7099_v44, 5  ;;  %v13342_v2 = vrot.slane %v5891_v34, 5  ;;  %v7015_v27 = vrot.slane %v7014_v45, 4 }
 0x255   : > { %6631 = vrot.lane.b32.xlu0 %v10654_v61, %s11558_s25  ;;  %v13344_v8 = vrot.slane %v5809_v56, 5  ;;  %v5815_v30 = vrot.slane %v5813_v60, 4  ;;  %v13346_v33 = vrot.slane %v7632_v11, 11  ;;  %v7025_v25 = vrot.slane %v7024_v32, 4 }
 0x256   : > { %v13348_v62 = vrot.slane %v6422_v48, 11  ;;  %v5073_v18 = vshrl.u32 %v4982_v16, 16  ;;  %v5076_v49 = vshll.u32 %v4982_v16, 16  ;;  %v5806_v54 = vor.u32 %v5805_v19, %v5802_v63 }
 0x257   : > { %6119 = vrot.lane.b32.xlu1 %v10622_v29, %s11561_s22  ;;  %v7020_v24 = vsel %vm11801_vm10, %v7015_v27, %v13303_v0  ;;  %v5816_v26 = vor.u32 %v5815_v30, %v13344_v8  ;;  %v5082_v42 = vshrl.u32 %v13350_v1, 16  ;;  %v7030_v56 = vsel %vm11801_vm10, %v7025_v25, %v12994_v10 }
 0x258   : > { %v13357_v43 = vrot.slane %v5073_v18, 7  ;;  %v13361_v28 = vrot.slane %v5806_v54, 4 }
 0x259   : > { %v7420_v47 = vld [vmem:[#allocation2 + $0x80] sm:$0xf]  ;;  %v13366_v29 = vrot.slane %v5816_v26, 4 }
 0x25a   : > { %v7549_v44 = vshrl.u32 %v7420_v47, 16  ;;  %v7552_v31 = vshll.u32 %v7420_v47, 16  ;;  %v6191_v3 = vld [vmem:[#allocation2 + $0x80] sm:$0xf]  ;;  %v10686_v47 = vcombine.low %v7020_v24, %v7030_v56  ;;  %v13373_v10 = vor.u32 %v5076_v49, %v13357_v43 }
 0x25b   : > { %v11276_v40 = vld [vmem:[#allocation2 + $0x80] sm:$0xff]   ;;  %v6339_v57 = vshrl.u32 %v6191_v3, 16  ;;  %v6342_v21 = vshll.u32 %v6191_v3, 16  ;;  %v5812_v3 = vsel %vm11801_vm10, %v13361_v28, %v13344_v8 }
 0x25c   : > { %v7421_v50 = vld [vmem:[#allocation2 + $0x84] sm:$0xf]  ;;  %v7551_v34 = vrot.slane %v7549_v44, 7  ;;  %8039 = vrot.lane.b32.xlu0 %v11276_v40, %s11557_s23  ;;  %v6878_v36 = vld [vmem:[#allocation2 + $0x80] sm:$0xf] }
 0x25d   : > { %v7558_v39 = vshrl.u32 %v7421_v50, 16  ;;  %v7561_v46 = vshll.u32 %v7421_v50, 16  ;;  %v6192_v6 = vld [vmem:[#allocation2 + $0x84] sm:$0xf]  ;;  %v6341_v35 = vrot.slane %v6339_v57, 7  ;;  %v7032_v32 = vshrl.u32 %v6878_v36, 16 }
 0x25e   : > { %v7554_v53 = vor.u32 %v7552_v31, %v7551_v34  ;;  %v6348_v23 = vshrl.u32 %v6192_v6, 16  ;;  %v11277_v11 = vld [vmem:[#allocation2 + $0x80] sm:$0xff]   ;;  %v7556_v0 = vrot.slane %v7551_v34, 4  ;;  %v6351_v17 = vshll.u32 %v6192_v6, 16 }
 0x25f   : > { %v7560_v45 = vrot.slane %v7558_v39, 7  ;;  %v6879_v60 = vld [vmem:[#allocation2 + $0x84] sm:$0xf]  ;;  %v6346_v61 = vrot.slane %v6341_v35, 4  ;;  %v6344_v19 = vor.u32 %v6342_v21, %v6341_v35  ;;  %v7035_v27 = vshll.u32 %v6878_v36, 16 }
 0x260   : > { %v6350_v48 = vrot.slane %v6348_v23, 7  ;;  %6809 = vrot.lane.b32.xlu0 %v11277_v11, %s11556_s17  ;;  %v7555_v16 = vsel %vm11813_vm11, %v13121_v52, %v7554_v53  ;;  %v5649_v30 = vld [vmem:[#allocation2 + $0x80] sm:$0xf]  ;;  %v7041_v44 = vshll.u32 %v6879_v60, 16  ;;  %v7034_v52 = vrot.slane %v7032_v32, 4  ;;  %v11463_v32 = vld [vmem:[%s11721_s20 + $0x60] sm:$0xff] }
 0x261   : > { %v7563_v63 = vor.u32 %v7561_v46, %v7560_v45  ;;  %v11278_v31 = vld [vmem:[#allocation2 + $0x80] sm:$0xff]   ;;  %v7045_v54 = vshrl.u32 %v6879_v60, 16  ;;  %v7037_v34 = vrot.slane %v7035_v27, 5  ;;  %v5824_v24 = vshrl.u32 %v5649_v30, 16 }
 0x262   : > { %v6353_v18 = vor.u32 %v6351_v17, %v6350_v48  ;;  %v5650_v40 = vld [vmem:[#allocation2 + $0x84] sm:$0xf]  ;;  %v5827_v26 = vshll.u32 %v5649_v30, 16  ;;  %v6345_v46 = vsel %vm11813_vm11, %v13125_v5, %v6344_v19  ;;  %v5822_v6 = vsel %vm11801_vm10, %v13366_v29, %v12996_v22  ;;  %v4984_v30 = vld [vmem:[#allocation2 + $0x40] sm:$0x8] }
 0x263   : > { %v7564_v25 = vsel %vm11813_vm11, %v7556_v0, %v7563_v63  ;;  %v6889_v35 = vld [vmem:[#allocation2 + $0xc4] sm:$0x1]  ;;  %v13393_v21 = vrot.slane %v7041_v44, 5  ;;  %v7047_v23 = vrot.slane %v7045_v54, 4  ;;  %v5833_v28 = vshll.u32 %v5650_v40, 16 }
 0x264   : > { %v4672_v57 = vpop.f32.mrb[24].mxu0  ;;  %v10718_v50 = vcombine.low %v7555_v16, %v7564_v25  ;;  %5579 = vrot.lane.b32.xlu0 %v11278_v31, %s11555_s28  ;;  %v6354_v8 = vsel %vm11813_vm11, %v6346_v61, %v6353_v18  ;;  %v5837_v36 = vshrl.u32 %v5650_v40, 16  ;;  %v6800_v11 = vpop.permute.xlu1 %6799  ;;  %v5826_v17 = vrot.slane %v5824_v24, 4  ;;  %v5660_v60 = vld [vmem:[#allocation2 + $0xc4] sm:$0x1] }
 0x265   : > { %v4673_v49 = vadd.f32 %v13281_v13, %v4672_v57  ;;  %v4674_v39 = vpop.f32.mrb[25].mxu0  ;;  %v5829_v56 = vrot.slane %v5827_v26, 5  ;;  %v10655_v61 = vcombine.low %v6345_v46, %v6354_v8  ;;  %v7038_v22 = vor.u32 %v7037_v34, %v7034_v52  ;;  %v7434_v54 = vld [vmem:[#allocation2 + $0xe0] sm:$0x8]  ;;  %v11464_v57 = vld [vmem:[%s11721_s20 + $0x68] sm:$0xff] }
 0x266   : > { %v4675_v53 = vpop.f32.mrb[26].mxu0  ;;  %7863 = vrot.lane.b32.xlu1 %v10718_v50, %s11559_s14  ;;  %v13396_v48 = vrot.slane %v5833_v28, 5  ;;  %v5839_v29 = vrot.slane %v5837_v36, 4  ;;  %v5085_v19 = vshll.u32 %v13350_v1, 16  ;;  %v7123_v27 = vshll.u32 %v6889_v35, 16 }
 0x267   : > { %v4763_v5 = vmax.f32 %v4673_v49, 0.0  ;;  %v4676_v0 = vadd.f32 %v13281_v13, %v4675_v53  ;;  %v4677_v45 = vpop.f32.mrb[27].mxu0  ;;  %v7048_v18 = vor.u32 %v7047_v23, %v13393_v21  ;;  %v5079_v25 = vsel %vm11813_vm11, %v12989_v59, %v13373_v10  ;;  %v4986_v26 = vld [vmem:[#allocation2 + $0x48] sm:$0xf]  ;;  %v8098_v23 = vld [vmem:[#allocation2 + $0x44] sm:$0xf] }
 0x268   : > { %7351 = vrot.lane.b32.xlu0 %v10686_v47, %s11560_s15  ;;  %v5570_v44 = vpop.permute.xlu1 %5569  ;;  %v5084_v31 = vrot.slane %v5082_v42, 7  ;;  %v5915_v52 = vshll.u32 %v5660_v60, 16  ;;  %v4985_v47 = vld [vmem:[#allocation2 + $0x44] sm:$0xf]  ;;  %v10623_v34 = vcombine.low %v5812_v3, %v5822_v6  ;;  %v5830_v24 = vor.u32 %v5829_v56, %v5826_v17  ;;  %v6205_v45 = vld [vmem:[#allocation2 + $0xe0] sm:$0x8] }
 0x269   : > { %v4795_v16 = vadd.f32 %v11463_v32, %v4763_v5  ;;  %v4764_v63 = vmax.f32 %v4676_v0, 0.0  ;;  %5616 = vst.msk [vmem:[#allocation3 + $0x10] sm:$0xff] %vm1428_vm13, %v5570_v44  ;;  %v13411_v49 = vrot.slane %v7038_v22, 4  ;;  %v5840_v39 = vor.u32 %v5839_v29, %v13396_v48  ;;  %v6892_v22 = vld [vmem:[#allocation2 + $0xd8] sm:$0x1] }
 0x26a   : > { %6633 = vrot.lane.b32.xlu1 %v10655_v61, %s11558_s25  ;;  %v5080_v59 = vrot.slane %v13357_v43, 4  ;;  %v5087_v10 = vor.u32 %v5085_v19, %v5084_v31  ;;  %v7654_v42 = vshrl.u32 %v7434_v54, 16  ;;  %v5090_v46 = vshrl.u32 %v4984_v30, 16 }
 0x26b   : > { %v10939_v40 = vpack.c.bf16 %v4795_v16, %v4795_v16  ;;  %v4796_v50 = vadd.f32 %v11464_v57, %v4764_v63  ;;  %v5095_v8 = vshrl.u32 %v4985_v47, 16  ;;  %v13417_v3 = vrot.slane %v7048_v18, 4  ;;  %v13435_v16 = vld [vmem:[#allocation2 + $0x48] sm:$0xf] }
 0x26c   : > { %6121 = vrot.lane.b32.xlu0 %v10623_v34, %s11561_s22  ;;  %v5088_v6 = vsel %vm11813_vm11, %v5080_v59, %v5087_v10  ;;  %v5098_v35 = vshll.u32 %v4985_v47, 16  ;;  %v5104_v53 = vshrl.u32 %v4986_v26, 16  ;;  %v13422_v43 = vrot.slane %v5830_v24, 4 }
 0x26d   : > { %4955 = vst.msk [vmem:[#allocation2 + $0x94] sm:$0xf] %vm462_vm0, %v10939_v40  ;;  %v10940_v1 = vpack.c.bf16 %v4796_v50, %v4796_v50  ;;  %v10588_v36 = vcombine.low %v5079_v25, %v5088_v6  ;;  %v13424_v5 = vrot.slane %v7123_v27, 5  ;;  %v13426_v0 = vrot.slane %v5915_v52, 5 }
 0x26e   : > { %v6624_v28 = vpop.permute.xlu0 %6623  ;;  %v10573_v17 = vrot.slane %v5090_v46, 11  ;;  %v5097_v56 = vrot.slane %v5095_v8, 7  ;;  %v5106_v60 = vrot.slane %v5104_v53, 7  ;;  %v5107_v61 = vshll.u32 %v4986_v26, 16  ;;  %v11465_v53 = vld [vmem:[%s11721_s20 + $0x70] sm:$0xff] }
 0x26f   : > { %4956 = vst.msk [vmem:[#allocation2 + $0x98] sm:$0xf] %vm462_vm0, %v10940_v1  ;;  %v13429_v29 = vrot.slane %v5840_v39, 4  ;;  %v13433_v32 = vrot.slane %v7654_v42, 11  ;;  %v8168_v63 = vshrl.u32 %v8098_v23, 16  ;;  %v8171_v19 = vshll.u32 %v8098_v23, 16 }
 0x270   : > { %6671 = vst.msk [vmem:[#allocation3] sm:$0xff] %vm2489_vm15, %v6624_v28  ;;  %v5100_v30 = vor.u32 %v5098_v35, %v5097_v56  ;;  %v5102_v18 = vrot.slane %v5097_v56, 4  ;;  %v5109_v44 = vor.u32 %v5107_v61, %v5106_v60  ;;  %v6444_v25 = vshrl.u32 %v6205_v45, 16 }
 0x271   : > { %6847 = vst.msk [vmem:[#allocation3] sm:$0xff] %vm2666_vm1, %v6800_v11  ;;  %v7147_v54 = vshll.u32 %v6892_v22, 16  ;;  %v8170_v47 = vrot.slane %v8168_v63, 4  ;;  %v8173_v40 = vrot.slane %v8171_v19, 5  ;;  %v8177_v34 = vshll.u32 %v13435_v16, 16 }
 0x272   : > { %5441 = vst.msk [vmem:[#allocation3 + $0x20] sm:$0xff] %vm1251_vm12, %v10588_v36  ;;  %v4680_v27 = vpop.f32.mrb[28].mxu0  ;;  %v5101_v57 = vsel %vm11813_vm11, %v10573_v17, %v5100_v30  ;;  %v5110_v50 = vsel %vm11813_vm11, %v5102_v18, %v5109_v44  ;;  %v7044_v8 = vsel %vm11801_vm10, %v13411_v49, %v13393_v21  ;;  %v7054_v6 = vsel %vm11801_vm10, %v13417_v3, %v13129_v15 }
 0x273   : > { %v4681_v31 = vadd.f32 %v13281_v13, %v4680_v27  ;;  %v4682_v52 = vpop.f32.mrb[29].mxu0  ;;  %v10589_v10 = vcombine.low %v5101_v57, %v5110_v50  ;;  %v8174_v1 = vor.u32 %v8173_v40, %v8170_v47  ;;  %v5836_v35 = vsel %vm11801_vm10, %v13422_v43, %v13396_v48  ;;  %v11466_v27 = vld [vmem:[%s11721_s20 + $0x78] sm:$0xff] }
 0x274   : > { %v4683_v11 = vpop.f32.mrb[30].mxu0  ;;  %v7423_v59 = vld [vmem:[#allocation2 + $0x94] sm:$0xf]  ;;  %v13458_v17 = vrot.slane %v6444_v25, 11  ;;  %v13463_v63 = vrot.slane %v7147_v54, 5  ;;  %v5846_v25 = vsel %vm11801_vm10, %v13429_v29, %v13133_v58  ;;  %v13525_v3 = vrot.slane %v8177_v34, 5 }
 0x275   : > { %v4765_v24 = vmax.f32 %v4681_v31, 0.0  ;;  %v4684_v26 = vadd.f32 %v13281_v13, %v4683_v11  ;;  %v4685_v39 = vpop.f32.mrb[31].mxu0  ;;  %v7571_v46 = vshrl.u32 %v7423_v59, 16  ;;  %v7574_v45 = vshll.u32 %v7423_v59, 16  ;;  %5442 = vst.msk [vmem:[#allocation3 + $0x30] sm:$0xff] %vm1251_vm12, %v10589_v10 }
 0x276   : > { %v11279_v42 = vld [vmem:[#allocation2 + $0x94] sm:$0xff]   ;;  %v13461_v22 = vpop.permute.xlu0 %8031  ;;  %v13470_v52 = vrot.slane %v8174_v1, 4  ;;  %v10624_v15 = vcombine.low %v5836_v35, %v5846_v25 }
 0x277   : > { %v4797_v23 = vadd.f32 %v11465_v53, %v4765_v24  ;;  %v4766_v28 = vmax.f32 %v4684_v26, 0.0  ;;  %v7424_v36 = vld [vmem:[#allocation2 + $0x98] sm:$0xf]  ;;  %8041 = vrot.lane.b32.xlu1 %v11279_v42, %s11557_s23  ;;  %v7573_v56 = vrot.slane %v7571_v46, 7  ;;  %v6194_v44 = vld [vmem:[#allocation2 + $0x94] sm:$0xf] }
 0x278   : > { %v7580_v60 = vshrl.u32 %v7424_v36, 16  ;;  %v7583_v61 = vshll.u32 %v7424_v36, 16  ;;  %v11280_v18 = vld [vmem:[#allocation2 + $0x94] sm:$0xff]   ;;  %v6361_v50 = vshrl.u32 %v6194_v44, 16  ;;  %v6364_v59 = vshll.u32 %v6194_v44, 16 }
 0x279   : > { %v10941_v19 = vpack.c.bf16 %v4797_v23, %v4797_v23  ;;  %v4798_v30 = vadd.f32 %v11466_v27, %v4766_v28  ;;  %v6195_v31 = vld [vmem:[#allocation2 + $0x98] sm:$0xf]  ;;  %v7576_v40 = vor.u32 %v7574_v45, %v7573_v56  ;;  %v7578_v11 = vrot.slane %v7573_v56, 4  ;;  %v6881_v54 = vld [vmem:[#allocation2 + $0x94] sm:$0xf] }
 0x27a   : > { %v4688_v47 = vpop.f32.mrb[32].mxu0  ;;  %v7582_v57 = vrot.slane %v7580_v60, 7  ;;  %v6370_v10 = vshrl.u32 %v6195_v31, 16  ;;  %v6363_v53 = vrot.slane %v6361_v50, 7  ;;  %v6373_v23 = vshll.u32 %v6195_v31, 16  ;;  %v13478_v28 = vpop.permute.xlu0 %6801  ;;  %v11467_v31 = vld [vmem:[%s11721_s20 + $0x80] sm:$0xff] }
 0x27b   : > { %4957 = vst.msk [vmem:[#allocation2 + $0xa8] sm:$0xf] %vm462_vm0, %v10941_v19  ;;  %v10942_v24 = vpack.c.bf16 %v4798_v30, %v4798_v30  ;;  %v4689_v26 = vadd.f32 %v13281_v13, %v4688_v47  ;;  %v4690_v39 = vpop.f32.mrb[33].mxu0  ;;  %6811 = vrot.lane.b32.xlu1 %v11280_v18, %s11556_s17  ;;  %v7577_v1 = vsel %vm11813_vm11, %v13136_v12, %v7576_v40  ;;  %v6882_v19 = vld [vmem:[#allocation2 + $0x98] sm:$0xf]  ;;  %v7056_v27 = vshrl.u32 %v6881_v54, 16 }
 0x27c   : > { %v4691_v42 = vpop.f32.mrb[34].mxu0  ;;  %v7585_v46 = vor.u32 %v7583_v61, %v7582_v57  ;;  %v6372_v60 = vrot.slane %v6370_v10, 7  ;;  %v11281_v18 = vld [vmem:[#allocation2 + $0x94] sm:$0xff]   ;;  %v6366_v12 = vor.u32 %v6364_v59, %v6363_v53  ;;  %v6368_v61 = vrot.slane %v6363_v53, 4 }
 0x27d   : > { %4958 = vst.msk [vmem:[#allocation2 + $0xac] sm:$0xf] %vm462_vm0, %v10942_v24  ;;  %v4767_v36 = vmax.f32 %v4689_v26, 0.0  ;;  %v4692_v45 = vadd.f32 %v13281_v13, %v4691_v42  ;;  %v4693_v56 = vpop.f32.mrb[35].mxu0  ;;  %v7059_v44 = vshll.u32 %v6881_v54, 16  ;;  %v13489_v26 = vrot.slane %v7056_v27, 4 }
 0x27e   : > { %v7586_v30 = vsel %vm11813_vm11, %v7578_v11, %v7585_v46  ;;  %v6375_v50 = vor.u32 %v6373_v23, %v6372_v60  ;;  %v6367_v24 = vsel %vm11813_vm11, %v13138_v51, %v6366_v12  ;;  %v7065_v11 = vshll.u32 %v6882_v19, 16  ;;  %v5572_v10 = vpop.permute.xlu0 %5571  ;;  %v11468_v42 = vld [vmem:[%s11721_s20 + $0x88] sm:$0xff] }
 0x27f   : > { %v4799_v47 = vadd.f32 %v11467_v31, %v4767_v36  ;;  %v4768_v40 = vmax.f32 %v4692_v45, 0.0  ;;  %v10719_v57 = vcombine.low %v7577_v1, %v7586_v30  ;;  %5581 = vrot.lane.b32.xlu1 %v11281_v18, %s11555_s28  ;;  %v13491_v39 = vrot.slane %v7059_v44, 5  ;;  %5617 = vst.msk [vmem:[#allocation3 + $0x20] sm:$0xff] %vm1428_vm13, %v5572_v10  ;;  %v11469_v44 = vld [vmem:[%s11721_s20 + $0x90] sm:$0xff] }
 0x280   : > { %v6376_v1 = vsel %vm11813_vm11, %v6368_v61, %v6375_v50  ;;  %v7069_v46 = vshrl.u32 %v6882_v19, 16  ;;  %v7856_v53 = vpop.permute.xlu1 %7855  ;;  %v10687_v51 = vcombine.low %v7044_v8, %v7054_v6  ;;  %v13508_v36 = vrot.slane %v7065_v11, 5 }
 0x281   : > { %v10943_v59 = vpack.c.bf16 %v4799_v47, %v4799_v47  ;;  %v4800_v54 = vadd.f32 %v11468_v42, %v4768_v40  ;;  %7865 = vrot.lane.b32.xlu0 %v10719_v57, %s11559_s14  ;;  %v10656_v56 = vcombine.low %v6367_v24, %v6376_v1  ;;  %v7062_v34 = vor.u32 %v13491_v39, %v13489_v26 }
 0x282   : > { %v7426_v27 = vld [vmem:[#allocation2 + $0xa8] sm:$0xf]  ;;  %v7071_v30 = vrot.slane %v7069_v46, 4  ;;  %v7344_v49 = vpop.permute.xlu0 %7343  ;;  %v8180_v61 = vsel %vm11801_vm10, %v13470_v52, %v13525_v3 }
 0x283   : > { %4959 = vst.msk [vmem:[#allocation2 + $0xbc] sm:$0xf] %vm462_vm0, %v10943_v59  ;;  %v10944_v45 = vpack.c.bf16 %v4800_v54, %v4800_v54  ;;  %7353 = vrot.lane.b32.xlu1 %v10687_v51, %s11560_s15  ;;  %v7593_v6 = vshrl.u32 %v7426_v27, 16  ;;  %v7596_v18 = vshll.u32 %v7426_v27, 16  ;;  %v6197_v57 = vld [vmem:[#allocation2 + $0xa8] sm:$0xf] }
 0x284   : > { %v7427_v29 = vld [vmem:[#allocation2 + $0xac] sm:$0xf]  ;;  %v6626_v12 = vpop.permute.xlu1 %6625  ;;  %7391 = vst.msk [vmem:[#allocation3] sm:$0xff] %vm3211_vm2, %v7344_v49  ;;  %v7072_v24 = vor.u32 %v7071_v30, %v13508_v36  ;;  %v6383_v39 = vshrl.u32 %v6197_v57, 16  ;;  %v6386_v11 = vshll.u32 %v6197_v57, 16  ;;  %v11470_v54 = vld [vmem:[%s11721_s20 + $0x98] sm:$0xff] }
 0x285   : > { %v4696_v23 = vpop.f32.mrb[36].mxu0  ;;  %4960 = vst.msk [vmem:[#allocation2 + $0xc0] sm:$0xf] %vm462_vm0, %v10944_v45  ;;  %6635 = vrot.lane.b32.xlu0 %v10656_v56, %s11558_s25  ;;  %v11282_v48 = vld [vmem:[#allocation2 + $0xa8] sm:$0xff]   ;;  %v7602_v43 = vshrl.u32 %v7427_v29, 16  ;;  %v7605_v35 = vshll.u32 %v7427_v29, 16 }
 0x286   : > { %v4697_v60 = vadd.f32 %v13281_v13, %v4696_v23  ;;  %v4698_v19 = vpop.f32.mrb[37].mxu0  ;;  %7903 = vst.msk [vmem:[#allocation3] sm:$0xff] %vm3725_vm3, %v7856_v53  ;;  %v7595_v40 = vrot.slane %v7593_v6, 7  ;;  %v6198_v50 = vld [vmem:[#allocation2 + $0xac] sm:$0xf]  ;;  %v6114_v59 = vpop.permute.xlu0 %6113  ;;  %v6385_v23 = vrot.slane %v6383_v39, 7 }
 0x287   : > { %v4699_v21 = vpop.f32.mrb[38].mxu0  ;;  %8079 = vst.msk [vmem:[#allocation3] sm:$0xff] %vm3902_vm4, %v13461_v22  ;;  %6123 = vrot.lane.b32.xlu1 %v10624_v15, %s11561_s22  ;;  %v7604_v26 = vrot.slane %v7602_v43, 7  ;;  %v6392_v10 = vshrl.u32 %v6198_v50, 16  ;;  %v6395_v22 = vshll.u32 %v6198_v50, 16  ;;  %v11283_v30 = vld [vmem:[#allocation2 + $0xa8] sm:$0xff]  }
 0x288   : > { %v4769_v8 = vmax.f32 %v4697_v60, 0.0  ;;  %v4700_v58 = vadd.f32 %v13281_v13, %v4699_v21  ;;  %v4701_v25 = vpop.f32.mrb[39].mxu0  ;;  %v7598_v46 = vor.u32 %v7596_v18, %v7595_v40  ;;  %v7600_v53 = vrot.slane %v7595_v40, 4  ;;  %6160 = vst.msk [vmem:[#allocation3 + $0x10] sm:$0xff] %vm1976_vm14, %v6114_v59  ;;  %v5652_v60 = vld [vmem:[#allocation2 + $0x94] sm:$0xf] }
 0x289   : > { %8043 = vrot.lane.b32.xlu0 %v11282_v48, %s11557_s23  ;;  %v7607_v51 = vor.u32 %v7605_v35, %v7604_v26  ;;  %v6394_v45 = vrot.slane %v6392_v10, 7  ;;  %v13546_v19 = vpop.permute.xlu1 %8033  ;;  %6672 = vst.msk [vmem:[#allocation3 + $0x10] sm:$0xff] %vm2489_vm15, %v6626_v12  ;;  %v7063_v21 = vrot.slane %v7062_v34, 4  ;;  %v7073_v49 = vrot.slane %v7072_v24, 4  ;;  %v5653_v48 = vld [vmem:[#allocation2 + $0x98] sm:$0xf] }
 0x28a   : > { %v4801_v31 = vadd.f32 %v11469_v44, %v4769_v8  ;;  %v4770_v47 = vmax.f32 %v4700_v58, 0.0  ;;  %v7599_v15 = vsel %vm11813_vm11, %v13231_v38, %v7598_v46  ;;  %6848 = vst.msk [vmem:[#allocation3 + $0x10] sm:$0xff] %vm2666_vm1, %v13478_v28  ;;  %v6388_v29 = vor.u32 %v6386_v11, %v6385_v23  ;;  %v7429_v34 = vld [vmem:[#allocation2 + $0xbc] sm:$0xf]  ;;  %v11284_v44 = vld [vmem:[#allocation2 + $0xa8] sm:$0xff]  }
 0x28b   : > { %v7608_v58 = vsel %vm11813_vm11, %v7600_v53, %v7607_v51  ;;  %v6390_v6 = vrot.slane %v6385_v23, 4  ;;  %v6397_v18 = vor.u32 %v6395_v22, %v6394_v45  ;;  %v7068_v38 = vsel %vm11801_vm10, %v7063_v21, %v13508_v36  ;;  %v11472_v22 = vld [vmem:[%s11721_s20 + $0xa8] sm:$0xff] }
 0x28c   : > { %v10945_v42 = vpack.c.bf16 %v4801_v31, %v4801_v31  ;;  %v4802_v1 = vadd.f32 %v11470_v54, %v4770_v47  ;;  %v10720_v43 = vcombine.low %v7599_v15, %v7608_v58  ;;  %v7078_v28 = vsel %vm11801_vm10, %v7073_v49, %v13310_v7  ;;  %v7430_v39 = vld [vmem:[#allocation2 + $0xc0] sm:$0xf]  ;;  %v6200_v54 = vld [vmem:[#allocation2 + $0xbc] sm:$0xf]  ;;  %v6884_v15 = vld [vmem:[#allocation2 + $0xa8] sm:$0xf] }
 0x28d   : > { %v4704_v56 = vpop.f32.mrb[40].mxu0  ;;  %6813 = vrot.lane.b32.xlu0 %v11283_v30, %s11556_s17  ;;  %v6389_v31 = vsel %vm11813_vm11, %v13233_v4, %v6388_v29  ;;  %v6398_v47 = vsel %vm11813_vm11, %v6390_v6, %v6397_v18  ;;  %v10688_v40 = vcombine.low %v7068_v38, %v7078_v28  ;;  %v13572_v36 = vpop.permute.xlu1 %6803  ;;  %v5848_v24 = vshrl.u32 %v5652_v60, 16  ;;  %v6201_v45 = vld [vmem:[#allocation2 + $0xc0] sm:$0xf]  ;;  %v13579_v18 = vld [vmem:[#allocation2 + $0xac] sm:$0xf] }
 0x28e   : > { %4961 = vst.msk [vmem:[#allocation2 + $0xd0] sm:$0xf] %vm462_vm0, %v10945_v42  ;;  %v10946_v27 = vpack.c.bf16 %v4802_v1, %v4802_v1  ;;  %v4706_v8 = vpop.f32.mrb[41].mxu0  ;;  %v4705_v35 = vadd.f32 %v13281_v13, %v4704_v56  ;;  %7867 = vrot.lane.b32.xlu1 %v10720_v43, %s11559_s14  ;;  %v10657_v7 = vcombine.low %v6389_v31, %v6398_v47  ;;  %v5851_v26 = vshll.u32 %v5652_v60, 16  ;;  %v8607_v11 = vld [vmem:[#allocation3] sm:$0xff] }
 0x28f   : > { %v4707_v12 = vpop.f32.mrb[42].mxu0  ;;  %v5857_v4 = vshll.u32 %v5653_v48, 16  ;;  %v5861_v59 = vshrl.u32 %v5653_v48, 16  ;;  %v7615_v42 = vshrl.u32 %v7429_v34, 16  ;;  %8799 = vmatmul.mubr.bf16.vlgmr.msra.gmra.mrb[0].mxu1 %v8607_v11  ;;  %v11471_v1 = vld [vmem:[%s11721_s20 + $0xa0] sm:$0xff]  ;;  %v5850_v53 = vrot.slane %v5848_v24, 4 }
 0x290   : > { %4962 = vst.msk [vmem:[#allocation2 + $0xd4] sm:$0xf] %vm462_vm0, %v10946_v27  ;;  %v4709_v25 = vpop.f32.mrb[43].mxu0  ;;  %v4708_v57 = vadd.f32 %v13281_v13, %v4707_v12  ;;  %v4771_v50 = vmax.f32 %v4705_v35, 0.0  ;;  %v5853_v51 = vrot.slane %v5851_v26, 5  ;;  %v7618_v23 = vshll.u32 %v7429_v34, 16 }
 0x291   : > { %5583 = vrot.lane.b32.xlu0 %v11284_v44, %s11555_s28  ;;  %v5859_v60 = vrot.slane %v5857_v4, 5  ;;  %v5863_v27 = vrot.slane %v5861_v59, 4  ;;  %v7617_v30 = vrot.slane %v7615_v42, 7  ;;  %v5574_v49 = vpop.permute.xlu1 %5573  ;;  %v7624_v29 = vshrl.u32 %v7430_v39, 16  ;;  %v11285_v48 = vld [vmem:[#allocation2 + $0xbc] sm:$0xff]  }
 0x292   : > { %v4772_v10 = vmax.f32 %v4708_v57, 0.0  ;;  %v4803_v46 = vadd.f32 %v11471_v1, %v4771_v50  ;;  %6637 = vrot.lane.b32.xlu1 %v10657_v7, %s11558_s25  ;;  %v5854_v58 = vor.u32 %v5853_v51, %v5850_v53  ;;  %v7627_v6 = vshll.u32 %v7430_v39, 16  ;;  %5618 = vst.msk [vmem:[#allocation3 + $0x30] sm:$0xff] %vm1428_vm13, %v5574_v49  ;;  %v11286_v53 = vld [vmem:[#allocation2 + $0xbc] sm:$0xff]  }
 0x293   : > { %v5864_v38 = vor.u32 %v5863_v27, %v5859_v60  ;;  %v7620_v28 = vor.u32 %v7618_v23, %v7617_v30  ;;  %v7622_v35 = vrot.slane %v7617_v30, 4  ;;  %v7858_v34 = vpop.permute.xlu0 %7857  ;;  %v7626_v31 = vrot.slane %v7624_v29, 7  ;;  %v5656_v30 = vld [vmem:[#allocation2 + $0xac] sm:$0xf] }
 0x294   : > { %v4804_v56 = vadd.f32 %v11472_v22, %v4772_v10  ;;  %v10947_v8 = vpack.c.bf16 %v4803_v46, %v4803_v46  ;;  %v5855_v44 = vrot.slane %v5854_v58, 4  ;;  %v6405_v47 = vshrl.u32 %v6200_v54, 16  ;;  %v5655_v22 = vld [vmem:[#allocation2 + $0xa8] sm:$0xf] }
 0x295   : > { %v4712_v21 = vpop.f32.mrb[44].mxu0  ;;  %7355 = vrot.lane.b32.xlu0 %v10688_v40, %s11560_s15  ;;  %v6408_v57 = vshll.u32 %v6200_v54, 16  ;;  %v5865_v7 = vrot.slane %v5864_v38, 4  ;;  %v7621_v50 = vsel %vm11813_vm11, %v13331_v41, %v7620_v28  ;;  %v6414_v24 = vshrl.u32 %v6201_v45, 16  ;;  %v7346_v11 = vpop.permute.xlu1 %7345 }
 0x296   : > { %v4714_v12 = vpop.f32.mrb[45].mxu0  ;;  %v10948_v43 = vpack.c.bf16 %v4804_v56, %v4804_v56  ;;  %4963 = vst.msk [vmem:[#allocation2 + $0xe4] sm:$0xf] %vm462_vm0, %v10947_v8  ;;  %v6417_v26 = vshll.u32 %v6201_v45, 16  ;;  %8045 = vrot.lane.b32.xlu1 %v11285_v48, %s11557_s23  ;;  %v5860_v40 = vsel %vm11801_vm10, %v5855_v44, %v5859_v60  ;;  %v7629_v10 = vor.u32 %v7627_v6, %v7626_v31  ;;  %v7432_v6 = vld [vmem:[#allocation2 + $0xd0] sm:$0xf] }
 0x297   : > { %v13582_v25 = vpop.f32.mrb[46].mxu0  ;;  %v6407_v4 = vrot.slane %v6405_v47, 7  ;;  %v7080_v59 = vshrl.u32 %v6884_v15, 16  ;;  %7392 = vst.msk [vmem:[#allocation3 + $0x10] sm:$0xff] %vm3211_vm2, %v7346_v11  ;;  %v5870_v42 = vsel %vm11801_vm10, %v5865_v7, %v13314_v14  ;;  %v6416_v54 = vrot.slane %v6414_v24, 7  ;;  %v11473_v24 = vld [vmem:[%s11721_s20 + $0xb0] sm:$0xff] }
 0x298   : > { %4964 = vst.msk [vmem:[#allocation2 + $0xe8] sm:$0xf] %vm462_vm0, %v10948_v43  ;;  %v4717_v39 = vpop.f32.mrb[47].mxu0  ;;  %v7083_v41 = vshll.u32 %v6884_v15, 16  ;;  %v7089_v1 = vshll.u32 %v13579_v18, 16  ;;  %v10625_v46 = vcombine.low %v5860_v40, %v5870_v42  ;;  %v7630_v51 = vsel %vm11813_vm11, %v7622_v35, %v7629_v10  ;;  %v6628_v15 = vpop.permute.xlu0 %6627 }
 0x299   : > { %7904 = vst.msk [vmem:[#allocation3 + $0x10] sm:$0xff] %vm3725_vm3, %v7858_v34  ;;  %v6410_v23 = vor.u32 %v6408_v57, %v6407_v4  ;;  %v6412_v45 = vrot.slane %v6407_v4, 4  ;;  %v10721_v56 = vcombine.low %v7621_v50, %v7630_v51  ;;  %v6419_v60 = vor.u32 %v6417_v26, %v6416_v54  ;;  %v6116_v49 = vpop.permute.xlu1 %6115  ;;  %v13626_v11 = vld [vmem:[%s14978_s2] ss:$0 sm:$0xff]  ;;  %v7433_v40 = vld [vmem:[#allocation2 + $0xd4] sm:$0xf] }
 0x29a   : > { %8080 = vst.msk [vmem:[#allocation3 + $0x10] sm:$0xff] %vm3902_vm4, %v13546_v19  ;;  %v7082_v14 = vrot.slane %v7080_v59, 4  ;;  %v7085_v27 = vrot.slane %v7083_v41, 5  ;;  %6125 = vrot.lane.b32.xlu0 %v10625_v46, %s11561_s22  ;;  %6815 = vrot.lane.b32.xlu1 %v11286_v53, %s11556_s17  ;;  %v7091_v58 = vrot.slane %v7089_v1, 5  ;;  %v7093_v29 = vshrl.u32 %v13579_v18, 16 }
 0x29b   : > { %v6411_v8 = vsel %vm11813_vm11, %v13335_v55, %v6410_v23  ;;  %v4713_v19 = vadd.f32 %v13281_v13, %v4712_v21  ;;  %6161 = vst.msk [vmem:[#allocation3 + $0x20] sm:$0xff] %vm1976_vm14, %v6116_v49  ;;  %v6420_v48 = vsel %vm11813_vm11, %v6412_v45, %v6419_v60  ;;  %v5872_v38 = vshrl.u32 %v5655_v22, 16  ;;  %v11288_v55 = vld [vmem:[#allocation2 + $0xbc] sm:$0xff]   ;;  %v6203_v41 = vld [vmem:[#allocation2 + $0xd0] sm:$0xf] }
 0x29c   : > { %v7086_v43 = vor.u32 %v7085_v27, %v7082_v14  ;;  %v5875_v28 = vshll.u32 %v5655_v22, 16  ;;  %6673 = vst.msk [vmem:[#allocation3 + $0x20] sm:$0xff] %vm2489_vm15, %v6628_v15  ;;  %v10658_v34 = vcombine.low %v6411_v8, %v6420_v48  ;;  %v7095_v18 = vrot.slane %v7093_v29, 4  ;;  %v11475_v14 = vld [vmem:[%s11721_s20 + $0xb8] sm:$0xff]  ;;  %v6204_v15 = vld [vmem:[#allocation2 + $0xd4] sm:$0xf] }
 0x29d   : > { %v13610_v12 = vpop.f32.mrb[48].mxu0  ;;  %v4773_v44 = vmax.f32 %v4713_v19, 0.0  ;;  %v5881_v13 = vshll.u32 %v5656_v30, 16  ;;  %6849 = vst.msk [vmem:[#allocation3 + $0x20] sm:$0xff] %vm2666_vm1, %v13572_v36  ;;  %v5874_v31 = vrot.slane %v5872_v38, 4  ;;  %v5885_v57 = vshrl.u32 %v5656_v30, 16 }
 0x29e   : > { %v4722_v35 = vpop.f32.mrb[49].mxu0  ;;  %v7087_v21 = vrot.slane %v7086_v43, 4  ;;  %v5877_v47 = vrot.slane %v5875_v28, 5  ;;  %7869 = vrot.lane.b32.xlu0 %v10721_v56, %s11559_s14  ;;  %5585 = vrot.lane.b32.xlu1 %v11288_v55, %s11555_s28  ;;  %v7096_v50 = vor.u32 %v7095_v18, %v7091_v58  ;;  %v4716_v36 = vadd.f32 %v13626_v11, %v13582_v25  ;;  %v13632_v1 = vpop.permute.xlu0 %8035  ;;  %v11291_v48 = vld [vmem:[#allocation2 + $0xd0] sm:$0xff]  }
 0x29f   : > { %v13618_v7 = vpop.f32.mrb[50].mxu0  ;;  %v4805_v26 = vadd.f32 %v11473_v24, %v4773_v44  ;;  %v5883_v39 = vrot.slane %v5881_v13, 5  ;;  %v5887_v42 = vrot.slane %v5885_v57, 4  ;;  %v7637_v54 = vshrl.u32 %v7432_v6, 16  ;;  %v6887_v35 = vld [vmem:[#allocation2 + $0xbc] sm:$0xf] }
 0x2a0   : > { %v4725_v10 = vpop.f32.mrb[51].mxu0  ;;  %v7092_v4 = vsel %vm11801_vm10, %v7087_v21, %v7091_v58  ;;  %v5878_v59 = vor.u32 %v5877_v47, %v5874_v31  ;;  %v7097_v46 = vrot.slane %v7096_v50, 4  ;;  %v4774_v51 = vmax.f32 %v4716_v36, 0.0  ;;  %v6888_v13 = vld [vmem:[#allocation2 + $0xc0] sm:$0xf]  ;;  %v11293_v36 = vld [vmem:[#allocation2 + $0xd0] sm:$0xff]  }
 0x2a1   : > { %v10949_v53 = vpack.c.bf16 %v4805_v26, %v4805_v26  ;;  %v7640_v23 = vshll.u32 %v7432_v6, 16  ;;  %v5888_v22 = vor.u32 %v5887_v42, %v5883_v39  ;;  %v7639_v56 = vrot.slane %v7637_v54, 7 }
 0x2a2   : > { %v5879_v45 = vrot.slane %v5878_v59, 4  ;;  %v7646_v25 = vshrl.u32 %v7433_v40, 16  ;;  %6639 = vrot.lane.b32.xlu0 %v10658_v34, %s11558_s25  ;;  %v7102_v60 = vsel %vm11801_vm10, %v7097_v46, %v13340_v37  ;;  %v4806_v27 = vadd.f32 %v11475_v14, %v4774_v51  ;;  %v13642_v6 = vpop.permute.xlu0 %6805  ;;  %v5658_v59 = vld [vmem:[#allocation2 + $0xbc] sm:$0xf] }
 0x2a3   : > { %4965 = vst.msk [vmem:[#allocation2 + $0xf8] sm:$0xf] %vm462_vm0, %v10949_v53  ;;  %v7649_v30 = vshll.u32 %v7433_v40, 16  ;;  %v6427_v49 = vshrl.u32 %v6203_v41, 16  ;;  %v10689_v8 = vcombine.low %v7092_v4, %v7102_v60  ;;  %v5889_v29 = vrot.slane %v5888_v22, 4 }
 0x2a4   : > { %v5884_v58 = vsel %vm11801_vm10, %v5879_v45, %v5883_v39  ;;  %v7642_v19 = vor.u32 %v7640_v23, %v7639_v56  ;;  %v10950_v43 = vpack.c.bf16 %v4806_v27, %v4806_v27  ;;  %v7644_v38 = vrot.slane %v7639_v56, 4  ;;  %v5659_v22 = vld [vmem:[#allocation2 + $0xc0] sm:$0xf]  ;;  %v11295_v27 = vld [vmem:[#allocation2 + $0xd0] sm:$0xff]  }
 0x2a5   : > { %v7648_v28 = vrot.slane %v7646_v25, 7  ;;  %v6429_v37 = vrot.slane %v6427_v49, 7  ;;  %7357 = vrot.lane.b32.xlu1 %v10689_v8, %s11560_s15  ;;  %v5894_v55 = vsel %vm11801_vm10, %v5889_v29, %v13342_v2  ;;  %v6430_v18 = vshll.u32 %v6203_v41, 16  ;;  %v11476_v8 = vld [vmem:[%s11721_s20 + $0xc0] sm:$0xff]  ;;  %v7435_v29 = vld [vmem:[#allocation2 + $0xe4] sm:$0xf] }
 0x2a6   : > { %v7643_v34 = vsel %vm11813_vm11, %v13346_v33, %v7642_v19  ;;  %v6436_v44 = vshrl.u32 %v6204_v15, 16  ;;  %8047 = vrot.lane.b32.xlu0 %v11291_v48, %s11557_s23  ;;  %v10626_v21 = vcombine.low %v5884_v58, %v5894_v55  ;;  %4966 = vst.msk [vmem:[#allocation2 + $0xfc] sm:$0xf] %vm462_vm0, %v10950_v43  ;;  %v6439_v57 = vshll.u32 %v6204_v15, 16  ;;  %v13653_v2 = vpop.permute.xlu0 %5575  ;;  %v11477_v55 = vld [vmem:[%s11721_s20 + $0xc8] sm:$0xff] }
 0x2a7   : > { %v7651_v31 = vor.u32 %v7649_v30, %v7648_v28  ;;  %v6434_v47 = vrot.slane %v6429_v37, 4  ;;  %v6432_v50 = vor.u32 %v6430_v18, %v6429_v37  ;;  %v7104_v26 = vshrl.u32 %v6887_v35, 16 }
 0x2a8   : > { %v6438_v24 = vrot.slane %v6436_v44, 7  ;;  %v7107_v39 = vshll.u32 %v6887_v35, 16  ;;  %v7113_v40 = vshll.u32 %v6888_v13, 16  ;;  %v7117_v10 = vshrl.u32 %v6888_v13, 16  ;;  %v7860_v56 = vpop.permute.xlu1 %7859  ;;  %v7436_v13 = vld [vmem:[#allocation2 + $0xe8] sm:$0xf] }
 0x2a9   : > { %v7652_v33 = vsel %vm11813_vm11, %v7644_v38, %v7651_v31  ;;  %v4721_v4 = vadd.f32 %v13626_v11, %v13610_v12  ;;  %6127 = vrot.lane.b32.xlu1 %v10626_v21, %s11561_s22  ;;  %v6433_v54 = vsel %vm11813_vm11, %v13348_v62, %v6432_v50  ;;  %v7106_v46 = vrot.slane %v7104_v26, 4  ;;  %v6206_v31 = vld [vmem:[#allocation2 + $0xe4] sm:$0xf] }
 0x2aa   : > { %v10722_v42 = vcombine.low %v7643_v34, %v7652_v33  ;;  %v6441_v41 = vor.u32 %v6439_v57, %v6438_v24  ;;  %6817 = vrot.lane.b32.xlu0 %v11293_v36, %s11556_s17  ;;  %v7109_v53 = vrot.slane %v7107_v39, 5  ;;  %v7115_v51 = vrot.slane %v7113_v40, 5  ;;  %v7348_v62 = vpop.permute.xlu0 %7347 }
 0x2ab   : > { %v7119_v23 = vrot.slane %v7117_v10, 4  ;;  %v4775_v45 = vmax.f32 %v4721_v4, 0.0  ;;  %v4724_v25 = vadd.f32 %v13626_v11, %v13618_v7  ;;  %v5896_v60 = vshrl.u32 %v5658_v59, 16  ;;  %7393 = vst.msk [vmem:[#allocation3 + $0x20] sm:$0xff] %vm3211_vm2, %v7348_v62  ;;  %v6207_v10 = vld [vmem:[#allocation2 + $0xe8] sm:$0xf] }
 0x2ac   : > { %v6442_v12 = vsel %vm11813_vm11, %v6434_v47, %v6441_v41  ;;  %v5899_v14 = vshll.u32 %v5658_v59, 16  ;;  %v7110_v15 = vor.u32 %v7109_v53, %v7106_v46  ;;  %v5905_v38 = vshll.u32 %v5659_v22, 16  ;;  %7905 = vst.msk [vmem:[#allocation3 + $0x20] sm:$0xff] %vm3725_vm3, %v7860_v56  ;;  %v6890_v41 = vld [vmem:[#allocation2 + $0xd0] sm:$0xf]  ;;  %v11297_v53 = vld [vmem:[#allocation2 + $0xe4] sm:$0xff]  }
 0x2ad   : > { %v10659_v30 = vcombine.low %v6433_v54, %v6442_v12  ;;  %v7120_v49 = vor.u32 %v7119_v23, %v7115_v51  ;;  %v4807_v58 = vadd.f32 %v11476_v8, %v4775_v45  ;;  %7871 = vrot.lane.b32.xlu1 %v10722_v42, %s11559_s14  ;;  %v4776_v19 = vmax.f32 %v4724_v25, 0.0  ;;  %8081 = vst.msk [vmem:[#allocation3 + $0x20] sm:$0xff] %vm3902_vm4, %v13632_v1  ;;  %v6630_v1 = vpop.permute.xlu1 %6629 }
 0x2ae   : > { %v5898_v48 = vrot.slane %v5896_v60, 4  ;;  %v5901_v43 = vrot.slane %v5899_v14, 5  ;;  %5587 = vrot.lane.b32.xlu0 %v11295_v27, %s11555_s28  ;;  %v7111_v7 = vrot.slane %v7110_v15, 4  ;;  %v5909_v35 = vshrl.u32 %v5659_v22, 16  ;;  %v6118_v47 = vpop.permute.xlu0 %6117 }
 0x2af   : > { %v7121_v28 = vrot.slane %v7120_v49, 4  ;;  %v10951_v37 = vpack.c.bf16 %v4807_v58, %v4807_v58  ;;  %v4808_v34 = vadd.f32 %v11477_v55, %v4776_v19  ;;  %v5907_v44 = vrot.slane %v5905_v38, 5  ;;  %6162 = vst.msk [vmem:[#allocation3 + $0x30] sm:$0xff] %vm1976_vm14, %v6118_v47  ;;  %v11299_v38 = vld [vmem:[#allocation2 + $0xe4] sm:$0xff]  }
 0x2b0   : > { %v5902_v18 = vor.u32 %v5901_v43, %v5898_v48  ;;  %v7659_v21 = vshrl.u32 %v7435_v29, 16  ;;  %v7116_v57 = vsel %vm11801_vm10, %v7111_v7, %v7115_v51  ;;  %v5911_v24 = vrot.slane %v5909_v35, 4  ;;  %6674 = vst.msk [vmem:[#allocation3 + $0x30] sm:$0xff] %vm2489_vm15, %v6630_v1  ;;  %v8100_v48 = vld [vmem:[#allocation2 + $0x4c] sm:$0x1] }
 0x2b1   : > { %v7126_v50 = vsel %vm11801_vm10, %v7121_v28, %v13424_v5  ;;  %4967 = vst.msk [vmem:[#allocation2 + $0x10c] sm:$0xf] %vm462_vm0, %v10951_v37  ;;  %v7662_v26 = vshll.u32 %v7435_v29, 16  ;;  %6641 = vrot.lane.b32.xlu1 %v10659_v30, %s11558_s25  ;;  %v10952_v36 = vpack.c.bf16 %v4808_v34, %v4808_v34  ;;  %v4728_v4 = vpop.f32.mrb[52].mxu0  ;;  %v7668_v42 = vshrl.u32 %v7436_v13, 16 }
 0x2b2   : > { %v10690_v39 = vcombine.low %v7116_v57, %v7126_v50  ;;  %v5903_v33 = vrot.slane %v5902_v18, 4  ;;  %v7661_v40 = vrot.slane %v7659_v21, 7  ;;  %v5912_v59 = vor.u32 %v5911_v24, %v5907_v44  ;;  %v4730_v46 = vpop.f32.mrb[53].mxu0  ;;  %6850 = vst.msk [vmem:[#allocation3 + $0x30] sm:$0xff] %vm2666_vm1, %v13642_v6  ;;  %v6891_v30 = vld [vmem:[#allocation2 + $0xd4] sm:$0xf] }
 0x2b3   : > { %v7671_v5 = vshll.u32 %v7436_v13, 16  ;;  %v6449_v54 = vshrl.u32 %v6206_v31, 16  ;;  %4968 = vst.msk [vmem:[#allocation2 + $0x110] sm:$0xf] %vm462_vm0, %v10952_v36  ;;  %v6452_v22 = vshll.u32 %v6206_v31, 16  ;;  %v13691_v56 = vpop.f32.mrb[54].mxu0  ;;  %v4729_v24 = vadd.f32 %v13626_v11, %v4728_v4 }
 0x2b4   : > { %7359 = vrot.lane.b32.xlu0 %v10690_v39, %s11560_s15  ;;  %v5908_v51 = vsel %vm11801_vm10, %v5903_v33, %v5907_v44  ;;  %v7664_v23 = vor.u32 %v7662_v26, %v7661_v40  ;;  %v7666_v45 = vrot.slane %v7661_v40, 4  ;;  %v5913_v12 = vrot.slane %v5912_v59, 4  ;;  %v4733_v62 = vpop.f32.mrb[55].mxu0  ;;  %v5661_v18 = vld [vmem:[#allocation2 + $0xd0] sm:$0xf] }
 0x2b5   : > { %v7670_v25 = vrot.slane %v7668_v42, 7  ;;  %v6451_v60 = vrot.slane %v6449_v54, 7  ;;  %v6458_v14 = vshrl.u32 %v6207_v10, 16  ;;  %8049 = vrot.lane.b32.xlu1 %v11297_v53, %s11557_s23  ;;  %v6461_v27 = vshll.u32 %v6207_v10, 16  ;;  %v5662_v31 = vld [vmem:[#allocation2 + $0xd4] sm:$0xf] }
 0x2b6   : > { %v7665_v6 = vsel %vm11813_vm11, %v13433_v32, %v7664_v23  ;;  %v7128_v15 = vshrl.u32 %v6890_v41, 16  ;;  %v7131_v49 = vshll.u32 %v6890_v41, 16  ;;  %v5918_v8 = vsel %vm11801_vm10, %v5913_v12, %v13426_v0  ;;  %v5663_v42 = vld [vmem:[#allocation2 + $0xd8] sm:$0x1]  ;;  %v7437_v62 = vld [vmem:[#allocation2 + $0xf4] sm:$0x8] }
 0x2b7   : > { %v7673_v58 = vor.u32 %v7671_v5, %v7670_v25  ;;  %v6454_v29 = vor.u32 %v6452_v22, %v6451_v60  ;;  %v6456_v19 = vrot.slane %v6451_v60, 4  ;;  %v10627_v43 = vcombine.low %v5908_v51, %v5918_v8  ;;  %v11478_v53 = vld [vmem:[%s11721_s20 + $0xd0] sm:$0xff] }
 0x2b8   : > { %v6460_v7 = vrot.slane %v6458_v14, 7  ;;  %v7130_v28 = vrot.slane %v7128_v15, 4  ;;  %v7133_v37 = vrot.slane %v7131_v49, 5  ;;  %v7137_v55 = vshll.u32 %v6891_v30, 16  ;;  %v7438_v49 = vld [vmem:[#allocation2 + $0xf8] sm:$0xf] }
 0x2b9   : > { %v7674_v32 = vsel %vm11813_vm11, %v7666_v45, %v7673_v58  ;;  %v6455_v35 = vsel %vm11813_vm11, %v13458_v17, %v6454_v29  ;;  %v7141_v34 = vshrl.u32 %v6891_v30, 16  ;;  %6129 = vrot.lane.b32.xlu0 %v10627_v43, %s11561_s22  ;;  %6819 = vrot.lane.b32.xlu1 %v11299_v38, %s11556_s17  ;;  %v8181_v21 = vshrl.u32 %v13435_v16, 16  ;;  %v13709_v26 = vpop.permute.xlu1 %8037  ;;  %v11301_v17 = vld [vmem:[#allocation2 + $0xe4] sm:$0xff]   ;;  %v7439_v8 = vld [vmem:[#allocation2 + $0xfc] sm:$0xf] }
 0x2ba   : > { %v10723_v0 = vcombine.low %v7665_v6, %v7674_v32  ;;  %v6463_v44 = vor.u32 %v6461_v27, %v6460_v7  ;;  %v7134_v13 = vor.u32 %v7133_v37, %v7130_v28  ;;  %v7139_v47 = vrot.slane %v7137_v55, 5  ;;  %v6208_v7 = vld [vmem:[#allocation2 + $0xf4] sm:$0x8]  ;;  %v6209_v28 = vld [vmem:[#allocation2 + $0xf8] sm:$0xf] }
 0x2bb   : > { %v7143_v57 = vrot.slane %v7141_v34, 4  ;;  %v8187_v50 = vshll.u32 %v8100_v48, 16  ;;  %v8183_v36 = vrot.slane %v8181_v21, 4  ;;  %v5920_v33 = vshrl.u32 %v5661_v18, 16  ;;  %v11303_v32 = vld [vmem:[#allocation2 + $0xf8] sm:$0xff]  }
 0x2bc   : > { %v6464_v1 = vsel %vm11813_vm11, %v6456_v19, %v6463_v44  ;;  %v7135_v39 = vrot.slane %v7134_v13, 4  ;;  %v4777_v16 = vmax.f32 %v4729_v24, 0.0  ;;  %v5923_v41 = vshll.u32 %v5661_v18, 16  ;;  %v4987_v21 = vld [vmem:[#allocation2 + $0x54] sm:$0x8] }
 0x2bd   : > { %v10660_v40 = vcombine.low %v6455_v35, %v6464_v1  ;;  %v7144_v10 = vor.u32 %v7143_v57, %v7139_v47  ;;  %v8189_v59 = vrot.slane %v8187_v50, 5  ;;  %7873 = vrot.lane.b32.xlu0 %v10723_v0, %s11559_s14  ;;  %5589 = vrot.lane.b32.xlu1 %v11301_v17, %s11555_s28  ;;  %v8184_v5 = vor.u32 %v8183_v36, %v13525_v3  ;;  %v13719_v22 = vpop.permute.xlu1 %6807  ;;  %v11479_v3 = vld [vmem:[%s11721_s20 + $0xd8] sm:$0xff]  ;;  %v6210_v24 = vld [vmem:[#allocation2 + $0xfc] sm:$0xf] }
 0x2be   : > { %v7140_v4 = vsel %vm11801_vm10, %v7135_v39, %v7139_v47  ;;  %v5922_v54 = vrot.slane %v5920_v33, 4  ;;  %v4809_v51 = vadd.f32 %v11478_v53, %v4777_v16  ;;  %v5929_v23 = vshll.u32 %v5662_v31, 16 }
 0x2bf   : > { %v7145_v46 = vrot.slane %v7144_v10, 4  ;;  %v5933_v45 = vshrl.u32 %v5662_v31, 16  ;;  %v8185_v12 = vrot.slane %v8184_v5, 4  ;;  %v5925_v25 = vrot.slane %v5923_v41, 5  ;;  %v4988_v31 = vld [vmem:[#allocation2 + $0x58] sm:$0xf] }
 0x2c0   : > { %v5939_v60 = vshll.u32 %v5663_v42, 16  ;;  %v4732_v14 = vadd.f32 %v13626_v11, %v13691_v56  ;;  %v10953_v27 = vpack.c.bf16 %v4809_v51, %v4809_v51  ;;  %v5931_v30 = vrot.slane %v5929_v23, 5  ;;  %v11304_v42 = vld [vmem:[#allocation2 + $0xf8] sm:$0xff]  }
 0x2c1   : > { %v7150_v6 = vsel %vm11801_vm10, %v7145_v46, %v13463_v63  ;;  %v5935_v15 = vrot.slane %v5933_v45, 4  ;;  %6643 = vrot.lane.b32.xlu0 %v10660_v40, %s11558_s25  ;;  %v8190_v29 = vsel %vm11801_vm10, %v8185_v12, %v8189_v59  ;;  %v5926_v19 = vor.u32 %v5925_v25, %v5922_v54  ;;  %v13735_v37 = vpop.permute.xlu1 %5577  ;;  %v4989_v40 = vld [vmem:[#allocation2 + $0x5c] sm:$0xf]  ;;  %v8101_v41 = vld [vmem:[#allocation2 + $0x58] sm:$0xf] }
 0x2c2   : > { %v10691_v58 = vcombine.low %v7140_v4, %v7150_v6  ;;  %v5941_v48 = vrot.slane %v5939_v60, 5  ;;  %v10747_v56 = vcombine.low %v8180_v61, %v8190_v29  ;;  %4969 = vst.msk [vmem:[#allocation2 + $0x120] sm:$0xf] %vm462_vm0, %v10953_v27  ;;  %v4778_v43 = vmax.f32 %v4732_v14, 0.0  ;;  %v8102_v27 = vld [vmem:[#allocation2 + $0x5c] sm:$0xf] }
 0x2c3   : > { %v5936_v63 = vor.u32 %v5935_v15, %v5931_v30  ;;  %v7676_v38 = vshrl.u32 %v7437_v62, 16  ;;  %v5927_v35 = vrot.slane %v5926_v19, 4  ;;  %v7681_v55 = vshrl.u32 %v7438_v49, 16  ;;  %v7862_v0 = vpop.permute.xlu0 %7861  ;;  %v8609_v29 = vld [vmem:[#allocation3 + $0x10] sm:$0xff] }
 0x2c4   : > { %7361 = vrot.lane.b32.xlu1 %v10691_v58, %s11560_s15  ;;  %v7684_v34 = vshll.u32 %v7438_v49, 16  ;;  %v7690_v18 = vshrl.u32 %v7439_v8, 16  ;;  %8592 = vst.msk [vmem:[#allocation3 + $0x18] sm:$0xff] %vm1251_vm12, %v10747_v56  ;;  %v4810_v61 = vadd.f32 %v11479_v3, %v4778_v43  ;;  %v7693_v13 = vshll.u32 %v7439_v8, 16 }
 0x2c5   : > { %v5937_v52 = vrot.slane %v5936_v63, 4  ;;  %v10708_v44 = vrot.slane %v7676_v38, 11  ;;  %8051 = vrot.lane.b32.xlu0 %v11303_v32, %s11557_s23  ;;  %v5932_v47 = vsel %vm11801_vm10, %v5927_v35, %v5931_v30  ;;  %v7683_v57 = vrot.slane %v7681_v55, 7  ;;  %v7350_v59 = vpop.permute.xlu1 %7349  ;;  %v8103_v35 = vld [vmem:[#allocation2 + $0x60] sm:$0x1] }
 0x2c6   : > { %v7692_v50 = vrot.slane %v7690_v18, 7  ;;  %v6466_v17 = vshrl.u32 %v6208_v7, 16  ;;  %v10954_v39 = vpack.c.bf16 %v4810_v61, %v4810_v61  ;;  %v6471_v36 = vshrl.u32 %v6209_v28, 16  ;;  %v13745_v10 = vpop.f32.mrb[56].mxu0  ;;  %7394 = vst.msk [vmem:[#allocation3 + $0x30] sm:$0xff] %vm3211_vm2, %v7350_v59 }
 0x2c7   : > { %v5942_v1 = vsel %vm11801_vm10, %v5937_v52, %v5941_v48  ;;  %v6474_v33 = vshll.u32 %v6209_v28, 16  ;;  %v7686_v4 = vor.u32 %v7684_v34, %v7683_v57  ;;  %v7688_v5 = vrot.slane %v7683_v57, 4  ;;  %v4738_v46 = vpop.f32.mrb[57].mxu0  ;;  %v13751_v25 = vpop.permute.xlu0 %6631  ;;  %7906 = vst.msk [vmem:[#allocation3 + $0x30] sm:$0xff] %vm3725_vm3, %v7862_v0  ;;  %v11305_v48 = vld [vmem:[#allocation2 + $0xf8] sm:$0xff]  }
 0x2c8   : > { %v10628_v16 = vcombine.low %v5932_v47, %v5942_v1  ;;  %v7695_v54 = vor.u32 %v7693_v13, %v7692_v50  ;;  %4970 = vst.msk [vmem:[#allocation2 + $0x124] sm:$0xf] %vm462_vm0, %v10954_v39  ;;  %v10645_v53 = vrot.slane %v6466_v17, 11  ;;  %v6473_v51 = vrot.slane %v6471_v36, 7  ;;  %v13749_v12 = vpop.f32.mrb[58].mxu0 }
 0x2c9   : > { %v6480_v23 = vshrl.u32 %v6210_v24, 16  ;;  %v6483_v45 = vshll.u32 %v6210_v24, 16  ;;  %6821 = vrot.lane.b32.xlu0 %v11304_v42, %s11556_s17  ;;  %v7687_v60 = vsel %vm11813_vm11, %v10708_v44, %v7686_v4  ;;  %v5112_v62 = vshrl.u32 %v4987_v21, 16  ;;  %v4741_v30 = vpop.f32.mrb[59].mxu0  ;;  %8082 = vst.msk [vmem:[#allocation3 + $0x30] sm:$0xff] %vm3902_vm4, %v13709_v26 }
 0x2ca   : > { %6131 = vrot.lane.b32.xlu1 %v10628_v16, %s11561_s22  ;;  %v7696_v14 = vsel %vm11813_vm11, %v7688_v5, %v7695_v54  ;;  %v5117_v6 = vshrl.u32 %v4988_v31, 16  ;;  %v6476_v49 = vor.u32 %v6474_v33, %v6473_v51  ;;  %v6478_v8 = vrot.slane %v6473_v51, 4  ;;  %v6893_v52 = vld [vmem:[#allocation2 + $0xe4] sm:$0xf]  ;;  %v6894_v21 = vld [vmem:[#allocation2 + $0xe8] sm:$0xf] }
 0x2cb   : > { %v10724_v15 = vcombine.low %v7687_v60, %v7696_v14  ;;  %v6482_v58 = vrot.slane %v6480_v23, 7  ;;  %v8610_v19 = vld [vmem:[#allocation3 + $0x18] sm:$0xff]  ;;  %v10574_v56 = vrot.slane %v5112_v62, 11  ;;  %v5120_v43 = vshll.u32 %v4988_v31, 16  ;;  %v6895_v59 = vld [vmem:[#allocation2 + $0xec] sm:$0x1]  ;;  %v6120_v62 = vpop.permute.xlu1 %6119 }
 0x2cc   : > { %v5119_v63 = vrot.slane %v5117_v6, 7  ;;  %v5126_v38 = vshrl.u32 %v4989_v40, 16  ;;  %10773 = vmatprep.mubr.msk.bf16.mxu1 %vm1251_vm12, %v8610_v19  ;;  %v6477_v7 = vsel %vm11813_vm11, %v10645_v53, %v6476_v49  ;;  %v5129_v32 = vshll.u32 %v4989_v40, 16  ;;  %v5664_v46 = vld [vmem:[#allocation2 + $0xe4] sm:$0xf]  ;;  %v11306_v14 = vld [vmem:[#allocation2 + $0x10c] sm:$0xff]  }
 0x2cd   : > { %v6485_v28 = vor.u32 %v6483_v45, %v6482_v58  ;;  %v8192_v26 = vshrl.u32 %v8101_v41, 16  ;;  %5591 = vrot.lane.b32.xlu0 %v11305_v48, %s11555_s28  ;;  %v8195_v0 = vshll.u32 %v8101_v41, 16  ;;  %8807 = vmatmul.mubr.bf16.gmra.mrb[4].mxu1 %v8609_v29  ;;  %v8201_v44 = vshll.u32 %v8102_v27, 16  ;;  %v5665_v29 = vld [vmem:[#allocation2 + $0xe8] sm:$0xf] }
 0x2ce   : > { %7875 = vrot.lane.b32.xlu1 %v10724_v15, %s11559_s14  ;;  %v5122_v55 = vor.u32 %v5120_v43, %v5119_v63  ;;  %v5124_v34 = vrot.slane %v5119_v63, 4  ;;  %v5128_v18 = vrot.slane %v5126_v38, 7  ;;  %v8205_v13 = vshrl.u32 %v8102_v27, 16  ;;  %v13769_v31 = vpop.permute.xlu0 %8039  ;;  %v5666_v63 = vld [vmem:[#allocation2 + $0xec] sm:$0x1] }
 0x2cf   : > { %v6486_v3 = vsel %vm11813_vm11, %v6478_v8, %v6485_v28  ;;  %v8194_v61 = vrot.slane %v8192_v26, 4  ;;  %v8197_v24 = vrot.slane %v8195_v0, 5  ;;  %v8203_v17 = vrot.slane %v8201_v44, 5 }
 0x2d0   : > { %v10661_v47 = vcombine.low %v6477_v7, %v6486_v3  ;;  %v5123_v57 = vsel %vm11813_vm11, %v10574_v56, %v5122_v55  ;;  %v5131_v50 = vor.u32 %v5129_v32, %v5128_v18  ;;  %v8207_v1 = vrot.slane %v8205_v13, 4  ;;  %v11307_v32 = vld [vmem:[#allocation2 + $0x10c] sm:$0xff]  }
 0x2d1   : > { %v8211_v39 = vshll.u32 %v8103_v35, 16  ;;  %v7152_v36 = vshrl.u32 %v6893_v52, 16  ;;  %v8198_v40 = vor.u32 %v8197_v24, %v8194_v61  ;;  %v7155_v16 = vshll.u32 %v6893_v52, 16  ;;  %v11480_v35 = vld [vmem:[%s11721_s20 + $0xe0] sm:$0xff]  ;;  %v11481_v55 = vld [vmem:[%s11721_s20 + $0xe8] sm:$0xff] }
 0x2d2   : > { %6645 = vrot.lane.b32.xlu1 %v10661_v47, %s11558_s25  ;;  %v5132_v33 = vsel %vm11813_vm11, %v5124_v34, %v5131_v50  ;;  %v7161_v42 = vshll.u32 %v6894_v21, 16  ;;  %v8208_v5 = vor.u32 %v8207_v1, %v8203_v17  ;;  %v13776_v53 = vpop.permute.xlu0 %6809  ;;  %v7165_v60 = vshrl.u32 %v6894_v21, 16  ;;  %v7440_v52 = vld [vmem:[#allocation2 + $0x108] sm:$0x8]  ;;  %v7442_v24 = vld [vmem:[#allocation2 + $0x110] sm:$0xf] }
 0x2d3   : > { %v10590_v4 = vcombine.low %v5123_v57, %v5132_v33  ;;  %v8213_v54 = vrot.slane %v8211_v39, 5  ;;  %v7154_v41 = vrot.slane %v7152_v36, 4  ;;  %v8199_v51 = vrot.slane %v8198_v40, 4  ;;  %v11308_v40 = vld [vmem:[#allocation2 + $0x10c] sm:$0xff]  }
 0x2d4   : > { %v7157_v23 = vrot.slane %v7155_v16, 5  ;;  %v7163_v45 = vrot.slane %v7161_v42, 5  ;;  %v8209_v6 = vrot.slane %v8208_v5, 4  ;;  %v7171_v27 = vshll.u32 %v6895_v59, 16  ;;  %v4991_v59 = vld [vmem:[#allocation2 + $0x6c] sm:$0xf] }
 0x2d5   : > { %5443 = vst.msk [vmem:[#allocation3 + $0x40] sm:$0xff] %vm1251_vm12, %v10590_v4  ;;  %v4737_v30 = vadd.f32 %v13626_v11, %v13745_v10  ;;  %v4740_v15 = vadd.f32 %v13626_v11, %v13749_v12  ;;  %v8204_v49 = vsel %vm11801_vm10, %v8199_v51, %v8203_v17  ;;  %v7167_v58 = vrot.slane %v7165_v60, 4  ;;  %v4990_v17 = vld [vmem:[#allocation2 + $0x68] sm:$0x8] }
 0x2d6   : > { %5619 = vst.msk [vmem:[#allocation3 + $0x40] sm:$0xff] %vm1428_vm13, %v13653_v2  ;;  %v7158_v8 = vor.u32 %v7157_v23, %v7154_v41  ;;  %8053 = vrot.lane.b32.xlu1 %v11306_v14, %s11557_s23  ;;  %v5944_v19 = vshrl.u32 %v5664_v46, 16  ;;  %v8214_v10 = vsel %vm11801_vm10, %v8209_v6, %v8213_v54  ;;  %v7173_v48 = vrot.slane %v7171_v27, 5  ;;  %v13791_v2 = vpop.permute.xlu0 %5579  ;;  %v4992_v41 = vld [vmem:[#allocation2 + $0x70] sm:$0xf] }
 0x2d7   : > { %v4779_v56 = vmax.f32 %v4737_v30, 0.0  ;;  %v4780_v12 = vmax.f32 %v4740_v15, 0.0  ;;  %6163 = vst.msk [vmem:[#allocation3 + $0x40] sm:$0xff] %vm1976_vm14, %v6120_v62  ;;  %v10748_v43 = vcombine.low %v8204_v49, %v8214_v10  ;;  %v7168_v7 = vor.u32 %v7167_v58, %v7163_v45  ;;  %v6211_v60 = vld [vmem:[#allocation2 + $0x108] sm:$0x8] }
 0x2d8   : > { %v7159_v38 = vrot.slane %v7158_v8, 4  ;;  %v5946_v28 = vrot.slane %v5944_v19, 4  ;;  %6675 = vst.msk [vmem:[#allocation3 + $0x40] sm:$0xff] %vm2489_vm15, %v13751_v25  ;;  %v5947_v18 = vshll.u32 %v5664_v46, 16  ;;  %v5953_v0 = vshll.u32 %v5665_v29, 16  ;;  %v7864_v16 = vpop.permute.xlu1 %7863 }
 0x2d9   : > { %v4811_v26 = vadd.f32 %v11480_v35, %v4779_v56  ;;  %v4812_v34 = vadd.f32 %v11481_v55, %v4780_v12  ;;  %6851 = vst.msk [vmem:[#allocation3 + $0x40] sm:$0xff] %vm2666_vm1, %v13719_v22  ;;  %v7169_v61 = vrot.slane %v7168_v7, 4  ;;  %v5957_v44 = vshrl.u32 %v5665_v29, 16  ;;  %v7441_v25 = vld [vmem:[#allocation2 + $0x10c] sm:$0xf] }
 0x2da   : > { %8593 = vst.msk [vmem:[#allocation3 + $0x28] sm:$0xff] %vm1251_vm12, %v10748_v43  ;;  %v7164_v3 = vsel %vm11801_vm10, %v7159_v38, %v7163_v45  ;;  %v5963_v13 = vshll.u32 %v5666_v63, 16  ;;  %6823 = vrot.lane.b32.xlu1 %v11307_v32, %s11556_s17  ;;  %v5949_v57 = vrot.slane %v5947_v18, 5  ;;  %v5955_v50 = vrot.slane %v5953_v0, 5  ;;  %v7352_v1 = vpop.permute.xlu0 %7351  ;;  %v8611_v29 = vld [vmem:[#allocation3 + $0x20] sm:$0xff] }
 0x2db   : > { %v10955_v21 = vpack.c.bf16 %v4811_v26, %v4811_v26  ;;  %v10956_v47 = vpack.c.bf16 %v4812_v34, %v4812_v34  ;;  %v7174_v22 = vsel %vm11801_vm10, %v7169_v61, %v7173_v48  ;;  %v5959_v39 = vrot.slane %v5957_v44, 4  ;;  %7395 = vst.msk [vmem:[#allocation3 + $0x40] sm:$0xff] %vm3211_vm2, %v7352_v1  ;;  %v6212_v63 = vld [vmem:[#allocation2 + $0x10c] sm:$0xf]  ;;  %v6896_v35 = vld [vmem:[#allocation2 + $0xf8] sm:$0xf] }
 0x2dc   : > { %v5965_v36 = vrot.slane %v5963_v13, 5  ;;  %v7698_v33 = vshrl.u32 %v7440_v52, 16  ;;  %v10692_v42 = vcombine.low %v7164_v3, %v7174_v22  ;;  %v5950_v4 = vor.u32 %v5949_v57, %v5946_v28  ;;  %7907 = vst.msk [vmem:[#allocation3 + $0x40] sm:$0xff] %vm3725_vm3, %v7864_v16  ;;  %v6213_v0 = vld [vmem:[#allocation2 + $0x110] sm:$0xf] }
 0x2dd   : > { %4971 = vst.msk [vmem:[#allocation2 + $0x134] sm:$0xf] %vm462_vm0, %v10955_v21  ;;  %4972 = vst.msk [vmem:[#allocation2 + $0x138] sm:$0xf] %vm462_vm0, %v10956_v47  ;;  %v7703_v5 = vshrl.u32 %v7441_v25, 16  ;;  %v7706_v54 = vshll.u32 %v7441_v25, 16  ;;  %v5960_v46 = vor.u32 %v5959_v39, %v5955_v50  ;;  %v6634_v21 = vpop.permute.xlu1 %6633 }
 0x2de   : > { %v10709_v51 = vrot.slane %v7698_v33, 11  ;;  %v7712_v23 = vshrl.u32 %v7442_v24, 16  ;;  %v7715_v45 = vshll.u32 %v7442_v24, 16  ;;  %5593 = vrot.lane.b32.xlu1 %v11308_v40, %s11555_s28  ;;  %8083 = vst.msk [vmem:[#allocation3 + $0x40] sm:$0xff] %vm3902_vm4, %v13769_v31  ;;  %7363 = vrot.lane.b32.xlu0 %v10692_v42, %s11560_s15  ;;  %v5951_v14 = vrot.slane %v5950_v4, 4 }
 0x2df   : > { %v7705_v62 = vrot.slane %v7703_v5, 7  ;;  %v5134_v6 = vshrl.u32 %v4990_v17, 16  ;;  %v5139_v27 = vshrl.u32 %v4991_v59, 16  ;;  %v13813_v30 = vpop.f32.mrb[60].mxu0  ;;  %v5961_v15 = vrot.slane %v5960_v46, 4 }
 0x2e0   : > { %v7714_v49 = vrot.slane %v7712_v23, 7  ;;  %v5142_v8 = vshll.u32 %v4991_v59, 16  ;;  %v5148_v58 = vshrl.u32 %v4992_v41, 16  ;;  %v4746_v19 = vpop.f32.mrb[61].mxu0  ;;  %v5956_v48 = vsel %vm11801_vm10, %v5951_v14, %v5955_v50  ;;  %v6897_v3 = vld [vmem:[#allocation2 + $0xfc] sm:$0xf]  ;;  %v6122_v14 = vpop.permute.xlu0 %6121 }
 0x2e1   : > { %v8612_v10 = vld [vmem:[#allocation3 + $0x28] sm:$0xff]  ;;  %v7708_v56 = vor.u32 %v7706_v54, %v7705_v62  ;;  %v7710_v31 = vrot.slane %v7705_v62, 4  ;;  %v10575_v12 = vrot.slane %v5134_v6, 11  ;;  %v13817_v43 = vpop.f32.mrb[62].mxu0  ;;  %v5966_v38 = vsel %vm11801_vm10, %v5961_v15, %v5965_v36  ;;  %v8104_v17 = vld [vmem:[#allocation2 + $0x6c] sm:$0xf] }
 0x2e2   : > { %10774 = vmatprep.mubr.msk.bf16.mxu1 %vm1251_vm12, %v8612_v10  ;;  %v7717_v7 = vor.u32 %v7715_v45, %v7714_v49  ;;  %v5141_v28 = vrot.slane %v5139_v27, 7  ;;  %v5150_v32 = vrot.slane %v5148_v58, 7  ;;  %v4749_v26 = vpop.f32.mrb[63].mxu0  ;;  %v10629_v55 = vcombine.low %v5956_v48, %v5966_v38  ;;  %v6898_v40 = vld [vmem:[#allocation2 + $0x100] sm:$0x1] }
 0x2e3   : > { %v7709_v34 = vsel %vm11813_vm11, %v10709_v51, %v7708_v56  ;;  %v5151_v18 = vshll.u32 %v4992_v41, 16  ;;  %v6488_v52 = vshrl.u32 %v6211_v60, 16  ;;  %8815 = vmatmul.mubr.bf16.gmra.mrb[8].mxu1 %v8611_v29  ;;  %v6493_v25 = vshrl.u32 %v6212_v63, 16  ;;  %v8105_v46 = vld [vmem:[#allocation2 + $0x70] sm:$0xf] }
 0x2e4   : > { %v7718_v61 = vsel %vm11813_vm11, %v7710_v31, %v7717_v7  ;;  %v5144_v44 = vor.u32 %v5142_v8, %v5141_v28  ;;  %v5146_v13 = vrot.slane %v5141_v28, 4  ;;  %6133 = vrot.lane.b32.xlu0 %v10629_v55, %s11561_s22  ;;  %v6496_v24 = vshll.u32 %v6212_v63, 16  ;;  %v8106_v29 = vld [vmem:[#allocation2 + $0x74] sm:$0x1]  ;;  %v5667_v63 = vld [vmem:[#allocation2 + $0xf8] sm:$0xf] }
 0x2e5   : > { %v10725_v47 = vcombine.low %v7709_v34, %v7718_v61  ;;  %v5153_v57 = vor.u32 %v5151_v18, %v5150_v32  ;;  %v10646_v50 = vrot.slane %v6488_v52, 11  ;;  %v6495_v22 = vrot.slane %v6493_v25, 7  ;;  %v5668_v34 = vld [vmem:[#allocation2 + $0xfc] sm:$0xf] }
 0x2e6   : > { %v5145_v1 = vsel %vm11813_vm11, %v10575_v12, %v5144_v44  ;;  %v6502_v39 = vshrl.u32 %v6213_v0, 16  ;;  %v6505_v36 = vshll.u32 %v6213_v0, 16  ;;  %v7176_v59 = vshrl.u32 %v6896_v35, 16 }
 0x2e7   : > { %v5154_v33 = vsel %vm11813_vm11, %v5146_v13, %v5153_v57  ;;  %v7179_v16 = vshll.u32 %v6896_v35, 16  ;;  %v7185_v42 = vshll.u32 %v6897_v3, 16  ;;  %v6498_v5 = vor.u32 %v6496_v24, %v6495_v22 }
 0x2e8   : > { %v10591_v4 = vcombine.low %v5145_v1, %v5154_v33  ;;  %v6500_v54 = vrot.slane %v6495_v22, 4  ;;  %v6504_v41 = vrot.slane %v6502_v39, 7  ;;  %7877 = vrot.lane.b32.xlu0 %v10725_v47, %s11559_s14  ;;  %v7178_v51 = vrot.slane %v7176_v59, 4  ;;  %v11309_v47 = vld [vmem:[#allocation2 + $0x120] sm:$0xff]   ;;  %v11482_v1 = vld [vmem:[%s11721_s20 + $0xf0] sm:$0xff] }
 0x2e9   : > { %v7181_v23 = vrot.slane %v7179_v16, 5  ;;  %v7187_v45 = vrot.slane %v7185_v42, 5  ;;  %v7189_v60 = vshrl.u32 %v6897_v3, 16  ;;  %v6499_v62 = vsel %vm11813_vm11, %v10646_v50, %v6498_v5  ;;  %v13835_v49 = vpop.permute.xlu1 %8041 }
 0x2ea   : > { %5444 = vst.msk [vmem:[#allocation3 + $0x50] sm:$0xff] %vm1251_vm12, %v10591_v4  ;;  %v6507_v6 = vor.u32 %v6505_v36, %v6504_v41  ;;  %v7195_v27 = vshll.u32 %v6898_v40, 16  ;;  %v8216_v15 = vshrl.u32 %v8104_v17, 16  ;;  %v8219_v19 = vshll.u32 %v8104_v17, 16  ;;  %v7443_v36 = vld [vmem:[#allocation2 + $0x11c] sm:$0x8] }
 0x2eb   : > { %5620 = vst.msk [vmem:[#allocation3 + $0x50] sm:$0xff] %vm1428_vm13, %v13735_v37  ;;  %v7182_v8 = vor.u32 %v7181_v23, %v7178_v51  ;;  %v7191_v58 = vrot.slane %v7189_v60, 4  ;;  %v8225_v10 = vshll.u32 %v8105_v46, 16  ;;  %v8229_v12 = vshrl.u32 %v8105_v46, 16  ;;  %v7444_v4 = vld [vmem:[#allocation2 + $0x120] sm:$0xf] }
 0x2ec   : > { %v6508_v48 = vsel %vm11813_vm11, %v6500_v54, %v6507_v6  ;;  %v7197_v56 = vrot.slane %v7195_v27, 5  ;;  %v8218_v31 = vrot.slane %v8216_v15, 4  ;;  %6164 = vst.msk [vmem:[#allocation3 + $0x50] sm:$0xff] %vm1976_vm14, %v6122_v14  ;;  %v8221_v32 = vrot.slane %v8219_v19, 5  ;;  %v11483_v51 = vld [vmem:[%s14978_s2] ss:$0 sm:$0xff] }
 0x2ed   : > { %v10662_v38 = vcombine.low %v6499_v62, %v6508_v48  ;;  %v7183_v7 = vrot.slane %v7182_v8, 4  ;;  %v7192_v28 = vor.u32 %v7191_v58, %v7187_v45  ;;  %6676 = vst.msk [vmem:[#allocation3 + $0x50] sm:$0xff] %vm2489_vm15, %v6634_v21  ;;  %v8227_v37 = vrot.slane %v8225_v10, 5  ;;  %v13847_v18 = vpop.permute.xlu1 %6811  ;;  %v5669_v21 = vld [vmem:[#allocation2 + $0x100] sm:$0x1] }
 0x2ee   : > { %v8231_v35 = vrot.slane %v8229_v12, 4  ;;  %v8235_v26 = vshll.u32 %v8106_v29, 16  ;;  %v4745_v55 = vadd.f32 %v13626_v11, %v13813_v30  ;;  %6852 = vst.msk [vmem:[#allocation3 + $0x50] sm:$0xff] %vm2666_vm1, %v13776_v53  ;;  %v8222_v3 = vor.u32 %v8221_v32, %v8218_v31  ;;  %v11310_v6 = vld [vmem:[#allocation2 + $0x120] sm:$0xff]   ;;  %v6214_v15 = vld [vmem:[#allocation2 + $0x11c] sm:$0x8] }
 0x2ef   : > { %6647 = vrot.lane.b32.xlu0 %v10662_v38, %s11558_s25  ;;  %v7188_v0 = vsel %vm11801_vm10, %v7183_v7, %v7187_v45  ;;  %v7193_v52 = vrot.slane %v7192_v28, 4  ;;  %v5968_v61 = vshrl.u32 %v5667_v63, 16  ;;  %v5971_v11 = vshll.u32 %v5667_v63, 16  ;;  %v7445_v45 = vld [vmem:[#allocation2 + $0x124] sm:$0xf] }
 0x2f0   : > { %v8232_v44 = vor.u32 %v8231_v35, %v8227_v37  ;;  %v8237_v13 = vrot.slane %v8235_v26, 5  ;;  %v4781_v25 = vmax.f32 %v4745_v55, 0.0  ;;  %v8223_v53 = vrot.slane %v8222_v3, 4  ;;  %v6215_v10 = vld [vmem:[#allocation2 + $0x120] sm:$0xf] }
 0x2f1   : > { %v7198_v30 = vsel %vm11801_vm10, %v7193_v52, %v7197_v56  ;;  %v5970_v57 = vrot.slane %v5968_v61, 4  ;;  %v5977_v50 = vshll.u32 %v5668_v34, 16  ;;  %v5973_v39 = vrot.slane %v5971_v11, 5  ;;  %v13855_v33 = vpop.permute.xlu1 %5581  ;;  %v11484_v7 = vld [vmem:[%s11721_s20 + $0xf8] sm:$0xff]  ;;  %v4993_v26 = vld [vmem:[#allocation2 + $0x7c] sm:$0x8] }
 0x2f2   : > { %v10693_v24 = vcombine.low %v7188_v0, %v7198_v30  ;;  %v8233_v17 = vrot.slane %v8232_v44, 4  ;;  %v4813_v22 = vadd.f32 %v11482_v1, %v4781_v25  ;;  %v8228_v40 = vsel %vm11801_vm10, %v8223_v53, %v8227_v37  ;;  %v6216_v37 = vld [vmem:[#allocation2 + $0x124] sm:$0xf] }
 0x2f3   : > { %8055 = vrot.lane.b32.xlu0 %v11309_v47, %s11557_s23  ;;  %v5979_v59 = vrot.slane %v5977_v50, 5  ;;  %v5981_v16 = vshrl.u32 %v5668_v34, 16  ;;  %v5987_v42 = vshll.u32 %v5669_v21, 16  ;;  %v7866_v5 = vpop.permute.xlu0 %7865  ;;  %v5974_v46 = vor.u32 %v5973_v39, %v5970_v57  ;;  %v11311_v0 = vld [vmem:[#allocation2 + $0x120] sm:$0xff]  }
 0x2f4   : > { %7365 = vrot.lane.b32.xlu1 %v10693_v24, %s11560_s15  ;;  %v8238_v54 = vsel %vm11801_vm10, %v8233_v17, %v8237_v13  ;;  %v10957_v41 = vpack.c.bf16 %v4813_v22, %v4813_v22  ;;  %v4748_v23 = vadd.f32 %v11483_v51, %v13817_v43  ;;  %v7720_v27 = vshrl.u32 %v7443_v36, 16  ;;  %v4994_v21 = vld [vmem:[#allocation2 + $0x80] sm:$0xf]  ;;  %v4995_v57 = vld [vmem:[#allocation2 + $0x84] sm:$0xf] }
 0x2f5   : > { %v10749_v60 = vcombine.low %v8228_v40, %v8238_v54  ;;  %v5983_v14 = vrot.slane %v5981_v16, 4  ;;  %v5989_v62 = vrot.slane %v5987_v42, 5  ;;  %v5975_v8 = vrot.slane %v5974_v46, 4  ;;  %v7354_v48 = vpop.permute.xlu1 %7353  ;;  %v8107_v50 = vld [vmem:[#allocation2 + $0x80] sm:$0xf] }
 0x2f6   : > { %4973 = vst.msk [vmem:[#allocation2 + $0x148] sm:$0xf] %vm462_vm0, %v10957_v41  ;;  %v4782_v58 = vmax.f32 %v4748_v23, 0.0  ;;  %v7725_v29 = vshrl.u32 %v7444_v4, 16  ;;  %v7728_v19 = vshll.u32 %v7444_v4, 16  ;;  %v10710_v43 = vrot.slane %v7720_v27, 11 }
 0x2f7   : > { %8594 = vst.msk [vmem:[#allocation3 + $0x38] sm:$0xff] %vm1251_vm12, %v10749_v60  ;;  %v5984_v56 = vor.u32 %v5983_v14, %v5979_v59  ;;  %6825 = vrot.lane.b32.xlu0 %v11310_v6, %s11556_s17  ;;  %v7734_v31 = vshrl.u32 %v7445_v45, 16  ;;  %v7737_v12 = vshll.u32 %v7445_v45, 16  ;;  %v13870_v63 = vpop.permute.xlu0 %6635  ;;  %v5980_v38 = vsel %vm11801_vm10, %v5975_v8, %v5979_v59  ;;  %v8108_v36 = vld [vmem:[#allocation2 + $0x84] sm:$0xf] }
 0x2f8   : > { %7396 = vst.msk [vmem:[#allocation3 + $0x50] sm:$0xff] %vm3211_vm2, %v7354_v48  ;;  %v4814_v28 = vadd.f32 %v11484_v7, %v4782_v58  ;;  %v7727_v32 = vrot.slane %v7725_v29, 7  ;;  %v6510_v35 = vshrl.u32 %v6214_v15, 16  ;;  %v6515_v52 = vshrl.u32 %v6215_v10, 16  ;;  %v8109_v40 = vld [vmem:[#allocation2 + $0x88] sm:$0x1] }
 0x2f9   : > { %7908 = vst.msk [vmem:[#allocation3 + $0x50] sm:$0xff] %vm3725_vm3, %v7866_v5  ;;  %v5985_v55 = vrot.slane %v5984_v56, 4  ;;  %v7736_v34 = vrot.slane %v7734_v31, 7  ;;  %v6518_v3 = vshll.u32 %v6215_v10, 16  ;;  %v6524_v47 = vshrl.u32 %v6216_v37, 16  ;;  %v13884_v17 = vpop.permute.xlu1 %6123  ;;  %v8613_v5 = vld [vmem:[#allocation3 + $0x30] sm:$0xff] }
 0x2fa   : > { %8084 = vst.msk [vmem:[#allocation3 + $0x50] sm:$0xff] %vm3902_vm4, %v13835_v49  ;;  %v10958_v61 = vpack.c.bf16 %v4814_v28, %v4814_v28  ;;  %v7730_v44 = vor.u32 %v7728_v19, %v7727_v32  ;;  %v7732_v13 = vrot.slane %v7727_v32, 4  ;;  %v10647_v25 = vrot.slane %v6510_v35, 11  ;;  %v6899_v56 = vld [vmem:[#allocation2 + $0x10c] sm:$0xf] }
 0x2fb   : > { %v5990_v11 = vsel %vm11801_vm10, %v5985_v55, %v5989_v62  ;;  %v7739_v30 = vor.u32 %v7737_v12, %v7736_v34  ;;  %5595 = vrot.lane.b32.xlu0 %v11311_v0, %s11555_s28  ;;  %v6517_v53 = vrot.slane %v6515_v52, 7  ;;  %v13882_v24 = vpop.permute.xlu0 %8043  ;;  %v6527_v22 = vshll.u32 %v6216_v37, 16  ;;  %v6900_v28 = vld [vmem:[#allocation2 + $0x110] sm:$0xf]  ;;  %v6901_v52 = vld [vmem:[#allocation2 + $0x114] sm:$0x1] }
 0x2fc   : > { %v10630_v49 = vcombine.low %v5980_v38, %v5990_v11  ;;  %4974 = vst.msk [vmem:[#allocation2 + $0x14c] sm:$0xf] %vm462_vm0, %v10958_v61  ;;  %v7731_v1 = vsel %vm11813_vm11, %v10710_v43, %v7730_v44  ;;  %v5156_v39 = vshrl.u32 %v4993_v26, 16  ;;  %v6526_v4 = vrot.slane %v6524_v47, 7  ;;  %v5670_v11 = vld [vmem:[#allocation2 + $0x10c] sm:$0xf] }
 0x2fd   : > { %v7740_v59 = vsel %vm11813_vm11, %v7732_v13, %v7739_v30  ;;  %v6520_v16 = vor.u32 %v6518_v3, %v6517_v53  ;;  %v6522_v42 = vrot.slane %v6517_v53, 4  ;;  %v5161_v51 = vshrl.u32 %v4994_v21, 16 }
 0x2fe   : > { %v8614_v54 = vld [vmem:[#allocation3 + $0x38] sm:$0xff]  ;;  %6135 = vrot.lane.b32.xlu1 %v10630_v49, %s11561_s22  ;;  %v10726_v41 = vcombine.low %v7731_v1, %v7740_v59  ;;  %v10576_v46 = vrot.slane %v5156_v39, 11  ;;  %v5164_v23 = vshll.u32 %v4994_v21, 16  ;;  %v6529_v60 = vor.u32 %v6527_v22, %v6526_v4  ;;  %v5671_v49 = vld [vmem:[#allocation2 + $0x110] sm:$0xf] }
 0x2ff   : > { %10775 = vmatprep.mubr.msk.bf16.mxu1 %vm1251_vm12, %v8614_v54  ;;  %v6521_v45 = vsel %vm11813_vm11, %v10647_v25, %v6520_v16  ;;  %v5170_v14 = vshrl.u32 %v4995_v57, 16  ;;  %v5173_v62 = vshll.u32 %v4995_v57, 16  ;;  %v13895_v6 = vpop.permute.xlu0 %6813  ;;  %v5163_v27 = vrot.slane %v5161_v51, 7  ;;  %v5672_v4 = vld [vmem:[#allocation2 + $0x114] sm:$0x1] }
 0x300   : > { %8823 = vmatmul.mubr.bf16.gmra.mrb[12].mxu1 %v8613_v5  ;;  %v8240_v15 = vshrl.u32 %v8107_v50, 16  ;;  %v8243_v8 = vshll.u32 %v8107_v50, 16  ;;  %v8249_v58 = vshll.u32 %v8108_v36, 16  ;;  %v6530_v29 = vsel %vm11813_vm11, %v6522_v42, %v6529_v60  ;;  %v13899_v43 = vpop.permute.xlu1 %7867  ;;  %v11312_v42 = vld [vmem:[#allocation2 + $0x134] sm:$0xff]  }
 0x301   : > { %v5172_v19 = vrot.slane %v5170_v14, 7  ;;  %v8253_v10 = vshrl.u32 %v8108_v36, 16  ;;  %v8259_v48 = vshll.u32 %v8109_v40, 16  ;;  %v10663_v31 = vcombine.low %v6521_v45, %v6530_v29  ;;  %v7446_v45 = vld [vmem:[#allocation2 + $0x130] sm:$0x8] }
 0x302   : > { %7879 = vrot.lane.b32.xlu1 %v10726_v41, %s11559_s14  ;;  %v5166_v12 = vor.u32 %v5164_v23, %v5163_v27  ;;  %v5168_v38 = vrot.slane %v5163_v27, 4  ;;  %v8242_v7 = vrot.slane %v8240_v15, 4  ;;  %v8245_v37 = vrot.slane %v8243_v8, 5  ;;  %v7447_v60 = vld [vmem:[#allocation2 + $0x134] sm:$0xf] }
 0x303   : > { %v5175_v32 = vor.u32 %v5173_v62, %v5172_v19  ;;  %v8251_v35 = vrot.slane %v8249_v58, 5  ;;  %v8255_v26 = vrot.slane %v8253_v10, 4  ;;  %v13902_v55 = vpop.permute.xlu0 %5583  ;;  %v8261_v0 = vrot.slane %v8259_v48, 5  ;;  %v7448_v10 = vld [vmem:[#allocation2 + $0x138] sm:$0xf] }
 0x304   : > { %v5167_v34 = vsel %vm11813_vm11, %v10576_v46, %v5166_v12  ;;  %v7200_v3 = vshrl.u32 %v6899_v56, 16  ;;  %v7203_v61 = vshll.u32 %v6899_v56, 16  ;;  %v8246_v13 = vor.u32 %v8245_v37, %v8242_v7  ;;  %v13908_v30 = vpop.permute.xlu1 %6637  ;;  %v4996_v37 = vld [vmem:[#allocation2 + $0x90] sm:$0x8] }
 0x305   : > { %v5176_v44 = vsel %vm11813_vm11, %v5168_v38, %v5175_v32  ;;  %v8256_v25 = vor.u32 %v8255_v26, %v8251_v35  ;;  %v7209_v21 = vshll.u32 %v6900_v28, 16  ;;  %v7213_v50 = vshrl.u32 %v6900_v28, 16 }
 0x306   : > { %6649 = vrot.lane.b32.xlu1 %v10663_v31, %s11558_s25  ;;  %v10592_v53 = vcombine.low %v5167_v34, %v5176_v44  ;;  %v7202_v47 = vrot.slane %v7200_v3, 4  ;;  %v7205_v57 = vrot.slane %v7203_v61, 5  ;;  %v8247_v1 = vrot.slane %v8246_v13, 4  ;;  %v11313_v31 = vld [vmem:[#allocation2 + $0x134] sm:$0xff]  }
 0x307   : > { %v8257_v22 = vrot.slane %v8256_v25, 4  ;;  %v7211_v39 = vrot.slane %v7209_v21, 5  ;;  %v7219_v36 = vshll.u32 %v6901_v52, 16  ;;  %v7356_v40 = vpop.permute.xlu0 %7355  ;;  %v7215_v16 = vrot.slane %v7213_v50, 4  ;;  %v4998_v25 = vld [vmem:[#allocation2 + $0x98] sm:$0xf] }
 0x308   : > { %5445 = vst.msk [vmem:[#allocation3 + $0x60] sm:$0xff] %vm1251_vm12, %v10592_v53  ;;  %v7206_v59 = vor.u32 %v7205_v57, %v7202_v47  ;;  %v5992_v5 = vshrl.u32 %v5670_v11, 16  ;;  %v5995_v54 = vshll.u32 %v5670_v11, 16  ;;  %v8252_v41 = vsel %vm11801_vm10, %v8247_v1, %v8251_v35  ;;  %v13918_v14 = vpop.permute.xlu1 %8045  ;;  %v11314_v47 = vld [vmem:[#allocation2 + $0x134] sm:$0xff]   ;;  %v6217_v50 = vld [vmem:[#allocation2 + $0x130] sm:$0x8] }
 0x309   : > { %5621 = vst.msk [vmem:[#allocation3 + $0x60] sm:$0xff] %vm1428_vm13, %v13791_v2  ;;  %v8262_v46 = vsel %vm11801_vm10, %v8257_v22, %v8261_v0  ;;  %v7221_v51 = vrot.slane %v7219_v36, 5  ;;  %v6001_v23 = vshll.u32 %v5671_v49, 16  ;;  %v7216_v15 = vor.u32 %v7215_v16, %v7211_v39 }
 0x30a   : > { %v10750_v62 = vcombine.low %v8252_v41, %v8262_v46  ;;  %v7207_v27 = vrot.slane %v7206_v59, 4  ;;  %8057 = vrot.lane.b32.xlu1 %v11312_v42, %s11557_s23  ;;  %v5994_v8 = vrot.slane %v5992_v5, 4  ;;  %6165 = vst.msk [vmem:[#allocation3 + $0x60] sm:$0xff] %vm1976_vm14, %v13884_v17  ;;  %v5997_v2 = vrot.slane %v5995_v54, 5  ;;  %v8615_v42 = vld [vmem:[#allocation3 + $0x40] sm:$0xff] }
 0x30b   : > { %v6003_v58 = vrot.slane %v6001_v23, 5  ;;  %v6005_v29 = vshrl.u32 %v5671_v49, 16  ;;  %v6011_v19 = vshll.u32 %v5672_v4, 16  ;;  %6677 = vst.msk [vmem:[#allocation3 + $0x60] sm:$0xff] %vm2489_vm15, %v13870_v63  ;;  %v7217_v56 = vrot.slane %v7216_v15, 4 }
 0x30c   : > { %8595 = vst.msk [vmem:[#allocation3 + $0x48] sm:$0xff] %vm1251_vm12, %v10750_v62  ;;  %v7212_v48 = vsel %vm11801_vm10, %v7207_v27, %v7211_v39  ;;  %v7742_v12 = vshrl.u32 %v7446_v45, 16  ;;  %v7747_v38 = vshrl.u32 %v7447_v60, 16  ;;  %v5998_v17 = vor.u32 %v5997_v2, %v5994_v8  ;;  %v13931_v63 = vpop.permute.xlu0 %6125  ;;  %v13933_v35 = vpop.permute.xlu1 %6815  ;;  %v6218_v39 = vld [vmem:[#allocation2 + $0x134] sm:$0xf] }
 0x30d   : > { %6853 = vst.msk [vmem:[#allocation3 + $0x60] sm:$0xff] %vm2666_vm1, %v13847_v18  ;;  %v6007_v7 = vrot.slane %v6005_v29, 4  ;;  %v6013_v28 = vrot.slane %v6011_v19, 5  ;;  %v7750_v32 = vshll.u32 %v7447_v60, 16  ;;  %v7222_v26 = vsel %vm11801_vm10, %v7217_v56, %v7221_v51  ;;  %v4997_v18 = vld [vmem:[#allocation2 + $0x94] sm:$0xf] }
 0x30e   : > { %7397 = vst.msk [vmem:[#allocation3 + $0x60] sm:$0xff] %vm3211_vm2, %v7356_v40  ;;  %6827 = vrot.lane.b32.xlu1 %v11313_v31, %s11556_s17  ;;  %v10711_v34 = vrot.slane %v7742_v12, 11  ;;  %v7749_v0 = vrot.slane %v7747_v38, 7  ;;  %v7756_v52 = vshrl.u32 %v7448_v10, 16  ;;  %v10694_v3 = vcombine.low %v7212_v48, %v7222_v26  ;;  %v6219_v51 = vld [vmem:[#allocation2 + $0x138] sm:$0xf] }
 0x30f   : > { %7909 = vst.msk [vmem:[#allocation3 + $0x60] sm:$0xff] %vm3725_vm3, %v13899_v43  ;;  %v5999_v61 = vrot.slane %v5998_v17, 4  ;;  %v6008_v44 = vor.u32 %v6007_v7, %v6003_v58  ;;  %v7759_v13 = vshll.u32 %v7448_v10, 16  ;;  %v5178_v57 = vshrl.u32 %v4996_v37, 16  ;;  %v6902_v15 = vld [vmem:[#allocation2 + $0x120] sm:$0xf] }
 0x310   : > { %8085 = vst.msk [vmem:[#allocation3 + $0x60] sm:$0xff] %vm3902_vm4, %v13882_v24  ;;  %v7752_v21 = vor.u32 %v7750_v32, %v7749_v0  ;;  %v7754_v11 = vrot.slane %v7749_v0, 4  ;;  %v7758_v53 = vrot.slane %v7756_v52, 7  ;;  %7367 = vrot.lane.b32.xlu0 %v10694_v3, %s11560_s15  ;;  %v5183_v1 = vshrl.u32 %v4997_v18, 16  ;;  %v13945_v36 = vpop.permute.xlu0 %7869  ;;  %v13950_v4 = vpop.permute.xlu1 %5585  ;;  %v6903_v12 = vld [vmem:[#allocation2 + $0x124] sm:$0xf] }
 0x311   : > { %v6004_v49 = vsel %vm11801_vm10, %v5999_v61, %v6003_v58  ;;  %v6009_v43 = vrot.slane %v6008_v44, 4  ;;  %v5186_v22 = vshll.u32 %v4997_v18, 16  ;;  %v10577_v59 = vrot.slane %v5178_v57, 11  ;;  %v6904_v7 = vld [vmem:[#allocation2 + $0x128] sm:$0x1] }
 0x312   : > { %v7753_v24 = vsel %vm11813_vm11, %v10711_v34, %v7752_v21  ;;  %v7761_v40 = vor.u32 %v7759_v13, %v7758_v53  ;;  %5597 = vrot.lane.b32.xlu1 %v11314_v47, %s11555_s28  ;;  %v5192_v16 = vshrl.u32 %v4998_v25, 16  ;;  %v5185_v41 = vrot.slane %v5183_v1, 7  ;;  %v8110_v52 = vld [vmem:[#allocation2 + $0x94] sm:$0xf]  ;;  %s14819_s28 = scalar_lea.vmem %s14989_s13, %s10894_s24 }
 0x313   : > { %v8616_v5 = vld [vmem:[#allocation3 + $0x48] sm:$0xff]  ;;  %v6014_v54 = vsel %vm11801_vm10, %v6009_v43, %v6013_v28  ;;  %v5195_v46 = vshll.u32 %v4998_v25, 16  ;;  %v6532_v23 = vshrl.u32 %v6217_v50, 16  ;;  %v6537_v27 = vshrl.u32 %v6218_v39, 16  ;;  %v8111_v25 = vld [vmem:[#allocation2 + $0x98] sm:$0xf] }
 0x314   : > { %10776 = vmatprep.mubr.msk.bf16.mxu1 %vm1251_vm12, %v8616_v5  ;;  %v10631_v45 = vcombine.low %v6004_v49, %v6014_v54  ;;  %v7762_v60 = vsel %vm11813_vm11, %v7754_v11, %v7761_v40  ;;  %v5194_v62 = vrot.slane %v5192_v16, 7  ;;  %v5188_v2 = vor.u32 %v5186_v22, %v5185_v41  ;;  %v13957_v19 = vpop.permute.xlu0 %6639  ;;  %v8112_v43 = vld [vmem:[#allocation2 + $0x9c] sm:$0x1]  ;;  %v5673_v16 = vld [vmem:[#allocation2 + $0x120] sm:$0xf] }
 0x315   : > { %v10727_v8 = vcombine.low %v7753_v24, %v7762_v60  ;;  %v5190_v58 = vrot.slane %v5185_v41, 4  ;;  %v10648_v29 = vrot.slane %v6532_v23, 11  ;;  %8831 = vmatmul.mubr.bf16.gmra.mrb[16].mxu1 %v8615_v42  ;;  %v6539_v48 = vrot.slane %v6537_v27, 7 }
 0x316   : > { %6137 = vrot.lane.b32.xlu0 %v10631_v45, %s11561_s22  ;;  %v5197_v10 = vor.u32 %v5195_v46, %v5194_v62  ;;  %v6540_v56 = vshll.u32 %v6218_v39, 16  ;;  %v6546_v31 = vshrl.u32 %v6219_v51, 16  ;;  %v5189_v38 = vsel %vm11813_vm11, %v10577_v59, %v5188_v2 }
 0x317   : > { %v6549_v17 = vshll.u32 %v6219_v51, 16  ;;  %v7224_v28 = vshrl.u32 %v6902_v15, 16  ;;  %v7227_v32 = vshll.u32 %v6902_v15, 16  ;;  %v6544_v34 = vrot.slane %v6539_v48, 4  ;;  %v7358_v18 = vpop.permute.xlu1 %7357  ;;  %v5674_v51 = vld [vmem:[#allocation2 + $0x124] sm:$0xf] }
 0x318   : > { %v5198_v37 = vsel %vm11813_vm11, %v5190_v58, %v5197_v10  ;;  %v6542_v26 = vor.u32 %v6540_v56, %v6539_v48  ;;  %v6548_v0 = vrot.slane %v6546_v31, 7  ;;  %v7233_v13 = vshll.u32 %v6903_v12, 16  ;;  %v13964_v21 = vpop.permute.xlu0 %8047  ;;  %v6905_v56 = vld [vmem:[#allocation2 + $0x134] sm:$0xf] }
 0x319   : > { %v10593_v3 = vcombine.low %v5189_v38, %v5198_v37  ;;  %v7226_v61 = vrot.slane %v7224_v28, 4  ;;  %v7229_v44 = vrot.slane %v7227_v32, 5  ;;  %v7237_v47 = vshrl.u32 %v6903_v12, 16  ;;  %v11315_v12 = vld [vmem:[#allocation2 + $0x148] sm:$0xff]  }
 0x31a   : > { %7881 = vrot.lane.b32.xlu0 %v10727_v8, %s11559_s14  ;;  %v6543_v11 = vsel %vm11813_vm11, %v10648_v29, %v6542_v26  ;;  %v6551_v53 = vor.u32 %v6549_v17, %v6548_v0  ;;  %v7243_v57 = vshll.u32 %v6904_v7, 16  ;;  %v7235_v49 = vrot.slane %v7233_v13, 5  ;;  %v5675_v8 = vld [vmem:[#allocation2 + $0x128] sm:$0x1] }
 0x31b   : > { %5446 = vst.msk [vmem:[#allocation3 + $0x70] sm:$0xff] %vm1251_vm12, %v10593_v3  ;;  %v7230_v50 = vor.u32 %v7229_v44, %v7226_v61  ;;  %v8264_v1 = vshrl.u32 %v8110_v52, 16  ;;  %v8267_v22 = vshll.u32 %v8110_v52, 16  ;;  %v7239_v24 = vrot.slane %v7237_v47, 4  ;;  %v13974_v42 = vpop.permute.xlu1 %6127  ;;  %v6907_v3 = vld [vmem:[#allocation2 + $0x13c] sm:$0x1] }
 0x31c   : > { %5622 = vst.msk [vmem:[#allocation3 + $0x70] sm:$0xff] %vm1428_vm13, %v13855_v33  ;;  %v6552_v39 = vsel %vm11813_vm11, %v6544_v34, %v6551_v53  ;;  %v7245_v40 = vrot.slane %v7243_v57, 5  ;;  %v8273_v59 = vshll.u32 %v8111_v25, 16  ;;  %v13978_v23 = vpop.permute.xlu0 %6817  ;;  %v8277_v60 = vshrl.u32 %v8111_v25, 16  ;;  %v6906_v34 = vld [vmem:[#allocation2 + $0x138] sm:$0xf] }
 0x31d   : > { %v10664_v5 = vcombine.low %v6543_v11, %v6552_v39  ;;  %v7231_v54 = vrot.slane %v7230_v50, 4  ;;  %v8266_v41 = vrot.slane %v8264_v1, 4  ;;  %v8269_v46 = vrot.slane %v8267_v22, 5  ;;  %6166 = vst.msk [vmem:[#allocation3 + $0x70] sm:$0xff] %vm1976_vm14, %v13931_v63  ;;  %v7449_v11 = vld [vmem:[#allocation2 + $0x144] sm:$0x8] }
 0x31e   : > { %v7240_v33 = vor.u32 %v7239_v24, %v7235_v49  ;;  %v8275_v45 = vrot.slane %v8273_v59, 5  ;;  %v8283_v62 = vshll.u32 %v8112_v43, 16  ;;  %6678 = vst.msk [vmem:[#allocation3 + $0x70] sm:$0xff] %vm2489_vm15, %v13908_v30  ;;  %v6016_v2 = vshrl.u32 %v5673_v16, 16  ;;  %v7451_v24 = vld [vmem:[#allocation2 + $0x14c] sm:$0xf] }
 0x31f   : > { %6651 = vrot.lane.b32.xlu0 %v10664_v5, %s11558_s25  ;;  %v7236_v27 = vsel %vm11801_vm10, %v7231_v54, %v7235_v49  ;;  %v8270_v15 = vor.u32 %v8269_v46, %v8266_v41  ;;  %v6019_v58 = vshll.u32 %v5673_v16, 16  ;;  %6854 = vst.msk [vmem:[#allocation3 + $0x70] sm:$0xff] %vm2666_vm1, %v13895_v6  ;;  %v8279_v29 = vrot.slane %v8277_v60, 4  ;;  %v13988_v30 = vpop.permute.xlu1 %7871  ;;  %v7450_v49 = vld [vmem:[#allocation2 + $0x148] sm:$0xf] }
 0x320   : > { %v7241_v63 = vrot.slane %v7240_v33, 4  ;;  %v8285_v10 = vrot.slane %v8283_v62, 5  ;;  %v6025_v48 = vshll.u32 %v5674_v51, 16  ;;  %7398 = vst.msk [vmem:[#allocation3 + $0x70] sm:$0xff] %vm3211_vm2, %v7358_v18  ;;  %v6018_v38 = vrot.slane %v6016_v2, 4  ;;  %v13992_v28 = vpop.permute.xlu0 %5587 }
 0x321   : > { %v8271_v31 = vrot.slane %v8270_v15, 4  ;;  %v6021_v17 = vrot.slane %v6019_v58, 5  ;;  %v6029_v7 = vshrl.u32 %v5674_v51, 16  ;;  %7910 = vst.msk [vmem:[#allocation3 + $0x70] sm:$0xff] %vm3725_vm3, %v13945_v36  ;;  %v8280_v32 = vor.u32 %v8279_v29, %v8275_v45 }
 0x322   : > { %v7246_v6 = vsel %vm11801_vm10, %v7241_v63, %v7245_v40  ;;  %v6027_v37 = vrot.slane %v6025_v48, 5  ;;  %v6035_v26 = vshll.u32 %v5675_v8, 16  ;;  %8086 = vst.msk [vmem:[#allocation3 + $0x70] sm:$0xff] %vm3902_vm4, %v13918_v14  ;;  %v7248_v13 = vshrl.u32 %v6905_v56, 16  ;;  %v6221_v8 = vld [vmem:[#allocation2 + $0x148] sm:$0xf] }
 0x323   : > { %v10695_v0 = vcombine.low %v7236_v27, %v7246_v6  ;;  %v8276_v52 = vsel %vm11801_vm10, %v8271_v31, %v8275_v45  ;;  %8059 = vrot.lane.b32.xlu0 %v11315_v12, %s11557_s23  ;;  %v6022_v18 = vor.u32 %v6021_v17, %v6018_v38  ;;  %v6031_v36 = vrot.slane %v6029_v7, 4  ;;  %v14001_v53 = vpop.permute.xlu1 %6641  ;;  %v6220_v45 = vld [vmem:[#allocation2 + $0x144] sm:$0x8]  ;;  %v6222_v12 = vld [vmem:[#allocation2 + $0x14c] sm:$0xf] }
 0x324   : > { %v8281_v61 = vrot.slane %v8280_v32, 4  ;;  %v6037_v44 = vrot.slane %v6035_v26, 5  ;;  %v7251_v25 = vshll.u32 %v6905_v56, 16  ;;  %v7257_v57 = vshll.u32 %v6906_v34, 16 }
 0x325   : > { %7369 = vrot.lane.b32.xlu1 %v10695_v0, %s11560_s15  ;;  %v6023_v47 = vrot.slane %v6022_v18, 4  ;;  %v6032_v14 = vor.u32 %v6031_v36, %v6027_v37  ;;  %v7261_v50 = vshrl.u32 %v6906_v34, 16  ;;  %v7250_v1 = vrot.slane %v7248_v13, 4  ;;  %v5000_v18 = vld [vmem:[#allocation2 + $0xa8] sm:$0xf] }
 0x326   : > { %v8286_v43 = vsel %vm11801_vm10, %v8281_v61, %v8285_v10  ;;  %v7253_v22 = vrot.slane %v7251_v25, 5  ;;  %v7267_v39 = vshll.u32 %v6907_v3, 16  ;;  %v7259_v5 = vrot.slane %v7257_v57, 5  ;;  %v14008_v54 = vpop.permute.xlu0 %7359  ;;  %v5001_v25 = vld [vmem:[#allocation2 + $0xac] sm:$0xf]  ;;  %v8617_v57 = vld [vmem:[#allocation3 + $0x50] sm:$0xff] }
 0x327   : > { %v10751_v40 = vcombine.low %v8276_v52, %v8286_v43  ;;  %v6028_v59 = vsel %vm11801_vm10, %v6023_v47, %v6027_v37  ;;  %v6033_v16 = vrot.slane %v6032_v14, 4  ;;  %v7263_v46 = vrot.slane %v7261_v50, 4  ;;  %v14013_v10 = vpop.permute.xlu1 %8049  ;;  %v4999_v37 = vld [vmem:[#allocation2 + $0xa4] sm:$0x8] }
 0x328   : > { %v7254_v41 = vor.u32 %v7253_v22, %v7250_v1  ;;  %v7269_v51 = vrot.slane %v7267_v39, 5  ;;  %v7764_v33 = vshrl.u32 %v7449_v11, 16  ;;  %v7769_v62 = vshrl.u32 %v7450_v49, 16 }
 0x329   : > { %8596 = vst.msk [vmem:[#allocation3 + $0x58] sm:$0xff] %vm1251_vm12, %v10751_v40  ;;  %v6038_v60 = vsel %vm11801_vm10, %v6033_v16, %v6037_v44  ;;  %v7772_v27 = vshll.u32 %v7450_v49, 16  ;;  %v7778_v15 = vshrl.u32 %v7451_v24, 16  ;;  %v7264_v63 = vor.u32 %v7263_v46, %v7259_v5  ;;  %v8113_v49 = vld [vmem:[#allocation2 + $0xa8] sm:$0xf] }
 0x32a   : > { %v10632_v2 = vcombine.low %v6028_v59, %v6038_v60  ;;  %v7255_v58 = vrot.slane %v7254_v41, 4  ;;  %v10712_v29 = vrot.slane %v7764_v33, 11  ;;  %v7771_v48 = vrot.slane %v7769_v62, 7  ;;  %v8114_v40 = vld [vmem:[#allocation2 + $0xac] sm:$0xf] }
 0x32b   : > { %v7780_v56 = vrot.slane %v7778_v15, 7  ;;  %v7781_v31 = vshll.u32 %v7451_v24, 16  ;;  %v6554_v38 = vshrl.u32 %v6220_v45, 16  ;;  %v7265_v7 = vrot.slane %v7264_v63, 4  ;;  %v14018_v36 = vpop.permute.xlu0 %6129  ;;  %v14026_v59 = vpop.permute.xlu1 %6819 }
 0x32c   : > { %6139 = vrot.lane.b32.xlu1 %v10632_v2, %s11561_s22  ;;  %v7260_v17 = vsel %vm11801_vm10, %v7255_v58, %v7259_v5  ;;  %v6559_v6 = vshrl.u32 %v6221_v8, 16  ;;  %v6562_v32 = vshll.u32 %v6221_v8, 16  ;;  %v7774_v26 = vor.u32 %v7772_v27, %v7771_v48  ;;  %v11316_v27 = vld [vmem:[#allocation2 + $0x148] sm:$0xff]  }
 0x32d   : > { %v7776_v34 = vrot.slane %v7771_v48, 4  ;;  %v7783_v0 = vor.u32 %v7781_v31, %v7780_v56  ;;  %v10649_v52 = vrot.slane %v6554_v38, 11  ;;  %v7270_v3 = vsel %vm11801_vm10, %v7265_v7, %v7269_v51  ;;  %v8115_v51 = vld [vmem:[#allocation2 + $0xb0] sm:$0x1] }
 0x32e   : > { %v6561_v61 = vrot.slane %v6559_v6, 7  ;;  %v6568_v44 = vshrl.u32 %v6222_v12, 16  ;;  %v6571_v13 = vshll.u32 %v6222_v12, 16  ;;  %v10696_v11 = vcombine.low %v7260_v17, %v7270_v3  ;;  %v5676_v12 = vld [vmem:[#allocation2 + $0x134] sm:$0xf] }
 0x32f   : > { %v7775_v47 = vsel %vm11813_vm11, %v10712_v29, %v7774_v26  ;;  %v7784_v14 = vsel %vm11813_vm11, %v7776_v34, %v7783_v0  ;;  %v5200_v50 = vshrl.u32 %v4999_v37, 16  ;;  %v5205_v5 = vshrl.u32 %v5000_v18, 16  ;;  %v14033_v63 = vpop.permute.xlu0 %7873 }
 0x330   : > { %v8618_v43 = vld [vmem:[#allocation3 + $0x58] sm:$0xff]  ;;  %v10728_v1 = vcombine.low %v7775_v47, %v7784_v14  ;;  %v6564_v22 = vor.u32 %v6562_v32, %v6561_v61  ;;  %v6566_v39 = vrot.slane %v6561_v61, 4  ;;  %v6570_v24 = vrot.slane %v6568_v44, 7  ;;  %7371 = vrot.lane.b32.xlu0 %v10696_v11, %s11560_s15  ;;  %v5677_v32 = vld [vmem:[#allocation2 + $0x138] sm:$0xf] }
 0x331   : > { %10777 = vmatprep.mubr.msk.bf16.mxu1 %vm1251_vm12, %v8618_v43  ;;  %v10578_v16 = vrot.slane %v5200_v50, 11  ;;  %v5208_v41 = vshll.u32 %v5000_v18, 16  ;;  %v5214_v46 = vshrl.u32 %v5001_v25, 16  ;;  %v5217_v60 = vshll.u32 %v5001_v25, 16  ;;  %v14038_v18 = vpop.permute.xlu1 %5589  ;;  %v6908_v25 = vld [vmem:[#allocation2 + $0x148] sm:$0xf] }
 0x332   : > { %7883 = vrot.lane.b32.xlu1 %v10728_v1, %s11559_s14  ;;  %v6565_v33 = vsel %vm11813_vm11, %v10649_v52, %v6564_v22  ;;  %v6573_v45 = vor.u32 %v6571_v13, %v6570_v24  ;;  %8839 = vmatmul.mubr.bf16.gmra.mrb[20].mxu1 %v8617_v57  ;;  %v8288_v62 = vshrl.u32 %v8113_v49, 16  ;;  %v5207_v15 = vrot.slane %v5205_v5, 7  ;;  %v5678_v52 = vld [vmem:[#allocation2 + $0x13c] sm:$0x1]  ;;  %v6909_v22 = vld [vmem:[#allocation2 + $0x14c] sm:$0xf] }
 0x333   : > { %v5216_v8 = vrot.slane %v5214_v46, 7  ;;  %v8291_v2 = vshll.u32 %v8113_v49, 16  ;;  %v8297_v58 = vshll.u32 %v8114_v40, 16  ;;  %v8301_v56 = vshrl.u32 %v8114_v40, 16  ;;  %v6910_v5 = vld [vmem:[#allocation2 + $0x150] sm:$0x1] }
 0x334   : > { %v6574_v29 = vsel %vm11813_vm11, %v6566_v39, %v6573_v45  ;;  %v8290_v48 = vrot.slane %v8288_v62, 4  ;;  %v8307_v31 = vshll.u32 %v8115_v51, 16  ;;  %6829 = vrot.lane.b32.xlu0 %v11316_v27, %s11556_s17  ;;  %v5210_v17 = vor.u32 %v5208_v41, %v5207_v15  ;;  %v14045_v39 = vpop.permute.xlu0 %6643 }
 0x335   : > { %v10665_v38 = vcombine.low %v6565_v33, %v6574_v29  ;;  %v5212_v7 = vrot.slane %v5207_v15, 4  ;;  %v5219_v6 = vor.u32 %v5217_v60, %v5216_v8  ;;  %v8293_v37 = vrot.slane %v8291_v2, 5  ;;  %v7452_v60 = vld [vmem:[#allocation2 + $0x158] sm:$0x8]  ;;  %v7453_v2 = vld [vmem:[#allocation2 + $0x15c] sm:$0xf] }
 0x336   : > { %v8299_v26 = vrot.slane %v8297_v58, 5  ;;  %v8303_v34 = vrot.slane %v8301_v56, 4  ;;  %v8309_v0 = vrot.slane %v8307_v31, 5  ;;  %v5211_v3 = vsel %vm11813_vm11, %v10578_v16, %v5210_v17  ;;  %v14056_v58 = vpop.permute.xlu1 %7361  ;;  %v7454_v17 = vld [vmem:[#allocation2 + $0x160] sm:$0xf] }
 0x337   : > { %6653 = vrot.lane.b32.xlu1 %v10665_v38, %s11558_s25  ;;  %v5220_v61 = vsel %vm11813_vm11, %v5212_v7, %v5219_v6  ;;  %v6040_v44 = vshrl.u32 %v5676_v12, 16  ;;  %v6043_v13 = vshll.u32 %v5676_v12, 16  ;;  %v8294_v47 = vor.u32 %v8293_v37, %v8290_v48 }
 0x338   : > { %v10594_v11 = vcombine.low %v5211_v3, %v5220_v61  ;;  %v8304_v14 = vor.u32 %v8303_v34, %v8299_v26  ;;  %v6049_v57 = vshll.u32 %v5677_v32, 16  ;;  %v6053_v43 = vshrl.u32 %v5677_v32, 16 }
 0x339   : > { %v6042_v50 = vrot.slane %v6040_v44, 4  ;;  %v6045_v49 = vrot.slane %v6043_v13, 5  ;;  %v6059_v1 = vshll.u32 %v5678_v52, 16  ;;  %v8295_v24 = vrot.slane %v8294_v47, 4 }
 0x33a   : > { %5447 = vst.msk [vmem:[#allocation3 + $0x80] sm:$0xff] %vm1251_vm12, %v10594_v11  ;;  %v8305_v40 = vrot.slane %v8304_v14, 4  ;;  %v6051_v16 = vrot.slane %v6049_v57, 5  ;;  %v7272_v41 = vshrl.u32 %v6908_v25, 16  ;;  %v6055_v51 = vrot.slane %v6053_v43, 4 }
 0x33b   : > { %5623 = vst.msk [vmem:[#allocation3 + $0x80] sm:$0xff] %vm1428_vm13, %v13902_v55  ;;  %v6046_v46 = vor.u32 %v6045_v49, %v6042_v50  ;;  %v6061_v33 = vrot.slane %v6059_v1, 5  ;;  %v7275_v45 = vshll.u32 %v6908_v25, 16  ;;  %v8300_v62 = vsel %vm11801_vm10, %v8295_v24, %v8299_v26  ;;  %v5002_v26 = vld [vmem:[#allocation2 + $0xb8] sm:$0x8] }
 0x33c   : > { %v8310_v27 = vsel %vm11801_vm10, %v8305_v40, %v8309_v0  ;;  %v7274_v15 = vrot.slane %v7272_v41, 4  ;;  %v7281_v8 = vshll.u32 %v6909_v22, 16  ;;  %6167 = vst.msk [vmem:[#allocation3 + $0x80] sm:$0xff] %vm1976_vm14, %v13974_v42  ;;  %v6056_v48 = vor.u32 %v6055_v51, %v6051_v16  ;;  %v5003_v25 = vld [vmem:[#allocation2 + $0xbc] sm:$0xf]  ;;  %v14075_v50 = vpop.permute.xlu1 %6131 }
 0x33d   : > { %v10752_v55 = vcombine.low %v8300_v62, %v8310_v27  ;;  %v6047_v29 = vrot.slane %v6046_v46, 4  ;;  %v7277_v56 = vrot.slane %v7275_v45, 5  ;;  %6679 = vst.msk [vmem:[#allocation3 + $0x80] sm:$0xff] %vm2489_vm15, %v13957_v19  ;;  %v7285_v12 = vshrl.u32 %v6909_v22, 16  ;;  %v14067_v19 = vpop.permute.xlu0 %8051  ;;  %v5004_v14 = vld [vmem:[#allocation2 + $0xc0] sm:$0xf] }
 0x33e   : > { %v7283_v31 = vrot.slane %v7281_v8, 5  ;;  %v7291_v38 = vshll.u32 %v6910_v5, 16  ;;  %v7786_v7 = vshrl.u32 %v7452_v60, 16  ;;  %6855 = vst.msk [vmem:[#allocation3 + $0x80] sm:$0xff] %vm2666_vm1, %v13933_v35  ;;  %v6057_v6 = vrot.slane %v6056_v48, 4  ;;  %v8619_v45 = vld [vmem:[#allocation3 + $0x60] sm:$0xff] }
 0x33f   : > { %8597 = vst.msk [vmem:[#allocation3 + $0x68] sm:$0xff] %vm1251_vm12, %v10752_v55  ;;  %v6052_v42 = vsel %vm11801_vm10, %v6047_v29, %v6051_v16  ;;  %v7278_v32 = vor.u32 %v7277_v56, %v7274_v15  ;;  %v7791_v37 = vshrl.u32 %v7453_v2, 16  ;;  %v7287_v34 = vrot.slane %v7285_v12, 4  ;;  %v8116_v22 = vld [vmem:[#allocation2 + $0xbc] sm:$0xf] }
 0x340   : > { %7399 = vst.msk [vmem:[#allocation3 + $0x80] sm:$0xff] %vm3211_vm2, %v14008_v54  ;;  %v7293_v0 = vrot.slane %v7291_v38, 5  ;;  %v10713_v52 = vrot.slane %v7786_v7, 11  ;;  %v7794_v3 = vshll.u32 %v7453_v2, 16  ;;  %v6062_v35 = vsel %vm11801_vm10, %v6057_v6, %v6061_v33  ;;  %v8117_v5 = vld [vmem:[#allocation2 + $0xc0] sm:$0xf] }
 0x341   : > { %7911 = vst.msk [vmem:[#allocation3 + $0x80] sm:$0xff] %vm3725_vm3, %v13988_v30  ;;  %v7279_v61 = vrot.slane %v7278_v32, 4  ;;  %v7793_v44 = vrot.slane %v7791_v37, 7  ;;  %v7800_v13 = vshrl.u32 %v7454_v17, 16  ;;  %v10633_v54 = vcombine.low %v6052_v42, %v6062_v35  ;;  %v14082_v60 = vpop.permute.xlu0 %6821  ;;  %v8118_v8 = vld [vmem:[#allocation2 + $0xc4] sm:$0x1]  ;;  %v14089_v32 = vpop.permute.xlu1 %7875 }
 0x342   : > { %8087 = vst.msk [vmem:[#allocation3 + $0x80] sm:$0xff] %vm3902_vm4, %v13964_v21  ;;  %v7288_v11 = vor.u32 %v7287_v34, %v7283_v31  ;;  %v7803_v47 = vshll.u32 %v7454_v17, 16  ;;  %v5222_v57 = vshrl.u32 %v5002_v26, 16  ;;  %v5227_v16 = vshrl.u32 %v5003_v25, 16  ;;  %v5005_v12 = vld [vmem:[#allocation2 + $0xcc] sm:$0x8] }
 0x343   : > { %v7284_v30 = vsel %vm11801_vm10, %v7279_v61, %v7283_v31  ;;  %v7796_v49 = vor.u32 %v7794_v3, %v7793_v44  ;;  %v7798_v43 = vrot.slane %v7793_v44, 4  ;;  %v7802_v1 = vrot.slane %v7800_v13, 7  ;;  %6141 = vrot.lane.b32.xlu0 %v10633_v54, %s11561_s22  ;;  %v5006_v38 = vld [vmem:[#allocation2 + $0xd0] sm:$0xf]  ;;  %v11317_v37 = vld [vmem:[#allocation2 + $0x15c] sm:$0xff]  }
 0x344   : > { %v7289_v24 = vrot.slane %v7288_v11, 4  ;;  %v10579_v40 = vrot.slane %v5222_v57, 11  ;;  %v5230_v21 = vshll.u32 %v5003_v25, 16  ;;  %v5236_v51 = vshrl.u32 %v5004_v14, 16  ;;  %v5007_v61 = vld [vmem:[#allocation2 + $0xd4] sm:$0xf] }
 0x345   : > { %v7797_v41 = vsel %vm11813_vm11, %v10713_v52, %v7796_v49  ;;  %v7805_v46 = vor.u32 %v7803_v47, %v7802_v1  ;;  %v5239_v33 = vshll.u32 %v5004_v14, 16  ;;  %v5229_v15 = vrot.slane %v5227_v16, 7  ;;  %v8119_v14 = vld [vmem:[#allocation2 + $0xd0] sm:$0xf]  ;;  %v14097_v57 = vpop.permute.xlu0 %5591 }
 0x346   : > { %v8620_v62 = vld [vmem:[#allocation3 + $0x68] sm:$0xff]  ;;  %v7294_v27 = vsel %vm11801_vm10, %v7289_v24, %v7293_v0  ;;  %v8312_v2 = vshrl.u32 %v8116_v22, 16  ;;  %v8315_v55 = vshll.u32 %v8116_v22, 16  ;;  %v5238_v56 = vrot.slane %v5236_v51, 7 }
 0x347   : > { %10778 = vmatprep.mubr.msk.bf16.mxu1 %vm1251_vm12, %v8620_v62  ;;  %v10697_v29 = vcombine.low %v7284_v30, %v7294_v27  ;;  %v7806_v48 = vsel %vm11813_vm11, %v7798_v43, %v7805_v46  ;;  %v8321_v31 = vshll.u32 %v8117_v5, 16  ;;  %v5232_v7 = vor.u32 %v5230_v21, %v5229_v15  ;;  %v8120_v22 = vld [vmem:[#allocation2 + $0xd4] sm:$0xf]  ;;  %v8121_v46 = vld [vmem:[#allocation2 + $0xd8] sm:$0x1] }
 0x348   : > { %v10729_v17 = vcombine.low %v7797_v41, %v7806_v48  ;;  %v5234_v42 = vrot.slane %v5229_v15, 4  ;;  %8847 = vmatmul.mubr.bf16.gmra.mrb[24].mxu1 %v8619_v45  ;;  %v8314_v6 = vrot.slane %v8312_v2, 4  ;;  %v5241_v26 = vor.u32 %v5239_v33, %v5238_v56  ;;  %v14101_v45 = vpop.permute.xlu1 %6645  ;;  %v5008_v2 = vld [vmem:[#allocation2 + $0xe0] sm:$0x8] }
 0x349   : > { %7373 = vrot.lane.b32.xlu1 %v10697_v29, %s11560_s15  ;;  %v8317_v34 = vrot.slane %v8315_v55, 5  ;;  %v8323_v0 = vrot.slane %v8321_v31, 5  ;;  %v8325_v52 = vshrl.u32 %v8117_v5, 16  ;;  %v5233_v3 = vsel %vm11813_vm11, %v10579_v40, %v5232_v7  ;;  %v5009_v31 = vld [vmem:[#allocation2 + $0xe4] sm:$0xf] }
 0x34a   : > { %7885 = vrot.lane.b32.xlu0 %v10729_v17, %s11559_s14  ;;  %v8331_v35 = vshll.u32 %v8118_v8, 16  ;;  %v5244_v44 = vshrl.u32 %v5005_v12, 16  ;;  %v5249_v13 = vshrl.u32 %v5006_v38, 16  ;;  %v5242_v25 = vsel %vm11813_vm11, %v5234_v42, %v5241_v26  ;;  %v5010_v26 = vld [vmem:[#allocation2 + $0xe8] sm:$0xf] }
 0x34b   : > { %v8318_v54 = vor.u32 %v8317_v34, %v8314_v6  ;;  %v8327_v11 = vrot.slane %v8325_v52, 4  ;;  %v5252_v47 = vshll.u32 %v5006_v38, 16  ;;  %v10595_v30 = vcombine.low %v5233_v3, %v5242_v25  ;;  %v8122_v34 = vld [vmem:[#allocation2 + $0xe4] sm:$0xf] }
 0x34c   : > { %v8333_v49 = vrot.slane %v8331_v35, 5  ;;  %v10580_v43 = vrot.slane %v5244_v44, 11  ;;  %v5251_v1 = vrot.slane %v5249_v13, 7  ;;  %v5258_v16 = vshrl.u32 %v5007_v61, 16 }
 0x34d   : > { %8061 = vrot.lane.b32.xlu1 %v11317_v37, %s11557_s23  ;;  %v8319_v24 = vrot.slane %v8318_v54, 4  ;;  %v8328_v40 = vor.u32 %v8327_v11, %v8323_v0  ;;  %v5261_v21 = vshll.u32 %v5007_v61, 16  ;;  %5448 = vst.msk [vmem:[#allocation3 + $0x90] sm:$0xff] %vm1251_vm12, %v10595_v30  ;;  %v8336_v51 = vshrl.u32 %v8119_v14, 16 }
 0x34e   : > { %v5254_v5 = vor.u32 %v5252_v47, %v5251_v1  ;;  %v5256_v41 = vrot.slane %v5251_v1, 4  ;;  %v8339_v33 = vshll.u32 %v8119_v14, 16  ;;  %5624 = vst.msk [vmem:[#allocation3 + $0x90] sm:$0xff] %vm1428_vm13, %v13950_v4  ;;  %v5260_v15 = vrot.slane %v5258_v16, 7  ;;  %v8124_v14 = vld [vmem:[#allocation2 + $0xec] sm:$0x1] }
 0x34f   : > { %v8324_v62 = vsel %vm11801_vm10, %v8319_v24, %v8323_v0  ;;  %v8329_v27 = vrot.slane %v8328_v40, 4  ;;  %v8345_v8 = vshll.u32 %v8120_v22, 16  ;;  %v8338_v29 = vrot.slane %v8336_v51, 4  ;;  %6168 = vst.msk [vmem:[#allocation3 + $0x90] sm:$0xff] %vm1976_vm14, %v14018_v36 }
 0x350   : > { %v5255_v55 = vsel %vm11813_vm11, %v10580_v43, %v5254_v5  ;;  %v8341_v48 = vrot.slane %v8339_v33, 5  ;;  %v8349_v56 = vshrl.u32 %v8120_v22, 16  ;;  %v5263_v12 = vor.u32 %v5261_v21, %v5260_v15  ;;  %6680 = vst.msk [vmem:[#allocation3 + $0x90] sm:$0xff] %vm2489_vm15, %v14001_v53  ;;  %v14115_v7 = vpop.permute.xlu0 %7363  ;;  %v8123_v53 = vld [vmem:[#allocation2 + $0xe8] sm:$0xf] }
 0x351   : > { %v8334_v4 = vsel %vm11801_vm10, %v8329_v27, %v8333_v49  ;;  %v8347_v38 = vrot.slane %v8345_v8, 5  ;;  %v8355_v17 = vshll.u32 %v8121_v46, 16  ;;  %6856 = vst.msk [vmem:[#allocation3 + $0x90] sm:$0xff] %vm2666_vm1, %v13978_v23  ;;  %v5266_v36 = vshrl.u32 %v5008_v2, 16  ;;  %v14126_v23 = vpop.permute.xlu1 %8053  ;;  %v5011_v22 = vld [vmem:[#allocation2 + $0xf4] sm:$0x8] }
 0x352   : > { %v10753_v42 = vcombine.low %v8324_v62, %v8334_v4  ;;  %v8342_v6 = vor.u32 %v8341_v48, %v8338_v29  ;;  %v8351_v37 = vrot.slane %v8349_v56, 4  ;;  %v5264_v0 = vsel %vm11813_vm11, %v5256_v41, %v5263_v12  ;;  %7400 = vst.msk [vmem:[#allocation3 + $0x90] sm:$0xff] %vm3211_vm2, %v14056_v58  ;;  %v5012_v21 = vld [vmem:[#allocation2 + $0xf8] sm:$0xf]  ;;  %v5013_v33 = vld [vmem:[#allocation2 + $0xfc] sm:$0xf] }
 0x353   : > { %v8357_v52 = vrot.slane %v8355_v17, 5  ;;  %v5271_v3 = vshrl.u32 %v5009_v31, 16  ;;  %v5274_v35 = vshll.u32 %v5009_v31, 16  ;;  %v10596_v61 = vcombine.low %v5255_v55, %v5264_v0  ;;  %7912 = vst.msk [vmem:[#allocation3 + $0x90] sm:$0xff] %vm3725_vm3, %v14033_v63  ;;  %v8621_v8 = vld [vmem:[#allocation3 + $0x70] sm:$0xff] }
 0x354   : > { %8598 = vst.msk [vmem:[#allocation3 + $0x78] sm:$0xff] %vm1251_vm12, %v10753_v42  ;;  %v8343_v44 = vrot.slane %v8342_v6, 4  ;;  %v8352_v13 = vor.u32 %v8351_v37, %v8347_v38  ;;  %v10581_v25 = vrot.slane %v5266_v36, 11  ;;  %v5280_v11 = vshrl.u32 %v5010_v26, 16  ;;  %v8125_v56 = vld [vmem:[#allocation2 + $0xf8] sm:$0xf] }
 0x355   : > { %v5273_v54 = vrot.slane %v5271_v3, 7  ;;  %v5283_v47 = vshll.u32 %v5010_v26, 16  ;;  %8088 = vst.msk [vmem:[#allocation3 + $0x90] sm:$0xff] %vm3902_vm4, %v14013_v10  ;;  %v8360_v58 = vshrl.u32 %v8122_v34, 16  ;;  %v8363_v43 = vshll.u32 %v8122_v34, 16 }
 0x356   : > { %5449 = vst.msk [vmem:[#allocation3 + $0xa0] sm:$0xff] %vm1251_vm12, %v10596_v61  ;;  %v8348_v30 = vsel %vm11801_vm10, %v8343_v44, %v8347_v38  ;;  %v8353_v49 = vrot.slane %v8352_v13, 4  ;;  %v8369_v1 = vshll.u32 %v8123_v53, 16  ;;  %v5282_v40 = vrot.slane %v5280_v11, 7  ;;  %v6134_v10 = vpop.permute.xlu0 %6133  ;;  %v8126_v17 = vld [vmem:[#allocation2 + $0xfc] sm:$0xf] }
 0x357   : > { %5625 = vst.msk [vmem:[#allocation3 + $0xa0] sm:$0xff] %vm1428_vm13, %v13992_v28  ;;  %v5276_v63 = vor.u32 %v5274_v35, %v5273_v54  ;;  %v5278_v24 = vrot.slane %v5273_v54, 4  ;;  %v8362_v16 = vrot.slane %v8360_v58, 4  ;;  %v8365_v41 = vrot.slane %v8363_v43, 5  ;;  %v8127_v35 = vld [vmem:[#allocation2 + $0x100] sm:$0x1] }
 0x358   : > { %v8358_v5 = vsel %vm11801_vm10, %v8353_v49, %v8357_v52  ;;  %v8371_v46 = vrot.slane %v8369_v1, 5  ;;  %v8373_v51 = vshrl.u32 %v8123_v53, 16  ;;  %6169 = vst.msk [vmem:[#allocation3 + $0xa0] sm:$0xff] %vm1976_vm14, %v14075_v50  ;;  %v5285_v27 = vor.u32 %v5283_v47, %v5282_v40  ;;  %v14145_v50 = vpop.permute.xlu1 %6823  ;;  %v5014_v54 = vld [vmem:[#allocation2 + $0x108] sm:$0x8] }
 0x359   : > { %v10754_v62 = vcombine.low %v8348_v30, %v8358_v5  ;;  %v5277_v28 = vsel %vm11813_vm11, %v10581_v25, %v5276_v63  ;;  %v8379_v15 = vshll.u32 %v8124_v14, 16  ;;  %6681 = vst.msk [vmem:[#allocation3 + $0xa0] sm:$0xff] %vm2489_vm15, %v14045_v39  ;;  %v8366_v2 = vor.u32 %v8365_v41, %v8362_v16  ;;  %v5015_v11 = vld [vmem:[#allocation2 + $0x10c] sm:$0xf]  ;;  %v5016_v30 = vld [vmem:[#allocation2 + $0x110] sm:$0xf] }
 0x35a   : > { %v8375_v55 = vrot.slane %v8373_v51, 4  ;;  %6857 = vst.msk [vmem:[#allocation3 + $0xa0] sm:$0xff] %vm2666_vm1, %v14026_v59  ;;  %v5288_v29 = vshrl.u32 %v5011_v22, 16  ;;  %v5293_v48 = vshrl.u32 %v5012_v21, 16  ;;  %v5286_v4 = vsel %vm11813_vm11, %v5278_v24, %v5285_v27  ;;  %v14152_v42 = vpop.permute.xlu0 %7877  ;;  %v8128_v24 = vld [vmem:[#allocation2 + $0x10c] sm:$0xf] }
 0x35b   : > { %v8622_v31 = vld [vmem:[#allocation3 + $0x78] sm:$0xff]  ;;  %8599 = vst.msk [vmem:[#allocation3 + $0x88] sm:$0xff] %vm1251_vm12, %v10754_v62  ;;  %v8381_v12 = vrot.slane %v8379_v15, 5  ;;  %v5296_v38 = vshll.u32 %v5012_v21, 16  ;;  %v5302_v39 = vshrl.u32 %v5013_v33, 16  ;;  %v10597_v59 = vcombine.low %v5277_v28, %v5286_v4  ;;  %v8623_v16 = vld [vmem:[#allocation3 + $0x80] sm:$0xff] }
 0x35c   : > { %7401 = vst.msk [vmem:[#allocation3 + $0xa0] sm:$0xff] %vm3211_vm2, %v14115_v7  ;;  %10779 = vmatprep.mubr.msk.bf16.mxu1 %vm1251_vm12, %v8622_v31  ;;  %v8367_v6 = vrot.slane %v8366_v2, 4  ;;  %v8376_v37 = vor.u32 %v8375_v55, %v8371_v46  ;;  %v10582_v26 = vrot.slane %v5288_v29, 11  ;;  %v5295_v36 = vrot.slane %v5293_v48, 7  ;;  %v14167_v49 = vpop.permute.xlu1 %5593 }
 0x35d   : > { %7913 = vst.msk [vmem:[#allocation3 + $0xa0] sm:$0xff] %vm3725_vm3, %v14089_v32  ;;  %8855 = vmatmul.mubr.bf16.gmra.mrb[28].mxu1 %v8621_v8  ;;  %v5304_v34 = vrot.slane %v5302_v39, 7  ;;  %v5305_v0 = vshll.u32 %v5013_v33, 16  ;;  %v8384_v52 = vshrl.u32 %v8125_v56, 16  ;;  %v8387_v53 = vshll.u32 %v8125_v56, 16 }
 0x35e   : > { %8089 = vst.msk [vmem:[#allocation3 + $0xa0] sm:$0xff] %vm3902_vm4, %v14067_v19  ;;  %v8372_v7 = vsel %vm11801_vm10, %v8367_v6, %v8371_v46  ;;  %v8377_v3 = vrot.slane %v8376_v37, 4  ;;  %v8393_v61 = vshll.u32 %v8126_v17, 16  ;;  %v5298_v32 = vor.u32 %v5296_v38, %v5295_v36  ;;  %v8129_v46 = vld [vmem:[#allocation2 + $0x110] sm:$0xf] }
 0x35f   : > { %5450 = vst.msk [vmem:[#allocation3 + $0xb0] sm:$0xff] %vm1251_vm12, %v10597_v59  ;;  %v5300_v44 = vrot.slane %v5295_v36, 4  ;;  %v5307_v13 = vor.u32 %v5305_v0, %v5304_v34  ;;  %v8386_v25 = vrot.slane %v8384_v52, 4  ;;  %v8389_v47 = vrot.slane %v8387_v53, 5  ;;  %v5017_v0 = vld [vmem:[#allocation2 + $0x11c] sm:$0x8] }
 0x360   : > { %5626 = vst.msk [vmem:[#allocation3 + $0xb0] sm:$0xff] %vm1428_vm13, %v14038_v18  ;;  %v8382_v19 = vsel %vm11801_vm10, %v8377_v3, %v8381_v12  ;;  %v8395_v14 = vrot.slane %v8393_v61, 5  ;;  %v8397_v58 = vshrl.u32 %v8126_v17, 16  ;;  %v5299_v18 = vsel %vm11813_vm11, %v10582_v26, %v5298_v32  ;;  %v8130_v17 = vld [vmem:[#allocation2 + $0x114] sm:$0x1] }
 0x361   : > { %6170 = vst.msk [vmem:[#allocation3 + $0xb0] sm:$0xff] %vm1976_vm14, %v6134_v10  ;;  %v10755_v43 = vcombine.low %v8372_v7, %v8382_v19  ;;  %v5308_v1 = vsel %vm11813_vm11, %v5300_v44, %v5307_v13  ;;  %v8403_v22 = vshll.u32 %v8127_v35, 16  ;;  %v14175_v63 = vpop.permute.xlu0 %6647  ;;  %v8390_v10 = vor.u32 %v8389_v47, %v8386_v25  ;;  %v5018_v52 = vld [vmem:[#allocation2 + $0x120] sm:$0xf]  ;;  %v5019_v61 = vld [vmem:[#allocation2 + $0x124] sm:$0xf] }
 0x362   : > { %6682 = vst.msk [vmem:[#allocation3 + $0xb0] sm:$0xff] %vm2489_vm15, %v14101_v45  ;;  %v8624_v40 = vld [vmem:[#allocation3 + $0x88] sm:$0xff]  ;;  %v10598_v21 = vcombine.low %v5299_v18, %v5308_v1  ;;  %v8399_v5 = vrot.slane %v8397_v58, 4  ;;  %v5310_v41 = vshrl.u32 %v5014_v54, 16  ;;  %v5315_v33 = vshrl.u32 %v5015_v11, 16  ;;  %v14181_v28 = vpop.f32.mrb[0].mxu1 }
 0x363   : > { %6858 = vst.msk [vmem:[#allocation3 + $0xb0] sm:$0xff] %vm2666_vm1, %v14082_v60  ;;  %10780 = vmatprep.mubr.msk.bf16.mxu1 %vm1251_vm12, %v8624_v40  ;;  %v8405_v51 = vrot.slane %v8403_v22, 5  ;;  %v5318_v45 = vshll.u32 %v5015_v11, 16  ;;  %v5324_v62 = vshrl.u32 %v5016_v30, 16  ;;  %v8391_v27 = vrot.slane %v8390_v10, 4  ;;  %v8802_v55 = vpop.f32.mrb[1].mxu1 }
 0x364   : > { %8600 = vst.msk [vmem:[#allocation3 + $0x98] sm:$0xff] %vm1251_vm12, %v10755_v43  ;;  %5451 = vst.msk [vmem:[#allocation3 + $0xc0] sm:$0xff] %vm1251_vm12, %v10598_v21  ;;  %v8400_v15 = vor.u32 %v8399_v5, %v8395_v14  ;;  %v10583_v8 = vrot.slane %v5310_v41, 11  ;;  %v5327_v2 = vshll.u32 %v5016_v30, 16  ;;  %v5317_v60 = vrot.slane %v5315_v33, 7  ;;  %v14188_v4 = vpop.f32.mrb[2].mxu1 }
 0x365   : > { %8863 = vmatmul.mubr.bf16.gmra.mrb[32].mxu1 %v8623_v16  ;;  %5627 = vst.msk [vmem:[#allocation3 + $0xc0] sm:$0xff] %vm1428_vm13, %v14097_v57  ;;  %v5326_v29 = vrot.slane %v5324_v62, 7  ;;  %v8408_v48 = vshrl.u32 %v8128_v24, 16  ;;  %v8411_v56 = vshll.u32 %v8128_v24, 16  ;;  %v14186_v31 = vpop.permute.xlu0 %8055  ;;  %v8396_v12 = vsel %vm11801_vm10, %v8391_v27, %v8395_v14  ;;  %v8805_v37 = vpop.f32.mrb[3].mxu1  ;;  %v8625_v11 = vld [vmem:[#allocation3 + $0x90] sm:$0xff] }
 0x366   : > { %v8401_v38 = vrot.slane %v8400_v15, 4  ;;  %v7366_v39 = vpop.permute.xlu1 %7365  ;;  %v8417_v59 = vshll.u32 %v8129_v46, 16  ;;  %v8421_v6 = vshrl.u32 %v8129_v46, 16  ;;  %v5320_v26 = vor.u32 %v5318_v45, %v5317_v60  ;;  %v8131_v58 = vld [vmem:[#allocation2 + $0x120] sm:$0xf] }
 0x367   : > { %v5322_v36 = vrot.slane %v5317_v60, 4  ;;  %v5329_v57 = vor.u32 %v5327_v2, %v5326_v29  ;;  %7402 = vst.msk [vmem:[#allocation3 + $0xb0] sm:$0xff] %vm3211_vm2, %v7366_v39  ;;  %v8410_v34 = vrot.slane %v8408_v48, 4  ;;  %v8413_v3 = vrot.slane %v8411_v56, 5  ;;  %v8132_v22 = vld [vmem:[#allocation2 + $0x124] sm:$0xf] }
 0x368   : > { %v8406_v7 = vsel %vm11801_vm10, %v8401_v38, %v8405_v51  ;;  %7914 = vst.msk [vmem:[#allocation3 + $0xb0] sm:$0xff] %vm3725_vm3, %v14152_v42  ;;  %v8419_v35 = vrot.slane %v8417_v59, 5  ;;  %v8423_v53 = vrot.slane %v8421_v6, 4  ;;  %v5321_v44 = vsel %vm11813_vm11, %v10583_v8, %v5320_v26  ;;  %v8133_v45 = vld [vmem:[#allocation2 + $0x128] sm:$0x1] }
 0x369   : > { %v10756_v32 = vcombine.low %v8396_v12, %v8406_v7  ;;  %v5330_v13 = vsel %vm11813_vm11, %v5322_v36, %v5329_v57  ;;  %8090 = vst.msk [vmem:[#allocation3 + $0xb0] sm:$0xff] %vm3902_vm4, %v14126_v23  ;;  %v8427_v25 = vshll.u32 %v8130_v17, 16  ;;  %v8414_v47 = vor.u32 %v8413_v3, %v8410_v34  ;;  %v14206_v40 = vpop.permute.xlu0 %6825  ;;  %v5020_v15 = vld [vmem:[#allocation2 + $0x130] sm:$0x8]  ;;  %v5021_v29 = vld [vmem:[#allocation2 + $0x134] sm:$0xf] }
 0x36a   : > { %v10599_v19 = vcombine.low %v5321_v44, %v5330_v13  ;;  %v8424_v42 = vor.u32 %v8423_v53, %v8419_v35  ;;  %v5332_v14 = vshrl.u32 %v5017_v0, 16  ;;  %v5337_v43 = vshrl.u32 %v5018_v52, 16  ;;  %v5022_v39 = vld [vmem:[#allocation2 + $0x138] sm:$0xf]  ;;  %v8134_v26 = vld [vmem:[#allocation2 + $0x134] sm:$0xf] }
 0x36b   : > { %v8626_v54 = vld [vmem:[#allocation3 + $0x98] sm:$0xff]  ;;  %8601 = vst.msk [vmem:[#allocation3 + $0xa8] sm:$0xff] %vm1251_vm12, %v10756_v32  ;;  %v8429_v30 = vrot.slane %v8427_v25, 5  ;;  %v5340_v18 = vshll.u32 %v5018_v52, 16  ;;  %v5346_v1 = vshrl.u32 %v5019_v61, 16  ;;  %v8415_v23 = vrot.slane %v8414_v47, 4 }
 0x36c   : > { %10781 = vmatprep.mubr.msk.bf16.mxu1 %vm1251_vm12, %v8626_v54  ;;  %5452 = vst.msk [vmem:[#allocation3 + $0xd0] sm:$0xff] %vm1251_vm12, %v10599_v19  ;;  %v8425_v24 = vrot.slane %v8424_v42, 4  ;;  %v10584_v16 = vrot.slane %v5332_v14, 11  ;;  %v5349_v21 = vshll.u32 %v5019_v61, 16  ;;  %v5339_v10 = vrot.slane %v5337_v43, 7  ;;  %v8627_v57 = vld [vmem:[#allocation3 + $0xa0] sm:$0xff] }
 0x36d   : > { %8871 = vmatmul.mubr.bf16.gmra.mrb[36].mxu1 %v8625_v11  ;;  %5628 = vst.msk [vmem:[#allocation3 + $0xd0] sm:$0xff] %vm1428_vm13, %v14167_v49  ;;  %v5348_v5 = vrot.slane %v5346_v1, 7  ;;  %v8432_v41 = vshrl.u32 %v8131_v58, 16  ;;  %v8435_v46 = vshll.u32 %v8131_v58, 16  ;;  %v8420_v51 = vsel %vm11801_vm10, %v8415_v23, %v8419_v35  ;;  %v5596_v0 = vpop.permute.xlu0 %5595  ;;  %v8135_v35 = vld [vmem:[#allocation2 + $0x138] sm:$0xf] }
 0x36e   : > { %v8430_v33 = vsel %vm11801_vm10, %v8425_v24, %v8429_v30  ;;  %v8441_v62 = vshll.u32 %v8132_v22, 16  ;;  %v8445_v27 = vshrl.u32 %v8132_v22, 16  ;;  %v5342_v2 = vor.u32 %v5340_v18, %v5339_v10  ;;  %v8136_v47 = vld [vmem:[#allocation2 + $0x13c] sm:$0x1]  ;;  %v8137_v1 = vld [vmem:[#allocation2 + $0x148] sm:$0xf] }
 0x36f   : > { %v10757_v8 = vcombine.low %v8420_v51, %v8430_v33  ;;  %v5344_v55 = vrot.slane %v5339_v10, 4  ;;  %v5351_v60 = vor.u32 %v5349_v21, %v5348_v5  ;;  %v8434_v48 = vrot.slane %v8432_v41, 4  ;;  %v8138_v21 = vld [vmem:[#allocation2 + $0x14c] sm:$0xf] }
 0x370   : > { %v6136_v49 = vpop.permute.xlu1 %6135  ;;  %v8437_v56 = vrot.slane %v8435_v46, 5  ;;  %v8443_v12 = vrot.slane %v8441_v62, 5  ;;  %v8447_v38 = vrot.slane %v8445_v27, 4  ;;  %v5343_v17 = vsel %vm11813_vm11, %v10584_v16, %v5342_v2  ;;  %v8139_v27 = vld [vmem:[#allocation2 + $0x150] sm:$0x1]  ;;  %v8629_v2 = vld [vmem:[#allocation3 + $0xb0] sm:$0xff] }
 0x371   : > { %8602 = vst.msk [vmem:[#allocation3 + $0xb8] sm:$0xff] %vm1251_vm12, %v10757_v8  ;;  %v5352_v59 = vsel %vm11813_vm11, %v5344_v55, %v5351_v60  ;;  %v8451_v6 = vshll.u32 %v8133_v45, 16  ;;  %v5354_v37 = vshrl.u32 %v5020_v15, 16  ;;  %v5359_v3 = vshrl.u32 %v5021_v29, 16 }
 0x372   : > { %6171 = vst.msk [vmem:[#allocation3 + $0xc0] sm:$0xff] %vm1976_vm14, %v6136_v49  ;;  %v8628_v36 = vld [vmem:[#allocation3 + $0xa8] sm:$0xff]  ;;  %v10600_v34 = vcombine.low %v5343_v17, %v5352_v59  ;;  %v8438_v52 = vor.u32 %v8437_v56, %v8434_v48  ;;  %v8448_v7 = vor.u32 %v8447_v38, %v8443_v12  ;;  %v5362_v32 = vshll.u32 %v5021_v29, 16 }
 0x373   : > { %6683 = vst.msk [vmem:[#allocation3 + $0xc0] sm:$0xff] %vm2489_vm15, %v14175_v63  ;;  %10782 = vmatprep.mubr.msk.bf16.mxu1 %vm1251_vm12, %v8628_v36  ;;  %v8453_v53 = vrot.slane %v8451_v6, 5  ;;  %v10585_v61 = vrot.slane %v5354_v37, 11  ;;  %v5368_v44 = vshrl.u32 %v5022_v39, 16  ;;  %v5361_v54 = vrot.slane %v5359_v3, 7 }
 0x374   : > { %6859 = vst.msk [vmem:[#allocation3 + $0xc0] sm:$0xff] %vm2666_vm1, %v14145_v50  ;;  %v14225_v13 = vpop.permute.xlu1 %7879  ;;  %v8439_v63 = vrot.slane %v8438_v52, 4  ;;  %v8449_v25 = vrot.slane %v8448_v7, 4  ;;  %v5371_v11 = vshll.u32 %v5022_v39, 16  ;;  %v8456_v42 = vshrl.u32 %v8134_v26, 16 }
 0x375   : > { %5453 = vst.msk [vmem:[#allocation3 + $0xe0] sm:$0xff] %vm1251_vm12, %v10600_v34  ;;  %8879 = vmatmul.mubr.bf16.gmra.mrb[40].mxu1 %v8627_v57  ;;  %v5370_v19 = vrot.slane %v5368_v44, 7  ;;  %v8459_v14 = vshll.u32 %v8134_v26, 16  ;;  %v8465_v50 = vshll.u32 %v8135_v35, 16  ;;  %v5364_v43 = vor.u32 %v5362_v32, %v5361_v54 }
 0x376   : > { %5629 = vst.msk [vmem:[#allocation3 + $0xe0] sm:$0xff] %vm1428_vm13, %v5596_v0  ;;  %v8444_v58 = vsel %vm11801_vm10, %v8439_v63, %v8443_v12  ;;  %v8454_v30 = vsel %vm11801_vm10, %v8449_v25, %v8453_v53  ;;  %v5366_v18 = vrot.slane %v5361_v54, 4  ;;  %v8458_v24 = vrot.slane %v8456_v42, 4 }
 0x377   : > { %v10758_v22 = vcombine.low %v8444_v58, %v8454_v30  ;;  %v5373_v23 = vor.u32 %v5371_v11, %v5370_v19  ;;  %v8461_v16 = vrot.slane %v8459_v14, 5  ;;  %v5365_v41 = vsel %vm11813_vm11, %v10585_v61, %v5364_v43  ;;  %v8998_v14 = vld [vmem:[%s14981_s5] sm:$0xff] }
 0x378   : > { %v8630_v10 = vld [vmem:[#allocation3 + $0xb8] sm:$0xff]  ;;  %v6650_v5 = vpop.permute.xlu1 %6649  ;;  %v8467_v46 = vrot.slane %v8465_v50, 5  ;;  %v8469_v51 = vshrl.u32 %v8135_v35, 16  ;;  %v8475_v33 = vshll.u32 %v8136_v47, 16  ;;  %v8480_v15 = vshrl.u32 %v8137_v1, 16  ;;  %v8999_v50 = vld [vmem:[%s14981_s5 + $0x8] sm:$0xff] }
 0x379   : > { %10783 = vmatprep.mubr.msk.bf16.mxu1 %vm1251_vm12, %v8630_v10  ;;  %8603 = vst.msk [vmem:[#allocation3 + $0xc8] sm:$0xff] %vm1251_vm12, %v10758_v22  ;;  %v5374_v45 = vsel %vm11813_vm11, %v5366_v18, %v5373_v23  ;;  %v8462_v62 = vor.u32 %v8461_v16, %v8458_v24  ;;  %v8483_v8 = vshll.u32 %v8137_v1, 16  ;;  %v8489_v29 = vshll.u32 %v8138_v21, 16 }
 0x37a   : > { %v10601_v55 = vcombine.low %v5365_v41, %v5374_v45  ;;  %v8471_v60 = vrot.slane %v8469_v51, 4  ;;  %v8482_v48 = vrot.slane %v8480_v15, 4  ;;  %v8493_v12 = vshrl.u32 %v8138_v21, 16  ;;  %v8638_v21 = vld [vmem:[#allocation3 + $0xf8] sm:$0xff] }
 0x37b   : > { %v8463_v49 = vrot.slane %v8462_v62, 4  ;;  %v8485_v56 = vrot.slane %v8483_v8, 5  ;;  %v8477_v17 = vrot.slane %v8475_v33, 5  ;;  %v8491_v59 = vrot.slane %v8489_v29, 5 }
 0x37c   : > { %v8058_v38 = vpop.permute.xlu1 %8057  ;;  %5454 = vst.msk [vmem:[#allocation3 + $0xf0] sm:$0xff] %vm1251_vm12, %v10601_v55  ;;  %v8472_v39 = vor.u32 %v8471_v60, %v8467_v46  ;;  %v8499_v20 = vshll.u32 %v8139_v27, 16  ;;  %v8495_v37 = vrot.slane %v8493_v12, 4  ;;  %v11562_v43 = vmov 0.0|0.0  }
 0x37d   : > { %8887 = vmatmul.mubr.bf16.gmra.mrb[44].mxu1 %v8629_v2  ;;  %v8486_v6 = vor.u32 %v8485_v56, %v8482_v48  ;;  %v8468_v26 = vsel %vm11801_vm10, %v8463_v49, %v8467_v46  ;;  %11145 = vmatprep.subr.bf16.mxu0 %v11562_v43  ;;  %v11146_v18 = vpack.c.bf16 %v8999_v50, %v8998_v14  ;;  %vm11563_vm0 = vmmov 0  }
 0x37e   : > { %v8473_v36 = vrot.slane %v8472_v39, 4  ;;  %v8496_v34 = vor.u32 %v8495_v37, %v8491_v59  ;;  %v8501_v0 = vrot.slane %v8499_v20, 5 }
 0x37f   : > { %v8487_v57 = vrot.slane %v8486_v6, 4  ;;  %11147 = vmatpush3.bf16.msra.mxu0 %v11146_v18 }
 0x380   : > { %v8632_v52 = vld [vmem:[#allocation3 + $0xc8] sm:$0xff]  ;;  %v6828_v7 = vpop.permute.xlu1 %6827  ;;  %v8478_v3 = vsel %vm11801_vm10, %v8473_v36, %v8477_v17  ;;  %v8497_v61 = vrot.slane %v8496_v34, 4  ;;  %v11564_v34 = vmov 0.0  }
 0x381   : > { %10784 = vmatprep.mubr.msk.bf16.mxu1 %vm1251_vm12, %v8632_v52  ;;  %v10759_v35 = vcombine.low %v8468_v26, %v8478_v3  ;;  %v8492_v53 = vsel %vm11801_vm10, %v8487_v57, %v8491_v59  ;;  %11035 = vmatprep.mubr.msk.f32.mxu0 %vm11563_vm0, %v11564_v34  ;;  %v9075_v52 = vld [vmem:[%s14983_s7] sm:$0x3] }
 0x382   : > { %v7368_v32 = vpop.permute.xlu0 %7367  ;;  %v8502_v44 = vsel %vm11801_vm10, %v8497_v61, %v8501_v0  ;;  %11038 = vmatprep.subr.mxu1 %v11564_v34 }
 0x383   : > { %8604 = vst.msk [vmem:[#allocation3 + $0xd8] sm:$0xff] %vm1251_vm12, %v10759_v35  ;;  %v10760_v25 = vcombine.low %v8492_v53, %v8502_v44  ;;  %11039 = vmatpush3.msk.msra.mxu1 %vm9081_vm5, %v9075_v52 }
 0x384   : > { %7403 = vst.msk [vmem:[#allocation3 + $0xc0] sm:$0xff] %vm3211_vm2, %v7368_v32  ;;  %v5598_v63 = vpop.permute.xlu1 %5597 }
 0x385   : > { %7915 = vst.msk [vmem:[#allocation3 + $0xc0] sm:$0xff] %vm3725_vm3, %v14225_v13 }
 0x386   : > { %5630 = vst.msk [vmem:[#allocation3 + $0xf0] sm:$0xff] %vm1428_vm13, %v5598_v63  ;;  %v14318_v63 = vld [vmem:[%s14980_s4] ss:$0 sm:$0xff] }
 0x387   : > { %8091 = vst.msk [vmem:[#allocation3 + $0xc0] sm:$0xff] %vm3902_vm4, %v14186_v31 }
 0x388   : > { %8605 = vst.msk [vmem:[#allocation3 + $0xe8] sm:$0xff] %vm1251_vm12, %v10760_v25  ;;  %v6138_v54 = vpop.permute.xlu0 %6137 }
 0x389   : > { %6172 = vst.msk [vmem:[#allocation3 + $0xd0] sm:$0xff] %vm1976_vm14, %v6138_v54  ;;  %v14322_v54 = vadd.f32 %v14318_v63, %v14188_v4 }
 0x38a   : > { %6684 = vst.msk [vmem:[#allocation3 + $0xd0] sm:$0xff] %vm2489_vm15, %v6650_v5  ;;  %v8634_v11 = vld [vmem:[#allocation3 + $0xd8] sm:$0xff] }
 0x38b   : > { %6860 = vst.msk [vmem:[#allocation3 + $0xd0] sm:$0xff] %vm2666_vm1, %v14206_v40 }
 0x38c   : > { %v7882_v13 = vpop.permute.xlu0 %7881 }
 0x38e   : > { %v8631_v9 = vld [vmem:[#allocation3 + $0xc0] sm:$0xff] }
 0x38f   : > { %8895 = vmatmul.mubr.bf16.gmra.mrb[48].mxu1 %v8631_v9  ;;  %v8636_v58 = vld [vmem:[#allocation3 + $0xe8] sm:$0xff] }
 0x390   : > { %10785 = vmatprep.mubr.msk.bf16.mxu1 %vm1251_vm12, %v8634_v11 }
 0x391   : > { %v6652_v19 = vpop.permute.xlu0 %6651 }
 0x395   : > { %v8060_v31 = vpop.permute.xlu0 %8059 }
 0x397   : > { %v7370_v47 = vpop.permute.xlu1 %7369 }
 0x398   : > { %7404 = vst.msk [vmem:[#allocation3 + $0xd0] sm:$0xff] %vm3211_vm2, %v7370_v47  ;;  %v8928_v47 = vsel %vm1251_vm12, %v14322_v54, 0.0 }
 0x399   : > { %7916 = vst.msk [vmem:[#allocation3 + $0xd0] sm:$0xff] %vm3725_vm3, %v7882_v13  ;;  %v14328_v13 = vadd.f32 %v14318_v63, %v14181_v28 }
 0x39a   : > { %8092 = vst.msk [vmem:[#allocation3 + $0xd0] sm:$0xff] %vm3902_vm4, %v8058_v38 }
 0x39e   : > { %v6140_v42 = vpop.permute.xlu1 %6139 }
 0x39f   : > { %6173 = vst.msk [vmem:[#allocation3 + $0xe0] sm:$0xff] %vm1976_vm14, %v6140_v42 }
 0x3a0   : > { %6685 = vst.msk [vmem:[#allocation3 + $0xe0] sm:$0xff] %vm2489_vm15, %v6652_v19  ;;  %v14274_v30 = vpop.f32.mrb[4].mxu1 }
 0x3a1   : > { %6861 = vst.msk [vmem:[#allocation3 + $0xe0] sm:$0xff] %vm2666_vm1, %v6828_v7  ;;  %v8633_v40 = vld [vmem:[#allocation3 + $0xd0] sm:$0xff]  ;;  %v8810_v22 = vpop.f32.mrb[5].mxu1  ;;  %v14332_v19 = vadd.f32 %v14318_v63, %v14274_v30 }
 0x3a2   : > { %8903 = vmatmul.mubr.bf16.gmra.mrb[52].mxu1 %v8633_v40  ;;  %v7372_v1 = vpop.permute.xlu0 %7371  ;;  %v14278_v24 = vpop.f32.mrb[6].mxu1 }
 0x3a3   : > { %10786 = vmatprep.mubr.msk.bf16.mxu1 %vm1251_vm12, %v8636_v58  ;;  %7405 = vst.msk [vmem:[#allocation3 + $0xe0] sm:$0xff] %vm3211_vm2, %v7372_v1  ;;  %v8813_v16 = vpop.f32.mrb[7].mxu1  ;;  %v8930_v4 = vsel %vm1251_vm12, %v14332_v19, 0.0  ;;  %v14342_v42 = vadd.f32 %v14318_v63, %v14278_v24 }
 0x3a4   : > { %v7884_v23 = vpop.permute.xlu1 %7883 }
 0x3a5   : > { %7917 = vst.msk [vmem:[#allocation3 + $0xe0] sm:$0xff] %vm3725_vm3, %v7884_v23  ;;  %v8932_v18 = vsel %vm1251_vm12, %v14342_v42, 0.0 }
 0x3a6   : > { %8093 = vst.msk [vmem:[#allocation3 + $0xe0] sm:$0xff] %vm3902_vm4, %v8060_v31  ;;  %v6830_v5 = vpop.permute.xlu0 %6829  ;;  %v8927_v31 = vsel %vm1251_vm12, %v14328_v13, 0.0 }
 0x3a7   : > { %v8929_v28 = vadd.f32 %v8928_v47, %v8927_v31 }
 0x3a9   : > { %v6654_v41 = vpop.permute.xlu1 %6653  ;;  %v8931_v30 = vadd.f32 %v8930_v4, %v8929_v28 }
 0x3ab   : > { %v8933_v23 = vadd.f32 %v8932_v18, %v8931_v30 }
 0x3ad   : > { %v8635_v10 = vld [vmem:[#allocation3 + $0xe0] sm:$0xff] }
 0x3ae   : > { %8911 = vmatmul.mubr.bf16.gmra.mrb[56].mxu1 %v8635_v10 }
 0x3af   : > { %10787 = vmatprep.mubr.msk.bf16.mxu1 %vm1251_vm12, %v8638_v21 }
 0x3b5   : > { %v6142_v46 = vpop.permute.xlu0 %6141 }
 0x3b6   : > { %v8816_v51 = vpop.f32.mrb[8].mxu1  ;;  %6174 = vst.msk [vmem:[#allocation3 + $0xf0] sm:$0xff] %vm1976_vm14, %v6142_v46 }
 0x3b7   : > { %v8818_v33 = vpop.f32.mrb[9].mxu1  ;;  %6686 = vst.msk [vmem:[#allocation3 + $0xf0] sm:$0xff] %vm2489_vm15, %v6654_v41  ;;  %v14347_v50 = vadd.f32 %v14318_v63, %v8816_v51 }
 0x3b8   : > { %v14285_v45 = vpop.f32.mrb[10].mxu1  ;;  %6862 = vst.msk [vmem:[#allocation3 + $0xf0] sm:$0xff] %vm2666_vm1, %v6830_v5 }
 0x3b9   : > { %v8821_v62 = vpop.f32.mrb[11].mxu1  ;;  %v8934_v1 = vsel %vm1251_vm12, %v14347_v50, 0.0  ;;  %v14357_v22 = vadd.f32 %v14318_v63, %v14285_v45 }
 0x3ba   : > { %v8935_v21 = vadd.f32 %v8934_v1, %v8933_v23 }
 0x3bb   : > { %v7374_v27 = vpop.permute.xlu1 %7373  ;;  %v8936_v5 = vsel %vm1251_vm12, %v14357_v22, 0.0 }
 0x3bc   : > { %7406 = vst.msk [vmem:[#allocation3 + $0xf0] sm:$0xff] %vm3211_vm2, %v7374_v27  ;;  %v7886_v15 = vpop.permute.xlu0 %7885  ;;  %v8937_v45 = vadd.f32 %v8936_v5, %v8935_v21 }
 0x3bd   : > { %7918 = vst.msk [vmem:[#allocation3 + $0xf0] sm:$0xff] %vm3725_vm3, %v7886_v15 }
 0x3bf   : > { %v8062_v8 = vpop.permute.xlu1 %8061 }
 0x3c0   : > { %8094 = vst.msk [vmem:[#allocation3 + $0xf0] sm:$0xff] %vm3902_vm4, %v8062_v8 }
 0x3c7   : > { %v8637_v2 = vld [vmem:[#allocation3 + $0xf0] sm:$0xff] }
 0x3c8   : > { %8919 = vmatmul.mubr.bf16.gmra.mrb[60].mxu1 %v8637_v2 }
 0x3c9   : > { %11040 = vmatprep.mubr.msk.f32.mxu1 %vm11563_vm0, %v11564_v34 }
 0x3d3   : > { %v8824_v55 = vpop.f32.mrb[12].mxu1 }
 0x3d4   : > { %v8826_v60 = vpop.f32.mrb[13].mxu1  ;;  %v14360_v24 = vadd.f32 %v14318_v63, %v8824_v55 }
 0x3d5   : > { %v8827_v29 = vpop.f32.mrb[14].mxu1 }
 0x3d6   : > { %v8829_v49 = vpop.f32.mrb[15].mxu1  ;;  %v8938_v51 = vsel %vm1251_vm12, %v14360_v24, 0.0  ;;  %v14367_v33 = vadd.f32 %v14318_v63, %v8827_v29 }
 0x3d7   : > { %v8939_v27 = vadd.f32 %v8938_v51, %v8937_v45 }
 0x3d8   : > { %v8940_v15 = vsel %vm1251_vm12, %v14367_v33, 0.0 }
 0x3d9   : > { %v8941_v55 = vadd.f32 %v8940_v15, %v8939_v27 }
 0x3e8   : > { %v8832_v48 = vpop.f32.mrb[16].mxu1 }
 0x3e9   : > { %v8834_v56 = vpop.f32.mrb[17].mxu1  ;;  %v14370_v62 = vadd.f32 %v14318_v63, %v8832_v48 }
 0x3ea   : > { %v14291_v12 = vpop.f32.mrb[18].mxu1 }
 0x3eb   : > { %v8837_v38 = vpop.f32.mrb[19].mxu1  ;;  %v8942_v8 = vsel %vm1251_vm12, %v14370_v62, 0.0  ;;  %v14378_v2 = vadd.f32 %v14318_v63, %v14291_v12 }
 0x3ec   : > { %v8943_v29 = vadd.f32 %v8942_v8, %v8941_v55 }
 0x3ed   : > { %v8944_v49 = vsel %vm1251_vm12, %v14378_v2, 0.0 }
 0x3ee   : > { %v8945_v38 = vadd.f32 %v8944_v49, %v8943_v29 }
 0x405   : > { %v14293_v39 = vpop.f32.mrb[20].mxu1 }
 0x406   : > { %v8842_v17 = vpop.f32.mrb[21].mxu1  ;;  %v14382_v60 = vadd.f32 %v14318_v63, %v14293_v39 }
 0x407   : > { %v14295_v59 = vpop.f32.mrb[22].mxu1 }
 0x408   : > { %v8845_v20 = vpop.f32.mrb[23].mxu1  ;;  %v8946_v48 = vsel %vm1251_vm12, %v14382_v60, 0.0  ;;  %v14390_v56 = vadd.f32 %v14318_v63, %v14295_v59 }
 0x409   : > { %v8947_v39 = vadd.f32 %v8946_v48, %v8945_v38 }
 0x41b   : > { %v14297_v6 = vpop.f32.mrb[24].mxu1 }
 0x41c   : > { %v8850_v37 = vpop.f32.mrb[25].mxu1  ;;  %v14394_v12 = vadd.f32 %v14318_v63, %v14297_v6 }
 0x41d   : > { %v14299_v26 = vpop.f32.mrb[26].mxu1 }
 0x41e   : > { %v8853_v36 = vpop.f32.mrb[27].mxu1  ;;  %v14402_v59 = vadd.f32 %v14318_v63, %v14299_v26 }
 0x41f   : > { %v8948_v36 = vsel %vm1251_vm12, %v14390_v56, 0.0 }
 0x420   : > { %v8949_v52 = vadd.f32 %v8948_v36, %v8947_v39 }
 0x430   : > { %v14301_v57 = vpop.f32.mrb[28].mxu1 }
 0x431   : > { %v8858_v0 = vpop.f32.mrb[29].mxu1 }
 0x432   : > { %v14306_v7 = vpop.f32.mrb[30].mxu1  ;;  %v8950_v0 = vsel %vm1251_vm12, %v14394_v12, 0.0 }
 0x433   : > { %v8861_v3 = vpop.f32.mrb[31].mxu1  ;;  %v8951_v6 = vadd.f32 %v8950_v0, %v8949_v52 }
 0x434   : > { %v14406_v3 = vadd.f32 %v14318_v63, %v14301_v57 }
 0x438   : > { %v14309_v35 = vpop.f32.mrb[32].mxu1 }
 0x439   : > { %v8866_v53 = vpop.f32.mrb[33].mxu1  ;;  %v14418_v26 = vadd.f32 %v14318_v63, %v14309_v35 }
 0x43a   : > { %v14311_v61 = vpop.f32.mrb[34].mxu1  ;;  %v8952_v53 = vsel %vm1251_vm12, %v14402_v59, 0.0 }
 0x43b   : > { %v8869_v32 = vpop.f32.mrb[35].mxu1  ;;  %v8958_v31 = vsel %vm1251_vm12, %v14418_v26, 0.0  ;;  %v14426_v4 = vadd.f32 %v14318_v63, %v14311_v61 }
 0x43c   : > { %v8954_v32 = vsel %vm1251_vm12, %v14406_v3, 0.0 }
 0x43d   : > { %v8960_v35 = vsel %vm1251_vm12, %v14426_v4, 0.0 }
 0x440   : > { %v14313_v44 = vpop.f32.mrb[36].mxu1 }
 0x441   : > { %v8874_v25 = vpop.f32.mrb[37].mxu1 }
 0x442   : > { %v14324_v9 = vpop.f32.mrb[38].mxu1  ;;  %v14414_v25 = vadd.f32 %v14318_v63, %v14306_v7  ;;  %v14430_v7 = vadd.f32 %v14318_v63, %v14313_v44 }
 0x443   : > { %v8877_v11 = vpop.f32.mrb[39].mxu1  ;;  %v14438_v23 = vadd.f32 %v14318_v63, %v14324_v9 }
 0x444   : > { %v8953_v11 = vadd.f32 %v8952_v53, %v8951_v6  ;;  %v8956_v57 = vsel %vm1251_vm12, %v14414_v25, 0.0  ;;  %v8962_v1 = vsel %vm1251_vm12, %v14430_v7, 0.0 }
 0x445   : > { %v8964_v5 = vsel %vm1251_vm12, %v14438_v23, 0.0 }
 0x446   : > { %v8955_v47 = vadd.f32 %v8954_v32, %v8953_v11 }
 0x448   : > { %v14344_v40 = vpop.f32.mrb[40].mxu1  ;;  %v8957_v28 = vadd.f32 %v8956_v57, %v8955_v47 }
 0x449   : > { %v8882_v14 = vpop.f32.mrb[41].mxu1  ;;  %v14442_v44 = vadd.f32 %v14318_v63, %v14344_v40 }
 0x44a   : > { %v14349_v58 = vpop.f32.mrb[42].mxu1  ;;  %v8959_v14 = vadd.f32 %v8958_v31, %v8957_v28 }
 0x44b   : > { %v8885_v43 = vpop.f32.mrb[43].mxu1  ;;  %v14450_v51 = vadd.f32 %v14318_v63, %v14349_v58 }
 0x44c   : > { %v8961_v21 = vadd.f32 %v8960_v35, %v8959_v14 }
 0x44d   : > { %v8968_v40 = vsel %vm1251_vm12, %v14450_v51, 0.0 }
 0x450   : > { %v8888_v16 = vpop.f32.mrb[44].mxu1 }
 0x451   : > { %v8890_v10 = vpop.f32.mrb[45].mxu1  ;;  %v14453_v9 = vadd.f32 %v14318_v63, %v8888_v16 }
 0x452   : > { %v8891_v41 = vpop.f32.mrb[46].mxu1  ;;  %v8963_v10 = vadd.f32 %v8962_v1, %v8961_v21 }
 0x453   : > { %v8893_v46 = vpop.f32.mrb[47].mxu1  ;;  %v8970_v29 = vsel %vm1251_vm12, %v14453_v9, 0.0  ;;  %v14460_v49 = vadd.f32 %v14318_v63, %v8891_v41 }
 0x454   : > { %v8966_v46 = vsel %vm1251_vm12, %v14442_v44, 0.0  ;;  %v8965_v45 = vadd.f32 %v8964_v5, %v8963_v10 }
 0x456   : > { %v8967_v27 = vadd.f32 %v8966_v46, %v8965_v45 }
 0x458   : > { %v8969_v58 = vadd.f32 %v8968_v40, %v8967_v27 }
 0x45a   : > { %v8971_v16 = vadd.f32 %v8970_v29, %v8969_v58 }
 0x462   : > { %v8896_v17 = vpop.f32.mrb[48].mxu1 }
 0x463   : > { %v8898_v20 = vpop.f32.mrb[49].mxu1  ;;  %v14463_v38 = vadd.f32 %v14318_v63, %v8896_v17 }
 0x464   : > { %v8899_v37 = vpop.f32.mrb[50].mxu1  ;;  %v8972_v20 = vsel %vm1251_vm12, %v14460_v49, 0.0 }
 0x465   : > { %v8901_v34 = vpop.f32.mrb[51].mxu1  ;;  %v8974_v39 = vsel %vm1251_vm12, %v14463_v38, 0.0  ;;  %v14470_v36 = vadd.f32 %v14318_v63, %v8899_v37 }
 0x466   : > { %v8973_v34 = vadd.f32 %v8972_v20, %v8971_v16 }
 0x467   : > { %v8976_v52 = vsel %vm1251_vm12, %v14470_v36, 0.0 }
 0x468   : > { %v8975_v41 = vadd.f32 %v8974_v39, %v8973_v34  ;;  %v9197_v34 = vld [vmem:[%s14985_s9] sm:$0xff] }
 0x46a   : > { %v8977_v53 = vadd.f32 %v8976_v52, %v8975_v41  ;;  %v9198_v41 = vld [vmem:[%s14985_s9 + $0x8] sm:$0xff] }
 0x46b   : > { %v11148_v52 = vpack.c.bf16 %v9198_v41, %v9197_v34 }
 0x46d   : > { %11149 = vmatprep.subr.bf16.mxu0 %v11148_v52 }
 0x475   : > { %v8904_v30 = vpop.f32.mrb[52].mxu1 }
 0x476   : > { %v8906_v43 = vpop.f32.mrb[53].mxu1  ;;  %v14473_v0 = vadd.f32 %v14318_v63, %v8904_v30 }
 0x477   : > { %v8907_v18 = vpop.f32.mrb[54].mxu1 }
 0x478   : > { %v8909_v61 = vpop.f32.mrb[55].mxu1  ;;  %v8978_v17 = vsel %vm1251_vm12, %v14473_v0, 0.0  ;;  %v14480_v6 = vadd.f32 %v14318_v63, %v8907_v18 }
 0x479   : > { %v8979_v37 = vadd.f32 %v8978_v17, %v8977_v53  ;;  %v9076_v17 = vld [vmem:[%s14984_s8] sm:$0x1] }
 0x47a   : > { %v8980_v11 = vsel %vm1251_vm12, %v14480_v6, 0.0 }
 0x47b   : > { %v8981_v31 = vadd.f32 %v8980_v11, %v8979_v37 }
 0x481   : > { %v8912_v15 = vpop.f32.mrb[56].mxu1 }
 0x482   : > { %v8914_v8 = vpop.f32.mrb[57].mxu1  ;;  %v14483_v32 = vadd.f32 %v14318_v63, %v8912_v15 }
 0x483   : > { %v8915_v55 = vpop.f32.mrb[58].mxu1 }
 0x484   : > { %v8917_v48 = vpop.f32.mrb[59].mxu1  ;;  %v8982_v47 = vsel %vm1251_vm12, %v14483_v32, 0.0  ;;  %v14490_v57 = vadd.f32 %v14318_v63, %v8915_v55 }
 0x485   : > { %v8983_v28 = vadd.f32 %v8982_v47, %v8981_v31 }
 0x486   : > { %v8984_v14 = vsel %vm1251_vm12, %v14490_v57, 0.0 }
 0x487   : > { %v8985_v18 = vadd.f32 %v8984_v14, %v8983_v28  ;;  %v9161_v14 = vlaneseq }
 0x49b   : > { %v8920_v30 = vpop.f32.mrb[60].mxu1 }
 0x49c   : > { %v14495_v35 = vadd.f32 %v14318_v63, %v8920_v30  ;;  %v8922_v43 = vpop.f32.mrb[61].mxu1  ;;  %v9162_v30 = vshrl.u32 %v9161_v14, 7 }
 0x49d   : > { %v8923_v1 = vpop.f32.mrb[62].mxu1 }
 0x49e   : > { %v8986_v61 = vsel %vm1251_vm12, %v14495_v35, 0.0  ;;  %v14500_v21 = vadd.f32 %v14318_v63, %v8923_v1  ;;  %v8925_v10 = vpop.f32.mrb[63].mxu1  ;;  %v9000_v63 = vld [vmem:[%s14982_s6] sm:$0x1]  ;;  %v9163_v43 = vsub.s32 0, %v9162_v30 }
 0x49f   : > { %v8987_v5 = vadd.f32 %v8986_v61, %v8985_v18 }
 0x4a0   : > { %v8988_v46 = vsel %vm1251_vm12, %v14500_v21, 0.0 }
 0x4a1   : > { %v8989_v45 = vadd.f32 %v8988_v46, %v8987_v5 }
 0x4a3   : > { %v8990_v27 = vrot.slane %v8989_v45, 4 }
 0x4a5   : > { %v8991_v15 = vadd.f32 %v8990_v27, %v8989_v45 }
 0x4a7   : > { %v8992_v40 = vrot.slane %v8991_v15, 2 }
 0x4a9   : > { %v8993_v8 = vadd.f32 %v8992_v40, %v8991_v15 }
 0x4ab   : > { %v8994_v55 = vrot.slane %v8993_v8, 1 }
 0x4ad   : > { %v8995_v29 = vadd.f32 %v8994_v55, %v8993_v8 }
 0x4af   : > { %v8997_v48 = vmul.f32 0.00390625, %v8995_v29 }
 0x4b1   : > { %11036 = vmatmul.mubr.msk.f32.vlgmr.msra.gmra.mrb[64].mxu0 %vm1251_vm12, %v8997_v48 }
 0x4b2   : > { %11151 = vmatpush3.bf16.msra.mxu0 %v11148_v52 }
 0x584   : > { %v9070_v58 = vpop.f32.mrb[64].mxu0 }
 0x585   : > { %v9071_v16 = vadd.f32 %v9070_v58, %v9000_v63  ;;  %v11037_v20 = vpop.f32.mrb[65].mxu0 }
 0x587   : > { %v9074_v39 = vmax.f32 %v9071_v16, 0.0 }
 0x589   : > { %11041 = vmatmul.mubr.msk.f32.vlgmr.msra.gmra.mrb[64].mxu1 %vm9077_vm6, %v9074_v39 }
 0x65c   : > { %v9151_v53 = vpop.f32.mrb[64].mxu1 }
 0x65d   : > { %v9152_v37 = vadd.f32 %v9151_v53, %v9076_v17  ;;  %v11042_v11 = vpop.f32.mrb[65].mxu1 }
 0x65f   : > { %v10791_v47 = vmul.f32 -1.442695, %v9152_v37 }
 0x661   : > { %11318 = vpow2.f32 %v10791_v47 }
 0x66b   : > { %v11319_v31 = vpop.eup %11318 }
 0x66c   : > { %v9158_v28 = vadd.f32 1.0, %v11319_v31 }
 0x66e   : > { %11320 = vrcp.f32 %v9158_v28 }
 0x678   : > { %v11321_v18 = vpop.eup %11320 }
 0x679   : > { %v14518_v1 = vrot.slane %v11321_v18, %v9163_v43 }
 0x67b   : > { %v14522_v61 = vmul.f32 %v14518_v1, %v14328_v13  ;;  %v14526_v10 = vmul.f32 %v14518_v1, %v14322_v54  ;;  %v14530_v5 = vmul.f32 %v14518_v1, %v14332_v19  ;;  %v14540_v13 = vmul.f32 %v14518_v1, %v14342_v42 }
 0x67c   : > { %v14544_v54 = vmul.f32 %v14518_v1, %v14347_v50  ;;  %v14552_v19 = vmul.f32 %v14518_v1, %v14357_v22  ;;  %v14556_v46 = vmul.f32 %v14518_v1, %v14360_v24  ;;  %v14564_v42 = vmul.f32 %v14518_v1, %v14367_v33 }
 0x67d   : > { %11047 = vmatprep.mubr.msk.f32.mxu0 %vm1251_vm12, %v14522_v61  ;;  %v14568_v50 = vmul.f32 %v14518_v1, %v14370_v62  ;;  %v14576_v22 = vmul.f32 %v14518_v1, %v14378_v2  ;;  %v14580_v24 = vmul.f32 %v14518_v1, %v14382_v60  ;;  %v14588_v33 = vmul.f32 %v14518_v1, %v14390_v56 }
 0x67e   : > { %11048 = vmatmul.mubr.msk.f32.vlgmr.msra.gmra.mrb[66].mxu0 %vm1251_vm12, %v14526_v10  ;;  %v14592_v62 = vmul.f32 %v14518_v1, %v14394_v12  ;;  %v14600_v2 = vmul.f32 %v14518_v1, %v14402_v59  ;;  %v14604_v60 = vmul.f32 %v14518_v1, %v14406_v3  ;;  %v14612_v56 = vmul.f32 %v14518_v1, %v14414_v25 }
 0x67f   : > { %11050 = vmatprep.mubr.msk.f32.mxu0 %vm1251_vm12, %v14530_v5  ;;  %v14616_v12 = vmul.f32 %v14518_v1, %v14418_v26  ;;  %v14624_v59 = vmul.f32 %v14518_v1, %v14426_v4  ;;  %v14628_v3 = vmul.f32 %v14518_v1, %v14430_v7  ;;  %v14636_v25 = vmul.f32 %v14518_v1, %v14438_v23 }
 0x680   : > { %v14640_v26 = vmul.f32 %v14518_v1, %v14442_v44  ;;  %v14648_v4 = vmul.f32 %v14518_v1, %v14450_v51  ;;  %v14652_v7 = vmul.f32 %v14518_v1, %v14453_v9  ;;  %v14660_v23 = vmul.f32 %v14518_v1, %v14460_v49 }
 0x681   : > { %v14664_v44 = vmul.f32 %v14518_v1, %v14463_v38  ;;  %v14672_v51 = vmul.f32 %v14518_v1, %v14470_v36  ;;  %v14676_v9 = vmul.f32 %v14518_v1, %v14473_v0  ;;  %v14684_v49 = vmul.f32 %v14518_v1, %v14480_v6 }
 0x682   : > { %11051 = vmatmul.mubr.msk.f32.gmra.mrb[68].mxu0 %vm1251_vm12, %v14540_v13  ;;  %v14688_v38 = vmul.f32 %v14518_v1, %v14483_v32  ;;  %v14696_v36 = vmul.f32 %v14518_v1, %v14490_v57  ;;  %v14700_v0 = vmul.f32 %v14518_v1, %v14495_v35  ;;  %v14708_v6 = vmul.f32 %v14518_v1, %v14500_v21  ;;  %v9559_v32 = vld [vmem:[%s14987_s11] sm:$0x3] }
 0x683   : > { %11053 = vmatprep.mubr.msk.f32.mxu0 %vm1251_vm12, %v14544_v54  ;;  %11095 = vmatprep.subr.msk.mxu1 %vm9081_vm5, %v9559_v32  ;;  %v14720_v57 = vld [vmem:[%s14986_s10] ss:$0 sm:$0xff] }
 0x684   : > { %11096 = vmatpush3.msk.msra.mxu1 %vm9081_vm5, %v9559_v32 }
 0x686   : > { %11054 = vmatmul.mubr.msk.f32.gmra.mrb[70].mxu0 %vm1251_vm12, %v14552_v19 }
 0x687   : > { %11056 = vmatprep.mubr.msk.f32.mxu0 %vm1251_vm12, %v14556_v46 }
 0x68a   : > { %11057 = vmatmul.mubr.msk.f32.gmra.mrb[72].mxu0 %vm1251_vm12, %v14564_v42 }
 0x68b   : > { %11059 = vmatprep.mubr.msk.f32.mxu0 %vm1251_vm12, %v14568_v50 }
 0x68e   : > { %11060 = vmatmul.mubr.msk.f32.gmra.mrb[74].mxu0 %vm1251_vm12, %v14576_v22 }
 0x68f   : > { %11062 = vmatprep.mubr.msk.f32.mxu0 %vm1251_vm12, %v14580_v24 }
 0x692   : > { %11063 = vmatmul.mubr.msk.f32.gmra.mrb[76].mxu0 %vm1251_vm12, %v14588_v33 }
 0x693   : > { %11065 = vmatprep.mubr.msk.f32.mxu0 %vm1251_vm12, %v14592_v62 }
 0x696   : > { %11066 = vmatmul.mubr.msk.f32.gmra.mrb[78].mxu0 %vm1251_vm12, %v14600_v2 }
 0x697   : > { %11068 = vmatprep.mubr.msk.f32.mxu0 %vm1251_vm12, %v14604_v60 }
 0x69a   : > { %11069 = vmatmul.mubr.msk.f32.gmra.mrb[80].mxu0 %vm1251_vm12, %v14612_v56 }
 0x69b   : > { %11071 = vmatprep.mubr.msk.f32.mxu0 %vm1251_vm12, %v14616_v12 }
 0x69e   : > { %11072 = vmatmul.mubr.msk.f32.gmra.mrb[82].mxu0 %vm1251_vm12, %v14624_v59 }
 0x69f   : > { %11074 = vmatprep.mubr.msk.f32.mxu0 %vm1251_vm12, %v14628_v3 }
 0x6a2   : > { %11075 = vmatmul.mubr.msk.f32.gmra.mrb[84].mxu0 %vm1251_vm12, %v14636_v25 }
 0x6a3   : > { %11077 = vmatprep.mubr.msk.f32.mxu0 %vm1251_vm12, %v14640_v26 }
 0x6a6   : > { %11078 = vmatmul.mubr.msk.f32.gmra.mrb[86].mxu0 %vm1251_vm12, %v14648_v4 }
 0x6a7   : > { %11080 = vmatprep.mubr.msk.f32.mxu0 %vm1251_vm12, %v14652_v7 }
 0x6aa   : > { %11081 = vmatmul.mubr.msk.f32.gmra.mrb[88].mxu0 %vm1251_vm12, %v14660_v23 }
 0x6ab   : > { %11083 = vmatprep.mubr.msk.f32.mxu0 %vm1251_vm12, %v14664_v44 }
 0x6ae   : > { %11084 = vmatmul.mubr.msk.f32.gmra.mrb[90].mxu0 %vm1251_vm12, %v14672_v51 }
 0x6af   : > { %11086 = vmatprep.mubr.msk.f32.mxu0 %vm1251_vm12, %v14676_v9 }
 0x6b2   : > { %11087 = vmatmul.mubr.msk.f32.gmra.mrb[92].mxu0 %vm1251_vm12, %v14684_v49 }
 0x6b3   : > { %11089 = vmatprep.mubr.msk.f32.mxu0 %vm1251_vm12, %v14688_v38 }
 0x6b6   : > { %11090 = vmatmul.mubr.msk.f32.gmra.mrb[94].mxu0 %vm1251_vm12, %v14696_v36 }
 0x6b7   : > { %11092 = vmatprep.mubr.msk.f32.mxu0 %vm1251_vm12, %v14700_v0 }
 0x6ba   : > { %11093 = vmatmul.mubr.msk.f32.gmra.mrb[96].mxu0 %vm1251_vm12, %v14708_v6 }
 0x751   : > { %v11049_v35 = vpop.f32.mrb[66].mxu0 }
 0x752   : > { %v9374_v21 = vadd.f32 %v11049_v35, %v14720_v57  ;;  %v9368_v45 = vpop.f32.mrb[67].mxu0 }
 0x753   : > { %v9369_v27 = vadd.f32 %v14720_v57, %v9368_v45 }
 0x754   : > { %v9528_v8 = vmax.f32 %v9374_v21, 0.0 }
 0x755   : > { %v9527_v15 = vmax.f32 %v9369_v27, 0.0  ;;  %v11052_v40 = vpop.f32.mrb[68].mxu0 }
 0x756   : > { %v9384_v55 = vadd.f32 %v11052_v40, %v14720_v57  ;;  %v9378_v29 = vpop.f32.mrb[69].mxu0 }
 0x757   : > { %v9379_v48 = vadd.f32 %v14720_v57, %v9378_v29  ;;  %11097 = vmatprep.mubr.msk.f32.mxu1 %vm9077_vm6, %v9527_v15 }
 0x758   : > { %11098 = vmatmul.mubr.msk.f32.vlgmr.msra.gmra.mrb[66].mxu1 %vm9077_vm6, %v9528_v8  ;;  %v9530_v16 = vmax.f32 %v9384_v55, 0.0 }
 0x759   : > { %v9529_v63 = vmax.f32 %v9379_v48, 0.0  ;;  %v11055_v58 = vpop.f32.mrb[70].mxu0 }
 0x75a   : > { %v9394_v20 = vadd.f32 %v11055_v58, %v14720_v57  ;;  %v9388_v39 = vpop.f32.mrb[71].mxu0 }
 0x75b   : > { %v9389_v34 = vadd.f32 %v14720_v57, %v9388_v39  ;;  %11100 = vmatprep.mubr.msk.f32.mxu1 %vm9077_vm6, %v9529_v63 }
 0x75c   : > { %11101 = vmatmul.mubr.msk.f32.gmra.mrb[68].mxu1 %vm9077_vm6, %v9530_v16  ;;  %v9532_v17 = vmax.f32 %v9394_v20, 0.0 }
 0x75d   : > { %v9531_v41 = vmax.f32 %v9389_v34, 0.0  ;;  %v11058_v52 = vpop.f32.mrb[72].mxu0 }
 0x75e   : > { %v9404_v53 = vadd.f32 %v11058_v52, %v14720_v57  ;;  %v9398_v37 = vpop.f32.mrb[73].mxu0 }
 0x75f   : > { %v9399_v11 = vadd.f32 %v14720_v57, %v9398_v37  ;;  %11103 = vmatprep.mubr.msk.f32.mxu1 %vm9077_vm6, %v9531_v41 }
 0x760   : > { %11104 = vmatmul.mubr.msk.f32.gmra.mrb[70].mxu1 %vm9077_vm6, %v9532_v17  ;;  %v9534_v28 = vmax.f32 %v9404_v53, 0.0 }
 0x761   : > { %v9533_v47 = vmax.f32 %v9399_v11, 0.0  ;;  %v11061_v31 = vpop.f32.mrb[74].mxu0 }
 0x762   : > { %v9414_v14 = vadd.f32 %v11061_v31, %v14720_v57  ;;  %v9408_v30 = vpop.f32.mrb[75].mxu0 }
 0x763   : > { %v9409_v43 = vadd.f32 %v14720_v57, %v9408_v30  ;;  %11106 = vmatprep.mubr.msk.f32.mxu1 %vm9077_vm6, %v9533_v47 }
 0x764   : > { %11107 = vmatmul.mubr.msk.f32.gmra.mrb[72].mxu1 %vm9077_vm6, %v9534_v28  ;;  %v9536_v32 = vmax.f32 %v9414_v14, 0.0 }
 0x765   : > { %v9535_v18 = vmax.f32 %v9409_v43, 0.0  ;;  %v11064_v1 = vpop.f32.mrb[76].mxu0 }
 0x766   : > { %v9424_v35 = vadd.f32 %v11064_v1, %v14720_v57  ;;  %v9418_v21 = vpop.f32.mrb[77].mxu0 }
 0x767   : > { %v9419_v45 = vadd.f32 %v14720_v57, %v9418_v21  ;;  %11109 = vmatprep.mubr.msk.f32.mxu1 %vm9077_vm6, %v9535_v18 }
 0x768   : > { %11110 = vmatmul.mubr.msk.f32.gmra.mrb[74].mxu1 %vm9077_vm6, %v9536_v32  ;;  %v9538_v40 = vmax.f32 %v9424_v35, 0.0 }
 0x769   : > { %v9537_v27 = vmax.f32 %v9419_v45, 0.0  ;;  %v11067_v15 = vpop.f32.mrb[78].mxu0 }
 0x76a   : > { %v9434_v8 = vadd.f32 %v11067_v15, %v14720_v57  ;;  %v9428_v55 = vpop.f32.mrb[79].mxu0 }
 0x76b   : > { %v9429_v29 = vadd.f32 %v14720_v57, %v9428_v55  ;;  %11112 = vmatprep.mubr.msk.f32.mxu1 %vm9077_vm6, %v9537_v27 }
 0x76c   : > { %11113 = vmatmul.mubr.msk.f32.gmra.mrb[76].mxu1 %vm9077_vm6, %v9538_v40  ;;  %v9540_v58 = vmax.f32 %v9434_v8, 0.0 }
 0x76d   : > { %v9539_v48 = vmax.f32 %v9429_v29, 0.0  ;;  %v11070_v63 = vpop.f32.mrb[80].mxu0 }
 0x76e   : > { %v9444_v16 = vadd.f32 %v11070_v63, %v14720_v57  ;;  %v9438_v20 = vpop.f32.mrb[81].mxu0 }
 0x76f   : > { %v9439_v39 = vadd.f32 %v14720_v57, %v9438_v20  ;;  %11115 = vmatprep.mubr.msk.f32.mxu1 %vm9077_vm6, %v9539_v48 }
 0x770   : > { %11116 = vmatmul.mubr.msk.f32.gmra.mrb[78].mxu1 %vm9077_vm6, %v9540_v58  ;;  %v9542_v52 = vmax.f32 %v9444_v16, 0.0 }
 0x771   : > { %v9541_v34 = vmax.f32 %v9439_v39, 0.0  ;;  %v11073_v41 = vpop.f32.mrb[82].mxu0 }
 0x772   : > { %v9454_v17 = vadd.f32 %v11073_v41, %v14720_v57  ;;  %v9448_v53 = vpop.f32.mrb[83].mxu0 }
 0x773   : > { %v9449_v37 = vadd.f32 %v14720_v57, %v9448_v53  ;;  %11118 = vmatprep.mubr.msk.f32.mxu1 %vm9077_vm6, %v9541_v34 }
 0x774   : > { %11119 = vmatmul.mubr.msk.f32.gmra.mrb[80].mxu1 %vm9077_vm6, %v9542_v52  ;;  %v9544_v31 = vmax.f32 %v9454_v17, 0.0 }
 0x775   : > { %v9543_v11 = vmax.f32 %v9449_v37, 0.0  ;;  %v11076_v47 = vpop.f32.mrb[84].mxu0 }
 0x776   : > { %v9464_v28 = vadd.f32 %v11076_v47, %v14720_v57  ;;  %v9458_v14 = vpop.f32.mrb[85].mxu0 }
 0x777   : > { %v9459_v30 = vadd.f32 %v14720_v57, %v9458_v14  ;;  %11121 = vmatprep.mubr.msk.f32.mxu1 %vm9077_vm6, %v9543_v11 }
 0x778   : > { %11122 = vmatmul.mubr.msk.f32.gmra.mrb[82].mxu1 %vm9077_vm6, %v9544_v31  ;;  %v9546_v1 = vmax.f32 %v9464_v28, 0.0 }
 0x779   : > { %v9545_v43 = vmax.f32 %v9459_v30, 0.0  ;;  %v11079_v18 = vpop.f32.mrb[86].mxu0 }
 0x77a   : > { %v9474_v32 = vadd.f32 %v11079_v18, %v14720_v57  ;;  %v9468_v35 = vpop.f32.mrb[87].mxu0 }
 0x77b   : > { %v9469_v21 = vadd.f32 %v14720_v57, %v9468_v35  ;;  %11124 = vmatprep.mubr.msk.f32.mxu1 %vm9077_vm6, %v9545_v43 }
 0x77c   : > { %11125 = vmatmul.mubr.msk.f32.gmra.mrb[84].mxu1 %vm9077_vm6, %v9546_v1  ;;  %v9548_v15 = vmax.f32 %v9474_v32, 0.0 }
 0x77d   : > { %v9547_v45 = vmax.f32 %v9469_v21, 0.0  ;;  %v11082_v27 = vpop.f32.mrb[88].mxu0 }
 0x77e   : > { %v9484_v40 = vadd.f32 %v11082_v27, %v14720_v57  ;;  %v9478_v8 = vpop.f32.mrb[89].mxu0  ;;  %v14789_v27 = vld [vmem:[%s14988_s12] ss:$0 sm:$0xff] }
 0x77f   : > { %v9479_v55 = vadd.f32 %v14720_v57, %v9478_v8  ;;  %11127 = vmatprep.mubr.msk.f32.mxu1 %vm9077_vm6, %v9547_v45 }
 0x780   : > { %11128 = vmatmul.mubr.msk.f32.gmra.mrb[86].mxu1 %vm9077_vm6, %v9548_v15  ;;  %v9550_v63 = vmax.f32 %v9484_v40, 0.0 }
 0x781   : > { %v9549_v29 = vmax.f32 %v9479_v55, 0.0  ;;  %v11085_v48 = vpop.f32.mrb[90].mxu0 }
 0x782   : > { %v9494_v58 = vadd.f32 %v11085_v48, %v14720_v57  ;;  %v9488_v16 = vpop.f32.mrb[91].mxu0 }
 0x783   : > { %v9489_v20 = vadd.f32 %v14720_v57, %v9488_v16  ;;  %11130 = vmatprep.mubr.msk.f32.mxu1 %vm9077_vm6, %v9549_v29 }
 0x784   : > { %11131 = vmatmul.mubr.msk.f32.gmra.mrb[88].mxu1 %vm9077_vm6, %v9550_v63  ;;  %v9552_v41 = vmax.f32 %v9494_v58, 0.0 }
 0x785   : > { %v9551_v39 = vmax.f32 %v9489_v20, 0.0  ;;  %v11088_v34 = vpop.f32.mrb[92].mxu0 }
 0x786   : > { %v9504_v52 = vadd.f32 %v11088_v34, %v14720_v57  ;;  %v9498_v17 = vpop.f32.mrb[93].mxu0 }
 0x787   : > { %v9499_v53 = vadd.f32 %v14720_v57, %v9498_v17  ;;  %11133 = vmatprep.mubr.msk.f32.mxu1 %vm9077_vm6, %v9551_v39 }
 0x788   : > { %11134 = vmatmul.mubr.msk.f32.gmra.mrb[90].mxu1 %vm9077_vm6, %v9552_v41  ;;  %v9554_v47 = vmax.f32 %v9504_v52, 0.0 }
 0x789   : > { %v9553_v37 = vmax.f32 %v9499_v53, 0.0  ;;  %v11091_v11 = vpop.f32.mrb[94].mxu0 }
 0x78a   : > { %v9514_v31 = vadd.f32 %v11091_v11, %v14720_v57  ;;  %v9508_v28 = vpop.f32.mrb[95].mxu0 }
 0x78b   : > { %v9509_v14 = vadd.f32 %v14720_v57, %v9508_v28  ;;  %11136 = vmatprep.mubr.msk.f32.mxu1 %vm9077_vm6, %v9553_v37 }
 0x78c   : > { %11137 = vmatmul.mubr.msk.f32.gmra.mrb[92].mxu1 %vm9077_vm6, %v9554_v47  ;;  %v9556_v18 = vmax.f32 %v9514_v31, 0.0 }
 0x78d   : > { %v9555_v30 = vmax.f32 %v9509_v14, 0.0  ;;  %v11094_v43 = vpop.f32.mrb[96].mxu0 }
 0x78e   : > { %v9524_v1 = vadd.f32 %v11094_v43, %v14720_v57  ;;  %v9518_v32 = vpop.f32.mrb[97].mxu0 }
 0x78f   : > { %v9519_v35 = vadd.f32 %v14720_v57, %v9518_v32  ;;  %11139 = vmatprep.mubr.msk.f32.mxu1 %vm9077_vm6, %v9555_v30 }
 0x790   : > { %11140 = vmatmul.mubr.msk.f32.gmra.mrb[94].mxu1 %vm9077_vm6, %v9556_v18  ;;  %v9558_v45 = vmax.f32 %v9524_v1, 0.0 }
 0x791   : > { %v9557_v21 = vmax.f32 %v9519_v35, 0.0 }
 0x793   : > { %11142 = vmatprep.mubr.msk.f32.mxu1 %vm9077_vm6, %v9557_v21 }
 0x794   : > { %11143 = vmatmul.mubr.msk.f32.gmra.mrb[96].mxu1 %vm9077_vm6, %v9558_v45 }
 0x82b   : > { %v11099_v15 = vpop.f32.mrb[66].mxu1 }
 0x82c   : > { %v9738_v40 = vadd.f32 %v11099_v15, %v14789_v27  ;;  %v9732_v8 = vpop.f32.mrb[67].mxu1 }
 0x82d   : > { %v9733_v57 = vadd.f32 %v14789_v27, %v9732_v8 }
 0x82e   : > { %v10860_v55 = vmul.f32 -1.442695, %v9738_v40 }
 0x82f   : > { %v10859_v29 = vmul.f32 -1.442695, %v9733_v57  ;;  %v11102_v48 = vpop.f32.mrb[68].mxu1 }
 0x830   : > { %11322 = vpow2.f32 %v10860_v55  ;;  %v9748_v63 = vadd.f32 %v11102_v48, %v14789_v27  ;;  %v9742_v58 = vpop.f32.mrb[69].mxu1 }
 0x831   : > { %11324 = vpow2.f32 %v10859_v29  ;;  %v9743_v16 = vadd.f32 %v14789_v27, %v9742_v58 }
 0x832   : > { %v10862_v20 = vmul.f32 -1.442695, %v9748_v63 }
 0x833   : > { %v10861_v39 = vmul.f32 -1.442695, %v9743_v16  ;;  %v11105_v34 = vpop.f32.mrb[70].mxu1 }
 0x834   : > { %11326 = vpow2.f32 %v10862_v20  ;;  %v9758_v41 = vadd.f32 %v11105_v34, %v14789_v27  ;;  %v9752_v52 = vpop.f32.mrb[71].mxu1 }
 0x835   : > { %11328 = vpow2.f32 %v10861_v39  ;;  %v9753_v17 = vadd.f32 %v14789_v27, %v9752_v52 }
 0x836   : > { %v10864_v53 = vmul.f32 -1.442695, %v9758_v41 }
 0x837   : > { %v10863_v37 = vmul.f32 -1.442695, %v9753_v17  ;;  %v11108_v11 = vpop.f32.mrb[72].mxu1 }
 0x838   : > { %11330 = vpow2.f32 %v10864_v53  ;;  %v9768_v47 = vadd.f32 %v11108_v11, %v14789_v27  ;;  %v9762_v31 = vpop.f32.mrb[73].mxu1 }
 0x839   : > { %11332 = vpow2.f32 %v10863_v37  ;;  %v9763_v28 = vadd.f32 %v14789_v27, %v9762_v31 }
 0x83a   : > { %v11323_v14 = vpop.eup %11322  ;;  %v10866_v30 = vmul.f32 -1.442695, %v9768_v47 }
 0x83b   : > { %v11325_v43 = vpop.eup %11324  ;;  %v9988_v18 = vadd.f32 1.0, %v11323_v14  ;;  %v10865_v1 = vmul.f32 -1.442695, %v9763_v28  ;;  %v11111_v32 = vpop.f32.mrb[74].mxu1 }
 0x83c   : > { %v9987_v35 = vadd.f32 1.0, %v11325_v43  ;;  %11334 = vpow2.f32 %v10866_v30  ;;  %v9778_v21 = vadd.f32 %v11111_v32, %v14789_v27  ;;  %v9772_v45 = vpop.f32.mrb[75].mxu1  ;;  %v10084_v43 = vld [vmem:[%s11721_s20 + $0x8] sm:$0xff] }
 0x83d   : > { %11336 = vrcp.f32 %v9988_v18  ;;  %v9773_v15 = vadd.f32 %v14789_v27, %v9772_v45  ;;  %v10083_v45 = vld [vmem:[%s11721_s20] sm:$0xff] }
 0x83e   : > { %v11327_v40 = vpop.eup %11326  ;;  %11338 = vrcp.f32 %v9987_v35  ;;  %v10868_v8 = vmul.f32 -1.442695, %v9778_v21 }
 0x83f   : > { %v11329_v57 = vpop.eup %11328  ;;  %v9990_v55 = vadd.f32 1.0, %v11327_v40  ;;  %11340 = vpow2.f32 %v10865_v1  ;;  %v10867_v29 = vmul.f32 -1.442695, %v9773_v15  ;;  %v11114_v48 = vpop.f32.mrb[76].mxu1 }
 0x840   : > { %v9989_v63 = vadd.f32 1.0, %v11329_v57  ;;  %11342 = vpow2.f32 %v10868_v8  ;;  %v9788_v58 = vadd.f32 %v11114_v48, %v14789_v27  ;;  %v9782_v16 = vpop.f32.mrb[77].mxu1 }
 0x841   : > { %11344 = vrcp.f32 %v9990_v55  ;;  %v9783_v20 = vadd.f32 %v14789_v27, %v9782_v16 }
 0x842   : > { %v11331_v39 = vpop.eup %11330  ;;  %11346 = vrcp.f32 %v9989_v63  ;;  %v10870_v34 = vmul.f32 -1.442695, %v9788_v58 }
 0x843   : > { %v11333_v41 = vpop.eup %11332  ;;  %v9992_v52 = vadd.f32 1.0, %v11331_v39  ;;  %11348 = vpow2.f32 %v10867_v29  ;;  %v10869_v17 = vmul.f32 -1.442695, %v9783_v20  ;;  %v11117_v53 = vpop.f32.mrb[78].mxu1  ;;  %v10086_v20 = vld [vmem:[%s11721_s20 + $0x18] sm:$0xff] }
 0x844   : > { %v9991_v37 = vadd.f32 1.0, %v11333_v41  ;;  %11350 = vpow2.f32 %v10870_v34  ;;  %v9798_v11 = vadd.f32 %v11117_v53, %v14789_v27  ;;  %v9792_v47 = vpop.f32.mrb[79].mxu1 }
 0x845   : > { %11352 = vrcp.f32 %v9992_v52  ;;  %v9793_v31 = vadd.f32 %v14789_v27, %v9792_v47 }
 0x846   : > { %v11335_v28 = vpop.eup %11334  ;;  %11354 = vrcp.f32 %v9991_v37  ;;  %v10872_v14 = vmul.f32 -1.442695, %v9798_v11 }
 0x847   : > { %v11337_v30 = vpop.eup %11336  ;;  %v9994_v18 = vadd.f32 1.0, %v11335_v28  ;;  %11356 = vpow2.f32 %v10869_v17  ;;  %v10871_v1 = vmul.f32 -1.442695, %v9793_v31  ;;  %v11120_v32 = vpop.f32.mrb[80].mxu1  ;;  %v10085_v17 = vld [vmem:[%s11721_s20 + $0x10] sm:$0xff] }
 0x848   : > { %v11339_v35 = vpop.eup %11338  ;;  %v10116_v21 = vmul.f32 %v11337_v30, %v14526_v10  ;;  %11358 = vpow2.f32 %v10872_v14  ;;  %v9808_v15 = vadd.f32 %v11120_v32, %v14789_v27  ;;  %v9802_v40 = vpop.f32.mrb[81].mxu1 }
 0x849   : > { %v11341_v8 = vpop.eup %11340  ;;  %v10115_v57 = vmul.f32 %v11339_v35, %v14522_v61  ;;  %11360 = vrcp.f32 %v9994_v18  ;;  %v9803_v55 = vadd.f32 %v14789_v27, %v9802_v40 }
 0x84a   : > { %v11343_v10 = vpop.eup %11342  ;;  %v10148_v29 = vadd.f32 %v10116_v21, %v10084_v43  ;;  %v9993_v48 = vadd.f32 1.0, %v11341_v8  ;;  %11362 = vpow2.f32 %v10871_v1  ;;  %v10874_v63 = vmul.f32 -1.442695, %v9808_v15  ;;  %v10088_v1 = vld [vmem:[%s11721_s20 + $0x28] sm:$0xff]  ;;  %v10087_v15 = vld [vmem:[%s11721_s20 + $0x20] sm:$0xff] }
 0x84b   : > { %v11345_v58 = vpop.eup %11344  ;;  %v10147_v16 = vadd.f32 %v10115_v57, %v10083_v45  ;;  %v9996_v39 = vadd.f32 1.0, %v11343_v10  ;;  %v10873_v34 = vmul.f32 -1.442695, %v9803_v55  ;;  %v11123_v41 = vpop.f32.mrb[82].mxu1 }
 0x84c   : > { %v11347_v52 = vpop.eup %11346  ;;  %10180 = vst.msk [vmem:[%s14819_s28 + $0x8] sm:$0xff] %vm1251_vm12, %v10148_v29  ;;  %v10118_v61 = vmul.f32 %v11345_v58, %v14540_v13  ;;  %11364 = vrcp.f32 %v9993_v48  ;;  %v9818_v53 = vadd.f32 %v11123_v41, %v14789_v27  ;;  %v9812_v37 = vpop.f32.mrb[83].mxu1 }
 0x84d   : > { %v11349_v11 = vpop.eup %11348  ;;  %10179 = vst.msk [vmem:[%s14819_s28] sm:$0xff] %vm1251_vm12, %v10147_v16  ;;  %v10117_v47 = vmul.f32 %v11347_v52, %v14530_v5  ;;  %11366 = vrcp.f32 %v9996_v39  ;;  %v9813_v31 = vadd.f32 %v14789_v27, %v9812_v37 }
 0x84e   : > { %v11351_v28 = vpop.eup %11350  ;;  %v10150_v14 = vadd.f32 %v10118_v61, %v10086_v20  ;;  %v9995_v30 = vadd.f32 1.0, %v11349_v11  ;;  %11368 = vpow2.f32 %v10874_v63  ;;  %v10876_v13 = vmul.f32 -1.442695, %v9818_v53  ;;  %v10090_v20 = vld [vmem:[%s11721_s20 + $0x38] sm:$0xff] }
 0x84f   : > { %v11353_v43 = vpop.eup %11352  ;;  %v10149_v18 = vadd.f32 %v10117_v47, %v10085_v17  ;;  %v9998_v32 = vadd.f32 1.0, %v11351_v28  ;;  %11370 = vpow2.f32 %v10873_v34  ;;  %v10875_v35 = vmul.f32 -1.442695, %v9813_v31  ;;  %v11126_v21 = vpop.f32.mrb[84].mxu1  ;;  %v10089_v31 = vld [vmem:[%s11721_s20 + $0x30] sm:$0xff] }
 0x850   : > { %v11355_v45 = vpop.eup %11354  ;;  %10182 = vst.msk [vmem:[%s14819_s28 + $0x18] sm:$0xff] %vm1251_vm12, %v10150_v14  ;;  %v10120_v5 = vmul.f32 %v11353_v43, %v14552_v19  ;;  %11372 = vrcp.f32 %v9995_v30  ;;  %v9828_v40 = vadd.f32 %v11126_v21, %v14789_v27  ;;  %v9822_v8 = vpop.f32.mrb[85].mxu1  ;;  %v10092_v30 = vld [vmem:[%s11721_s20 + $0x48] sm:$0xff] }
 0x851   : > { %v11357_v57 = vpop.eup %11356  ;;  %10181 = vst.msk [vmem:[%s14819_s28 + $0x10] sm:$0xff] %vm1251_vm12, %v10149_v18  ;;  %v10119_v55 = vmul.f32 %v11355_v45, %v14544_v54  ;;  %11374 = vrcp.f32 %v9998_v32  ;;  %v9823_v10 = vadd.f32 %v14789_v27, %v9822_v8  ;;  %v10091_v8 = vld [vmem:[%s11721_s20 + $0x40] sm:$0xff] }
 0x852   : > { %v11359_v29 = vpop.eup %11358  ;;  %v10152_v48 = vadd.f32 %v10120_v5, %v10088_v1  ;;  %v9997_v63 = vadd.f32 1.0, %v11357_v57  ;;  %11376 = vpow2.f32 %v10876_v13  ;;  %v10878_v19 = vmul.f32 -1.442695, %v9828_v40 }
 0x853   : > { %v11361_v58 = vpop.eup %11360  ;;  %v10151_v16 = vadd.f32 %v10119_v55, %v10087_v15  ;;  %v10000_v39 = vadd.f32 1.0, %v11359_v29  ;;  %11378 = vpow2.f32 %v10875_v35  ;;  %v11129_v34 = vpop.f32.mrb[86].mxu1  ;;  %v10877_v52 = vmul.f32 -1.442695, %v9823_v10  ;;  %v10094_v29 = vld [vmem:[%s11721_s20 + $0x58] sm:$0xff] }
 0x854   : > { %v11363_v41 = vpop.eup %11362  ;;  %10184 = vst.msk [vmem:[%s14819_s28 + $0x28] sm:$0xff] %vm1251_vm12, %v10152_v48  ;;  %v10122_v54 = vmul.f32 %v11361_v58, %v14564_v42  ;;  %11380 = vrcp.f32 %v9997_v63  ;;  %v9838_v61 = vadd.f32 %v11129_v34, %v14789_v27  ;;  %v9832_v17 = vpop.f32.mrb[87].mxu1 }
 0x855   : > { %10183 = vst.msk [vmem:[%s14819_s28 + $0x20] sm:$0xff] %vm1251_vm12, %v10151_v16  ;;  %11382 = vrcp.f32 %v10000_v39  ;;  %v9999_v53 = vadd.f32 1.0, %v11363_v41  ;;  %v9833_v37 = vadd.f32 %v14789_v27, %v9832_v17 }
 0x856   : > { %v11365_v11 = vpop.eup %11364  ;;  %v10154_v47 = vadd.f32 %v10122_v54, %v10090_v20  ;;  %11384 = vpow2.f32 %v10878_v19  ;;  %v10880_v28 = vmul.f32 -1.442695, %v9838_v61  ;;  %v10093_v61 = vld [vmem:[%s11721_s20 + $0x50] sm:$0xff] }
 0x857   : > { %v11367_v14 = vpop.eup %11366  ;;  %v10121_v42 = vmul.f32 %v11365_v11, %v14556_v46  ;;  %11386 = vrcp.f32 %v9999_v53  ;;  %v10879_v13 = vmul.f32 -1.442695, %v9833_v37  ;;  %v11132_v43 = vpop.f32.mrb[88].mxu1  ;;  %v10096_v11 = vld [vmem:[%s11721_s20 + $0x68] sm:$0xff] }
 0x858   : > { %v11369_v18 = vpop.eup %11368  ;;  %10186 = vst.msk [vmem:[%s14819_s28 + $0x38] sm:$0xff] %vm1251_vm12, %v10154_v47  ;;  %v10124_v1 = vmul.f32 %v11367_v14, %v14576_v22  ;;  %11388 = vpow2.f32 %v10877_v52  ;;  %v9848_v32 = vadd.f32 %v11132_v43, %v14789_v27  ;;  %v9842_v35 = vpop.f32.mrb[89].mxu1 }
 0x859   : > { %v11371_v21 = vpop.eup %11370  ;;  %v10153_v45 = vadd.f32 %v10121_v42, %v10089_v31  ;;  %v10002_v5 = vadd.f32 1.0, %v11369_v18  ;;  %11390 = vpow2.f32 %v10880_v28  ;;  %v9843_v46 = vadd.f32 %v14789_v27, %v9842_v35  ;;  %v10095_v18 = vld [vmem:[%s11721_s20 + $0x60] sm:$0xff] }
 0x85a   : > { %v11373_v15 = vpop.eup %11372  ;;  %v10156_v40 = vadd.f32 %v10124_v1, %v10092_v30  ;;  %v10001_v57 = vadd.f32 1.0, %v11371_v21  ;;  %11392 = vpow2.f32 %v10879_v13  ;;  %v10882_v55 = vmul.f32 -1.442695, %v9848_v32 }
 0x85b   : > { %v11375_v22 = vpop.eup %11374  ;;  %10185 = vst.msk [vmem:[%s14819_s28 + $0x30] sm:$0xff] %vm1251_vm12, %v10153_v45  ;;  %v10123_v10 = vmul.f32 %v11373_v15, %v14568_v50  ;;  %11394 = vrcp.f32 %v10002_v5  ;;  %v10881_v48 = vmul.f32 -1.442695, %v9843_v46  ;;  %v11135_v63 = vpop.f32.mrb[90].mxu1 }
 0x85c   : > { %v11377_v19 = vpop.eup %11376  ;;  %10188 = vst.msk [vmem:[%s14819_s28 + $0x48] sm:$0xff] %vm1251_vm12, %v10156_v40  ;;  %v10126_v58 = vmul.f32 %v11375_v22, %v14588_v33  ;;  %11396 = vrcp.f32 %v10001_v57  ;;  %v9858_v16 = vadd.f32 %v11135_v63, %v14789_v27  ;;  %v9852_v20 = vpop.f32.mrb[91].mxu1 }
 0x85d   : > { %v11379_v39 = vpop.eup %11378  ;;  %v10155_v34 = vadd.f32 %v10123_v10, %v10091_v8  ;;  %v10004_v41 = vadd.f32 1.0, %v11377_v19  ;;  %11398 = vpow2.f32 %v10882_v55  ;;  %v9853_v50 = vadd.f32 %v14789_v27, %v9852_v20  ;;  %v10098_v10 = vld [vmem:[%s11721_s20 + $0x78] sm:$0xff] }
 0x85e   : > { %v11381_v54 = vpop.eup %11380  ;;  %v10158_v52 = vadd.f32 %v10126_v58, %v10094_v29  ;;  %v10003_v17 = vadd.f32 1.0, %v11379_v39  ;;  %11400 = vpow2.f32 %v10881_v48  ;;  %v10884_v53 = vmul.f32 -1.442695, %v9858_v16  ;;  %v10097_v58 = vld [vmem:[%s11721_s20 + $0x70] sm:$0xff] }
 0x85f   : > { %v11383_v33 = vpop.eup %11382  ;;  %10187 = vst.msk [vmem:[%s14819_s28 + $0x40] sm:$0xff] %vm1251_vm12, %v10155_v34  ;;  %v10125_v37 = vmul.f32 %v11381_v54, %v14580_v24  ;;  %11402 = vrcp.f32 %v10004_v41  ;;  %v10883_v47 = vmul.f32 -1.442695, %v9853_v50  ;;  %v11138_v31 = vpop.f32.mrb[92].mxu1 }
 0x860   : > { %v11385_v28 = vpop.eup %11384  ;;  %10190 = vst.msk [vmem:[%s14819_s28 + $0x58] sm:$0xff] %vm1251_vm12, %v10158_v52  ;;  %v10128_v14 = vmul.f32 %v11383_v33, %v14600_v2  ;;  %11404 = vrcp.f32 %v10003_v17  ;;  %v9868_v42 = vadd.f32 %v11138_v31, %v14789_v27  ;;  %v9862_v30 = vpop.f32.mrb[93].mxu1  ;;  %v10100_v33 = vld [vmem:[%s11721_s20 + $0x88] sm:$0xff]  ;;  %v10099_v31 = vld [vmem:[%s11721_s20 + $0x80] sm:$0xff] }
 0x861   : > { %v11387_v13 = vpop.eup %11386  ;;  %v10157_v43 = vadd.f32 %v10125_v37, %v10093_v61  ;;  %v10006_v1 = vadd.f32 1.0, %v11385_v28  ;;  %11406 = vpow2.f32 %v10884_v53  ;;  %v9863_v24 = vadd.f32 %v14789_v27, %v9862_v30 }
 0x862   : > { %v11389_v32 = vpop.eup %11388  ;;  %v10160_v35 = vadd.f32 %v10128_v14, %v10096_v11  ;;  %v10127_v21 = vmul.f32 %v11387_v13, %v14592_v62  ;;  %11408 = vpow2.f32 %v10883_v47  ;;  %v10886_v2 = vmul.f32 -1.442695, %v9868_v42 }
 0x863   : > { %v11391_v45 = vpop.eup %11390  ;;  %10189 = vst.msk [vmem:[%s14819_s28 + $0x50] sm:$0xff] %vm1251_vm12, %v10157_v43  ;;  %11410 = vrcp.f32 %v10006_v1  ;;  %v10005_v5 = vadd.f32 1.0, %v11389_v32  ;;  %v10885_v46 = vmul.f32 -1.442695, %v9863_v24  ;;  %v11141_v15 = vpop.f32.mrb[94].mxu1 }
 0x864   : > { %v11393_v40 = vpop.eup %11392  ;;  %10192 = vst.msk [vmem:[%s14819_s28 + $0x68] sm:$0xff] %vm1251_vm12, %v10160_v35  ;;  %v10159_v8 = vadd.f32 %v10127_v21, %v10095_v18  ;;  %v10008_v57 = vadd.f32 1.0, %v11391_v45  ;;  %11412 = vpow2.f32 %v10886_v2  ;;  %v9878_v62 = vadd.f32 %v11141_v15, %v14789_v27  ;;  %v9872_v55 = vpop.f32.mrb[95].mxu1  ;;  %v10101_v21 = vld [vmem:[%s11721_s20 + $0x90] sm:$0xff]  ;;  %v10104_v15 = vld [vmem:[%s11721_s20 + $0xa8] sm:$0xff] }
 0x865   : > { %v11395_v22 = vpop.eup %11394  ;;  %11414 = vrcp.f32 %v10005_v5  ;;  %v10007_v29 = vadd.f32 1.0, %v11393_v40  ;;  %v9873_v48 = vadd.f32 %v14789_v27, %v9872_v55 }
 0x866   : > { %v11397_v63 = vpop.eup %11396  ;;  %10191 = vst.msk [vmem:[%s14819_s28 + $0x60] sm:$0xff] %vm1251_vm12, %v10159_v8  ;;  %v10130_v19 = vmul.f32 %v11395_v22, %v14612_v56  ;;  %11416 = vrcp.f32 %v10008_v57  ;;  %v10888_v16 = vmul.f32 -1.442695, %v9878_v62 }
 0x867   : > { %v11399_v20 = vpop.eup %11398  ;;  %v10129_v39 = vmul.f32 %v11397_v63, %v14604_v60  ;;  %11418 = vrcp.f32 %v10007_v29  ;;  %v10887_v34 = vmul.f32 -1.442695, %v9873_v48  ;;  %v11144_v41 = vpop.f32.mrb[96].mxu1  ;;  %v10106_v63 = vld [vmem:[%s11721_s20 + $0xb8] sm:$0xff] }
 0x868   : > { %v11401_v50 = vpop.eup %11400  ;;  %v10162_v54 = vadd.f32 %v10130_v19, %v10098_v10  ;;  %v10010_v52 = vadd.f32 1.0, %v11399_v20  ;;  %11420 = vpow2.f32 %v10885_v46  ;;  %v9888_v61 = vadd.f32 %v11144_v41, %v14789_v27  ;;  %v9882_v56 = vpop.f32.mrb[97].mxu1 }
 0x869   : > { %v11403_v17 = vpop.eup %11402  ;;  %v10161_v53 = vadd.f32 %v10129_v39, %v10097_v58  ;;  %v10009_v37 = vadd.f32 1.0, %v11401_v50  ;;  %11422 = vpow2.f32 %v10888_v16  ;;  %v9883_v60 = vadd.f32 %v14789_v27, %v9882_v56  ;;  %v10105_v16 = vld [vmem:[%s11721_s20 + $0xb0] sm:$0xff] }
 0x86a   : > { %v11405_v11 = vpop.eup %11404  ;;  %10194 = vst.msk [vmem:[%s14819_s28 + $0x78] sm:$0xff] %vm1251_vm12, %v10162_v54  ;;  %v10132_v47 = vmul.f32 %v11403_v17, %v14624_v59  ;;  %11424 = vrcp.f32 %v10010_v52  ;;  %v10890_v28 = vmul.f32 -1.442695, %v9888_v61  ;;  %v10102_v59 = vld [vmem:[%s11721_s20 + $0x98] sm:$0xff]  ;;  %v10108_v52 = vld [vmem:[%s11721_s20 + $0xc8] sm:$0xff]  ;;  %v10107_v17 = vld [vmem:[%s11721_s20 + $0xc0] sm:$0xff] }
 0x86b   : > { %v11407_v14 = vpop.eup %11406  ;;  %10193 = vst.msk [vmem:[%s14819_s28 + $0x70] sm:$0xff] %vm1251_vm12, %v10161_v53  ;;  %v10131_v42 = vmul.f32 %v11405_v11, %v14616_v12  ;;  %11426 = vrcp.f32 %v10009_v37  ;;  %v10889_v43 = vmul.f32 -1.442695, %v9883_v60  ;;  %v10110_v60 = vld [vmem:[%s11721_s20 + $0xd8] sm:$0xff] }
 0x86c   : > { %v11409_v30 = vpop.eup %11408  ;;  %v10164_v27 = vadd.f32 %v10132_v47, %v10100_v33  ;;  %v10012_v13 = vadd.f32 1.0, %v11407_v14  ;;  %11428 = vpow2.f32 %v10887_v34 }
 0x86d   : > { %v11411_v18 = vpop.eup %11410  ;;  %v10163_v1 = vadd.f32 %v10131_v42, %v10099_v31  ;;  %v10011_v24 = vadd.f32 1.0, %v11409_v30  ;;  %11430 = vpow2.f32 %v10890_v28  ;;  %v10109_v28 = vld [vmem:[%s11721_s20 + $0xd0] sm:$0xff]  ;;  %v10112_v30 = vld [vmem:[%s11721_s20 + $0xe8] sm:$0xff] }
 0x86e   : > { %v11413_v32 = vpop.eup %11412  ;;  %10196 = vst.msk [vmem:[%s14819_s28 + $0x88] sm:$0xff] %vm1251_vm12, %v10164_v27  ;;  %v10134_v12 = vmul.f32 %v11411_v18, %v14636_v25  ;;  %11432 = vrcp.f32 %v10012_v13  ;;  %v10103_v25 = vld [vmem:[%s11721_s20 + $0xa0] sm:$0xff] }
 0x86f   : > { %v11415_v35 = vpop.eup %11414  ;;  %10195 = vst.msk [vmem:[%s14819_s28 + $0x80] sm:$0xff] %vm1251_vm12, %v10163_v1  ;;  %11434 = vrcp.f32 %v10011_v24  ;;  %v10014_v2 = vadd.f32 1.0, %v11413_v32  ;;  %v10111_v18 = vld [vmem:[%s11721_s20 + $0xe0] sm:$0xff]  ;;  %v10114_v24 = vld [vmem:[%s11721_s20 + $0xf8] sm:$0xff] }
 0x870   : > { %v11417_v45 = vpop.eup %11416  ;;  %v10166_v5 = vadd.f32 %v10134_v12, %v10102_v59  ;;  %v10133_v46 = vmul.f32 %v11415_v35, %v14628_v3  ;;  %11436 = vpow2.f32 %v10889_v43 }
 0x871   : > { %v11419_v40 = vpop.eup %11418  ;;  %v10136_v8 = vmul.f32 %v11417_v45, %v14648_v4  ;;  %11438 = vrcp.f32 %v10014_v2 }
 0x872   : > { %v11421_v57 = vpop.eup %11420  ;;  %10198 = vst.msk [vmem:[%s14819_s28 + $0x98] sm:$0xff] %vm1251_vm12, %v10166_v5  ;;  %v10165_v62 = vadd.f32 %v10133_v46, %v10101_v21  ;;  %v10135_v55 = vmul.f32 %v11419_v40, %v14640_v26 }
 0x873   : > { %v11423_v22 = vpop.eup %11422  ;;  %v10168_v10 = vadd.f32 %v10136_v8, %v10104_v15  ;;  %v10013_v3 = vadd.f32 1.0, %v11421_v57 }
 0x874   : > { %v11425_v29 = vpop.eup %11424  ;;  %10197 = vst.msk [vmem:[%s14819_s28 + $0x90] sm:$0xff] %vm1251_vm12, %v10165_v62  ;;  %v10167_v48 = vadd.f32 %v10135_v55, %v10103_v25  ;;  %v10016_v4 = vadd.f32 1.0, %v11423_v22 }
 0x875   : > { %v11427_v19 = vpop.eup %11426  ;;  %10200 = vst.msk [vmem:[%s14819_s28 + $0xa8] sm:$0xff] %vm1251_vm12, %v10168_v10  ;;  %v10138_v58 = vmul.f32 %v11425_v29, %v14660_v23  ;;  %11440 = vrcp.f32 %v10013_v3 }
 0x876   : > { %v11429_v26 = vpop.eup %11428  ;;  %10199 = vst.msk [vmem:[%s14819_s28 + $0xa0] sm:$0xff] %vm1251_vm12, %v10167_v48  ;;  %v10137_v20 = vmul.f32 %v11427_v19, %v14652_v7  ;;  %11442 = vrcp.f32 %v10016_v4 }
 0x877   : > { %v11431_v39 = vpop.eup %11430  ;;  %v10170_v34 = vadd.f32 %v10138_v58, %v10106_v63  ;;  %v10015_v41 = vadd.f32 1.0, %v11429_v26 }
 0x878   : > { %v11433_v50 = vpop.eup %11432  ;;  %v10169_v54 = vadd.f32 %v10137_v20, %v10105_v16  ;;  %v10018_v61 = vadd.f32 1.0, %v11431_v39 }
 0x879   : > { %v11435_v23 = vpop.eup %11434  ;;  %10202 = vst.msk [vmem:[%s14819_s28 + $0xb8] sm:$0xff] %vm1251_vm12, %v10170_v34  ;;  %v10140_v56 = vmul.f32 %v11433_v50, %v14672_v51  ;;  %11444 = vrcp.f32 %v10015_v41 }
 0x87a   : > { %v11437_v7 = vpop.eup %11436  ;;  %10201 = vst.msk [vmem:[%s14819_s28 + $0xb0] sm:$0xff] %vm1251_vm12, %v10169_v54  ;;  %v10139_v53 = vmul.f32 %v11435_v23, %v14664_v44  ;;  %11446 = vrcp.f32 %v10018_v61 }
 0x87b   : > { %v11439_v33 = vpop.eup %11438  ;;  %v10172_v37 = vadd.f32 %v10140_v56, %v10108_v52  ;;  %v10017_v11 = vadd.f32 1.0, %v11437_v7 }
 0x87c   : > { %v10171_v47 = vadd.f32 %v10139_v53, %v10107_v17  ;;  %v10142_v31 = vmul.f32 %v11439_v33, %v14684_v49 }
 0x87d   : > { %10204 = vst.msk [vmem:[%s14819_s28 + $0xc8] sm:$0xff] %vm1251_vm12, %v10172_v37  ;;  %11448 = vrcp.f32 %v10017_v11 }
 0x87e   : > { %10203 = vst.msk [vmem:[%s14819_s28 + $0xc0] sm:$0xff] %vm1251_vm12, %v10171_v47  ;;  %v10174_v51 = vadd.f32 %v10142_v31, %v10110_v60 }
 0x87f   : > { %v11441_v44 = vpop.eup %11440 }
 0x880   : > { %v11443_v14 = vpop.eup %11442  ;;  %10206 = vst.msk [vmem:[%s14819_s28 + $0xd8] sm:$0xff] %vm1251_vm12, %v10174_v51  ;;  %v10141_v42 = vmul.f32 %v11441_v44, %v14676_v9 }
 0x881   : > { %v10144_v49 = vmul.f32 %v11443_v14, %v14696_v36  ;;  %v10113_v36 = vld [vmem:[%s11721_s20 + $0xf0] sm:$0xff] }
 0x882   : > { %v10173_v27 = vadd.f32 %v10141_v42, %v10109_v28 }
 0x883   : > { %v11445_v13 = vpop.eup %11444  ;;  %v10176_v43 = vadd.f32 %v10144_v49, %v10112_v30 }
 0x884   : > { %v11447_v1 = vpop.eup %11446  ;;  %10205 = vst.msk [vmem:[%s14819_s28 + $0xd0] sm:$0xff] %vm1251_vm12, %v10173_v27  ;;  %v10143_v59 = vmul.f32 %v11445_v13, %v14688_v38 }
 0x885   : > { %10208 = vst.msk [vmem:[%s14819_s28 + $0xe8] sm:$0xff] %vm1251_vm12, %v10176_v43  ;;  %v10146_v9 = vmul.f32 %v11447_v1, %v14708_v6 }
 0x886   : > { %v10175_v32 = vadd.f32 %v10143_v59, %v10111_v18 }
 0x887   : > { %v11449_v12 = vpop.eup %11448  ;;  %v10178_v35 = vadd.f32 %v10146_v9, %v10114_v24 }
 0x888   : > { %10207 = vst.msk [vmem:[%s14819_s28 + $0xe0] sm:$0xff] %vm1251_vm12, %v10175_v32  ;;  %v10145_v21 = vmul.f32 %v11449_v12, %v14700_v0 }
 0x889   : > { %10210 = vst.msk [vmem:[%s14819_s28 + $0xf8] sm:$0xff] %vm1251_vm12, %v10178_v35 }
 0x88a   : > { %v10177_v2 = vadd.f32 %v10145_v21, %v10113_v36 }
 0x88c   : > { %10209 = vst.msk [vmem:[%s14819_s28 + $0xf0] sm:$0xff] %vm1251_vm12, %v10177_v2 }
 0x88d PF: > { %s15003_s17 = sld [smem:[#allocation7_spill]]  ;;  %p23_p8 = scmp.ge.s32.totalorder %s11657_s30, 4  }
 0x88e   : > { %s15004_s25 = smov %s11541_s26  ;;  %s15005_s26 = smov %s11545_s27 }
 0x88f   : > { %s15007_s28 = smov %s11657_s30  ;;  %25 = sbr.rel (!%p23_p8) target bundleno = 3 (0x3), region = 115 }
 0x893   : > { %s15006_s27 = smov %s15003_s17 }
 0x896   :  { %10232 = vsyncpa [#allocation5], 1 }
 0x897   :  { %10234 = vsyncpa [#allocation5 + $0x1], 1 }

</bundles_post_ra>
